<compile_context>
chip_gen: v7x
topology: tpu7x:2x2x1
jax: 0.10.0
libtpu: 0.0.40
codegen_flags: <defaults>
</compile_context>

<pallas_src>
import math

import jax
import jax.numpy as jnp
from jax.experimental import pallas as pl
from jax.experimental.pallas import tpu as pltpu

# ---------------- model hyper-params (match the PyTorch __init__) -----------
D = 64                                   # hidden width
NUM_SDF_FEAT = 15
INPUT_CH = NUM_SDF_FEAT + 3 + 3          # 21 = cat([x(3), sdf(15), normals(3)])
N_HEAD = 1 + 3 + 1 + 3                   # opacity | scaling | theta | rgb = 8

TILE_N = 2048                            # points per grid step


# ------------------------------- Pallas kernel ------------------------------
def _gaussian_field_kernel(xin_ref, w0_ref, b0_ref, w1_ref, b1_ref,
                           wh_ref, bh_ref, scale_ref, out_ref):
    """xin: (TILE_N, 21) f32 tile -> out: (TILE_N, 8) f32 scaled sigmoid heads."""
    # linear[0] + relu (concat already fused in the wrapper; bf16 cast in-kernel)
    h = jnp.dot(xin_ref[...].astype(jnp.bfloat16), w0_ref[...],
                preferred_element_type=jnp.float32) + b0_ref[...]
    h = jnp.maximum(h, 0.0)
    # linear[1] + relu
    h = jnp.dot(h.astype(jnp.bfloat16), w1_ref[...],
                preferred_element_type=jnp.float32) + b1_ref[...]
    h = jnp.maximum(h, 0.0)
    # all 4 heads fused into one (D, 8) matmul; sigmoid + post-sigmoid scales fused
    z = jnp.dot(h.astype(jnp.bfloat16), wh_ref[...],
                preferred_element_type=jnp.float32) + bh_ref[...]
    out_ref[...] = jax.nn.sigmoid(z) * scale_ref[...]


def run_heads(xin, kp):
    """xin: (Np, 21) f32 -> (Np, 8) f32 heads = [opacity, scaling, theta, rgb] (scaled)."""
    Np = xin.shape[0]
    assert Np % TILE_N == 0
    grid = (Np // TILE_N,)

    tile = lambda i: (i, 0)
    full = lambda i: (0, 0)
    in_specs = [
        pl.BlockSpec((TILE_N, INPUT_CH), tile),   # cat([x, sdf, normals]) tile (f32)
        pl.BlockSpec((INPUT_CH, D), full),        # W0 (bf16)
        pl.BlockSpec((1, D), full),               # b0 (f32)
        pl.BlockSpec((D, D), full),               # W1 (bf16)
        pl.BlockSpec((1, D), full),               # b1 (f32)
        pl.BlockSpec((D, N_HEAD), full),          # fused head weights (bf16)
        pl.BlockSpec((1, N_HEAD), full),          # fused head biases (f32)
        pl.BlockSpec((1, N_HEAD), full),          # per-head post-sigmoid scales (f32)
    ]
    out_spec = pl.BlockSpec((TILE_N, N_HEAD), tile)

    weight_bytes = ((INPUT_CH * D + D * D + D * N_HEAD) * 2
                    + (D + D + 2 * N_HEAD) * 4)
    cost = pl.CostEstimate(
        flops=2 * Np * D * (INPUT_CH + D + N_HEAD),
        transcendentals=Np * N_HEAD,
        bytes_accessed=Np * INPUT_CH * 4 + Np * N_HEAD * 4 + weight_bytes,
    )

    return pl.pallas_call(
        _gaussian_field_kernel,
        out_shape=jax.ShapeDtypeStruct((Np, N_HEAD), jnp.float32),
        grid_spec=pltpu.PrefetchScalarGridSpec(
            num_scalar_prefetch=0,
            grid=grid,
            in_specs=in_specs,
            out_specs=out_spec,
        ),
        compiler_params=pltpu.CompilerParams(
            dimension_semantics=("parallel",),        # independent tiles -> both v7x TCs
            vmem_limit_bytes=32 * 1024 * 1024,        # explicit headroom (v5e default is 16 MiB)
        ),
        cost_estimate=cost,
    )(xin, kp["w0"], kp["b0"], kp["w1"], kp["b1"],
      kp["wh"], kp["bh"], kp["scale"])


# ------------------------------- JAX glue ------------------------------------
def exp_so3(axis, theta):
    """Rodrigues formula. axis: (N,3), theta: (N,1) -> (N,3,3).
    # TODO(synk): exp_so3 is not defined in the provided source; standard Rodrigues assumed.
    """
    wx, wy, wz = axis[:, 0], axis[:, 1], axis[:, 2]
    z = jnp.zeros_like(wx)
    K = jnp.stack([
        jnp.stack([z, -wz, wy], axis=-1),
        jnp.stack([wz, z, -wx], axis=-1),
        jnp.stack([-wy, wx, z], axis=-1),
    ], axis=-2)                                          # (N,3,3)
    th = theta.reshape(-1, 1, 1)
    I = jnp.eye(3, dtype=axis.dtype)[None]
    return I + jnp.sin(th) * K + (1.0 - jnp.cos(th)) * jnp.matmul(K, K)


def init_params(key):
    """Deterministic synthetic f32 master weights, nn.Linear-style init, (in, out) layout."""
    ks = jax.random.split(key, 12)

    def lin(kw, kb, fan_in, fan_out):
        bound = 1.0 / math.sqrt(fan_in)
        w = jax.random.uniform(kw, (fan_in, fan_out), jnp.float32, -bound, bound)
        b = jax.random.uniform(kb, (fan_out,), jnp.float32, -bound, bound)
        return w, b

    p = {}
    p["w0"], p["b0"] = lin(ks[0], ks[1], INPUT_CH, D)
    p["w1"], p["b1"] = lin(ks[2], ks[3], D, D)
    p["w_op"], p["b_op"] = lin(ks[4], ks[5], D, 1)       # opacity_lin
    p["w_sc"], p["b_sc"] = lin(ks[6], ks[7], D, 3)       # scaling_lin
    p["w_th"], p["b_th"] = lin(ks[8], ks[9], D, 1)       # rotation_angle_lin
    p["w_rgb"], p["b_rgb"] = lin(ks[10], ks[11], D, 3)   # rgb_lin
    return p


def pack_params(p):
    """Kernel weight layout: bf16 matmul weights, f32 biases + post-sigmoid scales.
    Computed ONCE (outside the per-call path)."""
    bf16 = jnp.bfloat16
    wh = jnp.concatenate([p["w_op"], p["w_sc"], p["w_th"], p["w_rgb"]], axis=1)  # (D, 8)
    bh = jnp.concatenate([p["b_op"], p["b_sc"], p["b_th"], p["b_rgb"]])          # (8,)
    scale = jnp.array([1.0, 0.02, 0.02, 0.02, 2.0 * math.pi, 1.0, 1.0, 1.0],
                      jnp.float32)
    return {
        "w0": p["w0"].astype(bf16),
        "b0": p["b0"].reshape(1, D),
        "w1": p["w1"].astype(bf16),
        "b1": p["b1"].reshape(1, D),
        "wh": wh.astype(bf16),
        "bh": bh.reshape(1, N_HEAD),
        "scale": scale.reshape(1, N_HEAD),
    }


@jax.jit
def gaussian_field_forward(kp, x, sdf_features, normals):
    """x: (1,N,3), sdf_features: (1,N,NUM_SDF_FEAT), normals: (1,N,3) -> gaussians dict."""
    N = x.shape[1]
    Np = ((N + TILE_N - 1) // TILE_N) * TILE_N
    # Fuse concat (+ padding to the tile size) into one XLA pass; keep f32 —
    # the kernel casts to bf16 internally right before the matmuls.
    xin = jnp.concatenate([x[0], sdf_features[0], normals[0]], axis=-1)   # (N, 21) f32
    if Np != N:
        xin = jnp.pad(xin, ((0, Np - N), (0, 0)))

    heads = run_heads(xin, kp)[:N]    # (N, 8) f32; 2/100 and 2*pi scales already applied

    opacity = heads[:, 0:1]
    scaling = heads[:, 1:4]
    theta = heads[:, 4:5]
    rgb = heads[:, 5:8]

    return {
        "xyz": x,                                             # passthrough, (1,N,3)
        "opacity": opacity[None],                             # (1,N,1)
        "scaling": scaling[None],                             # (1,N,3)
        "rotation_matrix": exp_so3(normals[0], theta)[None],  # (1,N,3,3)
        "rgb": rgb[None],                                     # (1,N,3)
    }


def reference_forward(params, x, sdf_features, normals):
    """Pure-JAX f32 reference matching the PyTorch forward, for correctness check."""
    h = jnp.concatenate([x, sdf_features, normals], axis=-1)[0]
    h = jnp.maximum(h @ params["w0"] + params["b0"], 0.0)
    h = jnp.maximum(h @ params["w1"] + params["b1"], 0.0)
    opacity = jax.nn.sigmoid(h @ params["w_op"] + params["b_op"])
    scaling = jax.nn.sigmoid(h @ params["w_sc"] + params["b_sc"]) * (2.0 / 100.0)
    theta = jax.nn.sigmoid(h @ params["w_th"] + params["b_th"]) * (2.0 * jnp.pi)
    rgb = jax.nn.sigmoid(h @ params["w_rgb"] + params["b_rgb"])
    return {
        "xyz": x,
        "opacity": opacity[None],
        "scaling": scaling[None],
        "rotation_matrix": exp_so3(normals[0], theta)[None],
        "rgb": rgb[None],
    }


# --------------------------------- main --------------------------------------
if __name__ == "__main__":
    key = jax.random.PRNGKey(0)
    k_param, k_x, k_sdf, k_nrm = jax.random.split(key, 4)

    N = 2500                                  # non-multiple of TILE_N: exercises padding + 2-step grid
    params = init_params(k_param)
    kp = pack_params(params)                  # packed once, outside the per-call path

    x = jax.random.normal(k_x, (1, N, 3), jnp.float32)
    sdf_features = jax.random.normal(k_sdf, (1, N, NUM_SDF_FEAT), jnp.float32)
    normals = jax.random.normal(k_nrm, (1, N, 3), jnp.float32)
    normals = normals / jnp.linalg.norm(normals, axis=-1, keepdims=True)

    out = gaussian_field_forward(kp, x, sdf_features, normals)
    out = jax.block_until_ready(out)

    # shape sanity
    assert out["xyz"].shape == (1, N, 3)
    assert out["opacity"].shape == (1, N, 1)
    assert out["scaling"].shape == (1, N, 3)
    assert out["rotation_matrix"].shape == (1, N, 3, 3)
    assert out["rgb"].shape == (1, N, 3)

    # numerical sanity vs f32 reference (bf16 matmul inputs -> loose tolerance)
    ref = reference_forward(params, x, sdf_features, normals)
    assert jnp.allclose(out["xyz"], ref["xyz"])
    tols = {"opacity": 5e-2, "rgb": 5e-2, "scaling": 5e-3, "rotation_matrix": 1e-1}
    for k, tol in tols.items():
        assert jnp.allclose(out[k], ref[k], atol=tol), k

    print("KERNEL_OK")
</pallas_src>

<mosaic_0001>
module attributes {stable_mosaic.version = 11 : i64} {
  func.func @_gaussian_field_kernel(%arg0: i32, %arg1: memref<2048x21xf32, #tpu.memory_space<vmem>>, %arg2: memref<21x64xbf16, #tpu.memory_space<vmem>>, %arg3: memref<1x64xf32, #tpu.memory_space<vmem>>, %arg4: memref<64x64xbf16, #tpu.memory_space<vmem>>, %arg5: memref<1x64xf32, #tpu.memory_space<vmem>>, %arg6: memref<64x8xbf16, #tpu.memory_space<vmem>>, %arg7: memref<1x8xf32, #tpu.memory_space<vmem>>, %arg8: memref<1x8xf32, #tpu.memory_space<vmem>>, %arg9: memref<2048x8xf32, #tpu.memory_space<vmem>>) attributes {dimension_semantics = [#tpu.dimension_semantics<parallel>], iteration_bounds = array<i64: 2>, scalar_prefetch = 0 : i64, scratch_operands = 0 : i64, tpu.core_type = #tpu.core_type<tc>, window_params = [{transform_indices = @transform_0, window_bounds = array<i64: 2048, 21>}, {pipeline_mode = #tpu.pipeline_mode<synchronous>, transform_indices = @transform_1, window_bounds = array<i64: 21, 64>}, {pipeline_mode = #tpu.pipeline_mode<synchronous>, transform_indices = @transform_2, window_bounds = array<i64: 1, 64>}, {pipeline_mode = #tpu.pipeline_mode<synchronous>, transform_indices = @transform_3, window_bounds = array<i64: 64, 64>}, {pipeline_mode = #tpu.pipeline_mode<synchronous>, transform_indices = @transform_4, window_bounds = array<i64: 1, 64>}, {pipeline_mode = #tpu.pipeline_mode<synchronous>, transform_indices = @transform_5, window_bounds = array<i64: 64, 8>}, {pipeline_mode = #tpu.pipeline_mode<synchronous>, transform_indices = @transform_6, window_bounds = array<i64: 1, 8>}, {pipeline_mode = #tpu.pipeline_mode<synchronous>, transform_indices = @transform_7, window_bounds = array<i64: 1, 8>}, {transform_indices = @transform_8, window_bounds = array<i64: 2048, 8>}]} {
    %c0 = arith.constant 0 : index
    %c0_0 = arith.constant 0 : index
    %0 = vector.load %arg1[%c0, %c0_0] : memref<2048x21xf32, #tpu.memory_space<vmem>>, vector<2048x21xf32>
    %1 = arith.truncf %0 : vector<2048x21xf32> to vector<2048x21xbf16>
    %c0_1 = arith.constant 0 : index
    %c0_2 = arith.constant 0 : index
    %2 = vector.load %arg2[%c0_1, %c0_2] : memref<21x64xbf16, #tpu.memory_space<vmem>>, vector<21x64xbf16>
    %cst = arith.constant dense<0.000000e+00> : vector<2048x64xf32>
    %3 = tpu.matmul %1, %2, %cst {dimension_numbers = #tpu.dot_dimension_numbers<[1], [0], [0], [1], [0, 0, 1, 1], [], []>} : vector<2048x21xbf16>, vector<21x64xbf16>, vector<2048x64xf32> -> vector<2048x64xf32>
    %c0_3 = arith.constant 0 : index
    %c0_4 = arith.constant 0 : index
    %4 = vector.load %arg3[%c0_3, %c0_4] : memref<1x64xf32, #tpu.memory_space<vmem>>, vector<1x64xf32>
    %5 = vector.broadcast %4 : vector<1x64xf32> to vector<2048x64xf32>
    %6 = arith.addf %3, %5 : vector<2048x64xf32>
    %cst_5 = arith.constant 0.000000e+00 : f32
    %7 = vector.broadcast %cst_5 : f32 to vector<2048x64xf32>
    %8 = arith.maximumf %6, %7 : vector<2048x64xf32>
    %9 = arith.truncf %8 : vector<2048x64xf32> to vector<2048x64xbf16>
    %c0_6 = arith.constant 0 : index
    %c0_7 = arith.constant 0 : index
    %10 = vector.load %arg4[%c0_6, %c0_7] : memref<64x64xbf16, #tpu.memory_space<vmem>>, vector<64x64xbf16>
    %cst_8 = arith.constant dense<0.000000e+00> : vector<2048x64xf32>
    %11 = tpu.matmul %9, %10, %cst_8 {dimension_numbers = #tpu.dot_dimension_numbers<[1], [0], [0], [1], [0, 0, 1, 1], [], []>} : vector<2048x64xbf16>, vector<64x64xbf16>, vector<2048x64xf32> -> vector<2048x64xf32>
    %c0_9 = arith.constant 0 : index
    %c0_10 = arith.constant 0 : index
    %12 = vector.load %arg5[%c0_9, %c0_10] : memref<1x64xf32, #tpu.memory_space<vmem>>, vector<1x64xf32>
    %13 = vector.broadcast %12 : vector<1x64xf32> to vector<2048x64xf32>
    %14 = arith.addf %11, %13 : vector<2048x64xf32>
    %cst_11 = arith.constant 0.000000e+00 : f32
    %15 = vector.broadcast %cst_11 : f32 to vector<2048x64xf32>
    %16 = arith.maximumf %14, %15 : vector<2048x64xf32>
    %17 = arith.truncf %16 : vector<2048x64xf32> to vector<2048x64xbf16>
    %c0_12 = arith.constant 0 : index
    %c0_13 = arith.constant 0 : index
    %18 = vector.load %arg6[%c0_12, %c0_13] : memref<64x8xbf16, #tpu.memory_space<vmem>>, vector<64x8xbf16>
    %cst_14 = arith.constant dense<0.000000e+00> : vector<2048x8xf32>
    %19 = tpu.matmul %17, %18, %cst_14 {dimension_numbers = #tpu.dot_dimension_numbers<[1], [0], [0], [1], [0, 0, 1, 1], [], []>} : vector<2048x64xbf16>, vector<64x8xbf16>, vector<2048x8xf32> -> vector<2048x8xf32>
    %c0_15 = arith.constant 0 : index
    %c0_16 = arith.constant 0 : index
    %20 = vector.load %arg7[%c0_15, %c0_16] : memref<1x8xf32, #tpu.memory_space<vmem>>, vector<1x8xf32>
    %21 = vector.broadcast %20 : vector<1x8xf32> to vector<2048x8xf32>
    %22 = arith.addf %19, %21 : vector<2048x8xf32>
    %23 = arith.negf %22 : vector<2048x8xf32>
    %24 = math.exp %23 : vector<2048x8xf32>
    %cst_17 = arith.constant 1.000000e+00 : f32
    %25 = vector.broadcast %cst_17 : f32 to vector<2048x8xf32>
    %26 = arith.addf %25, %24 : vector<2048x8xf32>
    %27 = arith.divf %25, %26 : vector<2048x8xf32>
    %c0_18 = arith.constant 0 : index
    %c0_19 = arith.constant 0 : index
    %28 = vector.load %arg8[%c0_18, %c0_19] : memref<1x8xf32, #tpu.memory_space<vmem>>, vector<1x8xf32>
    %29 = vector.broadcast %28 : vector<1x8xf32> to vector<2048x8xf32>
    %30 = arith.mulf %27, %29 : vector<2048x8xf32>
    %c0_20 = arith.constant 0 : index
    %c0_21 = arith.constant 0 : index
    %31 = vector.load %arg9[%c0_20, %c0_21] : memref<2048x8xf32, #tpu.memory_space<vmem>>, vector<2048x8xf32>
    tpu.vector_store %arg9[%c0_20, %c0_21], %30 {strides = array<i32>} : memref<2048x8xf32, #tpu.memory_space<vmem>>, vector<2048x8xf32>,
    return
  }
  func.func @transform_0(%arg0: i32) -> (i32, i32) {
    %c0_i32 = arith.constant 0 : i32
    %c0_i32_0 = arith.constant 0 : i32
    return %arg0, %c0_i32 : i32, i32
  }
  func.func @transform_1(%arg0: i32) -> (i32, i32) {
    %c0_i32 = arith.constant 0 : i32
    %c0_i32_0 = arith.constant 0 : i32
    %c0_i32_1 = arith.constant 0 : i32
    return %c0_i32, %c0_i32_0 : i32, i32
  }
  func.func @transform_2(%arg0: i32) -> (i32, i32) {
    %c0_i32 = arith.constant 0 : i32
    %c0_i32_0 = arith.constant 0 : i32
    %c0_i32_1 = arith.constant 0 : i32
    return %c0_i32, %c0_i32_0 : i32, i32
  }
  func.func @transform_3(%arg0: i32) -> (i32, i32) {
    %c0_i32 = arith.constant 0 : i32
    %c0_i32_0 = arith.constant 0 : i32
    %c0_i32_1 = arith.constant 0 : i32
    return %c0_i32, %c0_i32_0 : i32, i32
  }
  func.func @transform_4(%arg0: i32) -> (i32, i32) {
    %c0_i32 = arith.constant 0 : i32
    %c0_i32_0 = arith.constant 0 : i32
    %c0_i32_1 = arith.constant 0 : i32
    return %c0_i32, %c0_i32_0 : i32, i32
  }
  func.func @transform_5(%arg0: i32) -> (i32, i32) {
    %c0_i32 = arith.constant 0 : i32
    %c0_i32_0 = arith.constant 0 : i32
    %c0_i32_1 = arith.constant 0 : i32
    return %c0_i32, %c0_i32_0 : i32, i32
  }
  func.func @transform_6(%arg0: i32) -> (i32, i32) {
    %c0_i32 = arith.constant 0 : i32
    %c0_i32_0 = arith.constant 0 : i32
    %c0_i32_1 = arith.constant 0 : i32
    return %c0_i32, %c0_i32_0 : i32, i32
  }
  func.func @transform_7(%arg0: i32) -> (i32, i32) {
    %c0_i32 = arith.constant 0 : i32
    %c0_i32_0 = arith.constant 0 : i32
    %c0_i32_1 = arith.constant 0 : i32
    return %c0_i32, %c0_i32_0 : i32, i32
  }
  func.func @transform_8(%arg0: i32) -> (i32, i32) {
    %c0_i32 = arith.constant 0 : i32
    %c0_i32_0 = arith.constant 0 : i32
    return %arg0, %c0_i32 : i32, i32
  }
}

</mosaic_0001>

<bundles_post_ra>
// kernel: gaussian_field_forward.1
= control target key start
LH: loop header
LB: loop body
LE: loop exit
PB: predicated region body
PF: predicated region fallthrough
CT: control target
= control target key end

     0   :  { %s10967_s27 = smov 0   ;;  %s14103_s0 = inlined_call_operand.vmem [shape: f32[4096,21], index: 0, kind: input, shape index: {}]   ;;  %s14104_s1 = inlined_call_operand.vmem [shape: bf16[21,64], index: 1, kind: input, shape index: {}]   ;;  %s14105_s2 = inlined_call_operand.vmem [shape: f32[1,64], index: 2, kind: input, shape index: {}]   ;;  %s14106_s3 = inlined_call_operand.vmem [shape: bf16[64,64], index: 3, kind: input, shape index: {}]   ;;  %s14107_s4 = inlined_call_operand.vmem [shape: f32[1,64], index: 4, kind: input, shape index: {}]   ;;  %s14108_s5 = inlined_call_operand.vmem [shape: bf16[64,8], index: 5, kind: input, shape index: {}]   ;;  %s14109_s6 = inlined_call_operand.vmem [shape: f32[1,8], index: 6, kind: input, shape index: {}]   ;;  %s14110_s7 = inlined_call_operand.vmem [shape: f32[1,8], index: 7, kind: input, shape index: {}]   ;;  %s14111_s8 = inlined_call_operand.vmem [shape: f32[4096,8], index: 8, kind: output, shape index: {}]  }
   0x1 LB: > { %s8003_s28 = sadd.s32 4294967295, %s10919_s27   ;;  %p8007_p0 = scmp.ge.s32.totalorder %s10919_s27, 1  ;;  %s10919_s27 = sphi %s10967_s27, %s18_s27  }
   0x2   : > { %p263_p1 = scmp.lt.s32.totalorder %s10919_s27, 3 }
   0x4   : > { %p264_p2 = pnand %p8007_p0, %p263_p1 }
   0x6   : > { %267 = sbr.rel (%p264_p2) target bundleno = 1273 (0x4f9), region = 52 }
   0xd   : > { %v9863_v0 = vld [vmem:[%s14104_s1] sm:$0xff]   ;;  %vm1098_vm0 = vcmask 1041408   ;;  %v9864_v1 = vld [vmem:[%s14104_s1 + $0x8] ss:$0 sps:$4 sm:$0x77]   ;;  %vm1099_vm1 = vcmask 1042432  }
   0xe   : > { %9850 = vmatprep.subr.bf16.mxu1 %v9863_v0  ;;  %s8008_s11 = sshll.u32 %s8003_s28, 8  ;;  %9062 = vmatprep.subr.bf16.mxu0 %v9863_v0  ;;  %v10921_v2 = vmov 65535   ;;  %v9865_v6 = vld [vmem:[%s14106_s3] sm:$0xff]   ;;  %vm713_vm2 = vcmask 171008   ;;  %v9866_v16 = vld [vmem:[%s14106_s3 + $0x8] sm:$0xff]   ;;  %vm2585_vm3 = vcmask 523264  }
   0xf   : > { %9852 = vmatpush3.bf16.msra.mxu1 %v9863_v0  ;;  %v1100_v3 = vsel %vm1098_vm0, 4294967295, %v10921_v2  ;;  %p298_p3 = scmp.lt.s32.totalorder %s8008_s11, 511  ;;  %9063 = vmatpush3.bf16.msra.mxu0 %v9863_v0  ;;  %vm7690_vm4 = vcmask 64512  }
  0x10   : > { %v1101_v4 = vsel %vm1099_vm1, %v1100_v3, 0 }
  0x11   : > { %v1103_v5 = vand.u32 %v9864_v1, %v1101_v4  ;;  %s14171_s11 = smov (!%p298_p3, %s8008_s11), 511 }
  0x12   : > { %s8009_s14 = sshll.u32 %s14171_s11, 3 }
  0x13   : > { %9851 = vmatprep.subr.bf16.mxu1 %v1103_v5  ;;  %9064 = vmatprep.subr.bf16.mxu0 %v1103_v5  ;;  %s10992_s17 = scalar_lea.vmem %s14103_s0, %s8009_s14  ;;  %s12375_s30 = scalar_lea.vmem %s14111_s8, %s8009_s14 }
  0x14   : > { %9853 = vmatpush3.bf16.msra.mxu1 %v1103_v5  ;;  %9065 = vmatpush3.bf16.msra.mxu0 %v1103_v5  ;;  %v438_v7 = vld [vmem:[%s10992_s17 + $0x400] sm:$0xff]  ;;  %v439_v8 = vld [vmem:[%s10992_s17 + $0x408] sm:$0xff]  ;;  %v440_v9 = vld [vmem:[%s10992_s17 + $0x410] sm:$0xff] }
  0x15   : > { %9322 = vmatprep.subr.bf16.mxu1 %v9865_v6  ;;  %v630_v10 = vpack.c.bf16 %v439_v8, %v438_v7  ;;  %v441_v11 = vld [vmem:[%s10992_s17 + $0x418] sm:$0xff]  ;;  %v442_v12 = vld [vmem:[%s10992_s17 + $0x420] sm:$0xff]  ;;  %v443_v13 = vld [vmem:[%s10992_s17 + $0x428] sm:$0xff] }
  0x16   : > { %v631_v14 = vpack.c.bf16 %v441_v11, %v440_v9  ;;  %v632_v15 = vpack.c.bf16 %v443_v13, %v442_v12  ;;  %v444_v17 = vld [vmem:[%s10992_s17 + $0x430] sm:$0xff]  ;;  %v445_v18 = vld [vmem:[%s10992_s17 + $0x438] sm:$0xff]  ;;  %v310_v19 = vld [vmem:[%s10992_s17] sm:$0xff] }
  0x17   : > { %9194 = vmatprep.mubr.msk.bf16.mxu1 %vm713_vm2, %v630_v10  ;;  %v311_v20 = vld [vmem:[%s10992_s17 + $0x8] sm:$0xff]  ;;  %v446_v21 = vld [vmem:[%s10992_s17 + $0x440] sm:$0xff]  ;;  %v312_v24 = vld [vmem:[%s10992_s17 + $0x10] sm:$0xff]  ;;  %v633_v26 = vpack.c.bf16 %v445_v18, %v444_v17 }
  0x18   : > { %9195 = vmatmul.mubr.msk.bf16.vlgmr.msra.gmra.mrb[0].mxu1 %vm713_vm2, %v631_v14  ;;  %v447_v22 = vld [vmem:[%s10992_s17 + $0x448] sm:$0xff]  ;;  %v566_v23 = vpack.c.bf16 %v311_v20, %v310_v19  ;;  %v313_v25 = vld [vmem:[%s10992_s17 + $0x18] sm:$0xff]  ;;  %v314_v28 = vld [vmem:[%s10992_s17 + $0x20] sm:$0xff] }
  0x19   : > { %9323 = vmatpush3.bf16.msra.mxu1 %v9865_v6  ;;  %9198 = vmatprep.mubr.msk.bf16.mxu1 %vm713_vm2, %v632_v15  ;;  %v567_v27 = vpack.c.bf16 %v313_v25, %v312_v24  ;;  %v315_v29 = vld [vmem:[%s10992_s17 + $0x28] sm:$0xff]  ;;  %v634_v30 = vpack.c.bf16 %v447_v22, %v446_v21  ;;  %v316_v32 = vld [vmem:[%s10992_s17 + $0x30] sm:$0xff]  ;;  %v317_v33 = vld [vmem:[%s10992_s17 + $0x38] sm:$0xff] }
  0x1a   : > { %9324 = vmatprep.subr.bf16.mxu1 %v9866_v16  ;;  %9066 = vmatprep.mubr.msk.bf16.mxu0 %vm713_vm2, %v566_v23  ;;  %v568_v31 = vpack.c.bf16 %v315_v29, %v314_v28  ;;  %v318_v34 = vld [vmem:[%s10992_s17 + $0x40] sm:$0xff]  ;;  %v319_v35 = vld [vmem:[%s10992_s17 + $0x48] sm:$0xff]  ;;  %v448_v36 = vld [vmem:[%s10992_s17 + $0x450] sm:$0xff]  ;;  %v569_v40 = vpack.c.bf16 %v317_v33, %v316_v32 }
  0x1b   : > { %9067 = vmatmul.mubr.msk.bf16.vlgmr.msra.gmra.mrb[0].mxu0 %vm713_vm2, %v567_v27  ;;  %v449_v37 = vld [vmem:[%s10992_s17 + $0x458] sm:$0xff]  ;;  %v450_v38 = vld [vmem:[%s10992_s17 + $0x460] sm:$0xff]  ;;  %v451_v39 = vld [vmem:[%s10992_s17 + $0x468] sm:$0xff]  ;;  %v570_v41 = vpack.c.bf16 %v319_v35, %v318_v34 }
  0x1c   : > { %9070 = vmatprep.mubr.msk.bf16.mxu0 %vm713_vm2, %v568_v31  ;;  %v635_v42 = vpack.c.bf16 %v449_v37, %v448_v36  ;;  %v636_v43 = vpack.c.bf16 %v451_v39, %v450_v38  ;;  %v320_v44 = vld [vmem:[%s10992_s17 + $0x50] sm:$0xff]  ;;  %v321_v45 = vld [vmem:[%s10992_s17 + $0x58] sm:$0xff]  ;;  %v322_v46 = vld [vmem:[%s10992_s17 + $0x60] sm:$0xff] }
  0x1d   : > { %9325 = vmatpush3.bf16.msra.mxu1 %v9866_v16  ;;  %v323_v47 = vld [vmem:[%s10992_s17 + $0x68] sm:$0xff]  ;;  %v452_v48 = vld [vmem:[%s10992_s17 + $0x470] sm:$0xff]  ;;  %v453_v49 = vld [vmem:[%s10992_s17 + $0x478] sm:$0xff]  ;;  %v571_v52 = vpack.c.bf16 %v321_v45, %v320_v44 }
  0x1e   : > { %v454_v50 = vld [vmem:[%s10992_s17 + $0x480] sm:$0xff]  ;;  %v455_v51 = vld [vmem:[%s10992_s17 + $0x488] sm:$0xff]  ;;  %v572_v53 = vpack.c.bf16 %v323_v47, %v322_v46  ;;  %v637_v54 = vpack.c.bf16 %v453_v49, %v452_v48  ;;  %v324_v56 = vld [vmem:[%s10992_s17 + $0x70] sm:$0xff] }
  0x1f   : > { %v638_v55 = vpack.c.bf16 %v455_v51, %v454_v50  ;;  %v325_v57 = vld [vmem:[%s10992_s17 + $0x78] sm:$0xff]  ;;  %v326_v58 = vld [vmem:[%s10992_s17 + $0x80] sm:$0xff]  ;;  %v327_v59 = vld [vmem:[%s10992_s17 + $0x88] sm:$0xff] }
  0x20   : > { %9199 = vmatmul.mubr.msk.bf16.gmra.mrb[4].mxu1 %vm713_vm2, %v633_v26  ;;  %v456_v60 = vld [vmem:[%s10992_s17 + $0x490] sm:$0xff]  ;;  %v457_v61 = vld [vmem:[%s10992_s17 + $0x498] sm:$0xff]  ;;  %v458_v62 = vld [vmem:[%s10992_s17 + $0x4a0] sm:$0xff]  ;;  %v573_v0 = vpack.c.bf16 %v325_v57, %v324_v56  ;;  %v574_v1 = vpack.c.bf16 %v327_v59, %v326_v58 }
  0x21   : > { %9202 = vmatprep.mubr.msk.bf16.mxu1 %vm713_vm2, %v634_v30  ;;  %v459_v63 = vld [vmem:[%s10992_s17 + $0x4a8] sm:$0xff]  ;;  %v639_v2 = vpack.c.bf16 %v457_v61, %v456_v60  ;;  %v328_v4 = vld [vmem:[%s10992_s17 + $0x90] sm:$0xff]  ;;  %v329_v5 = vld [vmem:[%s10992_s17 + $0x98] sm:$0xff] }
  0x22   : > { %v640_v3 = vpack.c.bf16 %v459_v63, %v458_v62  ;;  %v330_v6 = vld [vmem:[%s10992_s17 + $0xa0] sm:$0xff]  ;;  %v331_v7 = vld [vmem:[%s10992_s17 + $0xa8] sm:$0xff]  ;;  %v460_v8 = vld [vmem:[%s10992_s17 + $0x4b0] sm:$0xff]  ;;  %v575_v12 = vpack.c.bf16 %v329_v5, %v328_v4 }
  0x23   : > { %9071 = vmatmul.mubr.msk.bf16.gmra.mrb[4].mxu0 %vm713_vm2, %v569_v40  ;;  %v461_v9 = vld [vmem:[%s10992_s17 + $0x4b8] sm:$0xff]  ;;  %v462_v10 = vld [vmem:[%s10992_s17 + $0x4c0] sm:$0xff]  ;;  %v463_v11 = vld [vmem:[%s10992_s17 + $0x4c8] sm:$0xff]  ;;  %v576_v13 = vpack.c.bf16 %v331_v7, %v330_v6 }
  0x24   : > { %9074 = vmatprep.mubr.msk.bf16.mxu0 %vm713_vm2, %v570_v41  ;;  %v641_v14 = vpack.c.bf16 %v461_v9, %v460_v8  ;;  %v9867_v15 = vld [vmem:[%s14106_s3 + $0x10] sm:$0xff]   ;;  %v642_v16 = vpack.c.bf16 %v463_v11, %v462_v10  ;;  %v333_v18 = vld [vmem:[%s10992_s17 + $0xb8] sm:$0xff]  ;;  %v334_v19 = vld [vmem:[%s10992_s17 + $0xc0] sm:$0xff] }
  0x25   : > { %9326 = vmatprep.subr.bf16.mxu1 %v9867_v15  ;;  %v332_v17 = vld [vmem:[%s10992_s17 + $0xb0] sm:$0xff]  ;;  %v335_v20 = vld [vmem:[%s10992_s17 + $0xc8] sm:$0xff]  ;;  %v465_v22 = vld [vmem:[%s10992_s17 + $0x4d8] sm:$0xff] }
  0x26   : > { %9327 = vmatpush3.bf16.msra.mxu1 %v9867_v15  ;;  %v464_v21 = vld [vmem:[%s10992_s17 + $0x4d0] sm:$0xff]  ;;  %v466_v23 = vld [vmem:[%s10992_s17 + $0x4e0] sm:$0xff]  ;;  %v467_v24 = vld [vmem:[%s10992_s17 + $0x4e8] sm:$0xff]  ;;  %v577_v25 = vpack.c.bf16 %v333_v18, %v332_v17  ;;  %v578_v26 = vpack.c.bf16 %v335_v20, %v334_v19 }
  0x27   : > { %v643_v27 = vpack.c.bf16 %v465_v22, %v464_v21  ;;  %v644_v28 = vpack.c.bf16 %v467_v24, %v466_v23  ;;  %v336_v29 = vld [vmem:[%s10992_s17 + $0xd0] sm:$0xff]  ;;  %v337_v30 = vld [vmem:[%s10992_s17 + $0xd8] sm:$0xff]  ;;  %v338_v31 = vld [vmem:[%s10992_s17 + $0xe0] sm:$0xff] }
  0x28   : > { %9203 = vmatmul.mubr.msk.bf16.gmra.mrb[8].mxu1 %vm713_vm2, %v635_v42  ;;  %v339_v32 = vld [vmem:[%s10992_s17 + $0xe8] sm:$0xff]  ;;  %v468_v33 = vld [vmem:[%s10992_s17 + $0x4f0] sm:$0xff]  ;;  %v469_v34 = vld [vmem:[%s10992_s17 + $0x4f8] sm:$0xff]  ;;  %v579_v37 = vpack.c.bf16 %v337_v30, %v336_v29 }
  0x29   : > { %9206 = vmatprep.mubr.msk.bf16.mxu1 %vm713_vm2, %v636_v43  ;;  %v470_v35 = vld [vmem:[%s10992_s17 + $0x500] sm:$0xff]  ;;  %v471_v36 = vld [vmem:[%s10992_s17 + $0x508] sm:$0xff]  ;;  %v580_v38 = vpack.c.bf16 %v339_v32, %v338_v31  ;;  %v645_v39 = vpack.c.bf16 %v469_v34, %v468_v33  ;;  %v340_v41 = vld [vmem:[%s10992_s17 + $0xf0] sm:$0xff] }
  0x2a   : > { %v646_v40 = vpack.c.bf16 %v471_v36, %v470_v35  ;;  %v341_v42 = vld [vmem:[%s10992_s17 + $0xf8] sm:$0xff]  ;;  %v342_v43 = vld [vmem:[%s10992_s17 + $0x100] sm:$0xff]  ;;  %v343_v44 = vld [vmem:[%s10992_s17 + $0x108] sm:$0xff] }
  0x2b   : > { %9075 = vmatmul.mubr.msk.bf16.gmra.mrb[8].mxu0 %vm713_vm2, %v571_v52  ;;  %v472_v45 = vld [vmem:[%s10992_s17 + $0x510] sm:$0xff]  ;;  %v473_v46 = vld [vmem:[%s10992_s17 + $0x518] sm:$0xff]  ;;  %v474_v47 = vld [vmem:[%s10992_s17 + $0x520] sm:$0xff]  ;;  %v581_v49 = vpack.c.bf16 %v341_v42, %v340_v41  ;;  %v582_v50 = vpack.c.bf16 %v343_v44, %v342_v43 }
  0x2c   : > { %9078 = vmatprep.mubr.msk.bf16.mxu0 %vm713_vm2, %v572_v53  ;;  %v475_v48 = vld [vmem:[%s10992_s17 + $0x528] sm:$0xff]  ;;  %v647_v51 = vpack.c.bf16 %v473_v46, %v472_v45  ;;  %v344_v53 = vld [vmem:[%s10992_s17 + $0x110] sm:$0xff]  ;;  %v9868_v57 = vld [vmem:[%s14106_s3 + $0x18] sm:$0xff]  }
  0x2d   : > { %v648_v52 = vpack.c.bf16 %v475_v48, %v474_v47  ;;  %v347_v56 = vld [vmem:[%s10992_s17 + $0x128] sm:$0xff]  ;;  %v476_v58 = vld [vmem:[%s10992_s17 + $0x530] sm:$0xff]  ;;  %v477_v59 = vld [vmem:[%s10992_s17 + $0x538] sm:$0xff]  ;;  %9328 = vmatprep.subr.bf16.mxu1 %v9868_v57 }
  0x2e   : > { %v478_v60 = vld [vmem:[%s10992_s17 + $0x540] sm:$0xff]  ;;  %v479_v61 = vld [vmem:[%s10992_s17 + $0x548] sm:$0xff]  ;;  %9329 = vmatpush3.bf16.msra.mxu1 %v9868_v57  ;;  %v480_v6 = vld [vmem:[%s10992_s17 + $0x550] sm:$0xff] }
  0x2f   : > { %v350_v4 = vld [vmem:[%s10992_s17 + $0x140] sm:$0xff]  ;;  %v351_v5 = vld [vmem:[%s10992_s17 + $0x148] sm:$0xff]  ;;  %v481_v7 = vld [vmem:[%s10992_s17 + $0x558] sm:$0xff] }
  0x30   : > { %9207 = vmatmul.mubr.msk.bf16.gmra.mrb[12].mxu1 %vm713_vm2, %v637_v54  ;;  %v345_v54 = vld [vmem:[%s10992_s17 + $0x118] sm:$0xff]  ;;  %v482_v8 = vld [vmem:[%s10992_s17 + $0x560] sm:$0xff]  ;;  %v483_v9 = vld [vmem:[%s10992_s17 + $0x568] sm:$0xff]  ;;  %v586_v11 = vpack.c.bf16 %v351_v5, %v350_v4 }
  0x31   : > { %9210 = vmatprep.mubr.msk.bf16.mxu1 %vm713_vm2, %v638_v55  ;;  %v346_v55 = vld [vmem:[%s10992_s17 + $0x120] sm:$0xff]  ;;  %v583_v62 = vpack.c.bf16 %v345_v54, %v344_v53  ;;  %v353_v15 = vld [vmem:[%s10992_s17 + $0x158] sm:$0xff]  ;;  %v355_v17 = vld [vmem:[%s10992_s17 + $0x168] sm:$0xff] }
  0x32   : > { %v584_v63 = vpack.c.bf16 %v347_v56, %v346_v55  ;;  %v484_v18 = vld [vmem:[%s10992_s17 + $0x570] sm:$0xff]  ;;  %v485_v19 = vld [vmem:[%s10992_s17 + $0x578] sm:$0xff]  ;;  %v486_v20 = vld [vmem:[%s10992_s17 + $0x580] sm:$0xff] }
  0x33   : > { %9079 = vmatmul.mubr.msk.bf16.gmra.mrb[12].mxu0 %vm713_vm2, %v573_v0  ;;  %v649_v0 = vpack.c.bf16 %v477_v59, %v476_v58  ;;  %v487_v21 = vld [vmem:[%s10992_s17 + $0x588] sm:$0xff]  ;;  %v653_v24 = vpack.c.bf16 %v485_v19, %v484_v18  ;;  %v488_v30 = vld [vmem:[%s10992_s17 + $0x590] sm:$0xff]  ;;  %v489_v31 = vld [vmem:[%s10992_s17 + $0x598] sm:$0xff] }
  0x34   : > { %9082 = vmatprep.mubr.msk.bf16.mxu0 %vm713_vm2, %v574_v1  ;;  %v650_v1 = vpack.c.bf16 %v479_v61, %v478_v60  ;;  %v359_v29 = vld [vmem:[%s10992_s17 + $0x188] sm:$0xff]  ;;  %v490_v32 = vld [vmem:[%s10992_s17 + $0x5a0] sm:$0xff]  ;;  %v655_v36 = vpack.c.bf16 %v489_v31, %v488_v30  ;;  %v492_v42 = vld [vmem:[%s10992_s17 + $0x5b0] sm:$0xff] }
  0x35   : > { %v491_v33 = vld [vmem:[%s10992_s17 + $0x5a8] sm:$0xff]  ;;  %v493_v43 = vld [vmem:[%s10992_s17 + $0x5b8] sm:$0xff]  ;;  %v494_v44 = vld [vmem:[%s10992_s17 + $0x5c0] sm:$0xff] }
  0x36   : > { %v363_v41 = vld [vmem:[%s10992_s17 + $0x1a8] sm:$0xff]  ;;  %v9869_v48 = vld [vmem:[%s14108_s5] sm:$0xff]   ;;  %v496_v55 = vld [vmem:[%s10992_s17 + $0x5d0] sm:$0xff] }
  0x37   : > { %v495_v45 = vld [vmem:[%s10992_s17 + $0x5c8] sm:$0xff]  ;;  %9586 = vmatprep.subr.bf16.mxu0 %v9869_v48  ;;  %v366_v53 = vld [vmem:[%s10992_s17 + $0x1c0] sm:$0xff]  ;;  %v497_v56 = vld [vmem:[%s10992_s17 + $0x5d8] sm:$0xff] }
  0x38   : > { %9211 = vmatmul.mubr.msk.bf16.gmra.mrb[16].mxu1 %vm713_vm2, %v639_v2  ;;  %v348_v2 = vld [vmem:[%s10992_s17 + $0x130] sm:$0xff]  ;;  %9587 = vmatpush3.bf16.msra.mxu0 %v9869_v48  ;;  %v367_v54 = vld [vmem:[%s10992_s17 + $0x1c8] sm:$0xff]  ;;  %v498_v57 = vld [vmem:[%s10992_s17 + $0x5e0] sm:$0xff]  ;;  %v659_v61 = vpack.c.bf16 %v497_v56, %v496_v55 }
  0x39   : > { %9214 = vmatprep.mubr.msk.bf16.mxu1 %vm713_vm2, %v640_v3  ;;  %v349_v3 = vld [vmem:[%s10992_s17 + $0x138] sm:$0xff]  ;;  %v499_v58 = vld [vmem:[%s10992_s17 + $0x5e8] sm:$0xff]  ;;  %v594_v60 = vpack.c.bf16 %v367_v54, %v366_v53  ;;  %v502_v5 = vld [vmem:[%s10992_s17 + $0x600] sm:$0xff] }
  0x3a   : > { %v585_v10 = vpack.c.bf16 %v349_v3, %v348_v2  ;;  %v371_v2 = vld [vmem:[%s10992_s17 + $0x1e8] sm:$0xff]  ;;  %v500_v3 = vld [vmem:[%s10992_s17 + $0x5f0] sm:$0xff]  ;;  %v501_v4 = vld [vmem:[%s10992_s17 + $0x5f8] sm:$0xff] }
  0x3b   : > { %9083 = vmatmul.mubr.msk.bf16.gmra.mrb[16].mxu0 %vm713_vm2, %v575_v12  ;;  %v651_v12 = vpack.c.bf16 %v481_v7, %v480_v6  ;;  %v503_v6 = vld [vmem:[%s10992_s17 + $0x608] sm:$0xff]  ;;  %v385_v48 = vld [vmem:[%s10992_s17 + $0x258] sm:$0xff]  ;;  %v518_v53 = vld [vmem:[%s10992_s17 + $0x680] sm:$0xff] }
  0x3c   : > { %9086 = vmatprep.mubr.msk.bf16.mxu0 %vm713_vm2, %v576_v13  ;;  %v652_v13 = vpack.c.bf16 %v483_v9, %v482_v8  ;;  %v661_v9 = vpack.c.bf16 %v501_v4, %v500_v3  ;;  %v507_v18 = vld [vmem:[%s10992_s17 + $0x628] sm:$0xff] }
  0x3d   : > { %v511_v30 = vld [vmem:[%s10992_s17 + $0x648] sm:$0xff] }
  0x3e   : > { %v519_v54 = vld [vmem:[%s10992_s17 + $0x688] sm:$0xff] }
  0x40   : > { %9215 = vmatmul.mubr.msk.bf16.gmra.mrb[20].mxu1 %vm713_vm2, %v641_v14  ;;  %v352_v14 = vld [vmem:[%s10992_s17 + $0x150] sm:$0xff] }
  0x41   : > { %9218 = vmatprep.mubr.msk.bf16.mxu1 %vm713_vm2, %v642_v16  ;;  %v354_v16 = vld [vmem:[%s10992_s17 + $0x160] sm:$0xff]  ;;  %v587_v22 = vpack.c.bf16 %v353_v15, %v352_v14  ;;  %v375_v14 = vld [vmem:[%s10992_s17 + $0x208] sm:$0xff]  ;;  %v504_v15 = vld [vmem:[%s10992_s17 + $0x610] sm:$0xff] }
  0x42   : > { %v588_v23 = vpack.c.bf16 %v355_v17, %v354_v16  ;;  %v505_v16 = vld [vmem:[%s10992_s17 + $0x618] sm:$0xff]  ;;  %v506_v17 = vld [vmem:[%s10992_s17 + $0x620] sm:$0xff] }
  0x43   : > { %9087 = vmatmul.mubr.msk.bf16.gmra.mrb[20].mxu0 %vm713_vm2, %v577_v25  ;;  %v654_v25 = vpack.c.bf16 %v487_v21, %v486_v20  ;;  %v663_v21 = vpack.c.bf16 %v505_v16, %v504_v15 }
  0x44   : > { %9090 = vmatprep.mubr.msk.bf16.mxu0 %vm713_vm2, %v578_v26  ;;  %v356_v26 = vld [vmem:[%s10992_s17 + $0x170] sm:$0xff] }
  0x48   : > { %9219 = vmatmul.mubr.msk.bf16.gmra.mrb[24].mxu1 %vm713_vm2, %v643_v27  ;;  %v357_v27 = vld [vmem:[%s10992_s17 + $0x178] sm:$0xff] }
  0x49   : > { %9222 = vmatprep.mubr.msk.bf16.mxu1 %vm713_vm2, %v644_v28  ;;  %v358_v28 = vld [vmem:[%s10992_s17 + $0x180] sm:$0xff]  ;;  %v589_v34 = vpack.c.bf16 %v357_v27, %v356_v26  ;;  %v379_v26 = vld [vmem:[%s10992_s17 + $0x228] sm:$0xff]  ;;  %v508_v27 = vld [vmem:[%s10992_s17 + $0x630] sm:$0xff] }
  0x4a   : > { %v590_v35 = vpack.c.bf16 %v359_v29, %v358_v28  ;;  %v509_v28 = vld [vmem:[%s10992_s17 + $0x638] sm:$0xff]  ;;  %v510_v29 = vld [vmem:[%s10992_s17 + $0x640] sm:$0xff] }
  0x4b   : > { %9091 = vmatmul.mubr.msk.bf16.gmra.mrb[24].mxu0 %vm713_vm2, %v579_v37  ;;  %v656_v37 = vpack.c.bf16 %v491_v33, %v490_v32  ;;  %v665_v33 = vpack.c.bf16 %v509_v28, %v508_v27  ;;  %v531_v27 = vld [vmem:[%s10992_s17 + $0x6e8] sm:$0xff] }
  0x4c   : > { %9094 = vmatprep.mubr.msk.bf16.mxu0 %vm713_vm2, %v580_v38  ;;  %v360_v38 = vld [vmem:[%s10992_s17 + $0x190] sm:$0xff] }
  0x50   : > { %9223 = vmatmul.mubr.msk.bf16.gmra.mrb[28].mxu1 %vm713_vm2, %v645_v39  ;;  %v361_v39 = vld [vmem:[%s10992_s17 + $0x198] sm:$0xff] }
  0x51   : > { %9226 = vmatprep.mubr.msk.bf16.mxu1 %vm713_vm2, %v646_v40  ;;  %v362_v40 = vld [vmem:[%s10992_s17 + $0x1a0] sm:$0xff]  ;;  %v591_v46 = vpack.c.bf16 %v361_v39, %v360_v38  ;;  %v383_v38 = vld [vmem:[%s10992_s17 + $0x248] sm:$0xff]  ;;  %v512_v39 = vld [vmem:[%s10992_s17 + $0x650] sm:$0xff] }
  0x52   : > { %v592_v47 = vpack.c.bf16 %v363_v41, %v362_v40  ;;  %v513_v40 = vld [vmem:[%s10992_s17 + $0x658] sm:$0xff]  ;;  %v514_v41 = vld [vmem:[%s10992_s17 + $0x660] sm:$0xff] }
  0x53   : > { %9095 = vmatmul.mubr.msk.bf16.gmra.mrb[28].mxu0 %vm713_vm2, %v581_v49  ;;  %v657_v49 = vpack.c.bf16 %v493_v43, %v492_v42  ;;  %v515_v42 = vld [vmem:[%s10992_s17 + $0x668] sm:$0xff] }
  0x54   : > { %9098 = vmatprep.mubr.msk.bf16.mxu0 %vm713_vm2, %v582_v50  ;;  %v658_v50 = vpack.c.bf16 %v495_v45, %v494_v44  ;;  %v667_v45 = vpack.c.bf16 %v513_v40, %v512_v39  ;;  %v535_v39 = vld [vmem:[%s10992_s17 + $0x708] sm:$0xff] }
  0x58   : > { %9227 = vmatmul.mubr.msk.bf16.gmra.mrb[32].mxu1 %vm713_vm2, %v647_v51  ;;  %v364_v51 = vld [vmem:[%s10992_s17 + $0x1b0] sm:$0xff] }
  0x59   : > { %9230 = vmatprep.mubr.msk.bf16.mxu1 %vm713_vm2, %v648_v52  ;;  %v365_v52 = vld [vmem:[%s10992_s17 + $0x1b8] sm:$0xff] }
  0x5a   : > { %v593_v59 = vpack.c.bf16 %v365_v52, %v364_v51  ;;  %v516_v51 = vld [vmem:[%s10992_s17 + $0x670] sm:$0xff]  ;;  %v517_v52 = vld [vmem:[%s10992_s17 + $0x678] sm:$0xff] }
  0x5b   : > { %9099 = vmatmul.mubr.msk.bf16.gmra.mrb[32].mxu0 %vm713_vm2, %v583_v62  ;;  %v660_v62 = vpack.c.bf16 %v499_v58, %v498_v57  ;;  %v669_v57 = vpack.c.bf16 %v517_v52, %v516_v51  ;;  %v670_v58 = vpack.c.bf16 %v519_v54, %v518_v53  ;;  %v539_v51 = vld [vmem:[%s10992_s17 + $0x728] sm:$0xff] }
  0x5c   : > { %9102 = vmatprep.mubr.msk.bf16.mxu0 %vm713_vm2, %v584_v63  ;;  %v368_v63 = vld [vmem:[%s10992_s17 + $0x1d0] sm:$0xff] }
  0x60   : > { %9231 = vmatmul.mubr.msk.bf16.gmra.mrb[36].mxu1 %vm713_vm2, %v649_v0  ;;  %v369_v0 = vld [vmem:[%s10992_s17 + $0x1d8] sm:$0xff] }
  0x61   : > { %9234 = vmatprep.mubr.msk.bf16.mxu1 %vm713_vm2, %v650_v1  ;;  %v370_v1 = vld [vmem:[%s10992_s17 + $0x1e0] sm:$0xff]  ;;  %v595_v7 = vpack.c.bf16 %v369_v0, %v368_v63  ;;  %v520_v63 = vld [vmem:[%s10992_s17 + $0x690] sm:$0xff]  ;;  %v521_v0 = vld [vmem:[%s10992_s17 + $0x698] sm:$0xff] }
  0x62   : > { %v596_v8 = vpack.c.bf16 %v371_v2, %v370_v1  ;;  %v522_v1 = vld [vmem:[%s10992_s17 + $0x6a0] sm:$0xff]  ;;  %v523_v2 = vld [vmem:[%s10992_s17 + $0x6a8] sm:$0xff] }
  0x63   : > { %9103 = vmatmul.mubr.msk.bf16.gmra.mrb[36].mxu0 %vm713_vm2, %v585_v10  ;;  %v662_v10 = vpack.c.bf16 %v503_v6, %v502_v5  ;;  %v671_v5 = vpack.c.bf16 %v521_v0, %v520_v63  ;;  %v672_v6 = vpack.c.bf16 %v523_v2, %v522_v1  ;;  %v543_v63 = vld [vmem:[%s10992_s17 + $0x748] sm:$0xff] }
  0x64   : > { %9106 = vmatprep.mubr.msk.bf16.mxu0 %vm713_vm2, %v586_v11  ;;  %v372_v11 = vld [vmem:[%s10992_s17 + $0x1f0] sm:$0xff] }
  0x68   : > { %9235 = vmatmul.mubr.msk.bf16.gmra.mrb[40].mxu1 %vm713_vm2, %v651_v12  ;;  %v373_v12 = vld [vmem:[%s10992_s17 + $0x1f8] sm:$0xff] }
  0x69   : > { %9238 = vmatprep.mubr.msk.bf16.mxu1 %vm713_vm2, %v652_v13  ;;  %v374_v13 = vld [vmem:[%s10992_s17 + $0x200] sm:$0xff]  ;;  %v597_v19 = vpack.c.bf16 %v373_v12, %v372_v11  ;;  %v524_v11 = vld [vmem:[%s10992_s17 + $0x6b0] sm:$0xff]  ;;  %v525_v12 = vld [vmem:[%s10992_s17 + $0x6b8] sm:$0xff] }
  0x6a   : > { %v598_v20 = vpack.c.bf16 %v375_v14, %v374_v13  ;;  %v526_v13 = vld [vmem:[%s10992_s17 + $0x6c0] sm:$0xff]  ;;  %v527_v14 = vld [vmem:[%s10992_s17 + $0x6c8] sm:$0xff] }
  0x6b   : > { %9107 = vmatmul.mubr.msk.bf16.gmra.mrb[40].mxu0 %vm713_vm2, %v587_v22  ;;  %v664_v22 = vpack.c.bf16 %v507_v18, %v506_v17  ;;  %v9870_v17 = vld [vmem:[%s14108_s5 + $0x8] sm:$0xff]   ;;  %v673_v18 = vpack.c.bf16 %v525_v12, %v524_v11 }
  0x6c   : > { %9110 = vmatprep.mubr.msk.bf16.mxu0 %vm713_vm2, %v588_v23  ;;  %v376_v23 = vld [vmem:[%s10992_s17 + $0x210] sm:$0xff]  ;;  %9588 = vmatprep.subr.bf16.mxu0 %v9870_v17  ;;  %v547_v11 = vld [vmem:[%s10992_s17 + $0x768] sm:$0xff] }
  0x6d   : > { %9589 = vmatpush3.bf16.msra.mxu0 %v9870_v17  ;;  %v417_v17 = vld [vmem:[%s10992_s17 + $0x358] sm:$0xff] }
  0x70   : > { %9239 = vmatmul.mubr.msk.bf16.gmra.mrb[44].mxu1 %vm713_vm2, %v653_v24  ;;  %v377_v24 = vld [vmem:[%s10992_s17 + $0x218] sm:$0xff] }
  0x71   : > { %9242 = vmatprep.mubr.msk.bf16.mxu1 %vm713_vm2, %v654_v25  ;;  %v378_v25 = vld [vmem:[%s10992_s17 + $0x220] sm:$0xff]  ;;  %v599_v31 = vpack.c.bf16 %v377_v24, %v376_v23  ;;  %v399_v23 = vld [vmem:[%s10992_s17 + $0x2c8] sm:$0xff]  ;;  %v528_v24 = vld [vmem:[%s10992_s17 + $0x6d0] sm:$0xff] }
  0x72   : > { %v600_v32 = vpack.c.bf16 %v379_v26, %v378_v25  ;;  %v529_v25 = vld [vmem:[%s10992_s17 + $0x6d8] sm:$0xff]  ;;  %v530_v26 = vld [vmem:[%s10992_s17 + $0x6e0] sm:$0xff] }
  0x73   : > { %9111 = vmatmul.mubr.msk.bf16.gmra.mrb[44].mxu0 %vm713_vm2, %v589_v34  ;;  %v666_v34 = vpack.c.bf16 %v511_v30, %v510_v29  ;;  %v675_v30 = vpack.c.bf16 %v529_v25, %v528_v24  ;;  %v551_v24 = vld [vmem:[%s10992_s17 + $0x788] sm:$0xff] }
  0x74   : > { %9114 = vmatprep.mubr.msk.bf16.mxu0 %vm713_vm2, %v590_v35  ;;  %v380_v35 = vld [vmem:[%s10992_s17 + $0x230] sm:$0xff] }
  0x78   : > { %9243 = vmatmul.mubr.msk.bf16.gmra.mrb[48].mxu1 %vm713_vm2, %v655_v36  ;;  %v381_v36 = vld [vmem:[%s10992_s17 + $0x238] sm:$0xff] }
  0x79   : > { %9246 = vmatprep.mubr.msk.bf16.mxu1 %vm713_vm2, %v656_v37  ;;  %v382_v37 = vld [vmem:[%s10992_s17 + $0x240] sm:$0xff]  ;;  %v601_v43 = vpack.c.bf16 %v381_v36, %v380_v35  ;;  %v403_v35 = vld [vmem:[%s10992_s17 + $0x2e8] sm:$0xff]  ;;  %v532_v36 = vld [vmem:[%s10992_s17 + $0x6f0] sm:$0xff] }
  0x7a   : > { %v602_v44 = vpack.c.bf16 %v383_v38, %v382_v37  ;;  %v533_v37 = vld [vmem:[%s10992_s17 + $0x6f8] sm:$0xff]  ;;  %v534_v38 = vld [vmem:[%s10992_s17 + $0x700] sm:$0xff] }
  0x7b   : > { %9115 = vmatmul.mubr.msk.bf16.gmra.mrb[48].mxu0 %vm713_vm2, %v591_v46  ;;  %v668_v46 = vpack.c.bf16 %v515_v42, %v514_v41  ;;  %v677_v42 = vpack.c.bf16 %v533_v37, %v532_v36  ;;  %v420_v37 = vld [vmem:[%s10992_s17 + $0x370] sm:$0xff] }
  0x7c   : > { %9118 = vmatprep.mubr.msk.bf16.mxu0 %vm713_vm2, %v592_v47  ;;  %v384_v47 = vld [vmem:[%s10992_s17 + $0x250] sm:$0xff] }
  0x7d   : > { %v603_v55 = vpack.c.bf16 %v385_v48, %v384_v47  ;;  %v407_v47 = vld [vmem:[%s10992_s17 + $0x308] sm:$0xff]  ;;  %v536_v48 = vld [vmem:[%s10992_s17 + $0x710] sm:$0xff] }
  0x80   : > { %9247 = vmatmul.mubr.msk.bf16.gmra.mrb[52].mxu1 %vm713_vm2, %v657_v49  ;;  %v386_v49 = vld [vmem:[%s10992_s17 + $0x260] sm:$0xff] }
  0x81   : > { %9250 = vmatprep.mubr.msk.bf16.mxu1 %vm713_vm2, %v658_v50  ;;  %v387_v50 = vld [vmem:[%s10992_s17 + $0x268] sm:$0xff] }
  0x82   : > { %v604_v56 = vpack.c.bf16 %v387_v50, %v386_v49  ;;  %v537_v49 = vld [vmem:[%s10992_s17 + $0x718] sm:$0xff]  ;;  %v538_v50 = vld [vmem:[%s10992_s17 + $0x720] sm:$0xff] }
  0x83   : > { %9119 = vmatmul.mubr.msk.bf16.gmra.mrb[52].mxu0 %vm713_vm2, %v593_v59  ;;  %v388_v59 = vld [vmem:[%s10992_s17 + $0x270] sm:$0xff]  ;;  %v679_v54 = vpack.c.bf16 %v537_v49, %v536_v48  ;;  %v554_v49 = vld [vmem:[%s10992_s17 + $0x7a0] sm:$0xff] }
  0x84   : > { %9122 = vmatprep.mubr.msk.bf16.mxu0 %vm713_vm2, %v594_v60  ;;  %v389_v60 = vld [vmem:[%s10992_s17 + $0x278] sm:$0xff] }
  0x85   : > { %v605_v3 = vpack.c.bf16 %v389_v60, %v388_v59  ;;  %v411_v59 = vld [vmem:[%s10992_s17 + $0x328] sm:$0xff]  ;;  %v540_v60 = vld [vmem:[%s10992_s17 + $0x730] sm:$0xff] }
  0x88   : > { %9251 = vmatmul.mubr.msk.bf16.gmra.mrb[56].mxu1 %vm713_vm2, %v659_v61  ;;  %v390_v61 = vld [vmem:[%s10992_s17 + $0x280] sm:$0xff] }
  0x89   : > { %9254 = vmatprep.mubr.msk.bf16.mxu1 %vm713_vm2, %v660_v62  ;;  %v391_v62 = vld [vmem:[%s10992_s17 + $0x288] sm:$0xff] }
  0x8a   : > { %v606_v4 = vpack.c.bf16 %v391_v62, %v390_v61  ;;  %v541_v61 = vld [vmem:[%s10992_s17 + $0x738] sm:$0xff]  ;;  %v542_v62 = vld [vmem:[%s10992_s17 + $0x740] sm:$0xff] }
  0x8b   : > { %9123 = vmatmul.mubr.msk.bf16.gmra.mrb[56].mxu0 %vm713_vm2, %v595_v7  ;;  %v392_v7 = vld [vmem:[%s10992_s17 + $0x290] sm:$0xff]  ;;  %v681_v2 = vpack.c.bf16 %v541_v61, %v540_v60 }
  0x8c   : > { %9126 = vmatprep.mubr.msk.bf16.mxu0 %vm713_vm2, %v596_v8  ;;  %v393_v8 = vld [vmem:[%s10992_s17 + $0x298] sm:$0xff] }
  0x8d   : > { %v607_v15 = vpack.c.bf16 %v393_v8, %v392_v7  ;;  %v415_v7 = vld [vmem:[%s10992_s17 + $0x348] sm:$0xff]  ;;  %v544_v8 = vld [vmem:[%s10992_s17 + $0x750] sm:$0xff] }
  0x90   : > { %9255 = vmatmul.mubr.msk.bf16.gmra.mrb[60].mxu1 %vm713_vm2, %v661_v9  ;;  %v394_v9 = vld [vmem:[%s10992_s17 + $0x2a0] sm:$0xff] }
  0x91   : > { %9258 = vmatprep.mubr.msk.bf16.mxu1 %vm713_vm2, %v662_v10  ;;  %v395_v10 = vld [vmem:[%s10992_s17 + $0x2a8] sm:$0xff] }
  0x92   : > { %v608_v16 = vpack.c.bf16 %v395_v10, %v394_v9  ;;  %v545_v9 = vld [vmem:[%s10992_s17 + $0x758] sm:$0xff]  ;;  %v546_v10 = vld [vmem:[%s10992_s17 + $0x760] sm:$0xff] }
  0x93   : > { %9127 = vmatmul.mubr.msk.bf16.gmra.mrb[60].mxu0 %vm713_vm2, %v597_v19  ;;  %v674_v19 = vpack.c.bf16 %v527_v14, %v526_v13  ;;  %v683_v14 = vpack.c.bf16 %v545_v9, %v544_v8 }
  0x94   : > { %9130 = vmatprep.mubr.msk.bf16.mxu0 %vm713_vm2, %v598_v20  ;;  %v396_v20 = vld [vmem:[%s10992_s17 + $0x2b0] sm:$0xff] }
  0x98   : > { %9259 = vmatmul.mubr.msk.bf16.gmra.mrb[64].mxu1 %vm713_vm2, %v663_v21  ;;  %v397_v21 = vld [vmem:[%s10992_s17 + $0x2b8] sm:$0xff] }
  0x99   : > { %9262 = vmatprep.mubr.msk.bf16.mxu1 %vm713_vm2, %v664_v22  ;;  %v398_v22 = vld [vmem:[%s10992_s17 + $0x2c0] sm:$0xff]  ;;  %v609_v28 = vpack.c.bf16 %v397_v21, %v396_v20  ;;  %v548_v21 = vld [vmem:[%s10992_s17 + $0x770] sm:$0xff] }
  0x9a   : > { %v610_v29 = vpack.c.bf16 %v399_v23, %v398_v22  ;;  %v11339_v20 = vld [vmem:[%s14105_s2] ss:$0 sm:$0xff]  ;;  %v549_v22 = vld [vmem:[%s10992_s17 + $0x778] sm:$0xff] }
  0x9b   : > { %9131 = vmatmul.mubr.msk.bf16.gmra.mrb[64].mxu0 %vm713_vm2, %v599_v31  ;;  %v676_v31 = vpack.c.bf16 %v531_v27, %v530_v26  ;;  %v550_v23 = vld [vmem:[%s10992_s17 + $0x780] sm:$0xff] }
  0x9c   : > { %9134 = vmatprep.mubr.msk.bf16.mxu0 %vm713_vm2, %v600_v32  ;;  %v400_v32 = vld [vmem:[%s10992_s17 + $0x2d0] sm:$0xff] }
  0xa0   : > { %9263 = vmatmul.mubr.msk.bf16.gmra.mrb[68].mxu1 %vm713_vm2, %v665_v33  ;;  %v401_v33 = vld [vmem:[%s10992_s17 + $0x2d8] sm:$0xff] }
  0xa1   : > { %9266 = vmatprep.mubr.msk.bf16.mxu1 %vm713_vm2, %v666_v34  ;;  %v402_v34 = vld [vmem:[%s10992_s17 + $0x2e0] sm:$0xff]  ;;  %v611_v40 = vpack.c.bf16 %v401_v33, %v400_v32  ;;  %v686_v33 = vpack.c.bf16 %v551_v24, %v550_v23 }
  0xa2   : > { %v612_v41 = vpack.c.bf16 %v403_v35, %v402_v34 }
  0xa3   : > { %9135 = vmatmul.mubr.msk.bf16.gmra.mrb[68].mxu0 %vm713_vm2, %v601_v43  ;;  %v678_v43 = vpack.c.bf16 %v535_v39, %v534_v38  ;;  %v421_v38 = vld [vmem:[%s10992_s17 + $0x378] sm:$0xff] }
  0xa4   : > { %9138 = vmatprep.mubr.msk.bf16.mxu0 %vm713_vm2, %v602_v44  ;;  %v404_v44 = vld [vmem:[%s10992_s17 + $0x2f0] sm:$0xff] }
  0xa8   : > { %9267 = vmatmul.mubr.msk.bf16.gmra.mrb[72].mxu1 %vm713_vm2, %v667_v45  ;;  %v405_v45 = vld [vmem:[%s10992_s17 + $0x2f8] sm:$0xff] }
  0xa9   : > { %9270 = vmatprep.mubr.msk.bf16.mxu1 %vm713_vm2, %v668_v46  ;;  %v406_v46 = vld [vmem:[%s10992_s17 + $0x300] sm:$0xff]  ;;  %v613_v52 = vpack.c.bf16 %v405_v45, %v404_v44  ;;  %v552_v45 = vld [vmem:[%s10992_s17 + $0x790] sm:$0xff] }
  0xaa   : > { %v614_v53 = vpack.c.bf16 %v407_v47, %v406_v46  ;;  %v553_v46 = vld [vmem:[%s10992_s17 + $0x798] sm:$0xff] }
  0xab   : > { %9139 = vmatmul.mubr.msk.bf16.gmra.mrb[72].mxu0 %vm713_vm2, %v603_v55  ;;  %v680_v55 = vpack.c.bf16 %v539_v51, %v538_v50  ;;  %v555_v50 = vld [vmem:[%s10992_s17 + $0x7a8] sm:$0xff]  ;;  %v687_v61 = vpack.c.bf16 %v553_v46, %v552_v45 }
  0xac   : > { %9142 = vmatprep.mubr.msk.bf16.mxu0 %vm713_vm2, %v604_v56  ;;  %v408_v56 = vld [vmem:[%s10992_s17 + $0x310] sm:$0xff] }
  0xb0   : > { %9271 = vmatmul.mubr.msk.bf16.gmra.mrb[76].mxu1 %vm713_vm2, %v669_v57  ;;  %v409_v57 = vld [vmem:[%s10992_s17 + $0x318] sm:$0xff] }
  0xb1   : > { %9274 = vmatprep.mubr.msk.bf16.mxu1 %vm713_vm2, %v670_v58  ;;  %v410_v58 = vld [vmem:[%s10992_s17 + $0x320] sm:$0xff]  ;;  %v615_v0 = vpack.c.bf16 %v409_v57, %v408_v56 }
  0xb2   : > { %v616_v1 = vpack.c.bf16 %v411_v59, %v410_v58 }
  0xb3   : > { %9143 = vmatmul.mubr.msk.bf16.gmra.mrb[76].mxu0 %vm713_vm2, %v605_v3  ;;  %v682_v3 = vpack.c.bf16 %v543_v63, %v542_v62 }
  0xb4   : > { %9146 = vmatprep.mubr.msk.bf16.mxu0 %vm713_vm2, %v606_v4  ;;  %v412_v4 = vld [vmem:[%s10992_s17 + $0x330] sm:$0xff] }
  0xb8   : > { %9275 = vmatmul.mubr.msk.bf16.gmra.mrb[80].mxu1 %vm713_vm2, %v671_v5  ;;  %v413_v5 = vld [vmem:[%s10992_s17 + $0x338] sm:$0xff] }
  0xb9   : > { %9278 = vmatprep.mubr.msk.bf16.mxu1 %vm713_vm2, %v672_v6  ;;  %v414_v6 = vld [vmem:[%s10992_s17 + $0x340] sm:$0xff]  ;;  %v617_v12 = vpack.c.bf16 %v413_v5, %v412_v4 }
  0xba   : > { %v618_v13 = vpack.c.bf16 %v415_v7, %v414_v6 }
  0xbb   : > { %9147 = vmatmul.mubr.msk.bf16.gmra.mrb[80].mxu0 %vm713_vm2, %v607_v15  ;;  %v684_v15 = vpack.c.bf16 %v547_v11, %v546_v10  ;;  %v424_v11 = vld [vmem:[%s10992_s17 + $0x390] sm:$0xff] }
  0xbc   : > { %9150 = vmatprep.mubr.msk.bf16.mxu0 %vm713_vm2, %v608_v16  ;;  %v416_v16 = vld [vmem:[%s10992_s17 + $0x350] sm:$0xff] }
  0xbd   : > { %v619_v25 = vpack.c.bf16 %v417_v17, %v416_v16  ;;  %v426_v16 = vld [vmem:[%s10992_s17 + $0x3a0] sm:$0xff]  ;;  %v427_v17 = vld [vmem:[%s10992_s17 + $0x3a8] sm:$0xff] }
  0xc0   : > { %9279 = vmatmul.mubr.msk.bf16.gmra.mrb[84].mxu1 %vm713_vm2, %v673_v18  ;;  %v418_v18 = vld [vmem:[%s10992_s17 + $0x360] sm:$0xff] }
  0xc1   : > { %9282 = vmatprep.mubr.msk.bf16.mxu1 %vm713_vm2, %v674_v19  ;;  %v419_v19 = vld [vmem:[%s10992_s17 + $0x368] sm:$0xff] }
  0xc2   : > { %v620_v27 = vpack.c.bf16 %v419_v19, %v418_v18 }
  0xc3   : > { %9151 = vmatmul.mubr.msk.bf16.gmra.mrb[84].mxu0 %vm713_vm2, %v609_v28 }
  0xc4   : > { %9154 = vmatprep.mubr.msk.bf16.mxu0 %vm713_vm2, %v610_v29 }
  0xc8   : > { %9283 = vmatmul.mubr.msk.bf16.gmra.mrb[88].mxu1 %vm713_vm2, %v675_v30  ;;  %v685_v30 = vpack.c.bf16 %v549_v22, %v548_v21  ;;  %v556_v21 = vld [vmem:[%s10992_s17 + $0x7b0] sm:$0xff]  ;;  %v557_v22 = vld [vmem:[%s10992_s17 + $0x7b8] sm:$0xff] }
  0xc9   : > { %9286 = vmatprep.mubr.msk.bf16.mxu1 %vm713_vm2, %v676_v31 }
  0xcb   : > { %9155 = vmatmul.mubr.msk.bf16.gmra.mrb[88].mxu0 %vm713_vm2, %v611_v40 }
  0xcc   : > { %9158 = vmatprep.mubr.msk.bf16.mxu0 %vm713_vm2, %v612_v41  ;;  %v422_v41 = vld [vmem:[%s10992_s17 + $0x380] sm:$0xff] }
  0xd0   : > { %9287 = vmatmul.mubr.msk.bf16.gmra.mrb[92].mxu1 %vm713_vm2, %v677_v42  ;;  %v423_v42 = vld [vmem:[%s10992_s17 + $0x388] sm:$0xff] }
  0xd1   : > { %9290 = vmatprep.mubr.msk.bf16.mxu1 %vm713_vm2, %v678_v43  ;;  %v622_v58 = vpack.c.bf16 %v423_v42, %v422_v41 }
  0xd3   : > { %9159 = vmatmul.mubr.msk.bf16.gmra.mrb[92].mxu0 %vm713_vm2, %v613_v52 }
  0xd4   : > { %9162 = vmatprep.mubr.msk.bf16.mxu0 %vm713_vm2, %v614_v53  ;;  %v621_v53 = vpack.c.bf16 %v421_v38, %v420_v37 }
  0xd8   : > { %9291 = vmatmul.mubr.msk.bf16.gmra.mrb[96].mxu1 %vm713_vm2, %v679_v54 }
  0xd9   : > { %9294 = vmatprep.mubr.msk.bf16.mxu1 %vm713_vm2, %v680_v55 }
  0xdb   : > { %9163 = vmatmul.mubr.msk.bf16.gmra.mrb[96].mxu0 %vm713_vm2, %v615_v0 }
  0xdc   : > { %9166 = vmatprep.mubr.msk.bf16.mxu0 %vm713_vm2, %v616_v1 }
  0xe0   : > { %9295 = vmatmul.mubr.msk.bf16.gmra.mrb[100].mxu1 %vm713_vm2, %v681_v2 }
  0xe1   : > { %9298 = vmatprep.mubr.msk.bf16.mxu1 %vm713_vm2, %v682_v3  ;;  %v688_v3 = vpack.c.bf16 %v555_v50, %v554_v49 }
  0xe3   : > { %9167 = vmatmul.mubr.msk.bf16.gmra.mrb[100].mxu0 %vm713_vm2, %v617_v12  ;;  %v425_v12 = vld [vmem:[%s10992_s17 + $0x398] sm:$0xff] }
  0xe4   : > { %9170 = vmatprep.mubr.msk.bf16.mxu0 %vm713_vm2, %v618_v13 }
  0xe8   : > { %9299 = vmatmul.mubr.msk.bf16.gmra.mrb[104].mxu1 %vm713_vm2, %v683_v14 }
  0xe9   : > { %9302 = vmatprep.mubr.msk.bf16.mxu1 %vm713_vm2, %v684_v15 }
  0xeb   : > { %v9196_v26 = vpop.f32.mrb[0].mxu1  ;;  %9171 = vmatmul.mubr.msk.bf16.gmra.mrb[104].mxu0 %vm713_vm2, %v619_v25 }
  0xec   : > { %v1660_v28 = vadd.f32 %v9196_v26, %v11339_v20  ;;  %v1651_v29 = vpop.f32.mrb[1].mxu1  ;;  %9174 = vmatprep.mubr.msk.bf16.mxu0 %vm713_vm2, %v620_v27  ;;  %v558_v26 = vld [vmem:[%s10992_s17 + $0x7c0] sm:$0xff]  ;;  %v559_v27 = vld [vmem:[%s10992_s17 + $0x7c8] sm:$0xff] }
  0xed   : > { %v1652_v31 = vadd.f32 %v11339_v20, %v1651_v29  ;;  %v9197_v32 = vpop.f32.mrb[2].mxu1  ;;  %v690_v45 = vpack.c.bf16 %v559_v27, %v558_v26 }
  0xee   : > { %v1663_v34 = vadd.f32 %v9197_v32, %v11339_v20  ;;  %v1654_v35 = vpop.f32.mrb[3].mxu1  ;;  %v2292_v39 = vmax.f32 %v1660_v28, 0.0  ;;  %v9068_v47 = vpop.f32.mrb[0].mxu0 }
  0xef   : > { %v1655_v36 = vadd.f32 %v11339_v20, %v1654_v35  ;;  %v2290_v43 = vmax.f32 %v1652_v31, 0.0  ;;  %v1148_v51 = vadd.f32 %v9068_v47, %v11339_v20  ;;  %v1139_v52 = vpop.f32.mrb[1].mxu0  ;;  %v624_v35 = vpack.c.bf16 %v427_v17, %v426_v16 }
  0xf0   : > { %v2293_v40 = vmax.f32 %v1663_v34, 0.0  ;;  %9303 = vmatmul.mubr.msk.bf16.gmra.mrb[108].mxu1 %vm713_vm2, %v685_v30  ;;  %v1140_v56 = vadd.f32 %v11339_v20, %v1139_v52  ;;  %v9069_v57 = vpop.f32.mrb[2].mxu0  ;;  %v623_v30 = vpack.c.bf16 %v425_v12, %v424_v11 }
  0xf1   : > { %v2291_v44 = vmax.f32 %v1655_v36, 0.0  ;;  %9306 = vmatprep.mubr.msk.bf16.mxu1 %vm713_vm2, %v686_v33  ;;  %v2164_v62 = vmax.f32 %v1148_v51, 0.0  ;;  %v1151_v63 = vadd.f32 %v9069_v57, %v11339_v20  ;;  %v1142_v0 = vpop.f32.mrb[3].mxu0  ;;  %v9871_v36 = vld [vmem:[%s14108_s5 + $0x10] sm:$0xff]  }
  0xf2   : > { %v11360_v48 = vpack.c.bf16 %v2293_v40, %v2292_v39  ;;  %v2162_v4 = vmax.f32 %v1140_v56, 0.0  ;;  %v1143_v5 = vadd.f32 %v11339_v20, %v1142_v0  ;;  %v689_v39 = vpack.c.bf16 %v557_v22, %v556_v21  ;;  %9590 = vmatprep.subr.bf16.mxu0 %v9871_v36  ;;  %v429_v56 = vld [vmem:[%s10992_s17 + $0x3b8] sm:$0xff]  ;;  %v560_v0 = vld [vmem:[%s10992_s17 + $0x7d0] sm:$0xff] }
  0xf3   : > { %v11365_v54 = vpack.c.bf16 %v2291_v44, %v2290_v43  ;;  %v9200_v55 = vpop.f32.mrb[4].mxu1  ;;  %v2165_v8 = vmax.f32 %v1151_v63, 0.0  ;;  %9175 = vmatmul.mubr.msk.bf16.gmra.mrb[108].mxu0 %vm713_vm2, %v621_v53 }
  0xf4   : > { %v1676_v59 = vadd.f32 %v9200_v55, %v11339_v20  ;;  %v1667_v60 = vpop.f32.mrb[5].mxu1  ;;  %v2163_v10 = vmax.f32 %v1143_v5, 0.0  ;;  %9178 = vmatprep.mubr.msk.bf16.mxu0 %vm713_vm2, %v622_v58  ;;  %v428_v55 = vld [vmem:[%s10992_s17 + $0x3b0] sm:$0xff]  ;;  %9591 = vmatpush3.bf16.msra.mxu0 %v9871_v36  ;;  %v562_v5 = vld [vmem:[%s10992_s17 + $0x7e0] sm:$0xff] }
  0xf5   : > { %v1668_v1 = vadd.f32 %v11339_v20, %v1667_v60  ;;  %v9201_v2 = vpop.f32.mrb[6].mxu1  ;;  %v11379_v15 = vpack.c.bf16 %v2165_v8, %v2164_v62  ;;  %v430_v60 = vld [vmem:[%s10992_s17 + $0x3c0] sm:$0xff]  ;;  %v432_v36 = vld [vmem:[%s10992_s17 + $0x3d0] sm:$0xff] }
  0xf6   : > { %v1679_v6 = vadd.f32 %v9201_v2, %v11339_v20  ;;  %v1670_v7 = vpop.f32.mrb[7].mxu1  ;;  %v2296_v13 = vmax.f32 %v1676_v59, 0.0  ;;  %v11386_v23 = vpack.c.bf16 %v2163_v10, %v2162_v4  ;;  %v9072_v24 = vpop.f32.mrb[4].mxu0 }
  0xf7   : > { %v1671_v9 = vadd.f32 %v11339_v20, %v1670_v7  ;;  %v2294_v18 = vmax.f32 %v1668_v1, 0.0  ;;  %v1164_v28 = vadd.f32 %v9072_v24, %v11339_v20  ;;  %v1155_v29 = vpop.f32.mrb[5].mxu0  ;;  %v561_v1 = vld [vmem:[%s10992_s17 + $0x7d8] sm:$0xff] }
  0xf8   : > { %v2297_v14 = vmax.f32 %v1679_v6, 0.0  ;;  %9307 = vmatmul.mubr.msk.bf16.gmra.mrb[112].mxu1 %vm713_vm2, %v687_v61  ;;  %v1156_v33 = vadd.f32 %v11339_v20, %v1155_v29  ;;  %v9073_v34 = vpop.f32.mrb[6].mxu0  ;;  %v431_v61 = vld [vmem:[%s10992_s17 + $0x3c8] sm:$0xff] }
  0xf9   : > { %v2295_v19 = vmax.f32 %v1671_v9, 0.0  ;;  %9310 = vmatprep.mubr.msk.bf16.mxu1 %vm713_vm2, %v688_v3  ;;  %v2168_v40 = vmax.f32 %v1164_v28, 0.0  ;;  %v1167_v41 = vadd.f32 %v9073_v34, %v11339_v20  ;;  %v1158_v42 = vpop.f32.mrb[7].mxu0  ;;  %v563_v6 = vld [vmem:[%s10992_s17 + $0x7e8] sm:$0xff]  ;;  %v625_v9 = vpack.c.bf16 %v429_v56, %v428_v55 }
  0xfa   : > { %v11388_v25 = vpack.c.bf16 %v2297_v14, %v2296_v13  ;;  %v2166_v46 = vmax.f32 %v1156_v33, 0.0  ;;  %v1159_v47 = vadd.f32 %v11339_v20, %v1158_v42  ;;  %v626_v14 = vpack.c.bf16 %v431_v61, %v430_v60  ;;  %v435_v42 = vld [vmem:[%s10992_s17 + $0x3e8] sm:$0xff] }
  0xfb   : > { %v11393_v31 = vpack.c.bf16 %v2295_v19, %v2294_v18  ;;  %v9204_v32 = vpop.f32.mrb[8].mxu1  ;;  %v2169_v51 = vmax.f32 %v1167_v41, 0.0  ;;  %9179 = vmatmul.mubr.msk.bf16.gmra.mrb[112].mxu0 %vm713_vm2, %v623_v30  ;;  %v691_v18 = vpack.c.bf16 %v561_v1, %v560_v0  ;;  %v692_v27 = vpack.c.bf16 %v563_v6, %v562_v5  ;;  %v434_v41 = vld [vmem:[%s10992_s17 + $0x3e0] sm:$0xff] }
  0xfc   : > { %v1692_v37 = vadd.f32 %v9204_v32, %v11339_v20  ;;  %v1683_v38 = vpop.f32.mrb[9].mxu1  ;;  %v2167_v53 = vmax.f32 %v1159_v47, 0.0  ;;  %9182 = vmatprep.mubr.msk.bf16.mxu0 %vm713_vm2, %v624_v35  ;;  %v628_v60 = vpack.c.bf16 %v435_v42, %v434_v41 }
  0xfd   : > { %v1684_v43 = vadd.f32 %v11339_v20, %v1683_v38  ;;  %v9205_v44 = vpop.f32.mrb[10].mxu1  ;;  %v11410_v59 = vpack.c.bf16 %v2169_v51, %v2168_v40 }
  0xfe   : > { %v1695_v49 = vadd.f32 %v9205_v44, %v11339_v20  ;;  %v1686_v50 = vpop.f32.mrb[11].mxu1  ;;  %v2300_v57 = vmax.f32 %v1692_v37, 0.0  ;;  %v11417_v2 = vpack.c.bf16 %v2167_v53, %v2166_v46  ;;  %v9076_v3 = vpop.f32.mrb[8].mxu0  ;;  %v433_v37 = vld [vmem:[%s10992_s17 + $0x3d8] sm:$0xff] }
  0xff   : > { %v1687_v52 = vadd.f32 %v11339_v20, %v1686_v50  ;;  %v2298_v62 = vmax.f32 %v1684_v43, 0.0  ;;  %v1180_v7 = vadd.f32 %v9076_v3, %v11339_v20  ;;  %v1171_v8 = vpop.f32.mrb[9].mxu0  ;;  %v565_v46 = vld [vmem:[%s10992_s17 + $0x7f8] sm:$0xff]  ;;  %v627_v53 = vpack.c.bf16 %v433_v37, %v432_v36 }
 0x100   : > { %v2301_v58 = vmax.f32 %v1695_v49, 0.0  ;;  %9311 = vmatmul.mubr.msk.bf16.gmra.mrb[116].mxu1 %vm713_vm2, %v689_v39  ;;  %v1172_v12 = vadd.f32 %v11339_v20, %v1171_v8  ;;  %v9077_v13 = vpop.f32.mrb[10].mxu0 }
 0x101   : > { %v2299_v63 = vmax.f32 %v1687_v52, 0.0  ;;  %9314 = vmatprep.mubr.msk.bf16.mxu1 %vm713_vm2, %v690_v45  ;;  %v2172_v19 = vmax.f32 %v1180_v7, 0.0  ;;  %v1183_v21 = vadd.f32 %v9077_v13, %v11339_v20  ;;  %v1174_v22 = vpop.f32.mrb[11].mxu0  ;;  %v564_v45 = vld [vmem:[%s10992_s17 + $0x7f0] sm:$0xff] }
 0x102   : > { %v11419_v4 = vpack.c.bf16 %v2301_v58, %v2300_v57  ;;  %v2170_v28 = vmax.f32 %v1172_v12, 0.0  ;;  %v1175_v29 = vadd.f32 %v11339_v20, %v1174_v22 }
 0x103   : > { %v11424_v10 = vpack.c.bf16 %v2299_v63, %v2298_v62  ;;  %v9208_v11 = vpop.f32.mrb[12].mxu1  ;;  %v2173_v33 = vmax.f32 %v1183_v21, 0.0  ;;  %9183 = vmatmul.mubr.msk.bf16.gmra.mrb[116].mxu0 %vm713_vm2, %v625_v9  ;;  %v693_v63 = vpack.c.bf16 %v565_v46, %v564_v45 }
 0x104   : > { %v1708_v16 = vadd.f32 %v9208_v11, %v11339_v20  ;;  %v1699_v17 = vpop.f32.mrb[13].mxu1  ;;  %v2171_v35 = vmax.f32 %v1175_v29, 0.0  ;;  %9186 = vmatprep.mubr.msk.bf16.mxu0 %vm713_vm2, %v626_v14 }
 0x105   : > { %v1700_v24 = vadd.f32 %v11339_v20, %v1699_v17  ;;  %v9209_v26 = vpop.f32.mrb[14].mxu1  ;;  %v11438_v40 = vpack.c.bf16 %v2173_v33, %v2172_v19  ;;  %v437_v17 = vld [vmem:[%s10992_s17 + $0x3f8] sm:$0xff] }
 0x106   : > { %v1711_v30 = vadd.f32 %v9209_v26, %v11339_v20  ;;  %v1702_v32 = vpop.f32.mrb[15].mxu1  ;;  %v2304_v38 = vmax.f32 %v1708_v16, 0.0  ;;  %v11445_v47 = vpack.c.bf16 %v2171_v35, %v2170_v28  ;;  %v9080_v49 = vpop.f32.mrb[12].mxu0  ;;  %v436_v16 = vld [vmem:[%s10992_s17 + $0x3f0] sm:$0xff] }
 0x107   : > { %v1703_v34 = vadd.f32 %v11339_v20, %v1702_v32  ;;  %v2302_v43 = vmax.f32 %v1700_v24, 0.0  ;;  %v1196_v51 = vadd.f32 %v9080_v49, %v11339_v20  ;;  %v1187_v52 = vpop.f32.mrb[13].mxu0  ;;  %v629_v32 = vpack.c.bf16 %v437_v17, %v436_v16 }
 0x108   : > { %v2305_v39 = vmax.f32 %v1711_v30, 0.0  ;;  %9315 = vmatmul.mubr.msk.bf16.gmra.mrb[120].mxu1 %vm713_vm2, %v691_v18  ;;  %v1188_v57 = vadd.f32 %v11339_v20, %v1187_v52  ;;  %v9081_v58 = vpop.f32.mrb[14].mxu0 }
 0x109   : > { %v2303_v44 = vmax.f32 %v1703_v34, 0.0  ;;  %9318 = vmatprep.mubr.msk.bf16.mxu1 %vm713_vm2, %v692_v27  ;;  %v2176_v0 = vmax.f32 %v1196_v51, 0.0  ;;  %v1199_v1 = vadd.f32 %v9081_v58, %v11339_v20  ;;  %v1190_v3 = vpop.f32.mrb[15].mxu0 }
 0x10a   : > { %v11447_v50 = vpack.c.bf16 %v2305_v39, %v2304_v38  ;;  %v2174_v7 = vmax.f32 %v1188_v57, 0.0  ;;  %v1191_v8 = vadd.f32 %v11339_v20, %v1190_v3 }
 0x10b   : > { %v11450_v55 = vpack.c.bf16 %v2303_v44, %v2302_v43  ;;  %v9212_v56 = vpop.f32.mrb[16].mxu1  ;;  %v2177_v12 = vmax.f32 %v1199_v1, 0.0  ;;  %9187 = vmatmul.mubr.msk.bf16.gmra.mrb[120].mxu0 %vm713_vm2, %v627_v53 }
 0x10c   : > { %v1724_v61 = vadd.f32 %v9212_v56, %v11339_v20  ;;  %v1715_v62 = vpop.f32.mrb[17].mxu1  ;;  %v2175_v14 = vmax.f32 %v1191_v8, 0.0  ;;  %9190 = vmatprep.mubr.msk.bf16.mxu0 %vm713_vm2, %v628_v60 }
 0x10d   : > { %v1716_v5 = vadd.f32 %v11339_v20, %v1715_v62  ;;  %v9213_v6 = vpop.f32.mrb[18].mxu1  ;;  %v11464_v21 = vpack.c.bf16 %v2177_v12, %v2176_v0 }
 0x10e   : > { %v1727_v9 = vadd.f32 %v9213_v6, %v11339_v20  ;;  %v1718_v11 = vpop.f32.mrb[19].mxu1  ;;  %v2308_v18 = vmax.f32 %v1724_v61, 0.0  ;;  %v11468_v26 = vpack.c.bf16 %v2175_v14, %v2174_v7  ;;  %v9084_v27 = vpop.f32.mrb[16].mxu0 }
 0x10f   : > { %v1719_v13 = vadd.f32 %v11339_v20, %v1718_v11  ;;  %v2306_v22 = vmax.f32 %v1716_v5, 0.0  ;;  %v1212_v29 = vadd.f32 %v9084_v27, %v11339_v20  ;;  %v1203_v30 = vpop.f32.mrb[17].mxu0 }
 0x110   : > { %v2309_v19 = vmax.f32 %v1727_v9, 0.0  ;;  %9319 = vmatmul.mubr.msk.bf16.gmra.mrb[124].mxu1 %vm713_vm2, %v693_v63  ;;  %v1204_v35 = vadd.f32 %v11339_v20, %v1203_v30  ;;  %v9085_v36 = vpop.f32.mrb[18].mxu0 }
 0x111   : > { %v2307_v24 = vmax.f32 %v1719_v13, 0.0  ;;  %9330 = vmatprep.mubr.msk.bf16.mxu1 %vm2585_vm3, %v11386_v23  ;;  %v2180_v39 = vmax.f32 %v1212_v29, 0.0  ;;  %v1215_v23 = vadd.f32 %v9085_v36, %v11339_v20  ;;  %v1206_v41 = vpop.f32.mrb[19].mxu0 }
 0x112   : > { %v11470_v28 = vpack.c.bf16 %v2309_v19, %v2308_v18  ;;  %v2178_v44 = vmax.f32 %v1204_v35, 0.0  ;;  %v1207_v45 = vadd.f32 %v11339_v20, %v1206_v41 }
 0x113   : > { %v11473_v33 = vpack.c.bf16 %v2307_v24, %v2306_v22  ;;  %v9216_v34 = vpop.f32.mrb[20].mxu1  ;;  %v2181_v51 = vmax.f32 %v1215_v23, 0.0  ;;  %9191 = vmatmul.mubr.msk.bf16.gmra.mrb[124].mxu0 %vm713_vm2, %v629_v32 }
 0x114   : > { %v1740_v37 = vadd.f32 %v9216_v34, %v11339_v20  ;;  %v1731_v38 = vpop.f32.mrb[21].mxu1  ;;  %v2179_v53 = vmax.f32 %v1207_v45, 0.0 }
 0x115   : > { %v1732_v42 = vadd.f32 %v11339_v20, %v1731_v38  ;;  %v9217_v43 = vpop.f32.mrb[22].mxu1  ;;  %v11485_v58 = vpack.c.bf16 %v2181_v51, %v2180_v39 }
 0x116   : > { %v1743_v46 = vadd.f32 %v9217_v43, %v11339_v20  ;;  %v1734_v49 = vpop.f32.mrb[23].mxu1  ;;  %v2312_v56 = vmax.f32 %v1740_v37, 0.0  ;;  %v11489_v62 = vpack.c.bf16 %v2179_v53, %v2178_v44  ;;  %v9088_v63 = vpop.f32.mrb[20].mxu0 }
 0x117   : > { %v1735_v52 = vadd.f32 %v11339_v20, %v1734_v49  ;;  %v2310_v60 = vmax.f32 %v1732_v42, 0.0  ;;  %v1228_v1 = vadd.f32 %v9088_v63, %v11339_v20  ;;  %v1219_v3 = vpop.f32.mrb[21].mxu0 }
 0x118   : > { %v2313_v57 = vmax.f32 %v1743_v46, 0.0  ;;  %9331 = vmatmul.mubr.msk.bf16.vlgmr.msra.gmra.mrb[128].mxu1 %vm2585_vm3, %v11379_v15  ;;  %v1220_v15 = vadd.f32 %v11339_v20, %v1219_v3  ;;  %v9089_v7 = vpop.f32.mrb[22].mxu0 }
 0x119   : > { %v2311_v61 = vmax.f32 %v1735_v52, 0.0  ;;  %9334 = vmatprep.mubr.msk.bf16.mxu1 %vm2585_vm3, %v11417_v2  ;;  %v2184_v11 = vmax.f32 %v1228_v1, 0.0  ;;  %v1231_v2 = vadd.f32 %v9089_v7, %v11339_v20  ;;  %v1222_v12 = vpop.f32.mrb[23].mxu0 }
 0x11a   : > { %v11491_v0 = vpack.c.bf16 %v2313_v57, %v2312_v56  ;;  %v2182_v16 = vmax.f32 %v1220_v15, 0.0  ;;  %v1223_v17 = vadd.f32 %v11339_v20, %v1222_v12 }
 0x11b   : > { %v11494_v5 = vpack.c.bf16 %v2311_v61, %v2310_v60  ;;  %v9220_v6 = vpop.f32.mrb[24].mxu1  ;;  %v2185_v22 = vmax.f32 %v1231_v2, 0.0 }
 0x11c   : > { %v1756_v8 = vadd.f32 %v9220_v6, %v11339_v20  ;;  %v1747_v9 = vpop.f32.mrb[25].mxu1  ;;  %v2183_v27 = vmax.f32 %v1223_v17, 0.0 }
 0x11d   : > { %v1748_v13 = vadd.f32 %v11339_v20, %v1747_v9  ;;  %v9221_v14 = vpop.f32.mrb[26].mxu1  ;;  %v11505_v32 = vpack.c.bf16 %v2185_v22, %v2184_v11 }
 0x11e   : > { %v1759_v18 = vadd.f32 %v9221_v14, %v11339_v20  ;;  %v1750_v19 = vpop.f32.mrb[27].mxu1  ;;  %v2316_v29 = vmax.f32 %v1756_v8, 0.0  ;;  %v11509_v36 = vpack.c.bf16 %v2183_v27, %v2182_v16  ;;  %v9092_v37 = vpop.f32.mrb[24].mxu0 }
 0x11f   : > { %v1751_v24 = vadd.f32 %v11339_v20, %v1750_v19  ;;  %v2314_v34 = vmax.f32 %v1748_v13, 0.0  ;;  %v1244_v39 = vadd.f32 %v9092_v37, %v11339_v20  ;;  %v1235_v23 = vpop.f32.mrb[25].mxu0 }
 0x120   : > { %v2317_v30 = vmax.f32 %v1759_v18, 0.0  ;;  %9335 = vmatmul.mubr.msk.bf16.gmra.mrb[132].mxu1 %vm2585_vm3, %v11410_v59  ;;  %v1236_v59 = vadd.f32 %v11339_v20, %v1235_v23  ;;  %v9093_v43 = vpop.f32.mrb[26].mxu0 }
 0x121   : > { %v2315_v35 = vmax.f32 %v1751_v24, 0.0  ;;  %9338 = vmatprep.mubr.msk.bf16.mxu1 %vm2585_vm3, %v11445_v47  ;;  %v2188_v46 = vmax.f32 %v1244_v39, 0.0  ;;  %v1247_v47 = vadd.f32 %v9093_v43, %v11339_v20  ;;  %v1238_v49 = vpop.f32.mrb[27].mxu0 }
 0x122   : > { %v11511_v38 = vpack.c.bf16 %v2317_v30, %v2316_v29  ;;  %v2186_v53 = vmax.f32 %v1236_v59, 0.0  ;;  %v1239_v56 = vadd.f32 %v11339_v20, %v1238_v49 }
 0x123   : > { %v11514_v41 = vpack.c.bf16 %v2315_v35, %v2314_v34  ;;  %v9224_v42 = vpop.f32.mrb[28].mxu1  ;;  %v2189_v61 = vmax.f32 %v1247_v47, 0.0 }
 0x124   : > { %v1772_v44 = vadd.f32 %v9224_v42, %v11339_v20  ;;  %v1763_v45 = vpop.f32.mrb[29].mxu1  ;;  %v2187_v1 = vmax.f32 %v1239_v56, 0.0 }
 0x125   : > { %v1764_v51 = vadd.f32 %v11339_v20, %v1763_v45  ;;  %v9225_v52 = vpop.f32.mrb[30].mxu1  ;;  %v11525_v15 = vpack.c.bf16 %v2189_v61, %v2188_v46 }
 0x126   : > { %v1775_v57 = vadd.f32 %v9225_v52, %v11339_v20  ;;  %v1766_v60 = vpop.f32.mrb[31].mxu1  ;;  %v2320_v3 = vmax.f32 %v1772_v44, 0.0  ;;  %v11529_v9 = vpack.c.bf16 %v2187_v1, %v2186_v53  ;;  %v9096_v11 = vpop.f32.mrb[28].mxu0 }
 0x127   : > { %v1767_v63 = vadd.f32 %v11339_v20, %v1766_v60  ;;  %v2318_v7 = vmax.f32 %v1764_v51, 0.0  ;;  %v1260_v12 = vadd.f32 %v9096_v11, %v11339_v20  ;;  %v1251_v13 = vpop.f32.mrb[29].mxu0 }
 0x128   : > { %v2321_v6 = vmax.f32 %v1775_v57, 0.0  ;;  %9339 = vmatmul.mubr.msk.bf16.gmra.mrb[136].mxu1 %vm2585_vm3, %v11438_v40  ;;  %v1252_v40 = vadd.f32 %v11339_v20, %v1251_v13  ;;  %v9097_v17 = vpop.f32.mrb[30].mxu0 }
 0x129   : > { %v2319_v8 = vmax.f32 %v1767_v63, 0.0  ;;  %9342 = vmatprep.mubr.msk.bf16.mxu1 %vm2585_vm3, %v11468_v26  ;;  %v2192_v22 = vmax.f32 %v1260_v12, 0.0  ;;  %v1263_v26 = vadd.f32 %v9097_v17, %v11339_v20  ;;  %v1254_v24 = vpop.f32.mrb[31].mxu0 }
 0x12a   : > { %v11531_v2 = vpack.c.bf16 %v2321_v6, %v2320_v3  ;;  %v2190_v30 = vmax.f32 %v1252_v40, 0.0  ;;  %v1255_v34 = vadd.f32 %v11339_v20, %v1254_v24 }
 0x12b   : > { %v11534_v14 = vpack.c.bf16 %v2319_v8, %v2318_v7  ;;  %v9228_v16 = vpop.f32.mrb[32].mxu1  ;;  %v2193_v39 = vmax.f32 %v1263_v26, 0.0 }
 0x12c   : > { %v1788_v18 = vadd.f32 %v9228_v16, %v11339_v20  ;;  %v1779_v19 = vpop.f32.mrb[33].mxu1  ;;  %v2191_v42 = vmax.f32 %v1255_v34, 0.0 }
 0x12d   : > { %v1780_v27 = vadd.f32 %v11339_v20, %v1779_v19  ;;  %v9229_v29 = vpop.f32.mrb[34].mxu1  ;;  %v11545_v44 = vpack.c.bf16 %v2193_v39, %v2192_v22 }
 0x12e   : > { %v1791_v35 = vadd.f32 %v9229_v29, %v11339_v20  ;;  %v1782_v37 = vpop.f32.mrb[35].mxu1  ;;  %v2324_v59 = vmax.f32 %v1788_v18, 0.0  ;;  %v11549_v47 = vpack.c.bf16 %v2191_v42, %v2190_v30  ;;  %v9100_v49 = vpop.f32.mrb[32].mxu0  ;;  %v9872_v42 = vld [vmem:[%s14108_s5 + $0x18] sm:$0xff]  }
 0x12f   : > { %v1783_v23 = vadd.f32 %v11339_v20, %v1782_v37  ;;  %v2322_v45 = vmax.f32 %v1780_v27, 0.0  ;;  %v1276_v52 = vadd.f32 %v9100_v49, %v11339_v20  ;;  %v1267_v53 = vpop.f32.mrb[33].mxu0  ;;  %9592 = vmatprep.subr.bf16.mxu0 %v9872_v42 }
 0x130   : > { %v2325_v43 = vmax.f32 %v1791_v35, 0.0  ;;  %9343 = vmatmul.mubr.msk.bf16.gmra.mrb[140].mxu1 %vm2585_vm3, %v11464_v21  ;;  %v1268_v21 = vadd.f32 %v11339_v20, %v1267_v53  ;;  %v9101_v60 = vpop.f32.mrb[34].mxu0  ;;  %9593 = vmatpush3.bf16.msra.mxu0 %v9872_v42 }
 0x131   : > { %v2323_v46 = vmax.f32 %v1783_v23, 0.0  ;;  %9346 = vmatprep.mubr.msk.bf16.mxu1 %vm2585_vm3, %v11489_v62  ;;  %v2196_v1 = vmax.f32 %v1276_v52, 0.0  ;;  %v1279_v62 = vadd.f32 %v9101_v60, %v11339_v20  ;;  %v1270_v3 = vpop.f32.mrb[35].mxu0 }
 0x132   : > { %v11551_v51 = vpack.c.bf16 %v2325_v43, %v2324_v59  ;;  %v2194_v8 = vmax.f32 %v1268_v21, 0.0  ;;  %v1271_v11 = vadd.f32 %v11339_v20, %v1270_v3 }
 0x133   : > { %v11554_v56 = vpack.c.bf16 %v2323_v46, %v2322_v45  ;;  %v9232_v57 = vpop.f32.mrb[36].mxu1  ;;  %v2197_v16 = vmax.f32 %v1279_v62, 0.0 }
 0x134   : > { %v1804_v61 = vadd.f32 %v9232_v57, %v11339_v20  ;;  %v1795_v63 = vpop.f32.mrb[37].mxu1  ;;  %v2195_v17 = vmax.f32 %v1271_v11, 0.0 }
 0x135   : > { %v1796_v6 = vadd.f32 %v11339_v20, %v1795_v63  ;;  %v9233_v7 = vpop.f32.mrb[38].mxu1  ;;  %v11565_v22 = vpack.c.bf16 %v2197_v16, %v2196_v1 }
 0x136   : > { %v1807_v12 = vadd.f32 %v9233_v7, %v11339_v20  ;;  %v1798_v13 = vpop.f32.mrb[39].mxu1  ;;  %v2328_v18 = vmax.f32 %v1804_v61, 0.0  ;;  %v11569_v27 = vpack.c.bf16 %v2195_v17, %v2194_v8  ;;  %v9104_v29 = vpop.f32.mrb[36].mxu0 }
 0x137   : > { %v1799_v40 = vadd.f32 %v11339_v20, %v1798_v13  ;;  %v2326_v26 = vmax.f32 %v1796_v6, 0.0  ;;  %v1292_v34 = vadd.f32 %v9104_v29, %v11339_v20  ;;  %v1283_v35 = vpop.f32.mrb[37].mxu0 }
 0x138   : > { %v2329_v19 = vmax.f32 %v1807_v12, 0.0  ;;  %9347 = vmatmul.mubr.msk.bf16.gmra.mrb[144].mxu1 %vm2585_vm3, %v11485_v58  ;;  %v1284_v58 = vadd.f32 %v11339_v20, %v1283_v35  ;;  %v9105_v23 = vpop.f32.mrb[38].mxu0 }
 0x139   : > { %v2327_v24 = vmax.f32 %v1799_v40, 0.0  ;;  %9350 = vmatprep.mubr.msk.bf16.mxu1 %vm2585_vm3, %v11509_v36  ;;  %v2200_v43 = vmax.f32 %v1292_v34, 0.0  ;;  %v1295_v45 = vadd.f32 %v9105_v23, %v11339_v20  ;;  %v1286_v46 = vpop.f32.mrb[39].mxu0 }
 0x13a   : > { %v11571_v30 = vpack.c.bf16 %v2329_v19, %v2328_v18  ;;  %v2198_v53 = vmax.f32 %v1284_v58, 0.0  ;;  %v1287_v57 = vadd.f32 %v11339_v20, %v1286_v46 }
 0x13b   : > { %v11574_v37 = vpack.c.bf16 %v2327_v24, %v2326_v26  ;;  %v9236_v39 = vpop.f32.mrb[40].mxu1  ;;  %v2201_v61 = vmax.f32 %v1295_v45, 0.0 }
 0x13c   : > { %v1820_v36 = vadd.f32 %v9236_v39, %v11339_v20  ;;  %v1811_v59 = vpop.f32.mrb[41].mxu1  ;;  %v2199_v1 = vmax.f32 %v1287_v57, 0.0 }
 0x13d   : > { %v1812_v49 = vadd.f32 %v11339_v20, %v1811_v59  ;;  %v9237_v52 = vpop.f32.mrb[42].mxu1  ;;  %v11588_v6 = vpack.c.bf16 %v2201_v61, %v2200_v43 }
 0x13e   : > { %v1823_v21 = vadd.f32 %v9237_v52, %v11339_v20  ;;  %v1814_v60 = vpop.f32.mrb[43].mxu1  ;;  %v2332_v62 = vmax.f32 %v1820_v36, 0.0  ;;  %v11592_v11 = vpack.c.bf16 %v2199_v1, %v2198_v53  ;;  %v9108_v12 = vpop.f32.mrb[40].mxu0 }
 0x13f   : > { %v1815_v63 = vadd.f32 %v11339_v20, %v1814_v60  ;;  %v2330_v7 = vmax.f32 %v1812_v49, 0.0  ;;  %v1308_v16 = vadd.f32 %v9108_v12, %v11339_v20  ;;  %v1299_v40 = vpop.f32.mrb[41].mxu0 }
 0x140   : > { %v2333_v3 = vmax.f32 %v1823_v21, 0.0  ;;  %9351 = vmatmul.mubr.msk.bf16.gmra.mrb[148].mxu1 %vm2585_vm3, %v11505_v32  ;;  %v1300_v32 = vadd.f32 %v11339_v20, %v1299_v40  ;;  %v9109_v19 = vpop.f32.mrb[42].mxu0 }
 0x141   : > { %v2331_v8 = vmax.f32 %v1815_v63, 0.0  ;;  %9354 = vmatprep.mubr.msk.bf16.mxu1 %vm2585_vm3, %v11529_v9  ;;  %v2204_v29 = vmax.f32 %v1308_v16, 0.0  ;;  %v1311_v9 = vadd.f32 %v9109_v19, %v11339_v20  ;;  %v1302_v34 = vpop.f32.mrb[43].mxu0 }
 0x142   : > { %v11594_v13 = vpack.c.bf16 %v2333_v3, %v2332_v62  ;;  %v2202_v58 = vmax.f32 %v1300_v32, 0.0  ;;  %v1303_v23 = vadd.f32 %v11339_v20, %v1302_v34 }
 0x143   : > { %v11597_v17 = vpack.c.bf16 %v2331_v8, %v2330_v7  ;;  %v9240_v18 = vpop.f32.mrb[44].mxu1  ;;  %v2205_v59 = vmax.f32 %v1311_v9, 0.0 }
 0x144   : > { %v1836_v26 = vadd.f32 %v9240_v18, %v11339_v20  ;;  %v1827_v24 = vpop.f32.mrb[45].mxu1  ;;  %v2203_v45 = vmax.f32 %v1303_v23, 0.0 }
 0x145   : > { %v1828_v35 = vadd.f32 %v11339_v20, %v1827_v24  ;;  %v9241_v39 = vpop.f32.mrb[46].mxu1  ;;  %v11608_v52 = vpack.c.bf16 %v2205_v59, %v2204_v29 }
 0x146   : > { %v1839_v42 = vadd.f32 %v9241_v39, %v11339_v20  ;;  %v1830_v36 = vpop.f32.mrb[47].mxu1  ;;  %v2336_v46 = vmax.f32 %v1836_v26, 0.0  ;;  %v11612_v21 = vpack.c.bf16 %v2203_v45, %v2202_v58  ;;  %v9112_v60 = vpop.f32.mrb[44].mxu0 }
 0x147   : > { %v1831_v43 = vadd.f32 %v11339_v20, %v1830_v36  ;;  %v2334_v53 = vmax.f32 %v1828_v35, 0.0  ;;  %v1324_v63 = vadd.f32 %v9112_v60, %v11339_v20  ;;  %v1315_v1 = vpop.f32.mrb[45].mxu0 }
 0x148   : > { %v2337_v49 = vmax.f32 %v1839_v42, 0.0  ;;  %9355 = vmatmul.mubr.msk.bf16.gmra.mrb[152].mxu1 %vm2585_vm3, %v11525_v15  ;;  %v1316_v15 = vadd.f32 %v11339_v20, %v1315_v1  ;;  %v9113_v7 = vpop.f32.mrb[46].mxu0 }
 0x149   : > { %v2335_v57 = vmax.f32 %v1831_v43, 0.0  ;;  %9358 = vmatprep.mubr.msk.bf16.mxu1 %vm2585_vm3, %v11549_v47  ;;  %v2208_v16 = vmax.f32 %v1324_v63, 0.0  ;;  %v1327_v47 = vadd.f32 %v9113_v7, %v11339_v20  ;;  %v1318_v40 = vpop.f32.mrb[47].mxu0 }
 0x14a   : > { %v11614_v61 = vpack.c.bf16 %v2337_v49, %v2336_v46  ;;  %v2206_v19 = vmax.f32 %v1316_v15, 0.0  ;;  %v1319_v26 = vadd.f32 %v11339_v20, %v1318_v40 }
 0x14b   : > { %v11617_v62 = vpack.c.bf16 %v2335_v57, %v2334_v53  ;;  %v9244_v3 = vpop.f32.mrb[48].mxu1  ;;  %v2209_v9 = vmax.f32 %v1327_v47, 0.0 }
 0x14c   : > { %v1852_v8 = vadd.f32 %v9244_v3, %v11339_v20  ;;  %v1843_v12 = vpop.f32.mrb[49].mxu1  ;;  %v2207_v35 = vmax.f32 %v1319_v26, 0.0 }
 0x14d   : > { %v1844_v18 = vadd.f32 %v11339_v20, %v1843_v12  ;;  %v9245_v32 = vpop.f32.mrb[50].mxu1  ;;  %v11628_v23 = vpack.c.bf16 %v2209_v9, %v2208_v16 }
 0x14e   : > { %v1855_v24 = vadd.f32 %v9245_v32, %v11339_v20  ;;  %v1846_v29 = vpop.f32.mrb[51].mxu1  ;;  %v2340_v39 = vmax.f32 %v1852_v8, 0.0  ;;  %v11632_v59 = vpack.c.bf16 %v2207_v35, %v2206_v19  ;;  %v9116_v43 = vpop.f32.mrb[48].mxu0 }
 0x14f   : > { %v1847_v34 = vadd.f32 %v11339_v20, %v1846_v29  ;;  %v2338_v42 = vmax.f32 %v1844_v18, 0.0  ;;  %v1340_v46 = vadd.f32 %v9116_v43, %v11339_v20  ;;  %v1331_v49 = vpop.f32.mrb[49].mxu0 }
 0x150   : > { %v2341_v58 = vmax.f32 %v1855_v24, 0.0  ;;  %9359 = vmatmul.mubr.msk.bf16.gmra.mrb[156].mxu1 %vm2585_vm3, %v11545_v44  ;;  %v1332_v44 = vadd.f32 %v11339_v20, %v1331_v49  ;;  %v9117_v60 = vpop.f32.mrb[50].mxu0 }
 0x151   : > { %v2339_v36 = vmax.f32 %v1847_v34, 0.0  ;;  %9362 = vmatprep.mubr.msk.bf16.mxu1 %vm2585_vm3, %v11569_v27  ;;  %v2212_v3 = vmax.f32 %v1340_v46, 0.0  ;;  %v1343_v27 = vadd.f32 %v9117_v60, %v11339_v20  ;;  %v1334_v15 = vpop.f32.mrb[51].mxu0 }
 0x152   : > { %v11634_v45 = vpack.c.bf16 %v2341_v58, %v2340_v39  ;;  %v2210_v12 = vmax.f32 %v1332_v44, 0.0  ;;  %v1335_v16 = vadd.f32 %v11339_v20, %v1334_v15 }
 0x153   : > { %v11637_v53 = vpack.c.bf16 %v2339_v36, %v2338_v42  ;;  %v9248_v57 = vpop.f32.mrb[52].mxu1  ;;  %v2213_v18 = vmax.f32 %v1343_v27, 0.0 }
 0x154   : > { %v1868_v63 = vadd.f32 %v9248_v57, %v11339_v20  ;;  %v1859_v1 = vpop.f32.mrb[53].mxu1  ;;  %v2211_v19 = vmax.f32 %v1335_v16, 0.0 }
 0x155   : > { %v1860_v7 = vadd.f32 %v11339_v20, %v1859_v1  ;;  %v9249_v8 = vpop.f32.mrb[54].mxu1  ;;  %v11648_v29 = vpack.c.bf16 %v2213_v18, %v2212_v3 }
 0x156   : > { %v1871_v47 = vadd.f32 %v9249_v8, %v11339_v20  ;;  %v1862_v40 = vpop.f32.mrb[55].mxu1  ;;  %v2344_v26 = vmax.f32 %v1868_v63, 0.0  ;;  %v11652_v35 = vpack.c.bf16 %v2211_v19, %v2210_v12  ;;  %v9120_v39 = vpop.f32.mrb[52].mxu0 }
 0x157   : > { %v1863_v32 = vadd.f32 %v11339_v20, %v1862_v40  ;;  %v2342_v9 = vmax.f32 %v1860_v7, 0.0  ;;  %v1356_v42 = vadd.f32 %v9120_v39, %v11339_v20  ;;  %v1347_v36 = vpop.f32.mrb[53].mxu0 }
 0x158   : > { %v2345_v24 = vmax.f32 %v1871_v47, 0.0  ;;  %9363 = vmatmul.mubr.msk.bf16.gmra.mrb[160].mxu1 %vm2585_vm3, %v11565_v22  ;;  %v1348_v22 = vadd.f32 %v11339_v20, %v1347_v36  ;;  %v9121_v49 = vpop.f32.mrb[54].mxu0 }
 0x159   : > { %v2343_v34 = vmax.f32 %v1863_v32, 0.0  ;;  %9366 = vmatprep.mubr.msk.bf16.mxu1 %vm2585_vm3, %v11592_v11  ;;  %v2216_v60 = vmax.f32 %v1356_v42, 0.0  ;;  %v1359_v11 = vadd.f32 %v9121_v49, %v11339_v20  ;;  %v1350_v63 = vpop.f32.mrb[55].mxu0 }
 0x15a   : > { %v11654_v58 = vpack.c.bf16 %v2345_v24, %v2344_v26  ;;  %v2214_v27 = vmax.f32 %v1348_v22, 0.0  ;;  %v1351_v15 = vadd.f32 %v11339_v20, %v1350_v63 }
 0x15b   : > { %v11657_v43 = vpack.c.bf16 %v2343_v34, %v2342_v9  ;;  %v9252_v46 = vpop.f32.mrb[56].mxu1  ;;  %v2217_v12 = vmax.f32 %v1359_v11, 0.0 }
 0x15c   : > { %v1884_v57 = vadd.f32 %v9252_v46, %v11339_v20  ;;  %v1875_v44 = vpop.f32.mrb[57].mxu1  ;;  %v2215_v47 = vmax.f32 %v1351_v15, 0.0 }
 0x15d   : > { %v1876_v1 = vadd.f32 %v11339_v20, %v1875_v44  ;;  %v9253_v3 = vpop.f32.mrb[58].mxu1  ;;  %v11668_v32 = vpack.c.bf16 %v2217_v12, %v2216_v60 }
 0x15e   : > { %v1887_v7 = vadd.f32 %v9253_v3, %v11339_v20  ;;  %v1878_v8 = vpop.f32.mrb[59].mxu1  ;;  %v2348_v40 = vmax.f32 %v1884_v57, 0.0  ;;  %v11672_v24 = vpack.c.bf16 %v2215_v47, %v2214_v27  ;;  %v9124_v9 = vpop.f32.mrb[56].mxu0 }
 0x15f   : > { %v1879_v16 = vadd.f32 %v11339_v20, %v1878_v8  ;;  %v2346_v19 = vmax.f32 %v1876_v1, 0.0  ;;  %v11679_v20 = vld [vmem:[%s14105_s2] ss:$0 sm:$0xff] }
 0x160   : > { %v2349_v18 = vmax.f32 %v1887_v7, 0.0  ;;  %9367 = vmatmul.mubr.msk.bf16.gmra.mrb[164].mxu1 %vm2585_vm3, %v11588_v6  ;;  %v1372_v39 = vadd.f32 %v11679_v20, %v9124_v9  ;;  %v1363_v6 = vpop.f32.mrb[57].mxu0 }
 0x161   : > { %v2347_v26 = vmax.f32 %v1879_v16, 0.0  ;;  %9370 = vmatprep.mubr.msk.bf16.mxu1 %vm2585_vm3, %v11612_v21  ;;  %v1364_v46 = vadd.f32 %v11679_v20, %v1363_v6  ;;  %v9125_v22 = vpop.f32.mrb[58].mxu0 }
 0x162   : > { %v11674_v34 = vpack.c.bf16 %v2349_v18, %v2348_v40  ;;  %v2220_v57 = vmax.f32 %v1372_v39, 0.0  ;;  %v1375_v44 = vadd.f32 %v11679_v20, %v9125_v22  ;;  %v1366_v60 = vpop.f32.mrb[59].mxu0 }
 0x163   : > { %v11682_v42 = vpack.c.bf16 %v2347_v26, %v2346_v19  ;;  %v9256_v36 = vpop.f32.mrb[60].mxu1  ;;  %v2218_v1 = vmax.f32 %v1364_v46, 0.0  ;;  %v1367_v3 = vadd.f32 %v11679_v20, %v1366_v60 }
 0x164   : > { %v1900_v21 = vadd.f32 %v11679_v20, %v9256_v36  ;;  %v1891_v49 = vpop.f32.mrb[61].mxu1  ;;  %v2221_v7 = vmax.f32 %v1375_v44, 0.0 }
 0x165   : > { %v1892_v11 = vadd.f32 %v11679_v20, %v1891_v49  ;;  %v9257_v63 = vpop.f32.mrb[62].mxu1  ;;  %v2219_v12 = vmax.f32 %v1367_v3, 0.0 }
 0x166   : > { %v1903_v27 = vadd.f32 %v11679_v20, %v9257_v63  ;;  %v1894_v15 = vpop.f32.mrb[63].mxu1  ;;  %v2352_v16 = vmax.f32 %v1900_v21, 0.0  ;;  %v11693_v40 = vpack.c.bf16 %v2221_v7, %v2220_v57  ;;  %v9128_v9 = vpop.f32.mrb[60].mxu0 }
 0x167   : > { %v1895_v8 = vadd.f32 %v11679_v20, %v1894_v15  ;;  %v2350_v18 = vmax.f32 %v1892_v11, 0.0  ;;  %v11697_v26 = vpack.c.bf16 %v2219_v12, %v2218_v1  ;;  %v1388_v6 = vadd.f32 %v11679_v20, %v9128_v9  ;;  %v1379_v36 = vpop.f32.mrb[61].mxu0 }
 0x168   : > { %v2353_v47 = vmax.f32 %v1903_v27, 0.0  ;;  %9371 = vmatmul.mubr.msk.bf16.gmra.mrb[168].mxu1 %vm2585_vm3, %v11608_v52  ;;  %v1380_v52 = vadd.f32 %v11679_v20, %v1379_v36  ;;  %v9129_v21 = vpop.f32.mrb[62].mxu0 }
 0x169   : > { %v2351_v19 = vmax.f32 %v1895_v8, 0.0  ;;  %9374 = vmatprep.mubr.msk.bf16.mxu1 %vm2585_vm3, %v11632_v59  ;;  %v2224_v44 = vmax.f32 %v1388_v6, 0.0  ;;  %v1391_v59 = vadd.f32 %v11679_v20, %v9129_v21  ;;  %v1382_v60 = vpop.f32.mrb[63].mxu0 }
 0x16a   : > { %v11699_v39 = vpack.c.bf16 %v2353_v47, %v2352_v16  ;;  %v2222_v1 = vmax.f32 %v1380_v52, 0.0  ;;  %v1383_v3 = vadd.f32 %v11679_v20, %v1382_v60 }
 0x16b   : > { %v11702_v46 = vpack.c.bf16 %v2351_v19, %v2350_v18  ;;  %v9260_v22 = vpop.f32.mrb[64].mxu1  ;;  %v2225_v7 = vmax.f32 %v1391_v59, 0.0 }
 0x16c   : > { %v1916_v49 = vadd.f32 %v11679_v20, %v9260_v22  ;;  %v1907_v57 = vpop.f32.mrb[65].mxu1  ;;  %v2223_v12 = vmax.f32 %v1383_v3, 0.0 }
 0x16d   : > { %v1908_v11 = vadd.f32 %v11679_v20, %v1907_v57  ;;  %v9261_v63 = vpop.f32.mrb[66].mxu1  ;;  %v11713_v18 = vpack.c.bf16 %v2225_v7, %v2224_v44 }
 0x16e   : > { %v1919_v27 = vadd.f32 %v11679_v20, %v9261_v63  ;;  %v1910_v15 = vpop.f32.mrb[67].mxu1  ;;  %v2356_v16 = vmax.f32 %v1916_v49, 0.0  ;;  %v11717_v6 = vpack.c.bf16 %v2223_v12, %v2222_v1  ;;  %v9132_v36 = vpop.f32.mrb[64].mxu0 }
 0x16f   : > { %v1911_v8 = vadd.f32 %v11679_v20, %v1910_v15  ;;  %v2354_v19 = vmax.f32 %v1908_v11, 0.0  ;;  %v1404_v52 = vadd.f32 %v11679_v20, %v9132_v36  ;;  %v1395_v21 = vpop.f32.mrb[65].mxu0 }
 0x170   : > { %v2357_v47 = vmax.f32 %v1919_v27, 0.0  ;;  %9375 = vmatmul.mubr.msk.bf16.gmra.mrb[172].mxu1 %vm2585_vm3, %v11628_v23  ;;  %v1396_v23 = vadd.f32 %v11679_v20, %v1395_v21  ;;  %v9133_v44 = vpop.f32.mrb[66].mxu0 }
 0x171   : > { %v2355_v9 = vmax.f32 %v1911_v8, 0.0  ;;  %9378 = vmatprep.mubr.msk.bf16.mxu1 %vm2585_vm3, %v11652_v35  ;;  %v2228_v11 = vmax.f32 %v1404_v52, 0.0  ;;  %v1407_v35 = vadd.f32 %v11679_v20, %v9133_v44  ;;  %v1398_v63 = vpop.f32.mrb[67].mxu0 }
 0x172   : > { %v11719_v22 = vpack.c.bf16 %v2357_v47, %v2356_v16  ;;  %v2226_v27 = vmax.f32 %v1396_v23, 0.0  ;;  %v1399_v15 = vadd.f32 %v11679_v20, %v1398_v63 }
 0x173   : > { %v11722_v49 = vpack.c.bf16 %v2355_v9, %v2354_v19  ;;  %v9264_v57 = vpop.f32.mrb[68].mxu1  ;;  %v2229_v12 = vmax.f32 %v1407_v35, 0.0 }
 0x174   : > { %v1932_v59 = vadd.f32 %v11679_v20, %v9264_v57  ;;  %v1923_v60 = vpop.f32.mrb[69].mxu1  ;;  %v2227_v47 = vmax.f32 %v1399_v15, 0.0 }
 0x175   : > { %v1924_v1 = vadd.f32 %v11679_v20, %v1923_v60  ;;  %v9265_v3 = vpop.f32.mrb[70].mxu1  ;;  %v11733_v36 = vpack.c.bf16 %v2229_v12, %v2228_v11 }
 0x176   : > { %v1935_v7 = vadd.f32 %v11679_v20, %v9265_v3  ;;  %v1926_v8 = vpop.f32.mrb[71].mxu1  ;;  %v2360_v19 = vmax.f32 %v1932_v59, 0.0  ;;  %v11737_v57 = vpack.c.bf16 %v2227_v47, %v2226_v27  ;;  %v9136_v23 = vpop.f32.mrb[68].mxu0 }
 0x177   : > { %v1927_v16 = vadd.f32 %v11679_v20, %v1926_v8  ;;  %v2358_v52 = vmax.f32 %v1924_v1, 0.0  ;;  %v1420_v60 = vadd.f32 %v11679_v20, %v9136_v23  ;;  %v1411_v35 = vpop.f32.mrb[69].mxu0 }
 0x178   : > { %v2361_v9 = vmax.f32 %v1935_v7, 0.0  ;;  %9379 = vmatmul.mubr.msk.bf16.gmra.mrb[176].mxu1 %vm2585_vm3, %v11648_v29  ;;  %v1412_v29 = vadd.f32 %v11679_v20, %v1411_v35  ;;  %v9137_v11 = vpop.f32.mrb[70].mxu0 }
 0x179   : > { %v2359_v21 = vmax.f32 %v1927_v16, 0.0  ;;  %9382 = vmatprep.mubr.msk.bf16.mxu1 %vm2585_vm3, %v11672_v24  ;;  %v2232_v15 = vmax.f32 %v1420_v60, 0.0  ;;  %v1423_v24 = vadd.f32 %v11679_v20, %v9137_v11  ;;  %v1414_v27 = vpop.f32.mrb[71].mxu0 }
 0x17a   : > { %v11739_v44 = vpack.c.bf16 %v2361_v9, %v2360_v19  ;;  %v2230_v12 = vmax.f32 %v1412_v29, 0.0  ;;  %v1415_v16 = vadd.f32 %v11679_v20, %v1414_v27 }
 0x17b   : > { %v11742_v59 = vpack.c.bf16 %v2359_v21, %v2358_v52  ;;  %v9268_v63 = vpop.f32.mrb[72].mxu1  ;;  %v2233_v9 = vmax.f32 %v1423_v24, 0.0 }
 0x17c   : > { %14112 = vst [vmem:[#allocation2_spill] sm:$0xff] %v11739_v44  ;;  %v1948_v1 = vadd.f32 %v11679_v20, %v9268_v63  ;;  %v1939_v3 = vpop.f32.mrb[73].mxu1  ;;  %v2231_v21 = vmax.f32 %v1415_v16, 0.0 }
 0x17d   : > { %v1940_v7 = vadd.f32 %v11679_v20, %v1939_v3  ;;  %v9269_v8 = vpop.f32.mrb[74].mxu1  ;;  %v11753_v60 = vpack.c.bf16 %v2233_v9, %v2232_v15 }
 0x17e   : > { %v1951_v47 = vadd.f32 %v11679_v20, %v9269_v8  ;;  %v1942_v19 = vpop.f32.mrb[75].mxu1  ;;  %v2364_v23 = vmax.f32 %v1948_v1, 0.0  ;;  %v11757_v29 = vpack.c.bf16 %v2231_v21, %v2230_v12  ;;  %v9140_v3 = vpop.f32.mrb[72].mxu0 }
 0x17f   : > { %v1943_v52 = vadd.f32 %v11679_v20, %v1942_v19  ;;  %v2362_v63 = vmax.f32 %v1940_v7, 0.0  ;;  %v1436_v24 = vadd.f32 %v11679_v20, %v9140_v3  ;;  %v1427_v8 = vpop.f32.mrb[73].mxu0 }
 0x180   : > { %v2365_v35 = vmax.f32 %v1951_v47, 0.0  ;;  %9383 = vmatmul.mubr.msk.bf16.gmra.mrb[180].mxu1 %vm2585_vm3, %v11668_v32  ;;  %v1428_v32 = vadd.f32 %v11679_v20, %v1427_v8  ;;  %v9141_v15 = vpop.f32.mrb[74].mxu0 }
 0x181   : > { %v2363_v11 = vmax.f32 %v1943_v52, 0.0  ;;  %9386 = vmatprep.mubr.msk.bf16.mxu1 %vm2585_vm3, %v11697_v26  ;;  %v2236_v19 = vmax.f32 %v1436_v24, 0.0  ;;  %v1439_v26 = vadd.f32 %v11679_v20, %v9141_v15  ;;  %v1430_v12 = vpop.f32.mrb[75].mxu0 }
 0x182   : > { %v11759_v27 = vpack.c.bf16 %v2365_v35, %v2364_v23  ;;  %v2234_v21 = vmax.f32 %v1428_v32, 0.0  ;;  %v1431_v23 = vadd.f32 %v11679_v20, %v1430_v12 }
 0x183   : > { %v11762_v1 = vpack.c.bf16 %v2363_v11, %v2362_v63  ;;  %v9272_v16 = vpop.f32.mrb[76].mxu1  ;;  %v2237_v11 = vmax.f32 %v1439_v26, 0.0 }
 0x184   : > { %14113 = vst [vmem:[#allocation3_spill] sm:$0xff] %v11759_v27  ;;  %v1964_v7 = vadd.f32 %v11679_v20, %v9272_v16  ;;  %v1955_v47 = vpop.f32.mrb[77].mxu1  ;;  %v2235_v8 = vmax.f32 %v1431_v23, 0.0 }
 0x185   : > { %14114 = vst [vmem:[#allocation4_spill] sm:$0xff] %v11762_v1  ;;  %v1956_v9 = vadd.f32 %v11679_v20, %v1955_v47  ;;  %v9273_v52 = vpop.f32.mrb[78].mxu1  ;;  %v11773_v24 = vpack.c.bf16 %v2237_v11, %v2236_v19 }
 0x186   : > { %v1967_v35 = vadd.f32 %v11679_v20, %v9273_v52  ;;  %v1958_v63 = vpop.f32.mrb[79].mxu1  ;;  %v2368_v27 = vmax.f32 %v1964_v7, 0.0  ;;  %v11777_v32 = vpack.c.bf16 %v2235_v8, %v2234_v21  ;;  %v9144_v12 = vpop.f32.mrb[76].mxu0 }
 0x187   : > { %v1959_v3 = vadd.f32 %v11679_v20, %v1958_v63  ;;  %v2366_v15 = vmax.f32 %v1956_v9, 0.0  ;;  %v1452_v26 = vadd.f32 %v11679_v20, %v9144_v12  ;;  %v1443_v23 = vpop.f32.mrb[77].mxu0 }
 0x188   : > { %v2369_v16 = vmax.f32 %v1967_v35, 0.0  ;;  %9387 = vmatmul.mubr.msk.bf16.gmra.mrb[184].mxu1 %vm2585_vm3, %v11693_v40  ;;  %v1444_v40 = vadd.f32 %v11679_v20, %v1443_v23  ;;  %v9145_v19 = vpop.f32.mrb[78].mxu0 }
 0x189   : > { %v2367_v47 = vmax.f32 %v1959_v3, 0.0  ;;  %9390 = vmatprep.mubr.msk.bf16.mxu1 %vm2585_vm3, %v11717_v6  ;;  %v2240_v11 = vmax.f32 %v1452_v26, 0.0  ;;  %v1455_v6 = vadd.f32 %v11679_v20, %v9145_v19  ;;  %v1446_v21 = vpop.f32.mrb[79].mxu0 }
 0x18a   : > { %v11779_v52 = vpack.c.bf16 %v2369_v16, %v2368_v27  ;;  %v2238_v8 = vmax.f32 %v1444_v40, 0.0  ;;  %v1447_v16 = vadd.f32 %v11679_v20, %v1446_v21 }
 0x18b   : > { %v11782_v7 = vpack.c.bf16 %v2367_v47, %v2366_v15  ;;  %v9276_v35 = vpop.f32.mrb[80].mxu1  ;;  %v2241_v12 = vmax.f32 %v1455_v6, 0.0 }
 0x18c   : > { %14115 = vst [vmem:[#allocation5_spill] sm:$0xff] %v11779_v52  ;;  %v1980_v9 = vadd.f32 %v11679_v20, %v9276_v35  ;;  %v1971_v63 = vpop.f32.mrb[81].mxu1  ;;  %v2239_v52 = vmax.f32 %v1447_v16, 0.0 }
 0x18d   : > { %14116 = vst [vmem:[#allocation6_spill] sm:$0xff] %v11782_v7  ;;  %v1972_v3 = vadd.f32 %v11679_v20, %v1971_v63  ;;  %v9277_v27 = vpop.f32.mrb[82].mxu1  ;;  %v11793_v26 = vpack.c.bf16 %v2241_v12, %v2240_v11 }
 0x18e   : > { %v1983_v15 = vadd.f32 %v11679_v20, %v9277_v27  ;;  %v1974_v47 = vpop.f32.mrb[83].mxu1  ;;  %v2372_v7 = vmax.f32 %v1980_v9, 0.0  ;;  %v11797_v40 = vpack.c.bf16 %v2239_v52, %v2238_v8  ;;  %v9148_v21 = vpop.f32.mrb[80].mxu0 }
 0x18f   : > { %v1975_v23 = vadd.f32 %v11679_v20, %v1974_v47  ;;  %v2370_v19 = vmax.f32 %v1972_v3, 0.0  ;;  %v1468_v6 = vadd.f32 %v11679_v20, %v9148_v21  ;;  %v1459_v16 = vpop.f32.mrb[81].mxu0 }
 0x190   : > { %v2373_v35 = vmax.f32 %v1983_v15, 0.0  ;;  %9391 = vmatmul.mubr.msk.bf16.gmra.mrb[188].mxu1 %vm2585_vm3, %v11713_v18  ;;  %v1460_v18 = vadd.f32 %v11679_v20, %v1459_v16  ;;  %v9149_v11 = vpop.f32.mrb[82].mxu0 }
 0x191   : > { %v2371_v63 = vmax.f32 %v1975_v23, 0.0  ;;  %9394 = vmatprep.mubr.msk.bf16.mxu1 %vm2585_vm3, %v11737_v57  ;;  %v2244_v12 = vmax.f32 %v1468_v6, 0.0  ;;  %v1471_v57 = vadd.f32 %v11679_v20, %v9149_v11  ;;  %v1462_v52 = vpop.f32.mrb[83].mxu0 }
 0x192   : > { %v11799_v27 = vpack.c.bf16 %v2373_v35, %v2372_v7  ;;  %v2242_v23 = vmax.f32 %v1460_v18, 0.0  ;;  %v1463_v35 = vadd.f32 %v11679_v20, %v1462_v52 }
 0x193   : > { %v11802_v9 = vpack.c.bf16 %v2371_v63, %v2370_v19  ;;  %v9280_v15 = vpop.f32.mrb[84].mxu1  ;;  %v2245_v21 = vmax.f32 %v1471_v57, 0.0 }
 0x194   : > { %14117 = vst [vmem:[#allocation7_spill] sm:$0xff] %v11799_v27  ;;  %v1996_v3 = vadd.f32 %v11679_v20, %v9280_v15  ;;  %v1987_v47 = vpop.f32.mrb[85].mxu1  ;;  %v2243_v27 = vmax.f32 %v1463_v35, 0.0 }
 0x195   : > { %14118 = vst [vmem:[#allocation8_spill] sm:$0xff] %v11802_v9  ;;  %v1988_v8 = vadd.f32 %v11679_v20, %v1987_v47  ;;  %v9281_v7 = vpop.f32.mrb[86].mxu1  ;;  %v11813_v6 = vpack.c.bf16 %v2245_v21, %v2244_v12 }
 0x196   : > { %v1999_v19 = vadd.f32 %v11679_v20, %v9281_v7  ;;  %v1990_v63 = vpop.f32.mrb[87].mxu1  ;;  %v2376_v9 = vmax.f32 %v1996_v3, 0.0  ;;  %v11817_v18 = vpack.c.bf16 %v2243_v27, %v2242_v23  ;;  %v9152_v52 = vpop.f32.mrb[84].mxu0 }
 0x197   : > { %v1991_v16 = vadd.f32 %v11679_v20, %v1990_v63  ;;  %v2374_v11 = vmax.f32 %v1988_v8, 0.0  ;;  %v1484_v57 = vadd.f32 %v11679_v20, %v9152_v52  ;;  %v1475_v35 = vpop.f32.mrb[85].mxu0 }
 0x198   : > { %v2377_v15 = vmax.f32 %v1999_v19, 0.0  ;;  %9395 = vmatmul.mubr.msk.bf16.gmra.mrb[192].mxu1 %vm2585_vm3, %v11733_v36  ;;  %v1476_v36 = vadd.f32 %v11679_v20, %v1475_v35  ;;  %v9153_v12 = vpop.f32.mrb[86].mxu0 }
 0x199   : > { %v2375_v47 = vmax.f32 %v1991_v16, 0.0  ;;  %9398 = vmatprep.mubr.msk.bf16.mxu1 %vm2585_vm3, %v11757_v29  ;;  %v2248_v21 = vmax.f32 %v1484_v57, 0.0  ;;  %v1487_v29 = vadd.f32 %v11679_v20, %v9153_v12  ;;  %v1478_v27 = vpop.f32.mrb[87].mxu0 }
 0x19a   : > { %v11819_v7 = vpack.c.bf16 %v2377_v15, %v2376_v9  ;;  %v2246_v16 = vmax.f32 %v1476_v36, 0.0  ;;  %v1479_v15 = vadd.f32 %v11679_v20, %v1478_v27 }
 0x19b   : > { %v11822_v3 = vpack.c.bf16 %v2375_v47, %v2374_v11  ;;  %v9284_v19 = vpop.f32.mrb[88].mxu1  ;;  %v2249_v52 = vmax.f32 %v1487_v29, 0.0 }
 0x19c   : > { %14119 = vst [vmem:[#allocation9_spill] sm:$0xff] %v11819_v7  ;;  %v2012_v8 = vadd.f32 %v11679_v20, %v9284_v19  ;;  %v2003_v63 = vpop.f32.mrb[89].mxu1  ;;  %v2247_v7 = vmax.f32 %v1479_v15, 0.0 }
 0x19d   : > { %14120 = vst [vmem:[#allocation10_spill] sm:$0xff] %v11822_v3  ;;  %v2004_v23 = vadd.f32 %v11679_v20, %v2003_v63  ;;  %v9285_v9 = vpop.f32.mrb[90].mxu1  ;;  %v11833_v57 = vpack.c.bf16 %v2249_v52, %v2248_v21 }
 0x19e   : > { %v2015_v11 = vadd.f32 %v11679_v20, %v9285_v9  ;;  %v2006_v47 = vpop.f32.mrb[91].mxu1  ;;  %v2380_v3 = vmax.f32 %v2012_v8, 0.0  ;;  %v11837_v36 = vpack.c.bf16 %v2247_v7, %v2246_v16  ;;  %v9156_v27 = vpop.f32.mrb[88].mxu0 }
 0x19f   : > { %v2007_v35 = vadd.f32 %v11679_v20, %v2006_v47  ;;  %v2378_v12 = vmax.f32 %v2004_v23, 0.0  ;;  %v1500_v29 = vadd.f32 %v11679_v20, %v9156_v27  ;;  %v1491_v15 = vpop.f32.mrb[89].mxu0 }
 0x1a0   : > { %v2381_v19 = vmax.f32 %v2015_v11, 0.0  ;;  %9399 = vmatmul.mubr.msk.bf16.gmra.mrb[196].mxu1 %vm2585_vm3, %v11753_v60  ;;  %v1492_v60 = vadd.f32 %v11679_v20, %v1491_v15  ;;  %v9157_v21 = vpop.f32.mrb[90].mxu0 }
 0x1a1   : > { %v2379_v63 = vmax.f32 %v2007_v35, 0.0  ;;  %9402 = vmatprep.mubr.msk.bf16.mxu1 %vm2585_vm3, %v11777_v32  ;;  %v2252_v52 = vmax.f32 %v1500_v29, 0.0  ;;  %v1503_v32 = vadd.f32 %v11679_v20, %v9157_v21  ;;  %v1494_v7 = vpop.f32.mrb[91].mxu0 }
 0x1a2   : > { %v11839_v9 = vpack.c.bf16 %v2381_v19, %v2380_v3  ;;  %v2250_v35 = vmax.f32 %v1492_v60, 0.0  ;;  %v1495_v19 = vadd.f32 %v11679_v20, %v1494_v7 }
 0x1a3   : > { %v11842_v8 = vpack.c.bf16 %v2379_v63, %v2378_v12  ;;  %v9288_v11 = vpop.f32.mrb[92].mxu1  ;;  %v2253_v27 = vmax.f32 %v1503_v32, 0.0 }
 0x1a4   : > { %14121 = vst [vmem:[#allocation11_spill] sm:$0xff] %v11839_v9  ;;  %v2028_v23 = vadd.f32 %v11679_v20, %v9288_v11  ;;  %v2019_v47 = vpop.f32.mrb[93].mxu1  ;;  %v2251_v9 = vmax.f32 %v1495_v19, 0.0 }
 0x1a5   : > { %14122 = vst [vmem:[#allocation12_spill] sm:$0xff] %v11842_v8  ;;  %v2020_v16 = vadd.f32 %v11679_v20, %v2019_v47  ;;  %v9289_v3 = vpop.f32.mrb[94].mxu1  ;;  %v11853_v29 = vpack.c.bf16 %v2253_v27, %v2252_v52 }
 0x1a6   : > { %v2031_v12 = vadd.f32 %v11679_v20, %v9289_v3  ;;  %v2022_v63 = vpop.f32.mrb[95].mxu1  ;;  %v2384_v8 = vmax.f32 %v2028_v23, 0.0  ;;  %v11857_v60 = vpack.c.bf16 %v2251_v9, %v2250_v35  ;;  %v9160_v7 = vpop.f32.mrb[92].mxu0 }
 0x1a7   : > { %v2023_v15 = vadd.f32 %v11679_v20, %v2022_v63  ;;  %v2382_v21 = vmax.f32 %v2020_v16, 0.0  ;;  %v1516_v32 = vadd.f32 %v11679_v20, %v9160_v7  ;;  %v1507_v19 = vpop.f32.mrb[93].mxu0 }
 0x1a8   : > { %v2385_v11 = vmax.f32 %v2031_v12, 0.0  ;;  %9403 = vmatmul.mubr.msk.bf16.gmra.mrb[200].mxu1 %vm2585_vm3, %v11773_v24  ;;  %v1508_v24 = vadd.f32 %v11679_v20, %v1507_v19  ;;  %v9161_v52 = vpop.f32.mrb[94].mxu0 }
 0x1a9   : > { %v2383_v47 = vmax.f32 %v2023_v15, 0.0  ;;  %9406 = vmatprep.mubr.msk.bf16.mxu1 %vm2585_vm3, %v11797_v40  ;;  %v2256_v27 = vmax.f32 %v1516_v32, 0.0  ;;  %v1519_v40 = vadd.f32 %v11679_v20, %v9161_v52  ;;  %v1510_v9 = vpop.f32.mrb[95].mxu0 }
 0x1aa   : > { %v11859_v3 = vpack.c.bf16 %v2385_v11, %v2384_v8  ;;  %v2254_v15 = vmax.f32 %v1508_v24, 0.0  ;;  %v1511_v11 = vadd.f32 %v11679_v20, %v1510_v9 }
 0x1ab   : > { %v11862_v23 = vpack.c.bf16 %v2383_v47, %v2382_v21  ;;  %v9292_v12 = vpop.f32.mrb[96].mxu1  ;;  %v2257_v7 = vmax.f32 %v1519_v40, 0.0 }
 0x1ac   : > { %14123 = vst [vmem:[#allocation13_spill] sm:$0xff] %v11859_v3  ;;  %v2044_v16 = vadd.f32 %v11679_v20, %v9292_v12  ;;  %v2035_v63 = vpop.f32.mrb[97].mxu1  ;;  %v2255_v3 = vmax.f32 %v1511_v11, 0.0 }
 0x1ad   : > { %14124 = vst [vmem:[#allocation14_spill] sm:$0xff] %v11862_v23  ;;  %v2036_v35 = vadd.f32 %v11679_v20, %v2035_v63  ;;  %v9293_v8 = vpop.f32.mrb[98].mxu1  ;;  %v11873_v32 = vpack.c.bf16 %v2257_v7, %v2256_v27 }
 0x1ae   : > { %v2047_v21 = vadd.f32 %v11679_v20, %v9293_v8  ;;  %v2038_v47 = vpop.f32.mrb[99].mxu1  ;;  %v2388_v23 = vmax.f32 %v2044_v16, 0.0  ;;  %v11877_v24 = vpack.c.bf16 %v2255_v3, %v2254_v15  ;;  %v9164_v9 = vpop.f32.mrb[96].mxu0 }
 0x1af   : > { %v2039_v19 = vadd.f32 %v11679_v20, %v2038_v47  ;;  %v2386_v52 = vmax.f32 %v2036_v35, 0.0  ;;  %v1532_v40 = vadd.f32 %v11679_v20, %v9164_v9  ;;  %v1523_v11 = vpop.f32.mrb[97].mxu0 }
 0x1b0   : > { %v2389_v12 = vmax.f32 %v2047_v21, 0.0  ;;  %9407 = vmatmul.mubr.msk.bf16.gmra.mrb[204].mxu1 %vm2585_vm3, %v11793_v26  ;;  %v1524_v26 = vadd.f32 %v11679_v20, %v1523_v11  ;;  %v9165_v27 = vpop.f32.mrb[98].mxu0 }
 0x1b1   : > { %v2387_v63 = vmax.f32 %v2039_v19, 0.0  ;;  %9410 = vmatprep.mubr.msk.bf16.mxu1 %vm2585_vm3, %v11817_v18  ;;  %v2260_v7 = vmax.f32 %v1532_v40, 0.0  ;;  %v1535_v18 = vadd.f32 %v11679_v20, %v9165_v27  ;;  %v1526_v3 = vpop.f32.mrb[99].mxu0 }
 0x1b2   : > { %v11879_v8 = vpack.c.bf16 %v2389_v12, %v2388_v23  ;;  %v2258_v19 = vmax.f32 %v1524_v26, 0.0  ;;  %v1527_v12 = vadd.f32 %v11679_v20, %v1526_v3 }
 0x1b3   : > { %v11882_v16 = vpack.c.bf16 %v2387_v63, %v2386_v52  ;;  %v9296_v21 = vpop.f32.mrb[100].mxu1  ;;  %v2261_v9 = vmax.f32 %v1535_v18, 0.0 }
 0x1b4   : > { %14125 = vst [vmem:[#allocation15_spill] sm:$0xff] %v11879_v8  ;;  %v2060_v35 = vadd.f32 %v11679_v20, %v9296_v21  ;;  %v2051_v47 = vpop.f32.mrb[101].mxu1  ;;  %v2259_v8 = vmax.f32 %v1527_v12, 0.0 }
 0x1b5   : > { %14126 = vst [vmem:[#allocation16_spill] sm:$0xff] %v11882_v16  ;;  %v2052_v15 = vadd.f32 %v11679_v20, %v2051_v47  ;;  %v9297_v23 = vpop.f32.mrb[102].mxu1  ;;  %v11893_v40 = vpack.c.bf16 %v2261_v9, %v2260_v7 }
 0x1b6   : > { %v2063_v52 = vadd.f32 %v11679_v20, %v9297_v23  ;;  %v2054_v63 = vpop.f32.mrb[103].mxu1  ;;  %v2392_v16 = vmax.f32 %v2060_v35, 0.0  ;;  %v11897_v26 = vpack.c.bf16 %v2259_v8, %v2258_v19  ;;  %v9168_v3 = vpop.f32.mrb[100].mxu0 }
 0x1b7   : > { %v2055_v11 = vadd.f32 %v11679_v20, %v2054_v63  ;;  %v2390_v27 = vmax.f32 %v2052_v15, 0.0  ;;  %v1548_v18 = vadd.f32 %v11679_v20, %v9168_v3  ;;  %v1539_v12 = vpop.f32.mrb[101].mxu0 }
 0x1b8   : > { %v2393_v21 = vmax.f32 %v2063_v52, 0.0  ;;  %9411 = vmatmul.mubr.msk.bf16.gmra.mrb[208].mxu1 %vm2585_vm3, %v11813_v6  ;;  %v1540_v6 = vadd.f32 %v11679_v20, %v1539_v12  ;;  %v9169_v7 = vpop.f32.mrb[102].mxu0 }
 0x1b9   : > { %v2391_v47 = vmax.f32 %v2055_v11, 0.0  ;;  %9414 = vmatprep.mubr.msk.bf16.mxu1 %vm2585_vm3, %v11837_v36  ;;  %v2264_v9 = vmax.f32 %v1548_v18, 0.0  ;;  %v1551_v36 = vadd.f32 %v11679_v20, %v9169_v7  ;;  %v1542_v8 = vpop.f32.mrb[103].mxu0 }
 0x1ba   : > { %v11899_v23 = vpack.c.bf16 %v2393_v21, %v2392_v16  ;;  %v2262_v11 = vmax.f32 %v1540_v6, 0.0  ;;  %v1543_v21 = vadd.f32 %v11679_v20, %v1542_v8 }
 0x1bb   : > { %v11902_v35 = vpack.c.bf16 %v2391_v47, %v2390_v27  ;;  %v9300_v52 = vpop.f32.mrb[104].mxu1  ;;  %v2265_v3 = vmax.f32 %v1551_v36, 0.0 }
 0x1bc   : > { %14127 = vst [vmem:[#allocation17_spill] sm:$0xff] %v11899_v23  ;;  %v2076_v15 = vadd.f32 %v11679_v20, %v9300_v52  ;;  %v2067_v63 = vpop.f32.mrb[105].mxu1  ;;  %v2263_v23 = vmax.f32 %v1543_v21, 0.0 }
 0x1bd   : > { %14128 = vst [vmem:[#allocation18_spill] sm:$0xff] %v11902_v35  ;;  %v2068_v19 = vadd.f32 %v11679_v20, %v2067_v63  ;;  %v9301_v16 = vpop.f32.mrb[106].mxu1  ;;  %v11913_v18 = vpack.c.bf16 %v2265_v3, %v2264_v9 }
 0x1be   : > { %v2079_v27 = vadd.f32 %v11679_v20, %v9301_v16  ;;  %v2070_v47 = vpop.f32.mrb[107].mxu1  ;;  %v2396_v35 = vmax.f32 %v2076_v15, 0.0  ;;  %v11917_v6 = vpack.c.bf16 %v2263_v23, %v2262_v11  ;;  %v9172_v8 = vpop.f32.mrb[104].mxu0 }
 0x1bf   : > { %v2071_v12 = vadd.f32 %v11679_v20, %v2070_v47  ;;  %v2394_v7 = vmax.f32 %v2068_v19, 0.0  ;;  %v1564_v36 = vadd.f32 %v11679_v20, %v9172_v8  ;;  %v1555_v21 = vpop.f32.mrb[105].mxu0 }
 0x1c0   : > { %v2397_v52 = vmax.f32 %v2079_v27, 0.0  ;;  %9415 = vmatmul.mubr.msk.bf16.gmra.mrb[212].mxu1 %vm2585_vm3, %v11833_v57  ;;  %v1556_v57 = vadd.f32 %v11679_v20, %v1555_v21  ;;  %v9173_v9 = vpop.f32.mrb[106].mxu0 }
 0x1c1   : > { %v2395_v63 = vmax.f32 %v2071_v12, 0.0  ;;  %9418 = vmatprep.mubr.msk.bf16.mxu1 %vm2585_vm3, %v11857_v60  ;;  %v2268_v3 = vmax.f32 %v1564_v36, 0.0  ;;  %v1567_v60 = vadd.f32 %v11679_v20, %v9173_v9  ;;  %v1558_v23 = vpop.f32.mrb[107].mxu0 }
 0x1c2   : > { %v11919_v16 = vpack.c.bf16 %v2397_v52, %v2396_v35  ;;  %v2266_v12 = vmax.f32 %v1556_v57, 0.0  ;;  %v1559_v52 = vadd.f32 %v11679_v20, %v1558_v23 }
 0x1c3   : > { %v11922_v15 = vpack.c.bf16 %v2395_v63, %v2394_v7  ;;  %v9304_v27 = vpop.f32.mrb[108].mxu1  ;;  %v2269_v8 = vmax.f32 %v1567_v60, 0.0 }
 0x1c4   : > { %14129 = vst [vmem:[#allocation19_spill] sm:$0xff] %v11919_v16  ;;  %v2092_v19 = vadd.f32 %v11679_v20, %v9304_v27  ;;  %v2083_v47 = vpop.f32.mrb[109].mxu1  ;;  %v2267_v16 = vmax.f32 %v1559_v52, 0.0 }
 0x1c5   : > { %14130 = vst [vmem:[#allocation20_spill] sm:$0xff] %v11922_v15  ;;  %v2084_v11 = vadd.f32 %v11679_v20, %v2083_v47  ;;  %v9305_v35 = vpop.f32.mrb[110].mxu1  ;;  %v11933_v36 = vpack.c.bf16 %v2269_v8, %v2268_v3 }
 0x1c6   : > { %v2095_v7 = vadd.f32 %v11679_v20, %v9305_v35  ;;  %v2086_v63 = vpop.f32.mrb[111].mxu1  ;;  %v2400_v15 = vmax.f32 %v2092_v19, 0.0  ;;  %v11937_v57 = vpack.c.bf16 %v2267_v16, %v2266_v12  ;;  %v9176_v23 = vpop.f32.mrb[108].mxu0 }
 0x1c7   : > { %v2087_v21 = vadd.f32 %v11679_v20, %v2086_v63  ;;  %v2398_v9 = vmax.f32 %v2084_v11, 0.0  ;;  %v1580_v60 = vadd.f32 %v11679_v20, %v9176_v23  ;;  %v1571_v52 = vpop.f32.mrb[109].mxu0 }
 0x1c8   : > { %v2401_v27 = vmax.f32 %v2095_v7, 0.0  ;;  %9419 = vmatmul.mubr.msk.bf16.gmra.mrb[216].mxu1 %vm2585_vm3, %v11853_v29  ;;  %v1572_v29 = vadd.f32 %v11679_v20, %v1571_v52  ;;  %v9177_v3 = vpop.f32.mrb[110].mxu0 }
 0x1c9   : > { %v2399_v47 = vmax.f32 %v2087_v21, 0.0  ;;  %9422 = vmatprep.mubr.msk.bf16.mxu1 %vm2585_vm3, %v11877_v24  ;;  %v2272_v8 = vmax.f32 %v1580_v60, 0.0  ;;  %v1583_v24 = vadd.f32 %v11679_v20, %v9177_v3  ;;  %v1574_v16 = vpop.f32.mrb[111].mxu0 }
 0x1ca   : > { %v11939_v35 = vpack.c.bf16 %v2401_v27, %v2400_v15  ;;  %v2270_v21 = vmax.f32 %v1572_v29, 0.0  ;;  %v1575_v27 = vadd.f32 %v11679_v20, %v1574_v16 }
 0x1cb   : > { %v11942_v19 = vpack.c.bf16 %v2399_v47, %v2398_v9  ;;  %v9308_v7 = vpop.f32.mrb[112].mxu1  ;;  %v2273_v23 = vmax.f32 %v1583_v24, 0.0 }
 0x1cc   : > { %14131 = vst [vmem:[#allocation21_spill] sm:$0xff] %v11939_v35  ;;  %v2108_v11 = vadd.f32 %v11679_v20, %v9308_v7  ;;  %v2099_v63 = vpop.f32.mrb[113].mxu1  ;;  %v2271_v35 = vmax.f32 %v1575_v27, 0.0 }
 0x1cd   : > { %14132 = vst [vmem:[#allocation22_spill] sm:$0xff] %v11942_v19  ;;  %v2100_v12 = vadd.f32 %v11679_v20, %v2099_v63  ;;  %v9309_v15 = vpop.f32.mrb[114].mxu1  ;;  %v11953_v60 = vpack.c.bf16 %v2273_v23, %v2272_v8 }
 0x1ce   : > { %v2111_v9 = vadd.f32 %v11679_v20, %v9309_v15  ;;  %v2102_v47 = vpop.f32.mrb[115].mxu1  ;;  %v2404_v19 = vmax.f32 %v2108_v11, 0.0  ;;  %v11957_v29 = vpack.c.bf16 %v2271_v35, %v2270_v21  ;;  %v9180_v16 = vpop.f32.mrb[112].mxu0 }
 0x1cf   : > { %v2103_v52 = vadd.f32 %v11679_v20, %v2102_v47  ;;  %v2402_v3 = vmax.f32 %v2100_v12, 0.0  ;;  %v1596_v24 = vadd.f32 %v11679_v20, %v9180_v16  ;;  %v1587_v27 = vpop.f32.mrb[113].mxu0 }
 0x1d0   : > { %v2405_v7 = vmax.f32 %v2111_v9, 0.0  ;;  %9423 = vmatmul.mubr.msk.bf16.gmra.mrb[220].mxu1 %vm2585_vm3, %v11873_v32  ;;  %v1588_v32 = vadd.f32 %v11679_v20, %v1587_v27  ;;  %v9181_v8 = vpop.f32.mrb[114].mxu0 }
 0x1d1   : > { %v2403_v63 = vmax.f32 %v2103_v52, 0.0  ;;  %9426 = vmatprep.mubr.msk.bf16.mxu1 %vm2585_vm3, %v11897_v26  ;;  %v2276_v23 = vmax.f32 %v1596_v24, 0.0  ;;  %v1599_v26 = vadd.f32 %v11679_v20, %v9181_v8  ;;  %v1590_v35 = vpop.f32.mrb[115].mxu0 }
 0x1d2   : > { %v11959_v15 = vpack.c.bf16 %v2405_v7, %v2404_v19  ;;  %v2274_v52 = vmax.f32 %v1588_v32, 0.0  ;;  %v1591_v7 = vadd.f32 %v11679_v20, %v1590_v35 }
 0x1d3   : > { %v11962_v11 = vpack.c.bf16 %v2403_v63, %v2402_v3  ;;  %v9312_v9 = vpop.f32.mrb[116].mxu1  ;;  %v2277_v16 = vmax.f32 %v1599_v26, 0.0 }
 0x1d4   : > { %14133 = vst [vmem:[#allocation23_spill] sm:$0xff] %v11959_v15  ;;  %v2124_v12 = vadd.f32 %v11679_v20, %v9312_v9  ;;  %v2115_v47 = vpop.f32.mrb[117].mxu1  ;;  %v2275_v15 = vmax.f32 %v1591_v7, 0.0 }
 0x1d5   : > { %14134 = vst [vmem:[#allocation24_spill] sm:$0xff] %v11962_v11  ;;  %v2116_v21 = vadd.f32 %v11679_v20, %v2115_v47  ;;  %v9313_v19 = vpop.f32.mrb[118].mxu1  ;;  %v11973_v24 = vpack.c.bf16 %v2277_v16, %v2276_v23 }
 0x1d6   : > { %v2127_v3 = vadd.f32 %v11679_v20, %v9313_v19  ;;  %v2118_v63 = vpop.f32.mrb[119].mxu1  ;;  %v2408_v11 = vmax.f32 %v2124_v12, 0.0  ;;  %v11977_v32 = vpack.c.bf16 %v2275_v15, %v2274_v52  ;;  %v9184_v35 = vpop.f32.mrb[116].mxu0 }
 0x1d7   : > { %v2119_v27 = vadd.f32 %v11679_v20, %v2118_v63  ;;  %v2406_v8 = vmax.f32 %v2116_v21, 0.0  ;;  %v1612_v26 = vadd.f32 %v11679_v20, %v9184_v35  ;;  %v1603_v7 = vpop.f32.mrb[117].mxu0 }
 0x1d8   : > { %v2409_v9 = vmax.f32 %v2127_v3, 0.0  ;;  %9427 = vmatmul.mubr.msk.bf16.gmra.mrb[224].mxu1 %vm2585_vm3, %v11893_v40  ;;  %v1604_v40 = vadd.f32 %v11679_v20, %v1603_v7  ;;  %v9185_v23 = vpop.f32.mrb[118].mxu0 }
 0x1d9   : > { %v2407_v47 = vmax.f32 %v2119_v27, 0.0  ;;  %9430 = vmatprep.mubr.msk.bf16.mxu1 %vm2585_vm3, %v11917_v6  ;;  %v2280_v16 = vmax.f32 %v1612_v26, 0.0  ;;  %v1615_v6 = vadd.f32 %v11679_v20, %v9185_v23  ;;  %v1606_v15 = vpop.f32.mrb[119].mxu0 }
 0x1da   : > { %v11979_v19 = vpack.c.bf16 %v2409_v9, %v2408_v11  ;;  %v2278_v27 = vmax.f32 %v1604_v40, 0.0  ;;  %v1607_v9 = vadd.f32 %v11679_v20, %v1606_v15 }
 0x1db   : > { %v11982_v12 = vpack.c.bf16 %v2407_v47, %v2406_v8  ;;  %v9316_v3 = vpop.f32.mrb[120].mxu1  ;;  %v2281_v35 = vmax.f32 %v1615_v6, 0.0 }
 0x1dc   : > { %14135 = vst [vmem:[#allocation25_spill] sm:$0xff] %v11979_v19  ;;  %v2140_v21 = vadd.f32 %v11679_v20, %v9316_v3  ;;  %v2131_v63 = vpop.f32.mrb[121].mxu1  ;;  %v2279_v19 = vmax.f32 %v1607_v9, 0.0 }
 0x1dd   : > { %14136 = vst [vmem:[#allocation26_spill] sm:$0xff] %v11982_v12  ;;  %v2132_v52 = vadd.f32 %v11679_v20, %v2131_v63  ;;  %v9317_v11 = vpop.f32.mrb[122].mxu1  ;;  %v11993_v26 = vpack.c.bf16 %v2281_v35, %v2280_v16 }
 0x1de   : > { %v2143_v8 = vadd.f32 %v11679_v20, %v9317_v11  ;;  %v2134_v47 = vpop.f32.mrb[123].mxu1  ;;  %v2412_v12 = vmax.f32 %v2140_v21, 0.0  ;;  %v11997_v40 = vpack.c.bf16 %v2279_v19, %v2278_v27  ;;  %v9188_v15 = vpop.f32.mrb[120].mxu0 }
 0x1df   : > { %v2135_v7 = vadd.f32 %v11679_v20, %v2134_v47  ;;  %v2410_v23 = vmax.f32 %v2132_v52, 0.0  ;;  %v1628_v6 = vadd.f32 %v11679_v20, %v9188_v15  ;;  %v1619_v9 = vpop.f32.mrb[121].mxu0 }
 0x1e0   : > { %v2413_v3 = vmax.f32 %v2143_v8, 0.0  ;;  %9431 = vmatmul.mubr.msk.bf16.gmra.mrb[228].mxu1 %vm2585_vm3, %v11913_v18  ;;  %v1620_v18 = vadd.f32 %v11679_v20, %v1619_v9  ;;  %v9189_v16 = vpop.f32.mrb[122].mxu0 }
 0x1e1   : > { %v2411_v63 = vmax.f32 %v2135_v7, 0.0  ;;  %9434 = vmatprep.mubr.msk.bf16.mxu1 %vm2585_vm3, %v11937_v57  ;;  %v2284_v35 = vmax.f32 %v1628_v6, 0.0  ;;  %v1631_v57 = vadd.f32 %v11679_v20, %v9189_v16  ;;  %v1622_v19 = vpop.f32.mrb[123].mxu0 }
 0x1e2   : > { %v11999_v11 = vpack.c.bf16 %v2413_v3, %v2412_v12  ;;  %v2282_v7 = vmax.f32 %v1620_v18, 0.0  ;;  %v1623_v3 = vadd.f32 %v11679_v20, %v1622_v19  ;;  %v12018_v18 = vld [vmem:[%s14107_s4] ss:$0 sm:$0xff] }
 0x1e3   : > { %v12002_v21 = vpack.c.bf16 %v2411_v63, %v2410_v23  ;;  %v9320_v8 = vpop.f32.mrb[124].mxu1  ;;  %v2285_v15 = vmax.f32 %v1631_v57, 0.0 }
 0x1e4   : > { %14137 = vst [vmem:[#allocation27_spill] sm:$0xff] %v11999_v11  ;;  %v2156_v52 = vadd.f32 %v11679_v20, %v9320_v8  ;;  %v2147_v47 = vpop.f32.mrb[125].mxu1  ;;  %v2283_v11 = vmax.f32 %v1623_v3, 0.0  ;;  %v10898_v3 = vld [vmem:[%s14105_s2] ss:$0 sm:$0xff] }
 0x1e5   : > { %14138 = vst [vmem:[#allocation28_spill] sm:$0xff] %v12002_v21  ;;  %v2148_v27 = vadd.f32 %v11679_v20, %v2147_v47  ;;  %v9321_v12 = vpop.f32.mrb[126].mxu1  ;;  %v12013_v6 = vpack.c.bf16 %v2285_v15, %v2284_v35 }
 0x1e6   : > { %v2159_v23 = vadd.f32 %v11679_v20, %v9321_v12  ;;  %v2150_v63 = vpop.f32.mrb[127].mxu1  ;;  %v2416_v21 = vmax.f32 %v2156_v52, 0.0  ;;  %v12022_v57 = vpack.c.bf16 %v2283_v11, %v2282_v7  ;;  %v9192_v19 = vpop.f32.mrb[124].mxu0 }
 0x1e7   : > { %v2151_v9 = vadd.f32 %v11679_v20, %v2150_v63  ;;  %v2414_v16 = vmax.f32 %v2148_v27, 0.0  ;;  %v1644_v12 = vadd.f32 %v11679_v20, %v9192_v19 }
 0x1e8   : > { %v2417_v8 = vmax.f32 %v2159_v23, 0.0  ;;  %9435 = vmatmul.mubr.msk.bf16.gmra.mrb[232].mxu1 %vm2585_vm3, %v11933_v36  ;;  %v1635_v36 = vpop.f32.mrb[125].mxu0 }
 0x1e9   : > { %v2415_v47 = vmax.f32 %v2151_v9, 0.0  ;;  %9438 = vmatprep.mubr.msk.bf16.mxu1 %vm2585_vm3, %v11957_v29  ;;  %v1636_v23 = vadd.f32 %v10898_v3, %v1635_v36  ;;  %v9193_v63 = vpop.f32.mrb[126].mxu0  ;;  %v2288_v11 = vmax.f32 %v1644_v12, 0.0 }
 0x1ea   : > { %v12024_v52 = vpack.c.bf16 %v2417_v8, %v2416_v21  ;;  %v1647_v7 = vadd.f32 %v10898_v3, %v9193_v63  ;;  %v1638_v9 = vpop.f32.mrb[127].mxu0 }
 0x1eb   : > { %v12027_v35 = vpack.c.bf16 %v2415_v47, %v2414_v16  ;;  %v9332_v27 = vpop.f32.mrb[128].mxu1  ;;  %v2286_v20 = vmax.f32 %v1636_v23, 0.0  ;;  %v1639_v19 = vadd.f32 %v10898_v3, %v1638_v9 }
 0x1ec   : > { %14139 = vst [vmem:[#allocation29_spill] sm:$0xff] %v12024_v52  ;;  %v3013_v15 = vadd.f32 %v9332_v27, %v12018_v18  ;;  %v3004_v29 = vpop.f32.mrb[129].mxu1  ;;  %v2289_v52 = vmax.f32 %v1647_v7, 0.0 }
 0x1ed   : > { %14140 = vst [vmem:[#allocation30_spill] sm:$0xff] %v12027_v35  ;;  %v3005_v21 = vadd.f32 %v12018_v18, %v3004_v29  ;;  %v9333_v8 = vpop.f32.mrb[130].mxu1  ;;  %v2287_v1 = vmax.f32 %v1639_v19, 0.0 }
 0x1ee   : > { %v3016_v16 = vadd.f32 %v9333_v8, %v12018_v18  ;;  %v3007_v47 = vpop.f32.mrb[131].mxu1  ;;  %v4029_v36 = vmax.f32 %v3013_v15, 0.0  ;;  %v12038_v12 = vpack.c.bf16 %v2289_v52, %v2288_v11 }
 0x1ef   : > { %v3008_v35 = vadd.f32 %v12018_v18, %v3007_v47  ;;  %v4027_v27 = vmax.f32 %v3005_v21, 0.0  ;;  %v2480_v3 = vpack.c.bf16 %v2287_v1, %v2286_v20 }
 0x1f0   : > { %v4030_v44 = vmax.f32 %v3016_v16, 0.0  ;;  %9439 = vmatmul.mubr.msk.bf16.gmra.mrb[236].mxu1 %vm2585_vm3, %v11953_v60 }
 0x1f1   : > { %v4028_v63 = vmax.f32 %v3008_v35, 0.0  ;;  %9442 = vmatprep.mubr.msk.bf16.mxu1 %vm2585_vm3, %v11977_v32 }
 0x1f2   : > { %v4284_v23 = vpack.c.bf16 %v4030_v44, %v4029_v36 }
 0x1f3   : > { %v4283_v29 = vpack.c.bf16 %v4028_v63, %v4027_v27  ;;  %v9336_v9 = vpop.f32.mrb[132].mxu1 }
 0x1f4   : > { %v3029_v7 = vadd.f32 %v9336_v9, %v12018_v18  ;;  %v3020_v8 = vpop.f32.mrb[133].mxu1 }
 0x1f5   : > { %v3021_v15 = vadd.f32 %v12018_v18, %v3020_v8  ;;  %v9337_v19 = vpop.f32.mrb[134].mxu1  ;;  %9594 = vmatprep.mubr.msk.bf16.mxu0 %vm2585_vm3, %v4283_v29 }
 0x1f6   : > { %v3032_v60 = vadd.f32 %v9337_v19, %v12018_v18  ;;  %v3023_v52 = vpop.f32.mrb[135].mxu1  ;;  %9595 = vmatmul.mubr.msk.bf16.vlgmr.msra.gmra.mrb[128].mxu0 %vm2585_vm3, %v4284_v23  ;;  %v4033_v32 = vmax.f32 %v3029_v7, 0.0 }
 0x1f7   : > { %v3024_v35 = vadd.f32 %v12018_v18, %v3023_v52  ;;  %v4031_v44 = vmax.f32 %v3021_v15, 0.0 }
 0x1f8   : > { %v4034_v1 = vmax.f32 %v3032_v60, 0.0  ;;  %9443 = vmatmul.mubr.msk.bf16.gmra.mrb[240].mxu1 %vm2585_vm3, %v11973_v24 }
 0x1f9   : > { %v4032_v11 = vmax.f32 %v3024_v35, 0.0  ;;  %9446 = vmatprep.mubr.msk.bf16.mxu1 %vm2585_vm3, %v11997_v40 }
 0x1fa   : > { %v4286_v21 = vpack.c.bf16 %v4034_v1, %v4033_v32 }
 0x1fb   : > { %v4285_v20 = vpack.c.bf16 %v4032_v11, %v4031_v44  ;;  %v9340_v16 = vpop.f32.mrb[136].mxu1 }
 0x1fc   : > { %v3045_v47 = vadd.f32 %v9340_v16, %v12018_v18  ;;  %v3036_v36 = vpop.f32.mrb[137].mxu1 }
 0x1fd   : > { %v3037_v27 = vadd.f32 %v12018_v18, %v3036_v36  ;;  %v9341_v63 = vpop.f32.mrb[138].mxu1  ;;  %9598 = vmatprep.mubr.msk.bf16.mxu0 %vm2585_vm3, %v4285_v20 }
 0x1fe   : > { %v3048_v23 = vadd.f32 %v9341_v63, %v12018_v18  ;;  %v3039_v29 = vpop.f32.mrb[139].mxu1  ;;  %9599 = vmatmul.mubr.msk.bf16.gmra.mrb[132].mxu0 %vm2585_vm3, %v4286_v21  ;;  %v4037_v9 = vmax.f32 %v3045_v47, 0.0 }
 0x1ff   : > { %v3040_v24 = vadd.f32 %v12018_v18, %v3039_v29  ;;  %v4035_v7 = vmax.f32 %v3037_v27, 0.0 }
 0x200   : > { %v4038_v40 = vmax.f32 %v3048_v23, 0.0  ;;  %9447 = vmatmul.mubr.msk.bf16.gmra.mrb[244].mxu1 %vm2585_vm3, %v11993_v26 }
 0x201   : > { %v4036_v8 = vmax.f32 %v3040_v24, 0.0  ;;  %9450 = vmatprep.mubr.msk.bf16.mxu1 %vm2585_vm3, %v12022_v57 }
 0x202   : > { %v4288_v15 = vpack.c.bf16 %v4038_v40, %v4037_v9 }
 0x203   : > { %v4287_v19 = vpack.c.bf16 %v4036_v8, %v4035_v7  ;;  %v9344_v60 = vpop.f32.mrb[140].mxu1 }
 0x204   : > { %v3061_v52 = vadd.f32 %v9344_v60, %v12018_v18  ;;  %v3052_v35 = vpop.f32.mrb[141].mxu1 }
 0x205   : > { %v3053_v32 = vadd.f32 %v12018_v18, %v3052_v35  ;;  %v9345_v1 = vpop.f32.mrb[142].mxu1  ;;  %9602 = vmatprep.mubr.msk.bf16.mxu0 %vm2585_vm3, %v4287_v19 }
 0x206   : > { %v3064_v44 = vadd.f32 %v9345_v1, %v12018_v18  ;;  %v3055_v11 = vpop.f32.mrb[143].mxu1  ;;  %9603 = vmatmul.mubr.msk.bf16.gmra.mrb[136].mxu0 %vm2585_vm3, %v4288_v15  ;;  %v4041_v21 = vmax.f32 %v3061_v52, 0.0 }
 0x207   : > { %v3056_v26 = vadd.f32 %v12018_v18, %v3055_v11  ;;  %v4039_v20 = vmax.f32 %v3053_v32, 0.0 }
 0x208   : > { %v4042_v57 = vmax.f32 %v3064_v44, 0.0  ;;  %9451 = vmatmul.mubr.msk.bf16.gmra.mrb[248].mxu1 %vm2585_vm3, %v12013_v6 }
 0x209   : > { %v4040_v16 = vmax.f32 %v3056_v26, 0.0  ;;  %9454 = vmatprep.mubr.msk.bf16.mxu1 %vm2585_vm3, %v2480_v3 }
 0x20a   : > { %v4290_v47 = vpack.c.bf16 %v4042_v57, %v4041_v21 }
 0x20b   : > { %v4289_v36 = vpack.c.bf16 %v4040_v16, %v4039_v20  ;;  %v9348_v27 = vpop.f32.mrb[144].mxu1 }
 0x20c   : > { %v3077_v63 = vadd.f32 %v9348_v27, %v12018_v18  ;;  %v3068_v23 = vpop.f32.mrb[145].mxu1 }
 0x20d   : > { %v3069_v29 = vadd.f32 %v12018_v18, %v3068_v23  ;;  %v9349_v24 = vpop.f32.mrb[146].mxu1  ;;  %9606 = vmatprep.mubr.msk.bf16.mxu0 %vm2585_vm3, %v4289_v36 }
 0x20e   : > { %v3080_v9 = vadd.f32 %v9349_v24, %v12018_v18  ;;  %v3071_v40 = vpop.f32.mrb[147].mxu1  ;;  %9607 = vmatmul.mubr.msk.bf16.gmra.mrb[140].mxu0 %vm2585_vm3, %v4290_v47  ;;  %v4045_v7 = vmax.f32 %v3077_v63, 0.0 }
 0x20f   : > { %v3072_v6 = vadd.f32 %v12018_v18, %v3071_v40  ;;  %v4043_v8 = vmax.f32 %v3069_v29, 0.0 }
 0x210   : > { %v4046_v3 = vmax.f32 %v3080_v9, 0.0  ;;  %9455 = vmatmul.mubr.msk.bf16.gmra.mrb[252].mxu1 %vm2585_vm3, %v12038_v12 }
 0x211   : > { %v4044_v15 = vmax.f32 %v3072_v6, 0.0  ;;  %9458 = vmatprep.mubr.msk.bf16.mxu1 %vm2585_vm3, %v11365_v54 }
 0x212   : > { %v4292_v19 = vpack.c.bf16 %v4046_v3, %v4045_v7 }
 0x213   : > { %v4291_v60 = vpack.c.bf16 %v4044_v15, %v4043_v8  ;;  %v9352_v52 = vpop.f32.mrb[148].mxu1 }
 0x214   : > { %v3093_v35 = vadd.f32 %v9352_v52, %v12018_v18  ;;  %v3084_v32 = vpop.f32.mrb[149].mxu1 }
 0x215   : > { %v3085_v1 = vadd.f32 %v12018_v18, %v3084_v32  ;;  %v9353_v44 = vpop.f32.mrb[150].mxu1  ;;  %9610 = vmatprep.mubr.msk.bf16.mxu0 %vm2585_vm3, %v4291_v60 }
 0x216   : > { %v3096_v11 = vadd.f32 %v9353_v44, %v12018_v18  ;;  %v3087_v26 = vpop.f32.mrb[151].mxu1  ;;  %9611 = vmatmul.mubr.msk.bf16.gmra.mrb[144].mxu0 %vm2585_vm3, %v4292_v19  ;;  %v4049_v21 = vmax.f32 %v3093_v35, 0.0 }
 0x217   : > { %v3088_v12 = vadd.f32 %v12018_v18, %v3087_v26  ;;  %v4047_v57 = vmax.f32 %v3085_v1, 0.0 }
 0x218   : > { %v4050_v54 = vmax.f32 %v3096_v11, 0.0  ;;  %9459 = vmatmul.mubr.msk.bf16.gmra.mrb[0].mxu1 %vm2585_vm3, %v11360_v48 }
 0x219   : > { %v4048_v20 = vmax.f32 %v3088_v12, 0.0  ;;  %9462 = vmatprep.mubr.msk.bf16.mxu1 %vm2585_vm3, %v11393_v31 }
 0x21a   : > { %v4294_v16 = vpack.c.bf16 %v4050_v54, %v4049_v21 }
 0x21b   : > { %v4293_v47 = vpack.c.bf16 %v4048_v20, %v4047_v57  ;;  %v9356_v36 = vpop.f32.mrb[152].mxu1 }
 0x21c   : > { %v3109_v27 = vadd.f32 %v9356_v36, %v12018_v18  ;;  %v3100_v63 = vpop.f32.mrb[153].mxu1 }
 0x21d   : > { %v3101_v23 = vadd.f32 %v12018_v18, %v3100_v63  ;;  %v9357_v29 = vpop.f32.mrb[154].mxu1  ;;  %9614 = vmatprep.mubr.msk.bf16.mxu0 %vm2585_vm3, %v4293_v47 }
 0x21e   : > { %v3112_v24 = vadd.f32 %v9357_v29, %v12018_v18  ;;  %v3103_v9 = vpop.f32.mrb[155].mxu1  ;;  %9615 = vmatmul.mubr.msk.bf16.gmra.mrb[148].mxu0 %vm2585_vm3, %v4294_v16  ;;  %v4053_v40 = vmax.f32 %v3109_v27, 0.0 }
 0x21f   : > { %v3104_v48 = vadd.f32 %v12018_v18, %v3103_v9  ;;  %v4051_v6 = vmax.f32 %v3101_v23, 0.0 }
 0x220   : > { %v4054_v31 = vmax.f32 %v3112_v24, 0.0  ;;  %9463 = vmatmul.mubr.msk.bf16.gmra.mrb[4].mxu1 %vm2585_vm3, %v11388_v25 }
 0x221   : > { %v4052_v7 = vmax.f32 %v3104_v48, 0.0  ;;  %9466 = vmatprep.mubr.msk.bf16.mxu1 %vm2585_vm3, %v11424_v10 }
 0x222   : > { %v4296_v3 = vpack.c.bf16 %v4054_v31, %v4053_v40 }
 0x223   : > { %v4295_v8 = vpack.c.bf16 %v4052_v7, %v4051_v6  ;;  %v9360_v15 = vpop.f32.mrb[156].mxu1 }
 0x224   : > { %v3125_v19 = vadd.f32 %v9360_v15, %v12018_v18  ;;  %v3116_v60 = vpop.f32.mrb[157].mxu1 }
 0x225   : > { %v3117_v52 = vadd.f32 %v12018_v18, %v3116_v60  ;;  %v9361_v35 = vpop.f32.mrb[158].mxu1  ;;  %9618 = vmatprep.mubr.msk.bf16.mxu0 %vm2585_vm3, %v4295_v8 }
 0x226   : > { %v3128_v32 = vadd.f32 %v9361_v35, %v12018_v18  ;;  %v3119_v1 = vpop.f32.mrb[159].mxu1  ;;  %9619 = vmatmul.mubr.msk.bf16.gmra.mrb[152].mxu0 %vm2585_vm3, %v4296_v3  ;;  %v4057_v44 = vmax.f32 %v3125_v19, 0.0 }
 0x227   : > { %v3120_v25 = vadd.f32 %v12018_v18, %v3119_v1  ;;  %v4055_v11 = vmax.f32 %v3117_v52, 0.0 }
 0x228   : > { %v4058_v10 = vmax.f32 %v3128_v32, 0.0  ;;  %9467 = vmatmul.mubr.msk.bf16.gmra.mrb[8].mxu1 %vm2585_vm3, %v11419_v4 }
 0x229   : > { %v4056_v26 = vmax.f32 %v3120_v25, 0.0  ;;  %9470 = vmatprep.mubr.msk.bf16.mxu1 %vm2585_vm3, %v11450_v55 }
 0x22a   : > { %v4298_v12 = vpack.c.bf16 %v4058_v10, %v4057_v44 }
 0x22b   : > { %v4297_v21 = vpack.c.bf16 %v4056_v26, %v4055_v11  ;;  %v9364_v54 = vpop.f32.mrb[160].mxu1 }
 0x22c   : > { %v3141_v57 = vadd.f32 %v9364_v54, %v12018_v18  ;;  %v3132_v20 = vpop.f32.mrb[161].mxu1 }
 0x22d   : > { %v3133_v16 = vadd.f32 %v12018_v18, %v3132_v20  ;;  %v9365_v47 = vpop.f32.mrb[162].mxu1  ;;  %9622 = vmatprep.mubr.msk.bf16.mxu0 %vm2585_vm3, %v4297_v21 }
 0x22e   : > { %v3144_v36 = vadd.f32 %v9365_v47, %v12018_v18  ;;  %v3135_v27 = vpop.f32.mrb[163].mxu1  ;;  %9623 = vmatmul.mubr.msk.bf16.gmra.mrb[156].mxu0 %vm2585_vm3, %v4298_v12  ;;  %v4061_v63 = vmax.f32 %v3141_v57, 0.0 }
 0x22f   : > { %v3136_v4 = vadd.f32 %v12018_v18, %v3135_v27  ;;  %v4059_v23 = vmax.f32 %v3133_v16, 0.0 }
 0x230   : > { %v4062_v55 = vmax.f32 %v3144_v36, 0.0  ;;  %9471 = vmatmul.mubr.msk.bf16.gmra.mrb[12].mxu1 %vm2585_vm3, %v11447_v50 }
 0x231   : > { %v4060_v29 = vmax.f32 %v3136_v4, 0.0  ;;  %9474 = vmatprep.mubr.msk.bf16.mxu1 %vm2585_vm3, %v11473_v33 }
 0x232   : > { %v4300_v24 = vpack.c.bf16 %v4062_v55, %v4061_v63 }
 0x233   : > { %v4299_v9 = vpack.c.bf16 %v4060_v29, %v4059_v23  ;;  %v9368_v48 = vpop.f32.mrb[164].mxu1 }
 0x234   : > { %v3157_v40 = vadd.f32 %v9368_v48, %v12018_v18  ;;  %v3148_v31 = vpop.f32.mrb[165].mxu1 }
 0x235   : > { %v3149_v6 = vadd.f32 %v12018_v18, %v3148_v31  ;;  %v9369_v7 = vpop.f32.mrb[166].mxu1  ;;  %9626 = vmatprep.mubr.msk.bf16.mxu0 %vm2585_vm3, %v4299_v9 }
 0x236   : > { %v3160_v3 = vadd.f32 %v9369_v7, %v12018_v18  ;;  %v3151_v8 = vpop.f32.mrb[167].mxu1  ;;  %9627 = vmatmul.mubr.msk.bf16.gmra.mrb[160].mxu0 %vm2585_vm3, %v4300_v24  ;;  %v4065_v15 = vmax.f32 %v3157_v40, 0.0 }
 0x237   : > { %v3152_v50 = vadd.f32 %v12018_v18, %v3151_v8  ;;  %v4063_v19 = vmax.f32 %v3149_v6, 0.0 }
 0x238   : > { %v4066_v33 = vmax.f32 %v3160_v3, 0.0  ;;  %9475 = vmatmul.mubr.msk.bf16.gmra.mrb[16].mxu1 %vm2585_vm3, %v11470_v28 }
 0x239   : > { %v4064_v60 = vmax.f32 %v3152_v50, 0.0  ;;  %9478 = vmatprep.mubr.msk.bf16.mxu1 %vm2585_vm3, %v11494_v5 }
 0x23a   : > { %v4302_v52 = vpack.c.bf16 %v4066_v33, %v4065_v15 }
 0x23b   : > { %v4301_v35 = vpack.c.bf16 %v4064_v60, %v4063_v19  ;;  %v9372_v32 = vpop.f32.mrb[168].mxu1 }
 0x23c   : > { %v3173_v1 = vadd.f32 %v9372_v32, %v12018_v18  ;;  %v3164_v25 = vpop.f32.mrb[169].mxu1 }
 0x23d   : > { %v3165_v44 = vadd.f32 %v12018_v18, %v3164_v25  ;;  %v9373_v10 = vpop.f32.mrb[170].mxu1  ;;  %9630 = vmatprep.mubr.msk.bf16.mxu0 %vm2585_vm3, %v4301_v35 }
 0x23e   : > { %v3176_v11 = vadd.f32 %v9373_v10, %v12018_v18  ;;  %v3167_v26 = vpop.f32.mrb[171].mxu1  ;;  %9631 = vmatmul.mubr.msk.bf16.gmra.mrb[164].mxu0 %vm2585_vm3, %v4302_v52  ;;  %v4069_v12 = vmax.f32 %v3173_v1, 0.0 }
 0x23f   : > { %v3168_v28 = vadd.f32 %v12018_v18, %v3167_v26  ;;  %v4067_v21 = vmax.f32 %v3165_v44, 0.0 }
 0x240   : > { %v4070_v5 = vmax.f32 %v3176_v11, 0.0  ;;  %9479 = vmatmul.mubr.msk.bf16.gmra.mrb[20].mxu1 %vm2585_vm3, %v11491_v0 }
 0x241   : > { %v4068_v54 = vmax.f32 %v3168_v28, 0.0  ;;  %9482 = vmatprep.mubr.msk.bf16.mxu1 %vm2585_vm3, %v11514_v41 }
 0x242   : > { %v4304_v57 = vpack.c.bf16 %v4070_v5, %v4069_v12 }
 0x243   : > { %v4303_v20 = vpack.c.bf16 %v4068_v54, %v4067_v21  ;;  %v9376_v16 = vpop.f32.mrb[172].mxu1 }
 0x244   : > { %v3189_v47 = vadd.f32 %v9376_v16, %v12018_v18  ;;  %v3180_v36 = vpop.f32.mrb[173].mxu1 }
 0x245   : > { %v3181_v27 = vadd.f32 %v12018_v18, %v3180_v36  ;;  %v9377_v4 = vpop.f32.mrb[174].mxu1  ;;  %9634 = vmatprep.mubr.msk.bf16.mxu0 %vm2585_vm3, %v4303_v20 }
 0x246   : > { %v3192_v63 = vadd.f32 %v9377_v4, %v12018_v18  ;;  %v3183_v55 = vpop.f32.mrb[175].mxu1  ;;  %9635 = vmatmul.mubr.msk.bf16.gmra.mrb[168].mxu0 %vm2585_vm3, %v4304_v57  ;;  %v4073_v23 = vmax.f32 %v3189_v47, 0.0 }
 0x247   : > { %v3184_v0 = vadd.f32 %v12018_v18, %v3183_v55  ;;  %v4071_v29 = vmax.f32 %v3181_v27, 0.0 }
 0x248   : > { %v4074_v41 = vmax.f32 %v3192_v63, 0.0  ;;  %9483 = vmatmul.mubr.msk.bf16.gmra.mrb[24].mxu1 %vm2585_vm3, %v11511_v38 }
 0x249   : > { %v4072_v24 = vmax.f32 %v3184_v0, 0.0  ;;  %9486 = vmatprep.mubr.msk.bf16.mxu1 %vm2585_vm3, %v11534_v14 }
 0x24a   : > { %v4306_v9 = vpack.c.bf16 %v4074_v41, %v4073_v23 }
 0x24b   : > { %v4305_v48 = vpack.c.bf16 %v4072_v24, %v4071_v29  ;;  %v9380_v40 = vpop.f32.mrb[176].mxu1 }
 0x24c   : > { %v3205_v31 = vadd.f32 %v9380_v40, %v12018_v18  ;;  %v3196_v6 = vpop.f32.mrb[177].mxu1 }
 0x24d   : > { %v3197_v7 = vadd.f32 %v12018_v18, %v3196_v6  ;;  %v9381_v3 = vpop.f32.mrb[178].mxu1  ;;  %9638 = vmatprep.mubr.msk.bf16.mxu0 %vm2585_vm3, %v4305_v48 }
 0x24e   : > { %v3208_v8 = vadd.f32 %v9381_v3, %v12018_v18  ;;  %v3199_v50 = vpop.f32.mrb[179].mxu1  ;;  %9639 = vmatmul.mubr.msk.bf16.gmra.mrb[172].mxu0 %vm2585_vm3, %v4306_v9  ;;  %v4077_v15 = vmax.f32 %v3205_v31, 0.0 }
 0x24f   : > { %v3200_v38 = vadd.f32 %v12018_v18, %v3199_v50  ;;  %v4075_v33 = vmax.f32 %v3197_v7, 0.0 }
 0x250   : > { %v4078_v14 = vmax.f32 %v3208_v8, 0.0  ;;  %9487 = vmatmul.mubr.msk.bf16.gmra.mrb[28].mxu1 %vm2585_vm3, %v11531_v2 }
 0x251   : > { %v4076_v19 = vmax.f32 %v3200_v38, 0.0  ;;  %9490 = vmatprep.mubr.msk.bf16.mxu1 %vm2585_vm3, %v11554_v56 }
 0x252   : > { %v4308_v60 = vpack.c.bf16 %v4078_v14, %v4077_v15 }
 0x253   : > { %v4307_v52 = vpack.c.bf16 %v4076_v19, %v4075_v33  ;;  %v9384_v35 = vpop.f32.mrb[180].mxu1 }
 0x254   : > { %v3221_v32 = vadd.f32 %v9384_v35, %v12018_v18  ;;  %v3212_v1 = vpop.f32.mrb[181].mxu1 }
 0x255   : > { %v3213_v25 = vadd.f32 %v12018_v18, %v3212_v1  ;;  %v9385_v44 = vpop.f32.mrb[182].mxu1  ;;  %9642 = vmatprep.mubr.msk.bf16.mxu0 %vm2585_vm3, %v4307_v52 }
 0x256   : > { %v3224_v10 = vadd.f32 %v9385_v44, %v12018_v18  ;;  %v3215_v11 = vpop.f32.mrb[183].mxu1  ;;  %9643 = vmatmul.mubr.msk.bf16.gmra.mrb[176].mxu0 %vm2585_vm3, %v4308_v60  ;;  %v4081_v26 = vmax.f32 %v3221_v32, 0.0 }
 0x257   : > { %v3216_v2 = vadd.f32 %v12018_v18, %v3215_v11  ;;  %v4079_v28 = vmax.f32 %v3213_v25, 0.0 }
 0x258   : > { %v4082_v56 = vmax.f32 %v3224_v10, 0.0  ;;  %9491 = vmatmul.mubr.msk.bf16.gmra.mrb[32].mxu1 %vm2585_vm3, %v11551_v51 }
 0x259   : > { %v4080_v12 = vmax.f32 %v3216_v2, 0.0  ;;  %9494 = vmatprep.mubr.msk.bf16.mxu1 %vm2585_vm3, %v11574_v37 }
 0x25a   : > { %v4310_v5 = vpack.c.bf16 %v4082_v56, %v4081_v26 }
 0x25b   : > { %v4309_v21 = vpack.c.bf16 %v4080_v12, %v4079_v28  ;;  %v9388_v54 = vpop.f32.mrb[184].mxu1 }
 0x25c   : > { %v3237_v57 = vadd.f32 %v9388_v54, %v12018_v18  ;;  %v3228_v20 = vpop.f32.mrb[185].mxu1 }
 0x25d   : > { %v3229_v16 = vadd.f32 %v12018_v18, %v3228_v20  ;;  %v9389_v47 = vpop.f32.mrb[186].mxu1  ;;  %9646 = vmatprep.mubr.msk.bf16.mxu0 %vm2585_vm3, %v4309_v21 }
 0x25e   : > { %v3240_v36 = vadd.f32 %v9389_v47, %v12018_v18  ;;  %v3231_v27 = vpop.f32.mrb[187].mxu1  ;;  %9647 = vmatmul.mubr.msk.bf16.gmra.mrb[180].mxu0 %vm2585_vm3, %v4310_v5  ;;  %v4085_v4 = vmax.f32 %v3237_v57, 0.0 }
 0x25f   : > { %v3232_v51 = vadd.f32 %v12018_v18, %v3231_v27  ;;  %v4083_v63 = vmax.f32 %v3229_v16, 0.0 }
 0x260   : > { %v4086_v37 = vmax.f32 %v3240_v36, 0.0  ;;  %9495 = vmatmul.mubr.msk.bf16.gmra.mrb[36].mxu1 %vm2585_vm3, %v11571_v30 }
 0x261   : > { %v4084_v55 = vmax.f32 %v3232_v51, 0.0  ;;  %9498 = vmatprep.mubr.msk.bf16.mxu1 %vm2585_vm3, %v11597_v17 }
 0x262   : > { %v4312_v0 = vpack.c.bf16 %v4086_v37, %v4085_v4 }
 0x263   : > { %v4311_v23 = vpack.c.bf16 %v4084_v55, %v4083_v63  ;;  %v9392_v41 = vpop.f32.mrb[188].mxu1 }
 0x264   : > { %v3253_v29 = vadd.f32 %v9392_v41, %v12018_v18  ;;  %v3244_v24 = vpop.f32.mrb[189].mxu1 }
 0x265   : > { %v3245_v9 = vadd.f32 %v12018_v18, %v3244_v24  ;;  %v9393_v48 = vpop.f32.mrb[190].mxu1  ;;  %9650 = vmatprep.mubr.msk.bf16.mxu0 %vm2585_vm3, %v4311_v23 }
 0x266   : > { %v3256_v40 = vadd.f32 %v9393_v48, %v12018_v18  ;;  %v3247_v31 = vpop.f32.mrb[191].mxu1  ;;  %9651 = vmatmul.mubr.msk.bf16.gmra.mrb[184].mxu0 %vm2585_vm3, %v4312_v0  ;;  %v4089_v6 = vmax.f32 %v3253_v29, 0.0 }
 0x267   : > { %v3248_v30 = vadd.f32 %v12018_v18, %v3247_v31  ;;  %v4087_v7 = vmax.f32 %v3245_v9, 0.0 }
 0x268   : > { %v4090_v17 = vmax.f32 %v3256_v40, 0.0  ;;  %9499 = vmatmul.mubr.msk.bf16.gmra.mrb[40].mxu1 %vm2585_vm3, %v11594_v13 }
 0x269   : > { %v4088_v3 = vmax.f32 %v3248_v30, 0.0  ;;  %9502 = vmatprep.mubr.msk.bf16.mxu1 %vm2585_vm3, %v11617_v62 }
 0x26a   : > { %v4314_v8 = vpack.c.bf16 %v4090_v17, %v4089_v6 }
 0x26b   : > { %v4313_v50 = vpack.c.bf16 %v4088_v3, %v4087_v7  ;;  %v9396_v38 = vpop.f32.mrb[192].mxu1 }
 0x26c   : > { %v3269_v15 = vadd.f32 %v9396_v38, %v12018_v18  ;;  %v3260_v14 = vpop.f32.mrb[193].mxu1 }
 0x26d   : > { %v3261_v33 = vadd.f32 %v12018_v18, %v3260_v14  ;;  %v9397_v19 = vpop.f32.mrb[194].mxu1  ;;  %9654 = vmatprep.mubr.msk.bf16.mxu0 %vm2585_vm3, %v4313_v50 }
 0x26e   : > { %v3272_v60 = vadd.f32 %v9397_v19, %v12018_v18  ;;  %v3263_v52 = vpop.f32.mrb[195].mxu1  ;;  %9655 = vmatmul.mubr.msk.bf16.gmra.mrb[188].mxu0 %vm2585_vm3, %v4314_v8  ;;  %v4093_v35 = vmax.f32 %v3269_v15, 0.0 }
 0x26f   : > { %v3264_v13 = vadd.f32 %v12018_v18, %v3263_v52  ;;  %v4091_v32 = vmax.f32 %v3261_v33, 0.0 }
 0x270   : > { %v4094_v62 = vmax.f32 %v3272_v60, 0.0  ;;  %9503 = vmatmul.mubr.msk.bf16.gmra.mrb[44].mxu1 %vm2585_vm3, %v11614_v61 }
 0x271   : > { %v4092_v1 = vmax.f32 %v3264_v13, 0.0  ;;  %9506 = vmatprep.mubr.msk.bf16.mxu1 %vm2585_vm3, %v11637_v53 }
 0x272   : > { %v4316_v25 = vpack.c.bf16 %v4094_v62, %v4093_v35 }
 0x273   : > { %v4315_v44 = vpack.c.bf16 %v4092_v1, %v4091_v32  ;;  %v9400_v10 = vpop.f32.mrb[196].mxu1 }
 0x274   : > { %v3285_v11 = vadd.f32 %v9400_v10, %v12018_v18  ;;  %v3276_v2 = vpop.f32.mrb[197].mxu1 }
 0x275   : > { %v3277_v26 = vadd.f32 %v12018_v18, %v3276_v2  ;;  %v9401_v56 = vpop.f32.mrb[198].mxu1  ;;  %9658 = vmatprep.mubr.msk.bf16.mxu0 %vm2585_vm3, %v4315_v44 }
 0x276   : > { %v3288_v28 = vadd.f32 %v9401_v56, %v12018_v18  ;;  %v3279_v12 = vpop.f32.mrb[199].mxu1  ;;  %9659 = vmatmul.mubr.msk.bf16.gmra.mrb[192].mxu0 %vm2585_vm3, %v4316_v25  ;;  %v4097_v5 = vmax.f32 %v3285_v11, 0.0 }
 0x277   : > { %v3280_v61 = vadd.f32 %v12018_v18, %v3279_v12  ;;  %v4095_v21 = vmax.f32 %v3277_v26, 0.0 }
 0x278   : > { %v4098_v53 = vmax.f32 %v3288_v28, 0.0  ;;  %9507 = vmatmul.mubr.msk.bf16.gmra.mrb[48].mxu1 %vm2585_vm3, %v11634_v45 }
 0x279   : > { %v4096_v54 = vmax.f32 %v3280_v61, 0.0  ;;  %9510 = vmatprep.mubr.msk.bf16.mxu1 %vm2585_vm3, %v11657_v43 }
 0x27a   : > { %v4318_v57 = vpack.c.bf16 %v4098_v53, %v4097_v5 }
 0x27b   : > { %v4317_v20 = vpack.c.bf16 %v4096_v54, %v4095_v21  ;;  %v9404_v16 = vpop.f32.mrb[200].mxu1 }
 0x27c   : > { %v3301_v47 = vadd.f32 %v9404_v16, %v12018_v18  ;;  %v3292_v36 = vpop.f32.mrb[201].mxu1 }
 0x27d   : > { %v3293_v27 = vadd.f32 %v12018_v18, %v3292_v36  ;;  %v9405_v51 = vpop.f32.mrb[202].mxu1  ;;  %9662 = vmatprep.mubr.msk.bf16.mxu0 %vm2585_vm3, %v4317_v20 }
 0x27e   : > { %v3304_v4 = vadd.f32 %v9405_v51, %v12018_v18  ;;  %v3295_v37 = vpop.f32.mrb[203].mxu1  ;;  %9663 = vmatmul.mubr.msk.bf16.gmra.mrb[196].mxu0 %vm2585_vm3, %v4318_v57  ;;  %v4101_v63 = vmax.f32 %v3301_v47, 0.0 }
 0x27f   : > { %v3296_v45 = vadd.f32 %v12018_v18, %v3295_v37  ;;  %v4099_v55 = vmax.f32 %v3293_v27, 0.0  ;;  %v14141_v27 = vld [vmem:[#allocation2_spill] sm:$0xff]  ;;  %v14142_v37 = vld [vmem:[#allocation4_spill] sm:$0xff] }
 0x280   : > { %v4102_v43 = vmax.f32 %v3304_v4, 0.0  ;;  %9511 = vmatmul.mubr.msk.bf16.gmra.mrb[52].mxu1 %vm2585_vm3, %v11654_v58 }
 0x281   : > { %v4100_v0 = vmax.f32 %v3296_v45, 0.0  ;;  %9514 = vmatprep.mubr.msk.bf16.mxu1 %vm2585_vm3, %v11682_v42 }
 0x282   : > { %v4320_v23 = vpack.c.bf16 %v4102_v43, %v4101_v63 }
 0x283   : > { %v4319_v41 = vpack.c.bf16 %v4100_v0, %v4099_v55  ;;  %v9408_v29 = vpop.f32.mrb[204].mxu1 }
 0x284   : > { %v3317_v24 = vadd.f32 %v9408_v29, %v12018_v18  ;;  %v3308_v9 = vpop.f32.mrb[205].mxu1 }
 0x285   : > { %v3309_v48 = vadd.f32 %v12018_v18, %v3308_v9  ;;  %v9409_v40 = vpop.f32.mrb[206].mxu1  ;;  %9666 = vmatprep.mubr.msk.bf16.mxu0 %vm2585_vm3, %v4319_v41 }
 0x286   : > { %v3320_v31 = vadd.f32 %v9409_v40, %v12018_v18  ;;  %v3311_v30 = vpop.f32.mrb[207].mxu1  ;;  %9667 = vmatmul.mubr.msk.bf16.gmra.mrb[200].mxu0 %vm2585_vm3, %v4320_v23  ;;  %v4105_v6 = vmax.f32 %v3317_v24, 0.0 }
 0x287   : > { %v3312_v58 = vadd.f32 %v12018_v18, %v3311_v30  ;;  %v4103_v17 = vmax.f32 %v3309_v48, 0.0 }
 0x288   : > { %v4106_v42 = vmax.f32 %v3320_v31, 0.0  ;;  %9515 = vmatmul.mubr.msk.bf16.gmra.mrb[56].mxu1 %vm2585_vm3, %v11674_v34  ;;  %v14143_v31 = vld [vmem:[#allocation3_spill] sm:$0xff] }
 0x289   : > { %v4104_v7 = vmax.f32 %v3312_v58, 0.0  ;;  %9518 = vmatprep.mubr.msk.bf16.mxu1 %vm2585_vm3, %v11702_v46 }
 0x28a   : > { %v4322_v3 = vpack.c.bf16 %v4106_v42, %v4105_v6  ;;  %v14144_v6 = vld [vmem:[#allocation6_spill] sm:$0xff] }
 0x28b   : > { %v4321_v8 = vpack.c.bf16 %v4104_v7, %v4103_v17  ;;  %v9412_v50 = vpop.f32.mrb[208].mxu1 }
 0x28c   : > { %v3333_v38 = vadd.f32 %v9412_v50, %v12018_v18  ;;  %v3324_v15 = vpop.f32.mrb[209].mxu1 }
 0x28d   : > { %v3325_v14 = vadd.f32 %v12018_v18, %v3324_v15  ;;  %v9413_v33 = vpop.f32.mrb[210].mxu1  ;;  %9670 = vmatprep.mubr.msk.bf16.mxu0 %vm2585_vm3, %v4321_v8 }
 0x28e   : > { %v3336_v19 = vadd.f32 %v9413_v33, %v12018_v18  ;;  %v3327_v60 = vpop.f32.mrb[211].mxu1  ;;  %9671 = vmatmul.mubr.msk.bf16.gmra.mrb[204].mxu0 %vm2585_vm3, %v4322_v3  ;;  %v4109_v52 = vmax.f32 %v3333_v38, 0.0 }
 0x28f   : > { %v3328_v34 = vadd.f32 %v12018_v18, %v3327_v60  ;;  %v4107_v13 = vmax.f32 %v3325_v14, 0.0 }
 0x290   : > { %v4110_v46 = vmax.f32 %v3336_v19, 0.0  ;;  %9519 = vmatmul.mubr.msk.bf16.gmra.mrb[60].mxu1 %vm2585_vm3, %v11699_v39 }
 0x291   : > { %v4108_v35 = vmax.f32 %v3328_v34, 0.0  ;;  %9522 = vmatprep.mubr.msk.bf16.mxu1 %vm2585_vm3, %v11722_v49  ;;  %v14145_v34 = vld [vmem:[#allocation5_spill] sm:$0xff] }
 0x292   : > { %v4324_v62 = vpack.c.bf16 %v4110_v46, %v4109_v52 }
 0x293   : > { %v4323_v32 = vpack.c.bf16 %v4108_v35, %v4107_v13  ;;  %v9416_v1 = vpop.f32.mrb[212].mxu1  ;;  %v14146_v13 = vld [vmem:[#allocation8_spill] sm:$0xff] }
 0x294   : > { %v3349_v25 = vadd.f32 %v9416_v1, %v12018_v18  ;;  %v3340_v44 = vpop.f32.mrb[213].mxu1 }
 0x295   : > { %v3341_v10 = vadd.f32 %v12018_v18, %v3340_v44  ;;  %v9417_v11 = vpop.f32.mrb[214].mxu1  ;;  %9674 = vmatprep.mubr.msk.bf16.mxu0 %vm2585_vm3, %v4323_v32 }
 0x296   : > { %v3352_v2 = vadd.f32 %v9417_v11, %v12018_v18  ;;  %v3343_v26 = vpop.f32.mrb[215].mxu1  ;;  %9675 = vmatmul.mubr.msk.bf16.gmra.mrb[208].mxu0 %vm2585_vm3, %v4324_v62  ;;  %v4113_v56 = vmax.f32 %v3349_v25, 0.0 }
 0x297   : > { %v3344_v39 = vadd.f32 %v12018_v18, %v3343_v26  ;;  %v4111_v28 = vmax.f32 %v3341_v10, 0.0 }
 0x298   : > { %v4114_v49 = vmax.f32 %v3352_v2, 0.0  ;;  %9523 = vmatmul.mubr.msk.bf16.gmra.mrb[64].mxu1 %vm2585_vm3, %v11719_v22 }
 0x299   : > { %v4112_v12 = vmax.f32 %v3344_v39, 0.0  ;;  %9526 = vmatprep.mubr.msk.bf16.mxu1 %vm2585_vm3, %v11742_v59 }
 0x29a   : > { %v4326_v61 = vpack.c.bf16 %v4114_v49, %v4113_v56  ;;  %v14147_v49 = vld [vmem:[#allocation7_spill] sm:$0xff] }
 0x29b   : > { %v4325_v5 = vpack.c.bf16 %v4112_v12, %v4111_v28  ;;  %v9420_v53 = vpop.f32.mrb[216].mxu1 }
 0x29c   : > { %v3365_v21 = vadd.f32 %v9420_v53, %v12018_v18  ;;  %v3356_v54 = vpop.f32.mrb[217].mxu1 }
 0x29d   : > { %v3357_v57 = vadd.f32 %v12018_v18, %v3356_v54  ;;  %v9421_v20 = vpop.f32.mrb[218].mxu1  ;;  %9678 = vmatprep.mubr.msk.bf16.mxu0 %vm2585_vm3, %v4325_v5 }
 0x29e   : > { %v3368_v16 = vadd.f32 %v9421_v20, %v12018_v18  ;;  %v3359_v47 = vpop.f32.mrb[219].mxu1  ;;  %9679 = vmatmul.mubr.msk.bf16.gmra.mrb[212].mxu0 %vm2585_vm3, %v4326_v61  ;;  %v4117_v36 = vmax.f32 %v3365_v21, 0.0  ;;  %v14148_v61 = vld [vmem:[#allocation10_spill] sm:$0xff] }
 0x29f   : > { %v3360_v22 = vadd.f32 %v12018_v18, %v3359_v47  ;;  %v4115_v51 = vmax.f32 %v3357_v57, 0.0 }
 0x2a0   : > { %v4118_v59 = vmax.f32 %v3368_v16, 0.0  ;;  %9527 = vmatmul.mubr.msk.bf16.gmra.mrb[68].mxu1 %vm2585_vm3, %v14141_v27 }
 0x2a1   : > { %v4116_v4 = vmax.f32 %v3360_v22, 0.0  ;;  %9530 = vmatprep.mubr.msk.bf16.mxu1 %vm2585_vm3, %v14142_v37 }
 0x2a2   : > { %v4328_v45 = vpack.c.bf16 %v4118_v59, %v4117_v36 }
 0x2a3   : > { %v4327_v63 = vpack.c.bf16 %v4116_v4, %v4115_v51  ;;  %v9424_v43 = vpop.f32.mrb[220].mxu1  ;;  %v14149_v51 = vld [vmem:[#allocation9_spill] sm:$0xff] }
 0x2a4   : > { %v3381_v55 = vadd.f32 %v9424_v43, %v12018_v18  ;;  %v3372_v0 = vpop.f32.mrb[221].mxu1 }
 0x2a5   : > { %v3373_v23 = vadd.f32 %v12018_v18, %v3372_v0  ;;  %v9425_v41 = vpop.f32.mrb[222].mxu1  ;;  %9682 = vmatprep.mubr.msk.bf16.mxu0 %vm2585_vm3, %v4327_v63 }
 0x2a6   : > { %v3384_v29 = vadd.f32 %v9425_v41, %v12018_v18  ;;  %v3375_v24 = vpop.f32.mrb[223].mxu1  ;;  %9683 = vmatmul.mubr.msk.bf16.gmra.mrb[216].mxu0 %vm2585_vm3, %v4328_v45  ;;  %v4121_v48 = vmax.f32 %v3381_v55, 0.0  ;;  %v14150_v45 = vld [vmem:[#allocation12_spill] sm:$0xff] }
 0x2a7   : > { %v3376_v9 = vadd.f32 %v12018_v18, %v3375_v24  ;;  %v4119_v30 = vmax.f32 %v3373_v23, 0.0 }
 0x2a8   : > { %v4122_v40 = vmax.f32 %v3384_v29, 0.0  ;;  %9531 = vmatmul.mubr.msk.bf16.gmra.mrb[72].mxu1 %vm2585_vm3, %v14143_v31  ;;  %v12315_v31 = vld [vmem:[%s14109_s6] ss:$0 sm:$0xff] }
 0x2a9   : > { %v4120_v58 = vmax.f32 %v3376_v9, 0.0  ;;  %9534 = vmatprep.mubr.msk.bf16.mxu1 %vm2585_vm3, %v14144_v6  ;;  %v14151_v6 = vld [vmem:[#allocation11_spill] sm:$0xff] }
 0x2aa   : > { %v4330_v42 = vpack.c.bf16 %v4122_v40, %v4121_v48  ;;  %v12309_v48 = vld [vmem:[%s14107_s4] ss:$0 sm:$0xff] }
 0x2ab   : > { %v4329_v17 = vpack.c.bf16 %v4120_v58, %v4119_v30  ;;  %v9428_v7 = vpop.f32.mrb[224].mxu1 }
 0x2ac   : > { %v3397_v3 = vadd.f32 %v9428_v7, %v12018_v18  ;;  %v3388_v8 = vpop.f32.mrb[225].mxu1 }
 0x2ad   : > { %v3389_v50 = vadd.f32 %v12018_v18, %v3388_v8  ;;  %v9429_v38 = vpop.f32.mrb[226].mxu1  ;;  %9686 = vmatprep.mubr.msk.bf16.mxu0 %vm2585_vm3, %v4329_v17  ;;  %v14152_v17 = vld [vmem:[#allocation14_spill] sm:$0xff] }
 0x2ae   : > { %v3400_v15 = vadd.f32 %v9429_v38, %v12018_v18  ;;  %v3391_v14 = vpop.f32.mrb[227].mxu1  ;;  %9687 = vmatmul.mubr.msk.bf16.gmra.mrb[220].mxu0 %vm2585_vm3, %v4330_v42  ;;  %v4125_v19 = vmax.f32 %v3397_v3, 0.0 }
 0x2af   : > { %v3392_v33 = vadd.f32 %v12018_v18, %v3391_v14  ;;  %v4123_v52 = vmax.f32 %v3389_v50, 0.0 }
 0x2b0   : > { %v4126_v60 = vmax.f32 %v3400_v15, 0.0  ;;  %9535 = vmatmul.mubr.msk.bf16.gmra.mrb[76].mxu1 %vm2585_vm3, %v14145_v34 }
 0x2b1   : > { %v4124_v46 = vmax.f32 %v3392_v33, 0.0  ;;  %9538 = vmatprep.mubr.msk.bf16.mxu1 %vm2585_vm3, %v14146_v13 }
 0x2b2   : > { %v4332_v35 = vpack.c.bf16 %v4126_v60, %v4125_v19 }
 0x2b3   : > { %v4331_v62 = vpack.c.bf16 %v4124_v46, %v4123_v52  ;;  %v9432_v32 = vpop.f32.mrb[228].mxu1 }
 0x2b4   : > { %v3413_v1 = vadd.f32 %v9432_v32, %v12018_v18  ;;  %v3404_v25 = vpop.f32.mrb[229].mxu1 }
 0x2b5   : > { %v3405_v44 = vadd.f32 %v12018_v18, %v3404_v25  ;;  %v9433_v10 = vpop.f32.mrb[230].mxu1  ;;  %9690 = vmatprep.mubr.msk.bf16.mxu0 %vm2585_vm3, %v4331_v62 }
 0x2b6   : > { %v3416_v11 = vadd.f32 %v9433_v10, %v12018_v18  ;;  %v3407_v2 = vpop.f32.mrb[231].mxu1  ;;  %9691 = vmatmul.mubr.msk.bf16.gmra.mrb[224].mxu0 %vm2585_vm3, %v4332_v35  ;;  %v4129_v39 = vmax.f32 %v3413_v1, 0.0 }
 0x2b7   : > { %v3408_v26 = vadd.f32 %v12018_v18, %v3407_v2  ;;  %v4127_v28 = vmax.f32 %v3405_v44, 0.0 }
 0x2b8   : > { %v4130_v56 = vmax.f32 %v3416_v11, 0.0  ;;  %9539 = vmatmul.mubr.msk.bf16.gmra.mrb[80].mxu1 %vm2585_vm3, %v14147_v49 }
 0x2b9   : > { %v4128_v12 = vmax.f32 %v3408_v26, 0.0  ;;  %9542 = vmatprep.mubr.msk.bf16.mxu1 %vm2585_vm3, %v14148_v61 }
 0x2ba   : > { %v4334_v5 = vpack.c.bf16 %v4130_v56, %v4129_v39  ;;  %v14153_v39 = vld [vmem:[#allocation13_spill] sm:$0xff] }
 0x2bb   : > { %v4333_v53 = vpack.c.bf16 %v4128_v12, %v4127_v28  ;;  %v9436_v21 = vpop.f32.mrb[232].mxu1  ;;  %v14154_v28 = vld [vmem:[#allocation16_spill] sm:$0xff] }
 0x2bc   : > { %v3429_v54 = vadd.f32 %v9436_v21, %v12018_v18  ;;  %v3420_v57 = vpop.f32.mrb[233].mxu1 }
 0x2bd   : > { %v3421_v20 = vadd.f32 %v12018_v18, %v3420_v57  ;;  %v9437_v16 = vpop.f32.mrb[234].mxu1  ;;  %9694 = vmatprep.mubr.msk.bf16.mxu0 %vm2585_vm3, %v4333_v53 }
 0x2be   : > { %v3432_v47 = vadd.f32 %v9437_v16, %v12018_v18  ;;  %v3423_v22 = vpop.f32.mrb[235].mxu1  ;;  %9695 = vmatmul.mubr.msk.bf16.gmra.mrb[228].mxu0 %vm2585_vm3, %v4334_v5  ;;  %v4133_v59 = vmax.f32 %v3429_v54, 0.0 }
 0x2bf   : > { %v3424_v36 = vadd.f32 %v12018_v18, %v3423_v22  ;;  %v4131_v4 = vmax.f32 %v3421_v20, 0.0 }
 0x2c0   : > { %v4134_v27 = vmax.f32 %v3432_v47, 0.0  ;;  %9543 = vmatmul.mubr.msk.bf16.gmra.mrb[84].mxu1 %vm2585_vm3, %v14149_v51 }
 0x2c1   : > { %v4132_v37 = vmax.f32 %v3424_v36, 0.0  ;;  %9546 = vmatprep.mubr.msk.bf16.mxu1 %vm2585_vm3, %v14150_v45 }
 0x2c2   : > { %v4336_v63 = vpack.c.bf16 %v4134_v27, %v4133_v59 }
 0x2c3   : > { %v4335_v43 = vpack.c.bf16 %v4132_v37, %v4131_v4  ;;  %v9440_v55 = vpop.f32.mrb[236].mxu1 }
 0x2c4   : > { %v3445_v0 = vadd.f32 %v9440_v55, %v12018_v18  ;;  %v3436_v23 = vpop.f32.mrb[237].mxu1 }
 0x2c5   : > { %v3437_v41 = vadd.f32 %v12018_v18, %v3436_v23  ;;  %v9441_v29 = vpop.f32.mrb[238].mxu1  ;;  %9698 = vmatprep.mubr.msk.bf16.mxu0 %vm2585_vm3, %v4335_v43 }
 0x2c6   : > { %v3448_v24 = vadd.f32 %v9441_v29, %v12018_v18  ;;  %v3439_v9 = vpop.f32.mrb[239].mxu1  ;;  %9699 = vmatmul.mubr.msk.bf16.gmra.mrb[232].mxu0 %vm2585_vm3, %v4336_v63  ;;  %v4137_v30 = vmax.f32 %v3445_v0, 0.0 }
 0x2c7   : > { %v3440_v40 = vadd.f32 %v12309_v48, %v3439_v9  ;;  %v4135_v18 = vmax.f32 %v3437_v41, 0.0 }
 0x2c8   : > { %v4138_v58 = vmax.f32 %v3448_v24, 0.0  ;;  %9547 = vmatmul.mubr.msk.bf16.gmra.mrb[88].mxu1 %vm2585_vm3, %v14151_v6  ;;  %v14155_v24 = vld [vmem:[#allocation15_spill] sm:$0xff]  ;;  %v14156_v6 = vld [vmem:[#allocation18_spill] sm:$0xff] }
 0x2c9   : > { %v4136_v42 = vmax.f32 %v3440_v40, 0.0  ;;  %9550 = vmatprep.mubr.msk.bf16.mxu1 %vm2585_vm3, %v14152_v17  ;;  %v9596_v7 = vpop.f32.mrb[128].mxu0 }
 0x2ca   : > { %v4338_v3 = vpack.c.bf16 %v4138_v58, %v4137_v30  ;;  %v4877_v8 = vadd.f32 %v9596_v7, %v12315_v31  ;;  %v4868_v50 = vpop.f32.mrb[129].mxu0 }
 0x2cb   : > { %v4337_v38 = vpack.c.bf16 %v4136_v42, %v4135_v18  ;;  %v4869_v15 = vadd.f32 %v12315_v31, %v4868_v50  ;;  %v9444_v14 = vpop.f32.mrb[240].mxu1  ;;  %v9597_v33 = vpop.f32.mrb[130].mxu0 }
 0x2cc   : > { %v8411_v19 = vmul.f32 -1.442695, %v4877_v8  ;;  %v3461_v60 = vadd.f32 %v12309_v48, %v9444_v14  ;;  %v4880_v34 = vadd.f32 %v9597_v33, %v12315_v31  ;;  %v3452_v52 = vpop.f32.mrb[241].mxu1  ;;  %v4871_v46 = vpop.f32.mrb[131].mxu0 }
 0x2cd   : > { %v8409_v13 = vmul.f32 -1.442695, %v4869_v15  ;;  %v3453_v35 = vadd.f32 %v12309_v48, %v3452_v52  ;;  %v4872_v62 = vadd.f32 %v12315_v31, %v4871_v46  ;;  %v9445_v32 = vpop.f32.mrb[242].mxu1  ;;  %9702 = vmatprep.mubr.msk.bf16.mxu0 %vm2585_vm3, %v4337_v38 }
 0x2ce   : > { %9873 = vpow2.f32 %v8411_v19  ;;  %v8412_v1 = vmul.f32 -1.442695, %v4880_v34  ;;  %v3464_v25 = vadd.f32 %v12309_v48, %v9445_v32  ;;  %v3455_v44 = vpop.f32.mrb[243].mxu1  ;;  %9703 = vmatmul.mubr.msk.bf16.gmra.mrb[236].mxu0 %vm2585_vm3, %v4338_v3  ;;  %v4141_v2 = vmax.f32 %v3461_v60, 0.0 }
 0x2cf   : > { %9875 = vpow2.f32 %v8409_v13  ;;  %v8410_v10 = vmul.f32 -1.442695, %v4872_v62  ;;  %v3456_v11 = vadd.f32 %v12309_v48, %v3455_v44  ;;  %v4139_v56 = vmax.f32 %v3453_v35, 0.0 }
 0x2d0   : > { %9877 = vpow2.f32 %v8412_v1  ;;  %v4142_v26 = vmax.f32 %v3464_v25, 0.0  ;;  %9551 = vmatmul.mubr.msk.bf16.gmra.mrb[92].mxu1 %vm2585_vm3, %v14153_v39 }
 0x2d1   : > { %9879 = vpow2.f32 %v8410_v10  ;;  %v4140_v49 = vmax.f32 %v3456_v11, 0.0  ;;  %9554 = vmatprep.mubr.msk.bf16.mxu1 %vm2585_vm3, %v14154_v28  ;;  %v9600_v12 = vpop.f32.mrb[132].mxu0  ;;  %v14157_v28 = vld [vmem:[#allocation17_spill] sm:$0xff] }
 0x2d2   : > { %v4340_v61 = vpack.c.bf16 %v4142_v26, %v4141_v2  ;;  %v4893_v5 = vadd.f32 %v9600_v12, %v12315_v31  ;;  %v4884_v53 = vpop.f32.mrb[133].mxu0 }
 0x2d3   : > { %v4339_v21 = vpack.c.bf16 %v4140_v49, %v4139_v56  ;;  %v4885_v54 = vadd.f32 %v12315_v31, %v4884_v53  ;;  %v9448_v57 = vpop.f32.mrb[244].mxu1  ;;  %v9601_v20 = vpop.f32.mrb[134].mxu0 }
 0x2d4   : > { %v8415_v16 = vmul.f32 -1.442695, %v4893_v5  ;;  %v3477_v47 = vadd.f32 %v12309_v48, %v9448_v57  ;;  %v4896_v22 = vadd.f32 %v9601_v20, %v12315_v31  ;;  %v3468_v36 = vpop.f32.mrb[245].mxu1  ;;  %v4887_v59 = vpop.f32.mrb[135].mxu0 }
 0x2d5   : > { %v8413_v27 = vmul.f32 -1.442695, %v4885_v54  ;;  %v3469_v51 = vadd.f32 %v12309_v48, %v3468_v36  ;;  %v4888_v4 = vadd.f32 %v12315_v31, %v4887_v59  ;;  %v9449_v37 = vpop.f32.mrb[246].mxu1  ;;  %9706 = vmatprep.mubr.msk.bf16.mxu0 %vm2585_vm3, %v4339_v21  ;;  %v14158_v21 = vld [vmem:[#allocation20_spill] sm:$0xff]  ;;  %v12367_v59 = vld [vmem:[%s14110_s7] ss:$0 sm:$0xff] }
 0x2d6   : > { %9881 = vpow2.f32 %v8415_v16  ;;  %v8416_v45 = vmul.f32 -1.442695, %v4896_v22  ;;  %v3480_v63 = vadd.f32 %v12309_v48, %v9449_v37  ;;  %v3471_v43 = vpop.f32.mrb[247].mxu1  ;;  %9707 = vmatmul.mubr.msk.bf16.gmra.mrb[240].mxu0 %vm2585_vm3, %v4340_v61  ;;  %v4145_v41 = vmax.f32 %v3477_v47, 0.0 }
 0x2d7   : > { %9883 = vpow2.f32 %v8413_v27  ;;  %v8414_v55 = vmul.f32 -1.442695, %v4888_v4  ;;  %v3472_v0 = vadd.f32 %v12309_v48, %v3471_v43  ;;  %v4143_v30 = vmax.f32 %v3469_v51, 0.0 }
 0x2d8   : > { %v9874_v23 = vpop.eup %9873  ;;  %9885 = vpow2.f32 %v8416_v45  ;;  %v4146_v29 = vmax.f32 %v3480_v63, 0.0  ;;  %9555 = vmatmul.mubr.msk.bf16.gmra.mrb[96].mxu1 %vm2585_vm3, %v14155_v24 }
 0x2d9   : > { %v9876_v9 = vpop.eup %9875  ;;  %v6661_v40 = vadd.f32 1.0, %v9874_v23  ;;  %9887 = vpow2.f32 %v8414_v55  ;;  %v4144_v58 = vmax.f32 %v3472_v0, 0.0  ;;  %9558 = vmatprep.mubr.msk.bf16.mxu1 %vm2585_vm3, %v14156_v6  ;;  %v9604_v18 = vpop.f32.mrb[136].mxu0 }
 0x2da   : > { %v9878_v42 = vpop.eup %9877  ;;  %v6659_v17 = vadd.f32 1.0, %v9876_v9  ;;  %v4342_v7 = vpack.c.bf16 %v4146_v29, %v4145_v41  ;;  %v4909_v3 = vadd.f32 %v9604_v18, %v12315_v31  ;;  %v4900_v8 = vpop.f32.mrb[137].mxu0 }
 0x2db   : > { %v9880_v50 = vpop.eup %9879  ;;  %9889 = vrcp.f32 %v6661_v40  ;;  %v6662_v38 = vadd.f32 1.0, %v9878_v42  ;;  %v4341_v15 = vpack.c.bf16 %v4144_v58, %v4143_v30  ;;  %v4901_v14 = vadd.f32 %v12315_v31, %v4900_v8  ;;  %v9452_v33 = vpop.f32.mrb[248].mxu1 }
 0x2dc   : > { %v9605_v19 = vpop.f32.mrb[138].mxu0  ;;  %9891 = vrcp.f32 %v6659_v17  ;;  %v6660_v60 = vadd.f32 1.0, %v9880_v50  ;;  %v8419_v34 = vmul.f32 -1.442695, %v4909_v3  ;;  %v3493_v52 = vadd.f32 %v12309_v48, %v9452_v33  ;;  %v3484_v46 = vpop.f32.mrb[249].mxu1 }
 0x2dd   : > { %v4903_v13 = vpop.f32.mrb[139].mxu0  ;;  %9893 = vrcp.f32 %v6662_v38  ;;  %v8417_v35 = vmul.f32 -1.442695, %v4901_v14  ;;  %v4912_v62 = vadd.f32 %v9605_v19, %v12315_v31  ;;  %v3485_v32 = vadd.f32 %v12309_v48, %v3484_v46  ;;  %v9453_v1 = vpop.f32.mrb[250].mxu1  ;;  %9710 = vmatprep.mubr.msk.bf16.mxu0 %vm2585_vm3, %v4341_v15  ;;  %v14159_v15 = vld [vmem:[#allocation19_spill] sm:$0xff] }
 0x2de   : > { %9895 = vrcp.f32 %v6660_v60  ;;  %v4904_v25 = vadd.f32 %v12315_v31, %v4903_v13  ;;  %v3496_v44 = vadd.f32 %v12309_v48, %v9453_v1  ;;  %v3487_v10 = vpop.f32.mrb[251].mxu1  ;;  %9711 = vmatmul.mubr.msk.bf16.gmra.mrb[244].mxu0 %vm2585_vm3, %v4342_v7  ;;  %v4149_v39 = vmax.f32 %v3493_v52, 0.0 }
 0x2df   : > { %9897 = vpow2.f32 %v8419_v34  ;;  %v8420_v11 = vmul.f32 -1.442695, %v4912_v62  ;;  %v3488_v2 = vadd.f32 %v12309_v48, %v3487_v10  ;;  %v4147_v5 = vmax.f32 %v3485_v32, 0.0  ;;  %v14160_v34 = vld [vmem:[#allocation22_spill] sm:$0xff] }
 0x2e0   : > { %v9882_v26 = vpop.eup %9881  ;;  %9899 = vpow2.f32 %v8417_v35  ;;  %v8418_v56 = vmul.f32 -1.442695, %v4904_v25  ;;  %v4150_v49 = vmax.f32 %v3496_v44, 0.0  ;;  %9559 = vmatmul.mubr.msk.bf16.gmra.mrb[100].mxu1 %vm2585_vm3, %v14157_v28 }
 0x2e1   : > { %v9884_v12 = vpop.eup %9883  ;;  %v6665_v61 = vadd.f32 1.0, %v9882_v26  ;;  %9901 = vpow2.f32 %v8420_v11  ;;  %v4148_v53 = vmax.f32 %v3488_v2, 0.0  ;;  %9562 = vmatprep.mubr.msk.bf16.mxu1 %vm2585_vm3, %v14158_v21  ;;  %v9608_v54 = vpop.f32.mrb[140].mxu0 }
 0x2e2   : > { %v9886_v57 = vpop.eup %9885  ;;  %v6663_v20 = vadd.f32 1.0, %v9884_v12  ;;  %9903 = vpow2.f32 %v8418_v56  ;;  %v4344_v16 = vpack.c.bf16 %v4150_v49, %v4149_v39  ;;  %v4925_v47 = vadd.f32 %v9608_v54, %v12315_v31  ;;  %v4916_v22 = vpop.f32.mrb[141].mxu0 }
 0x2e3   : > { %v9888_v36 = vpop.eup %9887  ;;  %9905 = vrcp.f32 %v6665_v61  ;;  %v6666_v27 = vadd.f32 1.0, %v9886_v57  ;;  %v4343_v51 = vpack.c.bf16 %v4148_v53, %v4147_v5  ;;  %v4917_v4 = vadd.f32 %v12315_v31, %v4916_v22  ;;  %v9456_v37 = vpop.f32.mrb[252].mxu1 }
 0x2e4   : > { %v9609_v45 = vpop.f32.mrb[142].mxu0  ;;  %9907 = vrcp.f32 %v6663_v20  ;;  %v6664_v63 = vadd.f32 1.0, %v9888_v36  ;;  %v8423_v43 = vmul.f32 -1.442695, %v4925_v47  ;;  %v3500_v55 = vpop.f32.mrb[253].mxu1  ;;  %v3509_v29 = vadd.f32 %v12309_v48, %v9456_v37 }
 0x2e5   : > { %v4919_v0 = vpop.f32.mrb[143].mxu0  ;;  %v9890_v23 = vpop.eup %9889  ;;  %9909 = vrcp.f32 %v6666_v27  ;;  %v8421_v41 = vmul.f32 -1.442695, %v4917_v4  ;;  %v4928_v24 = vadd.f32 %v9609_v45, %v12315_v31  ;;  %9714 = vmatprep.mubr.msk.bf16.mxu0 %vm2585_vm3, %v4343_v51  ;;  %v3501_v7 = vadd.f32 %v12309_v48, %v3500_v55 }
 0x2e6   : > { %v9457_v9 = vpop.f32.mrb[254].mxu1  ;;  %v9892_v40 = vpop.eup %9891  ;;  %v7436_v30 = vmul.f32 %v9890_v23, %v12367_v59  ;;  %9911 = vrcp.f32 %v6664_v63  ;;  %v4920_v58 = vadd.f32 %v12315_v31, %v4919_v0  ;;  %9715 = vmatmul.mubr.msk.bf16.gmra.mrb[248].mxu0 %vm2585_vm3, %v4344_v16  ;;  %v4153_v19 = vmax.f32 %v3509_v29, 0.0  ;;  %v14161_v0 = vld [vmem:[#allocation21_spill] sm:$0xff] }
 0x2e7   : > { %v3503_v6 = vpop.f32.mrb[255].mxu1  ;;  %v9894_v18 = vpop.eup %9893  ;;  %v7434_v42 = vmul.f32 %v9892_v40, %v12367_v59  ;;  %9913 = vpow2.f32 %v8423_v43  ;;  %v8424_v17 = vmul.f32 -1.442695, %v4928_v24  ;;  %v3512_v38 = vadd.f32 %v12309_v48, %v9457_v9  ;;  %v14162_v9 = vld [vmem:[#allocation24_spill] sm:$0xff] }
 0x2e8   : > { %v9896_v3 = vpop.eup %9895  ;;  %7693 = vst.msk [vmem:[%s12375_s30 + $0x10] sm:$0xff] %vm7690_vm4, %v7436_v30  ;;  %v7437_v8 = vmul.f32 %v9894_v18, %v12367_v59  ;;  %9915 = vpow2.f32 %v8421_v41  ;;  %v8422_v50 = vmul.f32 -1.442695, %v4920_v58  ;;  %9563 = vmatmul.mubr.msk.bf16.gmra.mrb[104].mxu1 %vm2585_vm3, %v14159_v15  ;;  %v3504_v60 = vadd.f32 %v12309_v48, %v3503_v6 }
 0x2e9   : > { %v9898_v14 = vpop.eup %9897  ;;  %7691 = vst.msk [vmem:[%s12375_s30] sm:$0xff] %vm7690_vm4, %v7434_v42  ;;  %v7435_v33 = vmul.f32 %v9896_v3, %v12367_v59  ;;  %9917 = vpow2.f32 %v8424_v17  ;;  %9566 = vmatprep.mubr.msk.bf16.mxu1 %vm2585_vm3, %v14160_v34  ;;  %v9612_v52 = vpop.f32.mrb[144].mxu0  ;;  %v4154_v35 = vmax.f32 %v3512_v38, 0.0  ;;  %v4151_v44 = vmax.f32 %v3501_v7, 0.0 }
 0x2ea   : > { %v9900_v46 = vpop.eup %9899  ;;  %7694 = vst.msk [vmem:[%s12375_s30 + $0x18] sm:$0xff] %vm7690_vm4, %v7437_v8  ;;  %v6669_v13 = vadd.f32 1.0, %v9898_v14  ;;  %9919 = vpow2.f32 %v8422_v50  ;;  %v4941_v62 = vadd.f32 %v9612_v52, %v12315_v31  ;;  %v4932_v32 = vpop.f32.mrb[145].mxu0  ;;  %v4152_v10 = vmax.f32 %v3504_v60, 0.0 }
 0x2eb   : > { %v9902_v1 = vpop.eup %9901  ;;  %7692 = vst.msk [vmem:[%s12375_s30 + $0x8] sm:$0xff] %vm7690_vm4, %v7435_v33  ;;  %v6667_v25 = vadd.f32 1.0, %v9900_v46  ;;  %v4933_v11 = vadd.f32 %v12315_v31, %v4932_v32  ;;  %v9460_v2 = vpop.f32.mrb[0].mxu1  ;;  %v4346_v49 = vpack.c.bf16 %v4154_v35, %v4153_v19 }
 0x2ec   : > { %v9613_v26 = vpop.f32.mrb[146].mxu0  ;;  %v9904_v39 = vpop.eup %9903  ;;  %9921 = vrcp.f32 %v6669_v13  ;;  %v6670_v56 = vadd.f32 1.0, %v9902_v1  ;;  %v8427_v28 = vmul.f32 -1.442695, %v4941_v62  ;;  %v4345_v21 = vpack.c.bf16 %v4152_v10, %v4151_v44 }
 0x2ed   : > { %v3516_v12 = vpop.f32.mrb[1].mxu1  ;;  %v4935_v61 = vpop.f32.mrb[147].mxu0  ;;  %9923 = vrcp.f32 %v6667_v25  ;;  %v6668_v53 = vadd.f32 1.0, %v9904_v39  ;;  %v8425_v54 = vmul.f32 -1.442695, %v4933_v11  ;;  %v3525_v47 = vadd.f32 %v12309_v48, %v9460_v2 }
 0x2ee   : > { %v9906_v5 = vpop.eup %9905  ;;  %v9461_v57 = vpop.f32.mrb[2].mxu1  ;;  %9925 = vrcp.f32 %v6670_v56  ;;  %v4944_v22 = vadd.f32 %v9613_v26, %v12315_v31  ;;  %v3517_v4 = vadd.f32 %v12309_v48, %v3516_v12  ;;  %v4936_v37 = vadd.f32 %v12315_v31, %v4935_v61  ;;  %9718 = vmatprep.mubr.msk.bf16.mxu0 %vm2585_vm3, %v4345_v21  ;;  %v14163_v12 = vld [vmem:[#allocation23_spill] sm:$0xff] }
 0x2ef   : > { %v9908_v20 = vpop.eup %9907  ;;  %v7440_v16 = vmul.f32 %v9906_v5, %v12367_v59  ;;  %v3519_v36 = vpop.f32.mrb[3].mxu1  ;;  %9927 = vrcp.f32 %v6668_v53  ;;  %v4157_v43 = vmax.f32 %v3525_v47, 0.0  ;;  %9719 = vmatmul.mubr.msk.bf16.gmra.mrb[252].mxu0 %vm2585_vm3, %v4346_v49  ;;  %v3528_v6 = vadd.f32 %v12309_v48, %v9461_v57 }
 0x2f0   : > { %v9910_v27 = vpop.eup %9909  ;;  %v7438_v51 = vmul.f32 %v9908_v20, %v12367_v59  ;;  %9929 = vpow2.f32 %v8427_v28  ;;  %v8428_v55 = vmul.f32 -1.442695, %v4944_v22  ;;  %9567 = vmatmul.mubr.msk.bf16.gmra.mrb[108].mxu1 %vm2585_vm3, %v14161_v0  ;;  %v4155_v29 = vmax.f32 %v3517_v4, 0.0 }
 0x2f1   : > { %v9912_v45 = vpop.eup %9911  ;;  %7697 = vst.msk [vmem:[%s12375_s30 + $0x30] sm:$0xff] %vm7690_vm4, %v7440_v16  ;;  %v7441_v63 = vmul.f32 %v9910_v27, %v12367_v59  ;;  %9931 = vpow2.f32 %v8425_v54  ;;  %v8426_v24 = vmul.f32 -1.442695, %v4936_v37  ;;  %9570 = vmatprep.mubr.msk.bf16.mxu1 %vm2585_vm3, %v14162_v9  ;;  %v9616_v40 = vpop.f32.mrb[148].mxu0  ;;  %v3520_v18 = vadd.f32 %v12309_v48, %v3519_v36  ;;  %v14164_v54 = vld [vmem:[#allocation26_spill] sm:$0xff] }
 0x2f2   : > { %v9914_v23 = vpop.eup %9913  ;;  %7695 = vst.msk [vmem:[%s12375_s30 + $0x20] sm:$0xff] %vm7690_vm4, %v7438_v51  ;;  %v7439_v41 = vmul.f32 %v9912_v45, %v12367_v59  ;;  %9933 = vpow2.f32 %v8428_v55  ;;  %v4948_v42 = vpop.f32.mrb[149].mxu0  ;;  %v4957_v3 = vadd.f32 %v9616_v40, %v12315_v31  ;;  %v4158_v33 = vmax.f32 %v3528_v6, 0.0 }
 0x2f3   : > { %v9916_v30 = vpop.eup %9915  ;;  %7698 = vst.msk [vmem:[%s12375_s30 + $0x38] sm:$0xff] %vm7690_vm4, %v7441_v63  ;;  %v6673_v58 = vadd.f32 1.0, %v9914_v23  ;;  %9935 = vpow2.f32 %v8426_v24  ;;  %v4949_v8 = vadd.f32 %v12315_v31, %v4948_v42  ;;  %v9464_v50 = vpop.f32.mrb[4].mxu1  ;;  %v4156_v19 = vmax.f32 %v3520_v18, 0.0 }
 0x2f4   : > { %v9918_v17 = vpop.eup %9917  ;;  %7696 = vst.msk [vmem:[%s12375_s30 + $0x28] sm:$0xff] %vm7690_vm4, %v7439_v41  ;;  %v6671_v7 = vadd.f32 1.0, %v9916_v30  ;;  %v9617_v38 = vpop.f32.mrb[150].mxu0  ;;  %v8431_v46 = vmul.f32 -1.442695, %v4957_v3  ;;  %v4348_v32 = vpack.c.bf16 %v4158_v33, %v4157_v43  ;;  %v3541_v25 = vadd.f32 %v12309_v48, %v9464_v50 }
 0x2f5   : > { %v9920_v15 = vpop.eup %9919  ;;  %9937 = vrcp.f32 %v6673_v58  ;;  %v6674_v14 = vadd.f32 1.0, %v9918_v17  ;;  %v3532_v60 = vpop.f32.mrb[5].mxu1  ;;  %v8429_v13 = vmul.f32 -1.442695, %v4949_v8  ;;  %v4347_v1 = vpack.c.bf16 %v4156_v19, %v4155_v29 }
 0x2f6   : > { %v4951_v34 = vpop.f32.mrb[151].mxu0  ;;  %9939 = vrcp.f32 %v6671_v7  ;;  %v6672_v52 = vadd.f32 1.0, %v9920_v15  ;;  %v9465_v35 = vpop.f32.mrb[6].mxu1  ;;  %v4960_v2 = vadd.f32 %v9617_v38, %v12315_v31  ;;  %v3533_v26 = vadd.f32 %v12309_v48, %v3532_v60 }
 0x2f7   : > { %v9922_v62 = vpop.eup %9921  ;;  %9941 = vrcp.f32 %v6674_v14  ;;  %v3535_v44 = vpop.f32.mrb[7].mxu1  ;;  %v4161_v49 = vmax.f32 %v3541_v25, 0.0  ;;  %v4952_v28 = vadd.f32 %v12315_v31, %v4951_v34  ;;  %9722 = vmatprep.mubr.msk.bf16.mxu0 %vm2585_vm3, %v4347_v1  ;;  %v3544_v22 = vadd.f32 %v12309_v48, %v9465_v35  ;;  %v14165_v34 = vld [vmem:[#allocation25_spill] sm:$0xff] }
 0x2f8   : > { %v9924_v10 = vpop.eup %9923  ;;  %v7444_v11 = vmul.f32 %v9922_v62, %v12367_v59  ;;  %9943 = vrcp.f32 %v6672_v52  ;;  %9571 = vmatmul.mubr.msk.bf16.gmra.mrb[112].mxu1 %vm2585_vm3, %v14163_v12  ;;  %v8432_v53 = vmul.f32 -1.442695, %v4960_v2  ;;  %v4159_v21 = vmax.f32 %v3533_v26, 0.0  ;;  %9723 = vmatmul.mubr.msk.bf16.gmra.mrb[0].mxu0 %vm2585_vm3, %v4348_v32  ;;  %v14166_v62 = vld [vmem:[#allocation28_spill] sm:$0xff] }
 0x2f9   : > { %v9926_v39 = vpop.eup %9925  ;;  %v7442_v56 = vmul.f32 %v9924_v10, %v12367_v59  ;;  %9945 = vpow2.f32 %v8431_v46  ;;  %9574 = vmatprep.mubr.msk.bf16.mxu1 %vm2585_vm3, %v14164_v54  ;;  %v9620_v57 = vpop.f32.mrb[152].mxu0  ;;  %v8430_v47 = vmul.f32 -1.442695, %v4952_v28  ;;  %v3536_v36 = vadd.f32 %v12309_v48, %v3535_v44 }
 0x2fa   : > { %v9928_v61 = vpop.eup %9927  ;;  %7701 = vst.msk [vmem:[%s12375_s30 + $0x50] sm:$0xff] %vm7690_vm4, %v7444_v11  ;;  %v7445_v5 = vmul.f32 %v9926_v39, %v12367_v59  ;;  %9947 = vpow2.f32 %v8429_v13  ;;  %v4964_v27 = vpop.f32.mrb[153].mxu0  ;;  %v4973_v37 = vadd.f32 %v9620_v57, %v12315_v31  ;;  %v4162_v23 = vmax.f32 %v3544_v22, 0.0 }
 0x2fb   : > { %v9930_v20 = vpop.eup %9929  ;;  %7699 = vst.msk [vmem:[%s12375_s30 + $0x40] sm:$0xff] %vm7690_vm4, %v7442_v56  ;;  %v7443_v16 = vmul.f32 %v9928_v61, %v12367_v59  ;;  %9949 = vpow2.f32 %v8432_v53  ;;  %v4965_v45 = vadd.f32 %v12315_v31, %v4964_v27  ;;  %v9468_v63 = vpop.f32.mrb[8].mxu1  ;;  %v4160_v41 = vmax.f32 %v3536_v36, 0.0 }
 0x2fc   : > { %v9932_v51 = vpop.eup %9931  ;;  %7702 = vst.msk [vmem:[%s12375_s30 + $0x58] sm:$0xff] %vm7690_vm4, %v7445_v5  ;;  %v6677_v4 = vadd.f32 1.0, %v9930_v20  ;;  %v9621_v43 = vpop.f32.mrb[154].mxu0  ;;  %9951 = vpow2.f32 %v8430_v47  ;;  %v8435_v30 = vmul.f32 -1.442695, %v4973_v37  ;;  %v4350_v17 = vpack.c.bf16 %v4162_v23, %v4161_v49 }
 0x2fd   : > { %v9934_v55 = vpop.eup %9933  ;;  %7700 = vst.msk [vmem:[%s12375_s30 + $0x48] sm:$0xff] %vm7690_vm4, %v7443_v16  ;;  %v6675_v0 = vadd.f32 1.0, %v9932_v51  ;;  %v3548_v29 = vpop.f32.mrb[9].mxu1  ;;  %v8433_v58 = vmul.f32 -1.442695, %v4965_v45  ;;  %v4349_v7 = vpack.c.bf16 %v4160_v41, %v4159_v21  ;;  %v3557_v38 = vadd.f32 %v12309_v48, %v9468_v63 }
 0x2fe   : > { %v4967_v24 = vpop.f32.mrb[155].mxu0  ;;  %v9936_v9 = vpop.eup %9935  ;;  %9953 = vrcp.f32 %v6677_v4  ;;  %v6678_v40 = vadd.f32 1.0, %v9934_v55  ;;  %v4976_v15 = vadd.f32 %v9621_v43, %v12315_v31  ;;  %v3549_v19 = vadd.f32 %v12309_v48, %v3548_v29 }
 0x2ff   : > { %v9469_v6 = vpop.f32.mrb[10].mxu1  ;;  %v9938_v18 = vpop.eup %9937  ;;  %9955 = vrcp.f32 %v6675_v0  ;;  %v6676_v42 = vadd.f32 1.0, %v9936_v9  ;;  %v4968_v60 = vadd.f32 %v12315_v31, %v4967_v24  ;;  %9726 = vmatprep.mubr.msk.bf16.mxu0 %vm2585_vm3, %v4349_v7  ;;  %v4165_v13 = vmax.f32 %v3557_v38, 0.0  ;;  %v14167_v24 = vld [vmem:[#allocation27_spill] sm:$0xff] }
 0x300   : > { %v3551_v3 = vpop.f32.mrb[11].mxu1  ;;  %v9940_v8 = vpop.eup %9939  ;;  %v7448_v50 = vmul.f32 %v9938_v18, %v12367_v59  ;;  %9957 = vrcp.f32 %v6678_v40  ;;  %9575 = vmatmul.mubr.msk.bf16.gmra.mrb[116].mxu1 %vm2585_vm3, %v14165_v34  ;;  %v8436_v35 = vmul.f32 -1.442695, %v4976_v15  ;;  %9727 = vmatmul.mubr.msk.bf16.gmra.mrb[4].mxu0 %vm2585_vm3, %v4350_v17  ;;  %v4163_v44 = vmax.f32 %v3549_v19, 0.0 }
 0x301   : > { %v9942_v14 = vpop.eup %9941  ;;  %v7446_v33 = vmul.f32 %v9940_v8, %v12367_v59  ;;  %9959 = vrcp.f32 %v6676_v42  ;;  %9578 = vmatprep.mubr.msk.bf16.mxu1 %vm2585_vm3, %v14166_v62  ;;  %v9624_v32 = vpop.f32.mrb[156].mxu0  ;;  %v8434_v10 = vmul.f32 -1.442695, %v4968_v60  ;;  %v3560_v39 = vadd.f32 %v12309_v48, %v9469_v6  ;;  %v14168_v6 = vld [vmem:[#allocation30_spill] sm:$0xff] }
 0x302   : > { %v9944_v52 = vpop.eup %9943  ;;  %7705 = vst.msk [vmem:[%s12375_s30 + $0x70] sm:$0xff] %vm7690_vm4, %v7448_v50  ;;  %v7449_v46 = vmul.f32 %v9942_v14, %v12367_v59  ;;  %9961 = vpow2.f32 %v8435_v30  ;;  %v4980_v11 = vpop.f32.mrb[157].mxu0  ;;  %v3552_v56 = vadd.f32 %v12309_v48, %v3551_v3  ;;  %v4989_v61 = vadd.f32 %v9624_v32, %v12315_v31 }
 0x303   : > { %v9946_v1 = vpop.eup %9945  ;;  %7703 = vst.msk [vmem:[%s12375_s30 + $0x60] sm:$0xff] %vm7690_vm4, %v7446_v33  ;;  %v7447_v25 = vmul.f32 %v9944_v52, %v12367_v59  ;;  %9963 = vpow2.f32 %v8433_v58  ;;  %v9472_v49 = vpop.f32.mrb[12].mxu1  ;;  %v4981_v5 = vadd.f32 %v12315_v31, %v4980_v11  ;;  %v4166_v57 = vmax.f32 %v3560_v39, 0.0 }
 0x304   : > { %v9948_v2 = vpop.eup %9947  ;;  %7706 = vst.msk [vmem:[%s12375_s30 + $0x78] sm:$0xff] %vm7690_vm4, %v7449_v46  ;;  %v6681_v26 = vadd.f32 1.0, %v9946_v1  ;;  %9965 = vpow2.f32 %v8436_v35  ;;  %v9625_v28 = vpop.f32.mrb[158].mxu0  ;;  %v4164_v20 = vmax.f32 %v3552_v56, 0.0  ;;  %v3573_v16 = vadd.f32 %v12309_v48, %v9472_v49 }
 0x305   : > { %7704 = vst.msk [vmem:[%s12375_s30 + $0x68] sm:$0xff] %vm7690_vm4, %v7447_v25  ;;  %v6679_v12 = vadd.f32 1.0, %v9948_v2  ;;  %9967 = vpow2.f32 %v8434_v10  ;;  %v3564_v53 = vpop.f32.mrb[13].mxu1  ;;  %v4983_v21 = vpop.f32.mrb[159].mxu0  ;;  %v8439_v27 = vmul.f32 -1.442695, %v4989_v61  ;;  %v4352_v63 = vpack.c.bf16 %v4166_v57, %v4165_v13 }
 0x306   : > { %v9950_v54 = vpop.eup %9949  ;;  %9969 = vrcp.f32 %v6681_v26  ;;  %v9473_v47 = vpop.f32.mrb[14].mxu1  ;;  %v8437_v51 = vmul.f32 -1.442695, %v4981_v5  ;;  %v4351_v43 = vpack.c.bf16 %v4164_v20, %v4163_v44  ;;  %v4169_v55 = vmax.f32 %v3573_v16, 0.0 }
 0x307   : > { %v9952_v22 = vpop.eup %9951  ;;  %9971 = vrcp.f32 %v6679_v12  ;;  %v6682_v36 = vadd.f32 1.0, %v9950_v54  ;;  %v3567_v4 = vpop.f32.mrb[15].mxu1  ;;  %v4992_v41 = vadd.f32 %v9625_v28, %v12315_v31  ;;  %v3565_v29 = vadd.f32 %v12309_v48, %v3564_v53  ;;  %v14169_v54 = vld [vmem:[#allocation29_spill] sm:$0xff] }
 0x308   : > { %v9954_v37 = vpop.eup %9953  ;;  %v6680_v45 = vadd.f32 1.0, %v9952_v22  ;;  %9579 = vmatmul.mubr.msk.bf16.gmra.mrb[120].mxu1 %vm2585_vm3, %v14167_v24  ;;  %v4984_v30 = vadd.f32 %v12315_v31, %v4983_v21  ;;  %v3576_v58 = vadd.f32 %v12309_v48, %v9473_v47  ;;  %9730 = vmatprep.mubr.msk.bf16.mxu0 %vm2585_vm3, %v4351_v43  ;;  %v3568_v52 = vadd.f32 %v12309_v48, %v3567_v4 }
 0x309   : > { %v9956_v0 = vpop.eup %9955  ;;  %v7452_v23 = vmul.f32 %v9954_v37, %v12367_v59  ;;  %9973 = vrcp.f32 %v6682_v36  ;;  %9582 = vmatprep.mubr.msk.bf16.mxu1 %vm2585_vm3, %v14168_v6  ;;  %v9628_v18 = vpop.f32.mrb[160].mxu0  ;;  %v8440_v7 = vmul.f32 -1.442695, %v4992_v41  ;;  %v4167_v3 = vmax.f32 %v3565_v29, 0.0  ;;  %9731 = vmatmul.mubr.msk.bf16.gmra.mrb[8].mxu0 %vm2585_vm3, %v4352_v63 }
 0x30a   : > { %v9958_v9 = vpop.eup %9957  ;;  %v7450_v40 = vmul.f32 %v9956_v0, %v12367_v59  ;;  %9975 = vrcp.f32 %v6680_v45  ;;  %v4996_v8 = vpop.f32.mrb[161].mxu0  ;;  %v8438_v15 = vmul.f32 -1.442695, %v4984_v30  ;;  %v4170_v14 = vmax.f32 %v3576_v58, 0.0 }
 0x30b   : > { %v9960_v42 = vpop.eup %9959  ;;  %7709 = vst.msk [vmem:[%s12375_s30 + $0x90] sm:$0xff] %vm7690_vm4, %v7452_v23  ;;  %v7453_v17 = vmul.f32 %v9958_v9, %v12367_v59  ;;  %9977 = vpow2.f32 %v8439_v27  ;;  %v9476_v33 = vpop.f32.mrb[16].mxu1  ;;  %v5005_v46 = vadd.f32 %v9628_v18, %v12315_v31  ;;  %v4997_v25 = vadd.f32 %v12315_v31, %v4996_v8 }
 0x30c   : > { %v9962_v50 = vpop.eup %9961  ;;  %7707 = vst.msk [vmem:[%s12375_s30 + $0x80] sm:$0xff] %vm7690_vm4, %v7450_v40  ;;  %v7451_v38 = vmul.f32 %v9960_v42, %v12367_v59  ;;  %9979 = vpow2.f32 %v8437_v51  ;;  %v9629_v19 = vpop.f32.mrb[162].mxu0  ;;  %v4354_v1 = vpack.c.bf16 %v4170_v14, %v4169_v55  ;;  %v4168_v2 = vmax.f32 %v3568_v52, 0.0 }
 0x30d   : > { %v9964_v60 = vpop.eup %9963  ;;  %7710 = vst.msk [vmem:[%s12375_s30 + $0x98] sm:$0xff] %vm7690_vm4, %v7453_v17  ;;  %v6685_v34 = vadd.f32 1.0, %v9962_v50  ;;  %9981 = vpow2.f32 %v8440_v7  ;;  %v3580_v13 = vpop.f32.mrb[17].mxu1  ;;  %v8443_v26 = vmul.f32 -1.442695, %v5005_v46  ;;  %v3589_v12 = vadd.f32 %v12309_v48, %v9476_v33 }
 0x30e   : > { %v4999_v35 = vpop.f32.mrb[163].mxu0  ;;  %v9966_v62 = vpop.eup %9965  ;;  %7708 = vst.msk [vmem:[%s12375_s30 + $0x88] sm:$0xff] %vm7690_vm4, %v7451_v38  ;;  %v6683_v32 = vadd.f32 1.0, %v9964_v60  ;;  %9983 = vpow2.f32 %v8438_v15  ;;  %v8441_v28 = vmul.f32 -1.442695, %v4997_v25  ;;  %v4353_v53 = vpack.c.bf16 %v4168_v2, %v4167_v3 }
 0x30f   : > { %v9477_v44 = vpop.f32.mrb[18].mxu1  ;;  %v9968_v10 = vpop.eup %9967  ;;  %9985 = vrcp.f32 %v6685_v34  ;;  %v6686_v11 = vadd.f32 1.0, %v9966_v62  ;;  %v5008_v21 = vadd.f32 %v9629_v19, %v12315_v31  ;;  %v4173_v20 = vmax.f32 %v3589_v12, 0.0 }
 0x310   : > { %v3583_v39 = vpop.f32.mrb[19].mxu1  ;;  %v9970_v56 = vpop.eup %9969  ;;  %9987 = vrcp.f32 %v6683_v32  ;;  %v6684_v49 = vadd.f32 1.0, %v9968_v10  ;;  %9583 = vmatmul.mubr.msk.bf16.gmra.mrb[124].mxu1 %vm2585_vm3, %v14169_v54  ;;  %v3581_v16 = vadd.f32 %v12309_v48, %v3580_v13  ;;  %v5000_v27 = vadd.f32 %v12315_v31, %v4999_v35  ;;  %9734 = vmatprep.mubr.msk.bf16.mxu0 %vm2585_vm3, %v4353_v53 }
 0x311   : > { %v9972_v61 = vpop.eup %9971  ;;  %v7456_v5 = vmul.f32 %v9970_v56, %v12367_v59  ;;  %9989 = vrcp.f32 %v6686_v11  ;;  %v9632_v47 = vpop.f32.mrb[164].mxu0  ;;  %v8444_v36 = vmul.f32 -1.442695, %v5008_v21  ;;  %v3592_v51 = vadd.f32 %v12309_v48, %v9477_v44  ;;  %9735 = vmatmul.mubr.msk.bf16.gmra.mrb[12].mxu0 %vm2585_vm3, %v4354_v1 }
 0x312   : > { %v7454_v57 = vmul.f32 %v9972_v61, %v12367_v59  ;;  %9991 = vrcp.f32 %v6684_v49  ;;  %v5012_v4 = vpop.f32.mrb[165].mxu0  ;;  %v4171_v63 = vmax.f32 %v3581_v16, 0.0  ;;  %v3584_v43 = vadd.f32 %v12309_v48, %v3583_v39 }
 0x313   : > { %v9974_v22 = vpop.eup %9973  ;;  %7713 = vst.msk [vmem:[%s12375_s30 + $0xb0] sm:$0xff] %vm7690_vm4, %v7456_v5  ;;  %9993 = vpow2.f32 %v8443_v26  ;;  %v9480_v55 = vpop.f32.mrb[20].mxu1  ;;  %v8442_v29 = vmul.f32 -1.442695, %v5000_v27  ;;  %v4174_v24 = vmax.f32 %v3592_v51, 0.0  ;;  %v5021_v18 = vadd.f32 %v9632_v47, %v12315_v31 }
 0x314   : > { %v9976_v37 = vpop.eup %9975  ;;  %7711 = vst.msk [vmem:[%s12375_s30 + $0xa0] sm:$0xff] %vm7690_vm4, %v7454_v57  ;;  %v7457_v45 = vmul.f32 %v9974_v22, %v12367_v59  ;;  %9995 = vpow2.f32 %v8441_v28  ;;  %v9633_v0 = vpop.f32.mrb[166].mxu0  ;;  %v4172_v6 = vmax.f32 %v3584_v43, 0.0  ;;  %v5013_v42 = vadd.f32 %v12315_v31, %v5012_v4  ;;  %v12557_v47 = vld [vmem:[%s14109_s6] ss:$0 sm:$0xff] }
 0x315   : > { %v9978_v23 = vpop.eup %9977  ;;  %v7455_v41 = vmul.f32 %v9976_v37, %v12367_v59  ;;  %9997 = vpow2.f32 %v8444_v36  ;;  %v3596_v9 = vpop.f32.mrb[21].mxu1  ;;  %v4356_v8 = vpack.c.bf16 %v4174_v24, %v4173_v20  ;;  %v3605_v50 = vadd.f32 %v12309_v48, %v9480_v55  ;;  %v12551_v20 = vld [vmem:[%s14107_s4] ss:$0 sm:$0xff] }
 0x316   : > { %v5015_v40 = vpop.f32.mrb[167].mxu0  ;;  %v9980_v30 = vpop.eup %9979  ;;  %7714 = vst.msk [vmem:[%s12375_s30 + $0xb8] sm:$0xff] %vm7690_vm4, %v7457_v45  ;;  %v6689_v58 = vadd.f32 1.0, %v9978_v23  ;;  %9999 = vpow2.f32 %v8442_v29  ;;  %v4355_v33 = vpack.c.bf16 %v4172_v6, %v4171_v63  ;;  %v8447_v19 = vmul.f32 -1.442695, %v5021_v18 }
 0x317   : > { %v9481_v17 = vpop.f32.mrb[22].mxu1  ;;  %v9982_v7 = vpop.eup %9981  ;;  %7712 = vst.msk [vmem:[%s12375_s30 + $0xa8] sm:$0xff] %vm7690_vm4, %v7455_v41  ;;  %v6687_v3 = vadd.f32 1.0, %v9980_v30  ;;  %v8445_v52 = vmul.f32 -1.442695, %v5013_v42  ;;  %v4177_v46 = vmax.f32 %v3605_v50, 0.0  ;;  %v5024_v62 = vadd.f32 %v9633_v0, %v12315_v31 }
 0x318   : > { %v3599_v38 = vpop.f32.mrb[23].mxu1  ;;  %v9984_v15 = vpop.eup %9983  ;;  %10001 = vrcp.f32 %v6689_v58  ;;  %v6690_v14 = vadd.f32 1.0, %v9982_v7  ;;  %v3597_v32 = vadd.f32 %v12309_v48, %v3596_v9  ;;  %9738 = vmatprep.mubr.msk.bf16.mxu0 %vm2585_vm3, %v4355_v33  ;;  %v5016_v10 = vadd.f32 %v12315_v31, %v5015_v40 }
 0x319   : > { %v9986_v60 = vpop.eup %9985  ;;  %10003 = vrcp.f32 %v6687_v3  ;;  %v6688_v34 = vadd.f32 1.0, %v9984_v15  ;;  %v9636_v1 = vpop.f32.mrb[168].mxu0  ;;  %v3608_v11 = vadd.f32 %v12309_v48, %v9481_v17  ;;  %v8448_v56 = vmul.f32 -1.442695, %v5024_v62  ;;  %9739 = vmatmul.mubr.msk.bf16.gmra.mrb[16].mxu0 %vm2585_vm3, %v4356_v8 }
 0x31a   : > { %v9988_v13 = vpop.eup %9987  ;;  %v7460_v35 = vmul.f32 %v9986_v60, %v12367_v59  ;;  %10005 = vrcp.f32 %v6690_v14  ;;  %v5028_v2 = vpop.f32.mrb[169].mxu0  ;;  %v4175_v49 = vmax.f32 %v3597_v32, 0.0  ;;  %v8446_v48 = vmul.f32 -1.442695, %v5016_v10 }
 0x31b   : > { %v9990_v25 = vpop.eup %9989  ;;  %v7458_v44 = vmul.f32 %v9988_v13, %v12367_v59  ;;  %10007 = vrcp.f32 %v6688_v34  ;;  %v9484_v28 = vpop.f32.mrb[24].mxu1  ;;  %v4178_v5 = vmax.f32 %v3608_v11, 0.0  ;;  %v3600_v16 = vadd.f32 %v12551_v20, %v3599_v38 }
 0x31c   : > { %v9992_v26 = vpop.eup %9991  ;;  %7717 = vst.msk [vmem:[%s12375_s30 + $0xd0] sm:$0xff] %vm7690_vm4, %v7460_v35  ;;  %v7461_v39 = vmul.f32 %v9990_v25, %v12367_v59  ;;  %10009 = vpow2.f32 %v8447_v19  ;;  %v9637_v12 = vpop.f32.mrb[170].mxu0  ;;  %v5037_v22 = vadd.f32 %v12557_v47, %v9636_v1  ;;  %v5029_v37 = vadd.f32 %v12557_v47, %v5028_v2 }
 0x31d   : > { %v9994_v61 = vpop.eup %9993  ;;  %7715 = vst.msk [vmem:[%s12375_s30 + $0xc0] sm:$0xff] %vm7690_vm4, %v7458_v44  ;;  %v7459_v31 = vmul.f32 %v9992_v26, %v12367_v59  ;;  %10011 = vpow2.f32 %v8445_v52  ;;  %v3612_v53 = vpop.f32.mrb[25].mxu1  ;;  %v4358_v4 = vpack.c.bf16 %v4178_v5, %v4177_v46  ;;  %v4176_v43 = vmax.f32 %v3600_v16, 0.0 }
 0x31e   : > { %v5031_v21 = vpop.f32.mrb[171].mxu0  ;;  %v9996_v54 = vpop.eup %9995  ;;  %7718 = vst.msk [vmem:[%s12375_s30 + $0xd8] sm:$0xff] %vm7690_vm4, %v7461_v39  ;;  %v6693_v57 = vadd.f32 1.0, %v9994_v61  ;;  %10013 = vpow2.f32 %v8448_v56  ;;  %v8451_v55 = vmul.f32 -1.442695, %v5037_v22  ;;  %v3621_v41 = vadd.f32 %v12551_v20, %v9484_v28 }
 0x31f   : > { %v9485_v36 = vpop.f32.mrb[26].mxu1  ;;  %v9998_v27 = vpop.eup %9997  ;;  %7716 = vst.msk [vmem:[%s12375_s30 + $0xc8] sm:$0xff] %vm7690_vm4, %v7459_v31  ;;  %v6691_v51 = vadd.f32 1.0, %v9996_v54  ;;  %10015 = vpow2.f32 %v8446_v48  ;;  %v8449_v23 = vmul.f32 -1.442695, %v5029_v37  ;;  %v5040_v29 = vadd.f32 %v12557_v47, %v9637_v12 }
 0x320   : > { %v3615_v45 = vpop.f32.mrb[27].mxu1  ;;  %10017 = vrcp.f32 %v6693_v57  ;;  %v6694_v63 = vadd.f32 1.0, %v9998_v27  ;;  %v10000_v0 = vpop.eup %9999  ;;  %v4357_v40 = vpack.c.bf16 %v4176_v43, %v4175_v49  ;;  %v3613_v30 = vadd.f32 %v12551_v20, %v3612_v53 }
 0x321   : > { %10019 = vrcp.f32 %v6691_v51  ;;  %v6692_v9 = vadd.f32 1.0, %v10000_v0  ;;  %v9640_v58 = vpop.f32.mrb[172].mxu0  ;;  %v4181_v42 = vmax.f32 %v3621_v41, 0.0  ;;  %v8452_v17 = vmul.f32 -1.442695, %v5040_v29 }
 0x322   : > { %v10002_v24 = vpop.eup %10001  ;;  %10021 = vrcp.f32 %v6694_v63  ;;  %v5044_v7 = vpop.f32.mrb[173].mxu0  ;;  %v4179_v50 = vmax.f32 %v3613_v30, 0.0  ;;  %v5032_v38 = vadd.f32 %v12557_v47, %v5031_v21  ;;  %9742 = vmatprep.mubr.msk.bf16.mxu0 %vm2585_vm3, %v4357_v40  ;;  %v3624_v60 = vadd.f32 %v12551_v20, %v9485_v36 }
 0x323   : > { %v10004_v6 = vpop.eup %10003  ;;  %v7464_v18 = vmul.f32 %v10002_v24, %v12367_v59  ;;  %10023 = vpow2.f32 %v8451_v55  ;;  %v9488_v15 = vpop.f32.mrb[28].mxu1  ;;  %v3616_v34 = vadd.f32 %v12551_v20, %v3615_v45  ;;  %9743 = vmatmul.mubr.msk.bf16.gmra.mrb[20].mxu0 %vm2585_vm3, %v4358_v4  ;;  %v5053_v32 = vadd.f32 %v12557_v47, %v9640_v58 }
 0x324   : > { %v10006_v3 = vpop.eup %10005  ;;  %v7462_v8 = vmul.f32 %v10004_v6, %v12367_v59  ;;  %10025 = vrcp.f32 %v6692_v9  ;;  %v9641_v14 = vpop.f32.mrb[174].mxu0  ;;  %v8450_v62 = vmul.f32 -1.442695, %v5032_v38  ;;  %v4182_v10 = vmax.f32 %v3624_v60, 0.0 }
 0x325   : > { %v10008_v33 = vpop.eup %10007  ;;  %7721 = vst.msk [vmem:[%s12375_s30 + $0xf0] sm:$0xff] %vm7690_vm4, %v7464_v18  ;;  %v7465_v19 = vmul.f32 %v10006_v3, %v12367_v59  ;;  %10027 = vpow2.f32 %v8449_v23  ;;  %v3628_v52 = vpop.f32.mrb[29].mxu1  ;;  %v4180_v11 = vmax.f32 %v3616_v34, 0.0  ;;  %v5045_v2 = vadd.f32 %v12557_v47, %v5044_v7 }
 0x326   : > { %v5047_v46 = vpop.f32.mrb[175].mxu0  ;;  %v10010_v13 = vpop.eup %10009  ;;  %7719 = vst.msk [vmem:[%s12375_s30 + $0xe0] sm:$0xff] %vm7690_vm4, %v7462_v8  ;;  %v7463_v35 = vmul.f32 %v10008_v33, %v12367_v59  ;;  %10029 = vpow2.f32 %v8452_v17  ;;  %v8455_v49 = vmul.f32 -1.442695, %v5053_v32  ;;  %v3637_v28 = vadd.f32 %v12551_v20, %v9488_v15 }
 0x327   : > { %v9489_v1 = vpop.f32.mrb[30].mxu1  ;;  %v10012_v25 = vpop.eup %10011  ;;  %7722 = vst.msk [vmem:[%s12375_s30 + $0xf8] sm:$0xff] %vm7690_vm4, %v7465_v19  ;;  %v6697_v44 = vadd.f32 1.0, %v10010_v13  ;;  %10031 = vpow2.f32 %v8450_v62  ;;  %v4360_v31 = vpack.c.bf16 %v4182_v10, %v4181_v42  ;;  %v4359_v48 = vpack.c.bf16 %v4180_v11, %v4179_v50 }
 0x328   : > { %v3631_v26 = vpop.f32.mrb[31].mxu1  ;;  %v10014_v39 = vpop.eup %10013  ;;  %7720 = vst.msk [vmem:[%s12375_s30 + $0xe8] sm:$0xff] %vm7690_vm4, %v7463_v35  ;;  %v6695_v56 = vadd.f32 1.0, %v10012_v25  ;;  %v8453_v21 = vmul.f32 -1.442695, %v5045_v2  ;;  %v4185_v54 = vmax.f32 %v3637_v28, 0.0  ;;  %v5056_v36 = vadd.f32 %v12557_v47, %v9641_v14 }
 0x329   : > { %v10016_v12 = vpop.eup %10015  ;;  %10033 = vrcp.f32 %v6697_v44  ;;  %v6698_v61 = vadd.f32 1.0, %v10014_v39  ;;  %v9644_v57 = vpop.f32.mrb[176].mxu0  ;;  %v3629_v27 = vadd.f32 %v12551_v20, %v3628_v52  ;;  %9746 = vmatprep.mubr.msk.bf16.mxu0 %vm2585_vm3, %v4359_v48  ;;  %v5048_v45 = vadd.f32 %v12557_v47, %v5047_v46 }
 0x32a   : > { %v10018_v5 = vpop.eup %10017  ;;  %10035 = vrcp.f32 %v6695_v56  ;;  %v6696_v53 = vadd.f32 1.0, %v10016_v12  ;;  %v5060_v51 = vpop.f32.mrb[177].mxu0  ;;  %v3640_v63 = vadd.f32 %v12551_v20, %v9489_v1  ;;  %v8456_v41 = vmul.f32 -1.442695, %v5056_v36 }
 0x32b   : > { %v10020_v16 = vpop.eup %10019  ;;  %v7468_v22 = vmul.f32 %v10018_v5, %v12367_v59  ;;  %10037 = vrcp.f32 %v6698_v61  ;;  %v9492_v43 = vpop.f32.mrb[32].mxu1  ;;  %v4183_v29 = vmax.f32 %v3629_v27, 0.0  ;;  %9747 = vmatmul.mubr.msk.bf16.gmra.mrb[24].mxu0 %vm2585_vm3, %v4360_v31  ;;  %v8454_v58 = vmul.f32 -1.442695, %v5048_v45 }
 0x32c   : > { %v10022_v4 = vpop.eup %10021  ;;  %v7466_v37 = vmul.f32 %v10020_v16, %v12367_v59  ;;  %10039 = vrcp.f32 %v6696_v53  ;;  %v9645_v55 = vpop.f32.mrb[178].mxu0  ;;  %v4186_v6 = vmax.f32 %v3640_v63, 0.0  ;;  %v3632_v7 = vadd.f32 %v12551_v20, %v3631_v26 }
 0x32d   : > { %v10024_v0 = vpop.eup %10023  ;;  %7725 = vst.msk [vmem:[%s12375_s30 + $0x110] sm:$0xff] %vm7690_vm4, %v7468_v22  ;;  %v7469_v23 = vmul.f32 %v10022_v4, %v12367_v59  ;;  %10041 = vpow2.f32 %v8455_v49  ;;  %v3644_v24 = vpop.f32.mrb[33].mxu1  ;;  %v12604_v59 = vld [vmem:[%s14110_s7] ss:$0 sm:$0xff]  ;;  %v5069_v3 = vadd.f32 %v12557_v47, %v9644_v57  ;;  %v5061_v14 = vadd.f32 %v12557_v47, %v5060_v51 }
 0x32e   : > { %v5063_v9 = vpop.f32.mrb[179].mxu0  ;;  %v10026_v40 = vpop.eup %10025  ;;  %7723 = vst.msk [vmem:[%s12375_s30 + $0x100] sm:$0xff] %vm7690_vm4, %v7466_v37  ;;  %v6701_v30 = vadd.f32 1.0, %v10024_v0  ;;  %10043 = vpow2.f32 %v8453_v21  ;;  %v4362_v15 = vpack.c.bf16 %v4186_v6, %v4185_v54  ;;  %v4184_v19 = vmax.f32 %v3632_v7, 0.0 }
 0x32f   : > { %v9493_v18 = vpop.f32.mrb[34].mxu1  ;;  %v10028_v42 = vpop.eup %10027  ;;  %7726 = vst.msk [vmem:[%s12375_s30 + $0x118] sm:$0xff] %vm7690_vm4, %v7469_v23  ;;  %v7467_v17 = vmul.f32 %v12604_v59, %v10026_v40  ;;  %10045 = vpow2.f32 %v8456_v41  ;;  %v8459_v60 = vmul.f32 -1.442695, %v5069_v3  ;;  %v8457_v52 = vmul.f32 -1.442695, %v5061_v14 }
 0x330   : > { %v3647_v8 = vpop.f32.mrb[35].mxu1  ;;  %v10030_v50 = vpop.eup %10029  ;;  %10047 = vrcp.f32 %v6701_v30  ;;  %v6699_v38 = vadd.f32 1.0, %v10028_v42  ;;  %v3653_v46 = vadd.f32 %v12551_v20, %v9492_v43  ;;  %v5072_v13 = vadd.f32 %v12557_v47, %v9645_v55 }
 0x331   : > { %7724 = vst.msk [vmem:[%s12375_s30 + $0x108] sm:$0xff] %vm7690_vm4, %v7467_v17  ;;  %v6702_v33 = vadd.f32 1.0, %v10030_v50  ;;  %10049 = vpow2.f32 %v8454_v58  ;;  %v10032_v34 = vpop.eup %10031  ;;  %v9648_v35 = vpop.f32.mrb[180].mxu0  ;;  %v4361_v1 = vpack.c.bf16 %v4184_v19, %v4183_v29  ;;  %v3645_v25 = vadd.f32 %v12551_v20, %v3644_v24 }
 0x332   : > { %10051 = vrcp.f32 %v6699_v38  ;;  %v6700_v32 = vadd.f32 1.0, %v10032_v34  ;;  %v5076_v44 = vpop.f32.mrb[181].mxu0  ;;  %v4189_v2 = vmax.f32 %v3653_v46, 0.0  ;;  %v8460_v26 = vmul.f32 -1.442695, %v5072_v13 }
 0x333   : > { %v10034_v62 = vpop.eup %10033  ;;  %10053 = vrcp.f32 %v6702_v33  ;;  %v9496_v39 = vpop.f32.mrb[36].mxu1  ;;  %v4187_v12 = vmax.f32 %v3645_v25, 0.0  ;;  %v5064_v61 = vadd.f32 %v12557_v47, %v5063_v9  ;;  %9750 = vmatprep.mubr.msk.bf16.mxu0 %vm2585_vm3, %v4361_v1  ;;  %v3656_v21 = vadd.f32 %v12551_v20, %v9493_v18 }
 0x334   : > { %v10036_v10 = vpop.eup %10035  ;;  %v7472_v11 = vmul.f32 %v12604_v59, %v10034_v62  ;;  %10055 = vpow2.f32 %v8459_v60  ;;  %v9649_v56 = vpop.f32.mrb[182].mxu0  ;;  %v3648_v54 = vadd.f32 %v12551_v20, %v3647_v8  ;;  %9751 = vmatmul.mubr.msk.bf16.gmra.mrb[28].mxu0 %vm2585_vm3, %v4362_v15  ;;  %v5085_v27 = vadd.f32 %v12557_v47, %v9648_v35 }
 0x335   : > { %v10038_v49 = vpop.eup %10037  ;;  %v7470_v28 = vmul.f32 %v12604_v59, %v10036_v10  ;;  %10057 = vrcp.f32 %v6700_v32  ;;  %v3660_v31 = vpop.f32.mrb[37].mxu1  ;;  %v8458_v36 = vmul.f32 -1.442695, %v5064_v61  ;;  %v4190_v45 = vmax.f32 %v3656_v21, 0.0 }
 0x336   : > { %v5079_v48 = vpop.f32.mrb[183].mxu0  ;;  %v10040_v5 = vpop.eup %10039  ;;  %7729 = vst.msk [vmem:[%s12375_s30 + $0x130] sm:$0xff] %vm7690_vm4, %v7472_v11  ;;  %v7473_v53 = vmul.f32 %v12604_v59, %v10038_v49  ;;  %10059 = vpow2.f32 %v8457_v52  ;;  %v4188_v63 = vmax.f32 %v3648_v54, 0.0  ;;  %v5077_v43 = vadd.f32 %v12557_v47, %v5076_v44 }
 0x337   : > { %v9497_v57 = vpop.f32.mrb[38].mxu1  ;;  %v10042_v16 = vpop.eup %10041  ;;  %7727 = vst.msk [vmem:[%s12375_s30 + $0x120] sm:$0xff] %vm7690_vm4, %v7470_v28  ;;  %v7471_v22 = vmul.f32 %v12604_v59, %v10040_v5  ;;  %10061 = vpow2.f32 %v8460_v26  ;;  %v8463_v23 = vmul.f32 -1.442695, %v5085_v27  ;;  %v3669_v41 = vadd.f32 %v12551_v20, %v9496_v39 }
 0x338   : > { %v3663_v51 = vpop.f32.mrb[39].mxu1  ;;  %v10044_v4 = vpop.eup %10043  ;;  %7730 = vst.msk [vmem:[%s12375_s30 + $0x138] sm:$0xff] %vm7690_vm4, %v7473_v53  ;;  %v6705_v37 = vadd.f32 1.0, %v10042_v16  ;;  %10063 = vpow2.f32 %v8458_v36  ;;  %v4364_v9 = vpack.c.bf16 %v4190_v45, %v4189_v2  ;;  %v4363_v40 = vpack.c.bf16 %v4188_v63, %v4187_v12 }
 0x339   : > { %v10046_v55 = vpop.eup %10045  ;;  %7728 = vst.msk [vmem:[%s12375_s30 + $0x128] sm:$0xff] %vm7690_vm4, %v7471_v22  ;;  %v6703_v0 = vadd.f32 1.0, %v10044_v4  ;;  %v9652_v30 = vpop.f32.mrb[184].mxu0  ;;  %v8461_v18 = vmul.f32 -1.442695, %v5077_v43  ;;  %v4193_v42 = vmax.f32 %v3669_v41, 0.0  ;;  %v5088_v8 = vadd.f32 %v12557_v47, %v9649_v56 }
 0x33a   : > { %v10048_v29 = vpop.eup %10047  ;;  %10065 = vrcp.f32 %v6705_v37  ;;  %v6706_v24 = vadd.f32 1.0, %v10046_v55  ;;  %v5092_v17 = vpop.f32.mrb[185].mxu0  ;;  %v3661_v50 = vadd.f32 %v12551_v20, %v3660_v31  ;;  %9754 = vmatprep.mubr.msk.bf16.mxu0 %vm2585_vm3, %v4363_v40  ;;  %v5080_v19 = vadd.f32 %v12557_v47, %v5079_v48 }
 0x33b   : > { %v10050_v58 = vpop.eup %10049  ;;  %v7476_v6 = vmul.f32 %v12604_v59, %v10048_v29  ;;  %10067 = vrcp.f32 %v6703_v0  ;;  %v9500_v38 = vpop.f32.mrb[40].mxu1  ;;  %v3672_v60 = vadd.f32 %v12551_v20, %v9497_v57  ;;  %v8464_v35 = vmul.f32 -1.442695, %v5088_v8 }
 0x33c   : > { %v10052_v7 = vpop.eup %10051  ;;  %10069 = vrcp.f32 %v6706_v24  ;;  %v6704_v3 = vadd.f32 1.0, %v10050_v58  ;;  %v9653_v15 = vpop.f32.mrb[186].mxu0  ;;  %v4191_v62 = vmax.f32 %v3661_v50, 0.0  ;;  %9755 = vmatmul.mubr.msk.bf16.gmra.mrb[32].mxu0 %vm2585_vm3, %v4364_v9  ;;  %v8462_v44 = vmul.f32 -1.442695, %v5080_v19 }
 0x33d   : > { %v10054_v14 = vpop.eup %10053  ;;  %7733 = vst.msk [vmem:[%s12375_s30 + $0x150] sm:$0xff] %vm7690_vm4, %v7476_v6  ;;  %v7474_v33 = vmul.f32 %v12604_v59, %v10052_v7  ;;  %10071 = vpow2.f32 %v8463_v23  ;;  %v3676_v34 = vpop.f32.mrb[41].mxu1  ;;  %v4194_v10 = vmax.f32 %v3672_v60, 0.0  ;;  %v3664_v39 = vadd.f32 %v12551_v20, %v3663_v51 }
 0x33e   : > { %v5095_v52 = vpop.f32.mrb[187].mxu0  ;;  %v10056_v46 = vpop.eup %10055  ;;  %v7477_v13 = vmul.f32 %v12604_v59, %v10054_v14  ;;  %10073 = vrcp.f32 %v6704_v3  ;;  %v5101_v56 = vadd.f32 %v12557_v47, %v9652_v30  ;;  %v5093_v61 = vadd.f32 %v12557_v47, %v5092_v17 }
 0x33f   : > { %v9501_v32 = vpop.f32.mrb[42].mxu1  ;;  %v10058_v1 = vpop.eup %10057  ;;  %7731 = vst.msk [vmem:[%s12375_s30 + $0x140] sm:$0xff] %vm7690_vm4, %v7474_v33  ;;  %v6709_v25 = vadd.f32 1.0, %v10056_v46  ;;  %10075 = vpow2.f32 %v8461_v18  ;;  %v4366_v12 = vpack.c.bf16 %v4194_v10, %v4193_v42  ;;  %v4192_v48 = vmax.f32 %v3664_v39, 0.0 }
 0x340   : > { %v3679_v11 = vpop.f32.mrb[43].mxu1  ;;  %v10060_v2 = vpop.eup %10059  ;;  %7734 = vst.msk [vmem:[%s12375_s30 + $0x158] sm:$0xff] %vm7690_vm4, %v7477_v13  ;;  %v7475_v26 = vmul.f32 %v12604_v59, %v10058_v1  ;;  %10077 = vpow2.f32 %v8464_v35  ;;  %v8467_v5 = vmul.f32 -1.442695, %v5101_v56  ;;  %v8465_v54 = vmul.f32 -1.442695, %v5093_v61 }
 0x341   : > { %v10062_v49 = vpop.eup %10061  ;;  %10079 = vrcp.f32 %v6709_v25  ;;  %v6707_v28 = vadd.f32 1.0, %v10060_v2  ;;  %v9656_v53 = vpop.f32.mrb[188].mxu0  ;;  %v3685_v57 = vadd.f32 %v12551_v20, %v9500_v38  ;;  %v5104_v16 = vadd.f32 %v12557_v47, %v9653_v15 }
 0x342   : > { %7732 = vst.msk [vmem:[%s12375_s30 + $0x148] sm:$0xff] %vm7690_vm4, %v7475_v26  ;;  %v6710_v31 = vadd.f32 1.0, %v10062_v49  ;;  %10081 = vpow2.f32 %v8462_v44  ;;  %v10064_v21 = vpop.eup %10063  ;;  %v5108_v22 = vpop.f32.mrb[189].mxu0  ;;  %v4365_v51 = vpack.c.bf16 %v4192_v48, %v4191_v62  ;;  %v3677_v4 = vadd.f32 %v12551_v20, %v3676_v34 }
 0x343   : > { %10083 = vrcp.f32 %v6707_v28  ;;  %v6708_v27 = vadd.f32 1.0, %v10064_v21  ;;  %v9504_v37 = vpop.f32.mrb[44].mxu1  ;;  %v9657_v45 = vpop.f32.mrb[190].mxu0  ;;  %v4197_v55 = vmax.f32 %v3685_v57, 0.0  ;;  %v8468_v0 = vmul.f32 -1.442695, %v5104_v16 }
 0x344   : > { %v10066_v36 = vpop.eup %10065  ;;  %10085 = vrcp.f32 %v6710_v31  ;;  %v3692_v23 = vpop.f32.mrb[45].mxu1  ;;  %v4195_v9 = vmax.f32 %v3677_v4, 0.0  ;;  %v5096_v40 = vadd.f32 %v12557_v47, %v5095_v52  ;;  %9758 = vmatprep.mubr.msk.bf16.mxu0 %vm2585_vm3, %v4365_v51  ;;  %v3688_v18 = vadd.f32 %v12551_v20, %v9501_v32 }
 0x345   : > { %v10068_v63 = vpop.eup %10067  ;;  %v7480_v43 = vmul.f32 %v12604_v59, %v10066_v36  ;;  %10087 = vpow2.f32 %v8467_v5  ;;  %v5111_v41 = vpop.f32.mrb[191].mxu0  ;;  %v3680_v42 = vadd.f32 %v12551_v20, %v3679_v11  ;;  %9759 = vmatmul.mubr.msk.bf16.gmra.mrb[36].mxu0 %vm2585_vm3, %v4366_v12  ;;  %v5117_v50 = vadd.f32 %v12557_v47, %v9656_v53 }
 0x346   : > { %v10070_v29 = vpop.eup %10069  ;;  %v7478_v24 = vmul.f32 %v12604_v59, %v10068_v63  ;;  %10089 = vrcp.f32 %v6708_v27  ;;  %v9505_v30 = vpop.f32.mrb[46].mxu1  ;;  %v8466_v8 = vmul.f32 -1.442695, %v5096_v40  ;;  %v4198_v14 = vmax.f32 %v3688_v18, 0.0 }
 0x347   : > { %v10072_v58 = vpop.eup %10071  ;;  %7737 = vst.msk [vmem:[%s12375_s30 + $0x170] sm:$0xff] %vm7690_vm4, %v7480_v43  ;;  %v7481_v6 = vmul.f32 %v12604_v59, %v10070_v29  ;;  %10091 = vpow2.f32 %v8465_v54  ;;  %v12669_v17 = vpop.f32.mrb[47].mxu1  ;;  %v4196_v33 = vmax.f32 %v3680_v42, 0.0  ;;  %v5109_v19 = vadd.f32 %v12557_v47, %v5108_v22 }
 0x348   : > { %v10074_v7 = vpop.eup %10073  ;;  %7735 = vst.msk [vmem:[%s12375_s30 + $0x160] sm:$0xff] %vm7690_vm4, %v7478_v24  ;;  %v6713_v3 = vadd.f32 1.0, %v10072_v58  ;;  %10093 = vpow2.f32 %v8468_v0  ;;  %v8471_v52 = vmul.f32 -1.442695, %v5117_v50  ;;  %v3701_v46 = vadd.f32 %v12551_v20, %v9504_v37 }
 0x349   : > { %v10076_v38 = vpop.eup %10075  ;;  %7738 = vst.msk [vmem:[%s12375_s30 + $0x178] sm:$0xff] %vm7690_vm4, %v7481_v6  ;;  %v7479_v15 = vmul.f32 %v12604_v59, %v10074_v7  ;;  %v9660_v13 = vpop.f32.mrb[192].mxu0  ;;  %v4368_v32 = vpack.c.bf16 %v4198_v14, %v4197_v55  ;;  %v4367_v1 = vpack.c.bf16 %v4196_v33, %v4195_v9  ;;  %v8469_v11 = vmul.f32 -1.442695, %v5109_v19 }
 0x34a   : > { %v10078_v60 = vpop.eup %10077  ;;  %10095 = vrcp.f32 %v6713_v3  ;;  %v6711_v34 = vadd.f32 1.0, %v10076_v38  ;;  %v5124_v25 = vpop.f32.mrb[193].mxu0  ;;  %v4201_v2 = vmax.f32 %v3701_v46, 0.0  ;;  %v5120_v28 = vadd.f32 %v12557_v47, %v9657_v45 }
 0x34b   : > { %v10080_v35 = vpop.eup %10079  ;;  %7736 = vst.msk [vmem:[%s12375_s30 + $0x168] sm:$0xff] %vm7690_vm4, %v7479_v15  ;;  %v6714_v62 = vadd.f32 1.0, %v10078_v60  ;;  %10097 = vpow2.f32 %v8466_v8  ;;  %v9508_v26 = vpop.f32.mrb[48].mxu1  ;;  %v3693_v12 = vadd.f32 %v12551_v20, %v3692_v23  ;;  %9762 = vmatprep.mubr.msk.bf16.mxu0 %vm2585_vm3, %v4367_v1  ;;  %v5112_v53 = vadd.f32 %v12557_v47, %v5111_v41 }
 0x34c   : > { %v10082_v44 = vpop.eup %10081  ;;  %v7484_v10 = vmul.f32 %v12604_v59, %v10080_v35  ;;  %10099 = vrcp.f32 %v6711_v34  ;;  %v9661_v39 = vpop.f32.mrb[194].mxu0  ;;  %v3704_v21 = vadd.f32 %v12551_v20, %v9505_v30  ;;  %v8472_v22 = vmul.f32 -1.442695, %v5120_v28 }
 0x34d   : > { %v10084_v56 = vpop.eup %10083  ;;  %10101 = vrcp.f32 %v6714_v62  ;;  %v6712_v49 = vadd.f32 1.0, %v10082_v44  ;;  %v3708_v61 = vpop.f32.mrb[49].mxu1  ;;  %v4199_v36 = vmax.f32 %v3693_v12, 0.0  ;;  %9763 = vmatmul.mubr.msk.bf16.gmra.mrb[40].mxu0 %vm2585_vm3, %v4368_v32  ;;  %v8470_v37 = vmul.f32 -1.442695, %v5112_v53 }
 0x34e   : > { %v12685_v31 = vpop.f32.mrb[195].mxu0  ;;  %v10086_v48 = vpop.eup %10085  ;;  %7741 = vst.msk [vmem:[%s12375_s30 + $0x190] sm:$0xff] %vm7690_vm4, %v7484_v10  ;;  %v7482_v5 = vmul.f32 %v12604_v59, %v10084_v56  ;;  %10103 = vpow2.f32 %v8471_v52  ;;  %v4202_v45 = vmax.f32 %v3704_v21, 0.0  ;;  %v3696_v55 = vadd.f32 %v12551_v20, %v12669_v17 }
 0x34f   : > { %v12692_v54 = vpop.f32.mrb[50].mxu1  ;;  %v10088_v57 = vpop.eup %10087  ;;  %v7485_v16 = vmul.f32 %v12604_v59, %v10086_v48  ;;  %10105 = vrcp.f32 %v6712_v49  ;;  %v5133_v0 = vadd.f32 %v12557_v47, %v9660_v13  ;;  %v5125_v24 = vadd.f32 %v12557_v47, %v5124_v25 }
 0x350   : > { %v3711_v27 = vpop.f32.mrb[51].mxu1  ;;  %v10090_v51 = vpop.eup %10089  ;;  %7739 = vst.msk [vmem:[%s12375_s30 + $0x180] sm:$0xff] %vm7690_vm4, %v7482_v5  ;;  %v6717_v4 = vadd.f32 1.0, %v10088_v57  ;;  %10107 = vpow2.f32 %v8469_v11  ;;  %v4370_v29 = vpack.c.bf16 %v4202_v45, %v4201_v2  ;;  %v4200_v30 = vmax.f32 %v3696_v55, 0.0 }
 0x351   : > { %v10092_v63 = vpop.eup %10091  ;;  %7742 = vst.msk [vmem:[%s12375_s30 + $0x198] sm:$0xff] %vm7690_vm4, %v7485_v16  ;;  %v7483_v43 = vmul.f32 %v12604_v59, %v10090_v51  ;;  %10109 = vpow2.f32 %v8472_v22  ;;  %v9664_v9 = vpop.f32.mrb[196].mxu0  ;;  %v8475_v58 = vmul.f32 -1.442695, %v5133_v0  ;;  %v8473_v42 = vmul.f32 -1.442695, %v5125_v24 }
 0x352   : > { %v10094_v23 = vpop.eup %10093  ;;  %10111 = vrcp.f32 %v6717_v4  ;;  %v6715_v41 = vadd.f32 1.0, %v10092_v63  ;;  %v5140_v6 = vpop.f32.mrb[197].mxu0  ;;  %v3717_v17 = vadd.f32 %v12551_v20, %v9508_v26  ;;  %v5136_v7 = vadd.f32 %v12557_v47, %v9661_v39 }
 0x353   : > { %7740 = vst.msk [vmem:[%s12375_s30 + $0x188] sm:$0xff] %vm7690_vm4, %v7483_v43  ;;  %v6718_v40 = vadd.f32 1.0, %v10094_v23  ;;  %10113 = vpow2.f32 %v8470_v37  ;;  %v9512_v3 = vpop.f32.mrb[52].mxu1  ;;  %v12709_v8 = vpop.f32.mrb[198].mxu0  ;;  %v4369_v15 = vpack.c.bf16 %v4200_v30, %v4199_v36  ;;  %v3709_v14 = vadd.f32 %v12551_v20, %v3708_v61 }
 0x354   : > { %v10096_v18 = vpop.eup %10095  ;;  %10115 = vrcp.f32 %v6715_v41  ;;  %v3724_v33 = vpop.f32.mrb[53].mxu1  ;;  %v4205_v52 = vmax.f32 %v3717_v17, 0.0  ;;  %v8476_v46 = vmul.f32 -1.442695, %v5136_v7  ;;  %v5128_v1 = vadd.f32 %v12557_v47, %v12685_v31 }
 0x355   : > { %v10098_v50 = vpop.eup %10097  ;;  %v7488_v38 = vmul.f32 %v12604_v59, %v10096_v18  ;;  %10117 = vrcp.f32 %v6718_v40  ;;  %v12713_v19 = vpop.f32.mrb[199].mxu0  ;;  %v4203_v32 = vmax.f32 %v3709_v14, 0.0  ;;  %9766 = vmatprep.mubr.msk.bf16.mxu0 %vm2585_vm3, %v4369_v15  ;;  %v3720_v11 = vadd.f32 %v12551_v20, %v12692_v54 }
 0x356   : > { %v10100_v60 = vpop.eup %10099  ;;  %v6716_v34 = vadd.f32 1.0, %v10098_v50  ;;  %10119 = vpow2.f32 %v8475_v58  ;;  %v9513_v13 = vpop.f32.mrb[54].mxu1  ;;  %v3712_v2 = vadd.f32 %v12551_v20, %v3711_v27  ;;  %9767 = vmatmul.mubr.msk.bf16.gmra.mrb[44].mxu0 %vm2585_vm3, %v4370_v29  ;;  %v8474_v56 = vmul.f32 -1.442695, %v5128_v1 }
 0x357   : > { %v10102_v35 = vpop.eup %10101  ;;  %7745 = vst.msk [vmem:[%s12375_s30 + $0x1b0] sm:$0xff] %vm7690_vm4, %v7488_v38  ;;  %v7486_v62 = vmul.f32 %v12604_v59, %v10100_v60  ;;  %10121 = vpow2.f32 %v8473_v42  ;;  %v12721_v25 = vpop.f32.mrb[55].mxu1  ;;  %v5149_v49 = vadd.f32 %v12557_v47, %v9664_v9  ;;  %v4206_v61 = vmax.f32 %v3720_v11, 0.0 }
 0x358   : > { %v10104_v44 = vpop.eup %10103  ;;  %v7489_v10 = vmul.f32 %v12604_v59, %v10102_v35  ;;  %10123 = vrcp.f32 %v6716_v34  ;;  %v4204_v31 = vmax.f32 %v3712_v2, 0.0  ;;  %v5141_v48 = vadd.f32 %v12557_v47, %v5140_v6 }
 0x359   : > { %v10106_v26 = vpop.eup %10105  ;;  %7743 = vst.msk [vmem:[%s12375_s30 + $0x1a0] sm:$0xff] %vm7690_vm4, %v7486_v62  ;;  %v6721_v39 = vadd.f32 1.0, %v10104_v44  ;;  %10125 = vpow2.f32 %v8476_v46  ;;  %v9668_v5 = vpop.f32.mrb[200].mxu0  ;;  %v8479_v54 = vmul.f32 -1.442695, %v5149_v49  ;;  %v3733_v57 = vadd.f32 %v12551_v20, %v9512_v3 }
 0x35a   : > { %v10108_v28 = vpop.eup %10107  ;;  %7746 = vst.msk [vmem:[%s12375_s30 + $0x1b8] sm:$0xff] %vm7690_vm4, %v7489_v10  ;;  %v7487_v12 = vmul.f32 %v12604_v59, %v10106_v26  ;;  %v5156_v16 = vpop.f32.mrb[201].mxu0  ;;  %v4372_v27 = vpack.c.bf16 %v4206_v61, %v4205_v52  ;;  %v4371_v51 = vpack.c.bf16 %v4204_v31, %v4203_v32  ;;  %v8477_v43 = vmul.f32 -1.442695, %v5141_v48 }
 0x35b   : > { %v10110_v53 = vpop.eup %10109  ;;  %10127 = vrcp.f32 %v6721_v39  ;;  %v6719_v21 = vadd.f32 1.0, %v10108_v28  ;;  %v9516_v4 = vpop.f32.mrb[56].mxu1  ;;  %v4209_v55 = vmax.f32 %v3733_v57, 0.0  ;;  %v5152_v24 = vadd.f32 %v12557_v47, %v12709_v8 }
 0x35c   : > { %v10112_v22 = vpop.eup %10111  ;;  %7744 = vst.msk [vmem:[%s12375_s30 + $0x1a8] sm:$0xff] %vm7690_vm4, %v7487_v12  ;;  %v6722_v36 = vadd.f32 1.0, %v10110_v53  ;;  %10129 = vpow2.f32 %v8474_v56  ;;  %v9669_v37 = vpop.f32.mrb[202].mxu0  ;;  %v3725_v9 = vadd.f32 %v12551_v20, %v3724_v33  ;;  %9770 = vmatprep.mubr.msk.bf16.mxu0 %vm2585_vm3, %v4371_v51  ;;  %v5144_v6 = vadd.f32 %v12557_v47, %v12713_v19 }
 0x35d   : > { %v10114_v45 = vpop.eup %10113  ;;  %v7492_v63 = vmul.f32 %v12604_v59, %v10112_v22  ;;  %10131 = vrcp.f32 %v6719_v21  ;;  %v3740_v0 = vpop.f32.mrb[57].mxu1  ;;  %v3736_v18 = vadd.f32 %v12551_v20, %v9513_v13  ;;  %v8480_v3 = vmul.f32 -1.442695, %v5152_v24 }
 0x35e   : > { %v12739_v23 = vpop.f32.mrb[203].mxu0  ;;  %v10116_v41 = vpop.eup %10115  ;;  %10133 = vrcp.f32 %v6722_v36  ;;  %v6720_v29 = vadd.f32 1.0, %v10114_v45  ;;  %v4207_v8 = vmax.f32 %v3725_v9, 0.0  ;;  %9771 = vmatmul.mubr.msk.bf16.gmra.mrb[48].mxu0 %vm2585_vm3, %v4372_v27  ;;  %v8478_v15 = vmul.f32 -1.442695, %v5144_v6 }
 0x35f   : > { %v12745_v40 = vpop.f32.mrb[58].mxu1  ;;  %v10118_v30 = vpop.eup %10117  ;;  %7749 = vst.msk [vmem:[%s12375_s30 + $0x1d0] sm:$0xff] %vm7690_vm4, %v7492_v63  ;;  %v7490_v58 = vmul.f32 %v12604_v59, %v10116_v41  ;;  %10135 = vpow2.f32 %v8479_v54  ;;  %v4210_v14 = vmax.f32 %v3736_v18, 0.0  ;;  %v3728_v60 = vadd.f32 %v12551_v20, %v12721_v25 }
 0x360   : > { %v12753_v42 = vpop.f32.mrb[59].mxu1  ;;  %v10120_v17 = vpop.eup %10119  ;;  %v7493_v7 = vmul.f32 %v12604_v59, %v10118_v30  ;;  %10137 = vrcp.f32 %v6720_v29  ;;  %v5165_v34 = vadd.f32 %v12557_v47, %v9668_v5  ;;  %v5157_v62 = vadd.f32 %v12557_v47, %v5156_v16 }
 0x361   : > { %v10122_v50 = vpop.eup %10121  ;;  %7747 = vst.msk [vmem:[%s12375_s30 + $0x1c0] sm:$0xff] %vm7690_vm4, %v7490_v58  ;;  %v6725_v38 = vadd.f32 1.0, %v10120_v17  ;;  %10139 = vpow2.f32 %v8477_v43  ;;  %v9672_v52 = vpop.f32.mrb[204].mxu0  ;;  %v4374_v35 = vpack.c.bf16 %v4210_v14, %v4209_v55  ;;  %v4208_v44 = vmax.f32 %v3728_v60, 0.0 }
 0x362   : > { %v10124_v33 = vpop.eup %10123  ;;  %7750 = vst.msk [vmem:[%s12375_s30 + $0x1d8] sm:$0xff] %vm7690_vm4, %v7493_v7  ;;  %v6723_v19 = vadd.f32 1.0, %v10122_v50  ;;  %10141 = vpow2.f32 %v8480_v3  ;;  %v5172_v32 = vpop.f32.mrb[205].mxu0  ;;  %v8483_v10 = vmul.f32 -1.442695, %v5165_v34  ;;  %v3749_v39 = vadd.f32 %v12551_v20, %v9516_v4 }
 0x363   : > { %v10126_v46 = vpop.eup %10125  ;;  %v7491_v13 = vmul.f32 %v12604_v59, %v10124_v33  ;;  %10143 = vrcp.f32 %v6725_v38  ;;  %v9520_v11 = vpop.f32.mrb[60].mxu1  ;;  %v8481_v26 = vmul.f32 -1.442695, %v5157_v62  ;;  %v5168_v56 = vadd.f32 %v12557_v47, %v9669_v37 }
 0x364   : > { %10145 = vrcp.f32 %v6723_v19  ;;  %v6726_v1 = vadd.f32 1.0, %v10126_v46  ;;  %v12766_v2 = vpop.f32.mrb[206].mxu0  ;;  %v12772_v49 = vpop.f32.mrb[61].mxu1  ;;  %v4373_v31 = vpack.c.bf16 %v4208_v44, %v4207_v8  ;;  %v3741_v48 = vadd.f32 %v12551_v20, %v3740_v0 }
 0x365   : > { %v10128_v25 = vpop.eup %10127  ;;  %7748 = vst.msk [vmem:[%s12375_s30 + $0x1c8] sm:$0xff] %vm7690_vm4, %v7491_v13  ;;  %10147 = vpow2.f32 %v8478_v15  ;;  %v12774_v28 = vpop.f32.mrb[207].mxu0  ;;  %v4213_v54 = vmax.f32 %v3749_v39, 0.0  ;;  %v8484_v57 = vmul.f32 -1.442695, %v5168_v56  ;;  %v5160_v51 = vadd.f32 %v12557_v47, %v12739_v23 }
 0x366   : > { %v10130_v12 = vpop.eup %10129  ;;  %v7496_v61 = vmul.f32 %v12604_v59, %v10128_v25  ;;  %10149 = vrcp.f32 %v6726_v1  ;;  %v12778_v5 = vpop.f32.mrb[62].mxu1  ;;  %v4211_v27 = vmax.f32 %v3741_v48, 0.0  ;;  %9774 = vmatprep.mubr.msk.bf16.mxu0 %vm2585_vm3, %v4373_v31  ;;  %v3752_v45 = vadd.f32 %v12551_v20, %v12745_v40 }
 0x367   : > { %v10132_v53 = vpop.eup %10131  ;;  %v6724_v21 = vadd.f32 1.0, %v10130_v12  ;;  %10151 = vpow2.f32 %v8483_v10  ;;  %v12780_v16 = vpop.f32.mrb[63].mxu1  ;;  %v3744_v63 = vadd.f32 %v12551_v20, %v12753_v42  ;;  %9775 = vmatmul.mubr.msk.bf16.gmra.mrb[52].mxu0 %vm2585_vm3, %v4374_v35  ;;  %v8482_v0 = vmul.f32 -1.442695, %v5160_v51  ;;  %v12804_v42 = vld [vmem:[%s14107_s4] ss:$0 sm:$0xff] }
 0x368   : > { %v10134_v22 = vpop.eup %10133  ;;  %7753 = vst.msk [vmem:[%s12375_s30 + $0x1f0] sm:$0xff] %vm7690_vm4, %v7496_v61  ;;  %v7494_v36 = vmul.f32 %v12604_v59, %v10132_v53  ;;  %10153 = vpow2.f32 %v8481_v26  ;;  %v5181_v23 = vadd.f32 %v12557_v47, %v9672_v52  ;;  %v4214_v9 = vmax.f32 %v3752_v45, 0.0  ;;  %v12824_v35 = vld [vmem:[%s14109_s6] ss:$0 sm:$0xff] }
 0x369   : > { %v10136_v4 = vpop.eup %10135  ;;  %v7497_v37 = vmul.f32 %v12604_v59, %v10134_v22  ;;  %10155 = vrcp.f32 %v6724_v21  ;;  %v9676_v41 = vpop.f32.mrb[208].mxu0  ;;  %v4212_v40 = vmax.f32 %v3744_v63, 0.0  ;;  %v5173_v20 = vadd.f32 %v12557_v47, %v5172_v32 }
 0x36a   : > { %v10138_v43 = vpop.eup %10137  ;;  %7751 = vst.msk [vmem:[%s12375_s30 + $0x1e0] sm:$0xff] %vm7690_vm4, %v7494_v36  ;;  %v6729_v55 = vadd.f32 1.0, %v10136_v4  ;;  %10157 = vpow2.f32 %v8484_v57  ;;  %v5188_v30 = vpop.f32.mrb[209].mxu0  ;;  %v8487_v18 = vmul.f32 -1.442695, %v5181_v23  ;;  %v3765_v17 = vadd.f32 %v12804_v42, %v9520_v11 }
 0x36b   : > { %v10140_v29 = vpop.eup %10139  ;;  %7754 = vst.msk [vmem:[%s12375_s30 + $0x1f8] sm:$0xff] %vm7690_vm4, %v7497_v37  ;;  %v7495_v24 = vmul.f32 %v12604_v59, %v10138_v43  ;;  %v12807_v7 = vpop.f32.mrb[64].mxu1  ;;  %v4376_v50 = vpack.c.bf16 %v4214_v9, %v4213_v54  ;;  %v4375_v38 = vpack.c.bf16 %v4212_v40, %v4211_v27  ;;  %v8485_v60 = vmul.f32 -1.442695, %v5173_v20 }
 0x36c   : > { %v10142_v58 = vpop.eup %10141  ;;  %10159 = vrcp.f32 %v6729_v55  ;;  %v6727_v6 = vadd.f32 1.0, %v10140_v29  ;;  %v12809_v3 = vpop.f32.mrb[210].mxu0  ;;  %v4217_v34 = vmax.f32 %v3765_v17, 0.0  ;;  %v5184_v62 = vadd.f32 %v12824_v35, %v12766_v2 }
 0x36d   : > { %v10144_v8 = vpop.eup %10143  ;;  %7752 = vst.msk [vmem:[%s12375_s30 + $0x1e8] sm:$0xff] %vm7690_vm4, %v7495_v24  ;;  %v6730_v47 = vadd.f32 1.0, %v10142_v58  ;;  %10161 = vpow2.f32 %v8482_v0  ;;  %v12813_v15 = vpop.f32.mrb[65].mxu1  ;;  %v3757_v32 = vadd.f32 %v12804_v42, %v12772_v49  ;;  %9778 = vmatprep.mubr.msk.bf16.mxu0 %vm2585_vm3, %v4375_v38  ;;  %v5176_v11 = vadd.f32 %v12824_v35, %v12774_v28 }
 0x36e   : > { %v12815_v14 = vpop.f32.mrb[211].mxu0  ;;  %v10146_v33 = vpop.eup %10145  ;;  %v7500_v19 = vmul.f32 %v12604_v59, %v10144_v8  ;;  %10163 = vrcp.f32 %v6727_v6  ;;  %v3768_v25 = vadd.f32 %v12804_v42, %v12778_v5  ;;  %v8488_v39 = vmul.f32 -1.442695, %v5184_v62 }
 0x36f   : > { %v12818_v52 = vpop.f32.mrb[66].mxu1  ;;  %v10148_v46 = vpop.eup %10147  ;;  %v7498_v13 = vmul.f32 %v12604_v59, %v10146_v33  ;;  %10165 = vrcp.f32 %v6730_v47  ;;  %v4215_v56 = vmax.f32 %v3757_v32, 0.0  ;;  %9779 = vmatmul.mubr.msk.bf16.gmra.mrb[56].mxu0 %vm2585_vm3, %v4376_v50  ;;  %v8486_v61 = vmul.f32 -1.442695, %v5176_v11 }
 0x370   : > { %v12831_v1 = vpop.f32.mrb[67].mxu1  ;;  %v10150_v44 = vpop.eup %10149  ;;  %7757 = vst.msk [vmem:[%s12375_s30 + $0x210] sm:$0xff] %vm7690_vm4, %v7500_v19  ;;  %v6728_v10 = vadd.f32 1.0, %v10148_v46  ;;  %10167 = vpow2.f32 %v8487_v18  ;;  %v4218_v31 = vmax.f32 %v3768_v25, 0.0  ;;  %v3760_v53 = vadd.f32 %v12804_v42, %v12780_v16  ;;  %v12898_v25 = vld [vmem:[%s14110_s7] ss:$0 sm:$0xff] }
 0x371   : > { %v10152_v2 = vpop.eup %10151  ;;  %7755 = vst.msk [vmem:[%s12375_s30 + $0x200] sm:$0xff] %vm7690_vm4, %v7498_v13  ;;  %v7501_v26 = vmul.f32 %v12604_v59, %v10150_v44  ;;  %10169 = vpow2.f32 %v8485_v60  ;;  %v9680_v28 = vpop.f32.mrb[212].mxu0  ;;  %v5197_v21 = vadd.f32 %v12824_v35, %v9676_v41  ;;  %v5189_v27 = vadd.f32 %v12824_v35, %v5188_v30 }
 0x372   : > { %v10154_v49 = vpop.eup %10153  ;;  %10171 = vrcp.f32 %v6728_v10  ;;  %v6733_v12 = vadd.f32 1.0, %v10152_v2  ;;  %v5204_v54 = vpop.f32.mrb[213].mxu0  ;;  %v4378_v36 = vpack.c.bf16 %v4218_v31, %v4217_v34  ;;  %v4216_v45 = vmax.f32 %v3760_v53, 0.0 }
 0x373   : > { %v10156_v48 = vpop.eup %10155  ;;  %7758 = vst.msk [vmem:[%s12375_s30 + $0x218] sm:$0xff] %vm7690_vm4, %v7501_v26  ;;  %v6731_v5 = vadd.f32 1.0, %v10154_v49  ;;  %10173 = vpow2.f32 %v8488_v39  ;;  %v9528_v51 = vpop.f32.mrb[68].mxu1  ;;  %v8491_v63 = vmul.f32 -1.442695, %v5197_v21  ;;  %v3781_v23 = vadd.f32 %v12804_v42, %v12807_v7 }
 0x374   : > { %v10158_v57 = vpop.eup %10157  ;;  %v7499_v22 = vmul.f32 %v12604_v59, %v10156_v48  ;;  %10175 = vrcp.f32 %v6733_v12  ;;  %v12850_v4 = vpop.f32.mrb[214].mxu0  ;;  %v8489_v0 = vmul.f32 -1.442695, %v5189_v27  ;;  %v5200_v41 = vadd.f32 %v12824_v35, %v12809_v3 }
 0x375   : > { %10177 = vrcp.f32 %v6731_v5  ;;  %v6734_v37 = vadd.f32 1.0, %v10158_v57  ;;  %v12852_v43 = vpop.f32.mrb[69].mxu1  ;;  %v12854_v16 = vpop.f32.mrb[215].mxu0  ;;  %v4377_v40 = vpack.c.bf16 %v4216_v45, %v4215_v56  ;;  %v3773_v20 = vadd.f32 %v12804_v42, %v12813_v15 }
 0x376   : > { %v10160_v55 = vpop.eup %10159  ;;  %7756 = vst.msk [vmem:[%s12375_s30 + $0x208] sm:$0xff] %vm7690_vm4, %v7499_v22  ;;  %10179 = vpow2.f32 %v8486_v61  ;;  %v12862_v29 = vpop.f32.mrb[70].mxu1  ;;  %v4221_v18 = vmax.f32 %v3781_v23, 0.0  ;;  %v8492_v17 = vmul.f32 -1.442695, %v5200_v41  ;;  %v5192_v47 = vadd.f32 %v12824_v35, %v12815_v14 }
 0x377   : > { %v10162_v24 = vpop.eup %10161  ;;  %v7504_v9 = vmul.f32 %v12604_v59, %v10160_v55  ;;  %10181 = vrcp.f32 %v6734_v37  ;;  %v12867_v30 = vpop.f32.mrb[71].mxu1  ;;  %v4219_v8 = vmax.f32 %v3773_v20, 0.0  ;;  %9782 = vmatprep.mubr.msk.bf16.mxu0 %vm2585_vm3, %v4377_v40  ;;  %v3784_v15 = vadd.f32 %v12804_v42, %v12818_v52 }
 0x378   : > { %v10164_v58 = vpop.eup %10163  ;;  %v6732_v6 = vadd.f32 1.0, %v10162_v24  ;;  %10183 = vpow2.f32 %v8491_v63  ;;  %v3776_v33 = vadd.f32 %v12804_v42, %v12831_v1  ;;  %9783 = vmatmul.mubr.msk.bf16.gmra.mrb[60].mxu0 %vm2585_vm3, %v4378_v36  ;;  %v8490_v34 = vmul.f32 -1.442695, %v5192_v47 }
 0x379   : > { %v10166_v7 = vpop.eup %10165  ;;  %7761 = vst.msk [vmem:[%s12375_s30 + $0x230] sm:$0xff] %vm7690_vm4, %v7504_v9  ;;  %v7502_v3 = vmul.f32 %v12604_v59, %v10164_v58  ;;  %10185 = vpow2.f32 %v8489_v0  ;;  %v12881_v19 = vpop.f32.mrb[216].mxu0  ;;  %v5213_v46 = vadd.f32 %v12824_v35, %v9680_v28  ;;  %v4222_v62 = vmax.f32 %v3784_v15, 0.0 }
 0x37a   : > { %v10168_v50 = vpop.eup %10167  ;;  %v7505_v38 = vmul.f32 %v12604_v59, %v10166_v7  ;;  %10187 = vrcp.f32 %v6732_v6  ;;  %v12886_v59 = vpop.f32.mrb[217].mxu0  ;;  %v4220_v32 = vmax.f32 %v3776_v33, 0.0  ;;  %v5205_v1 = vadd.f32 %v12824_v35, %v5204_v54 }
 0x37b   : > { %v10170_v60 = vpop.eup %10169  ;;  %7759 = vst.msk [vmem:[%s12375_s30 + $0x220] sm:$0xff] %vm7690_vm4, %v7502_v3  ;;  %v6737_v14 = vadd.f32 1.0, %v10168_v50  ;;  %10189 = vpow2.f32 %v8492_v17  ;;  %v12891_v44 = vpop.f32.mrb[72].mxu1  ;;  %v8495_v26 = vmul.f32 -1.442695, %v5213_v46  ;;  %v3797_v39 = vadd.f32 %v12804_v42, %v9528_v51 }
 0x37c   : > { %v10172_v13 = vpop.eup %10171  ;;  %7762 = vst.msk [vmem:[%s12375_s30 + $0x238] sm:$0xff] %vm7690_vm4, %v7505_v38  ;;  %v6735_v52 = vadd.f32 1.0, %v10170_v60  ;;  %v12893_v10 = vpop.f32.mrb[218].mxu0  ;;  %v4380_v31 = vpack.c.bf16 %v4222_v62, %v4221_v18  ;;  %v4379_v28 = vpack.c.bf16 %v4220_v32, %v4219_v8  ;;  %v8493_v21 = vmul.f32 -1.442695, %v5205_v1 }
 0x37d   : > { %v10174_v11 = vpop.eup %10173  ;;  %v7503_v2 = vmul.f32 %v12898_v25, %v10172_v13  ;;  %10191 = vrcp.f32 %v6737_v14  ;;  %v12902_v56 = vpop.f32.mrb[73].mxu1  ;;  %v4225_v54 = vmax.f32 %v3797_v39, 0.0  ;;  %v5216_v27 = vadd.f32 %v12824_v35, %v12850_v4 }
 0x37e   : > { %v12904_v49 = vpop.f32.mrb[219].mxu0  ;;  %v10176_v12 = vpop.eup %10175  ;;  %10193 = vrcp.f32 %v6735_v52  ;;  %v6738_v61 = vadd.f32 1.0, %v10174_v11  ;;  %v3789_v51 = vadd.f32 %v12804_v42, %v12852_v43  ;;  %9786 = vmatprep.mubr.msk.bf16.mxu0 %vm2585_vm3, %v4379_v28  ;;  %v5208_v63 = vadd.f32 %v12824_v35, %v12854_v16 }
 0x37f   : > { %v12906_v48 = vpop.f32.mrb[74].mxu1  ;;  %v10178_v5 = vpop.eup %10177  ;;  %7760 = vst.msk [vmem:[%s12375_s30 + $0x228] sm:$0xff] %vm7690_vm4, %v7503_v2  ;;  %v7508_v53 = vmul.f32 %v12898_v25, %v10176_v12  ;;  %10195 = vpow2.f32 %v8490_v34  ;;  %v3800_v55 = vadd.f32 %v12804_v42, %v12862_v29  ;;  %v8496_v43 = vmul.f32 -1.442695, %v5216_v27 }
 0x380   : > { %v12911_v57 = vpop.f32.mrb[75].mxu1  ;;  %v10180_v22 = vpop.eup %10179  ;;  %v7506_v36 = vmul.f32 %v12898_v25, %v10178_v5  ;;  %10197 = vrcp.f32 %v6738_v61  ;;  %v4223_v23 = vmax.f32 %v3789_v51, 0.0  ;;  %9787 = vmatmul.mubr.msk.bf16.gmra.mrb[64].mxu0 %vm2585_vm3, %v4380_v31  ;;  %v8494_v16 = vmul.f32 -1.442695, %v5208_v63 }
 0x381   : > { %v10182_v37 = vpop.eup %10181  ;;  %7765 = vst.msk [vmem:[%s12375_s30 + $0x250] sm:$0xff] %vm7690_vm4, %v7508_v53  ;;  %v6736_v45 = vadd.f32 1.0, %v10180_v22  ;;  %10199 = vpow2.f32 %v8495_v26  ;;  %v12929_v41 = vpop.f32.mrb[220].mxu0  ;;  %v4226_v40 = vmax.f32 %v3800_v55, 0.0  ;;  %v3792_v6 = vadd.f32 %v12804_v42, %v12867_v30 }
 0x382   : > { %v10184_v0 = vpop.eup %10183  ;;  %7763 = vst.msk [vmem:[%s12375_s30 + $0x240] sm:$0xff] %vm7690_vm4, %v7506_v36  ;;  %v7509_v4 = vmul.f32 %v12898_v25, %v10182_v37  ;;  %10201 = vpow2.f32 %v8493_v21  ;;  %v12931_v20 = vpop.f32.mrb[221].mxu0  ;;  %v5229_v18 = vadd.f32 %v12824_v35, %v12881_v19  ;;  %v5221_v50 = vadd.f32 %v12824_v35, %v12886_v59 }
 0x383   : > { %v10186_v24 = vpop.eup %10185  ;;  %10203 = vrcp.f32 %v6736_v45  ;;  %v6741_v9 = vadd.f32 1.0, %v10184_v0  ;;  %v12939_v17 = vpop.f32.mrb[76].mxu1  ;;  %v4382_v47 = vpack.c.bf16 %v4226_v40, %v4225_v54  ;;  %v4224_v33 = vmax.f32 %v3792_v6, 0.0 }
 0x384   : > { %v10188_v29 = vpop.eup %10187  ;;  %7766 = vst.msk [vmem:[%s12375_s30 + $0x258] sm:$0xff] %vm7690_vm4, %v7509_v4  ;;  %v6739_v58 = vadd.f32 1.0, %v10186_v24  ;;  %10205 = vpow2.f32 %v8496_v43  ;;  %v12941_v7 = vpop.f32.mrb[222].mxu0  ;;  %v8499_v19 = vmul.f32 -1.442695, %v5229_v18  ;;  %v3813_v46 = vadd.f32 %v12804_v42, %v12891_v44 }
 0x385   : > { %v10190_v3 = vpop.eup %10189  ;;  %v7507_v8 = vmul.f32 %v12898_v25, %v10188_v29  ;;  %10207 = vrcp.f32 %v6741_v9  ;;  %v12946_v38 = vpop.f32.mrb[77].mxu1  ;;  %v8497_v34 = vmul.f32 -1.442695, %v5221_v50  ;;  %v5232_v59 = vadd.f32 %v12824_v35, %v12893_v10 }
 0x386   : > { %v12948_v15 = vpop.f32.mrb[223].mxu0  ;;  %10209 = vrcp.f32 %v6739_v58  ;;  %v6742_v30 = vadd.f32 1.0, %v10190_v3  ;;  %v12950_v60 = vpop.f32.mrb[78].mxu1  ;;  %v4381_v32 = vpack.c.bf16 %v4224_v33, %v4223_v23  ;;  %v3805_v1 = vadd.f32 %v12804_v42, %v12902_v56 }
 0x387   : > { %v10192_v14 = vpop.eup %10191  ;;  %7764 = vst.msk [vmem:[%s12375_s30 + $0x248] sm:$0xff] %vm7690_vm4, %v7507_v8  ;;  %10211 = vpow2.f32 %v8494_v16  ;;  %v12958_v13 = vpop.f32.mrb[79].mxu1  ;;  %v4229_v26 = vmax.f32 %v3813_v46, 0.0  ;;  %v8500_v44 = vmul.f32 -1.442695, %v5232_v59  ;;  %v5224_v61 = vadd.f32 %v12824_v35, %v12904_v49 }
 0x388   : > { %v10194_v52 = vpop.eup %10193  ;;  %v7512_v62 = vmul.f32 %v12898_v25, %v10192_v14  ;;  %10213 = vrcp.f32 %v6742_v30  ;;  %v4227_v12 = vmax.f32 %v3805_v1, 0.0  ;;  %9790 = vmatprep.mubr.msk.bf16.mxu0 %vm2585_vm3, %v4381_v32  ;;  %v3816_v5 = vadd.f32 %v12804_v42, %v12906_v48 }
 0x389   : > { %v10196_v11 = vpop.eup %10195  ;;  %v7510_v2 = vmul.f32 %v12898_v25, %v10194_v52  ;;  %10215 = vpow2.f32 %v8499_v19  ;;  %v12969_v31 = vpop.f32.mrb[224].mxu0  ;;  %v3808_v53 = vadd.f32 %v12804_v42, %v12911_v57  ;;  %9791 = vmatmul.mubr.msk.bf16.gmra.mrb[68].mxu0 %vm2585_vm3, %v4382_v47  ;;  %v8498_v22 = vmul.f32 -1.442695, %v5224_v61 }
 0x38a   : > { %v10198_v39 = vpop.eup %10197  ;;  %7769 = vst.msk [vmem:[%s12375_s30 + $0x270] sm:$0xff] %vm7690_vm4, %v7512_v62  ;;  %v6740_v10 = vadd.f32 1.0, %v10196_v11  ;;  %10217 = vpow2.f32 %v8497_v34  ;;  %v12979_v49 = vpop.f32.mrb[225].mxu0  ;;  %v5245_v36 = vadd.f32 %v12824_v35, %v12929_v41  ;;  %v4230_v57 = vmax.f32 %v3816_v5, 0.0 }
 0x38b   : > { %v10200_v56 = vpop.eup %10199  ;;  %7767 = vst.msk [vmem:[%s12375_s30 + $0x260] sm:$0xff] %vm7690_vm4, %v7510_v2  ;;  %v7513_v28 = vmul.f32 %v12898_v25, %v10198_v39  ;;  %10219 = vpow2.f32 %v8500_v44  ;;  %v12983_v27 = vpop.f32.mrb[80].mxu1  ;;  %v4228_v45 = vmax.f32 %v3808_v53, 0.0  ;;  %v5237_v63 = vadd.f32 %v12824_v35, %v12931_v20 }
 0x38c   : > { %v10202_v21 = vpop.eup %10201  ;;  %10221 = vrcp.f32 %v6740_v10  ;;  %v6745_v54 = vadd.f32 1.0, %v10200_v56  ;;  %v12985_v51 = vpop.f32.mrb[226].mxu0  ;;  %v8503_v23 = vmul.f32 -1.442695, %v5245_v36  ;;  %v3829_v41 = vadd.f32 %v12804_v42, %v12939_v17 }
 0x38d   : > { %v10204_v37 = vpop.eup %10203  ;;  %7770 = vst.msk [vmem:[%s12375_s30 + $0x278] sm:$0xff] %vm7690_vm4, %v7513_v28  ;;  %v6743_v48 = vadd.f32 1.0, %v10202_v21  ;;  %v12991_v55 = vpop.f32.mrb[81].mxu1  ;;  %v4384_v40 = vpack.c.bf16 %v4230_v57, %v4229_v26  ;;  %v4383_v20 = vpack.c.bf16 %v4228_v45, %v4227_v12  ;;  %v8501_v18 = vmul.f32 -1.442695, %v5237_v63 }
 0x38e   : > { %v12993_v0 = vpop.f32.mrb[227].mxu0  ;;  %v10206_v4 = vpop.eup %10205  ;;  %v7511_v43 = vmul.f32 %v12898_v25, %v10204_v37  ;;  %10223 = vrcp.f32 %v6745_v54  ;;  %v4233_v3 = vmax.f32 %v3829_v41, 0.0  ;;  %v5248_v47 = vadd.f32 %v12824_v35, %v12941_v7 }
 0x38f   : > { %v12998_v24 = vpop.f32.mrb[82].mxu1  ;;  %v10208_v9 = vpop.eup %10207  ;;  %10225 = vrcp.f32 %v6743_v48  ;;  %v6746_v16 = vadd.f32 1.0, %v10206_v4  ;;  %v3821_v50 = vadd.f32 %v12804_v42, %v12946_v38  ;;  %9794 = vmatprep.mubr.msk.bf16.mxu0 %vm2585_vm3, %v4383_v20  ;;  %v5240_v19 = vadd.f32 %v12824_v35, %v12948_v15 }
 0x390   : > { %v13000_v29 = vpop.f32.mrb[83].mxu1  ;;  %v10210_v58 = vpop.eup %10209  ;;  %7768 = vst.msk [vmem:[%s12375_s30 + $0x268] sm:$0xff] %vm7690_vm4, %v7511_v43  ;;  %v7516_v6 = vmul.f32 %v12898_v25, %v10208_v9  ;;  %10227 = vpow2.f32 %v8498_v22  ;;  %v3832_v14 = vadd.f32 %v12804_v42, %v12950_v60  ;;  %v8504_v38 = vmul.f32 -1.442695, %v5248_v47 }
 0x391   : > { %v10212_v17 = vpop.eup %10211  ;;  %v7514_v8 = vmul.f32 %v12898_v25, %v10210_v58  ;;  %10229 = vrcp.f32 %v6746_v16  ;;  %v13017_v34 = vpop.f32.mrb[228].mxu0  ;;  %v4231_v59 = vmax.f32 %v3821_v50, 0.0  ;;  %9795 = vmatmul.mubr.msk.bf16.gmra.mrb[72].mxu0 %vm2585_vm3, %v4384_v40  ;;  %v8502_v32 = vmul.f32 -1.442695, %v5240_v19 }
 0x392   : > { %v10214_v30 = vpop.eup %10213  ;;  %7773 = vst.msk [vmem:[%s12375_s30 + $0x290] sm:$0xff] %vm7690_vm4, %v7516_v6  ;;  %v6744_v33 = vadd.f32 1.0, %v10212_v17  ;;  %10231 = vpow2.f32 %v8503_v23  ;;  %v13023_v52 = vpop.f32.mrb[229].mxu0  ;;  %v4234_v60 = vmax.f32 %v3832_v14, 0.0  ;;  %v3824_v44 = vadd.f32 %v12804_v42, %v12958_v13 }
 0x393   : > { %v10216_v46 = vpop.eup %10215  ;;  %7771 = vst.msk [vmem:[%s12375_s30 + $0x280] sm:$0xff] %vm7690_vm4, %v7514_v8  ;;  %v7517_v7 = vmul.f32 %v12898_v25, %v10214_v30  ;;  %10233 = vpow2.f32 %v8501_v18  ;;  %v13025_v1 = vpop.f32.mrb[84].mxu1  ;;  %v5261_v39 = vadd.f32 %v12824_v35, %v12969_v31  ;;  %v5253_v5 = vadd.f32 %v12824_v35, %v12979_v49 }
 0x394   : > { %v10218_v62 = vpop.eup %10217  ;;  %10235 = vrcp.f32 %v6744_v33  ;;  %v6749_v15 = vadd.f32 1.0, %v10216_v46  ;;  %v13027_v11 = vpop.f32.mrb[230].mxu0  ;;  %v4386_v28 = vpack.c.bf16 %v4234_v60, %v4233_v3  ;;  %v4232_v13 = vmax.f32 %v3824_v44, 0.0 }
 0x395   : > { %v10220_v2 = vpop.eup %10219  ;;  %7774 = vst.msk [vmem:[%s12375_s30 + $0x298] sm:$0xff] %vm7690_vm4, %v7517_v7  ;;  %v6747_v26 = vadd.f32 1.0, %v10218_v62  ;;  %10237 = vpow2.f32 %v8504_v38  ;;  %v13035_v10 = vpop.f32.mrb[85].mxu1  ;;  %v8507_v54 = vmul.f32 -1.442695, %v5261_v39  ;;  %v3845_v37 = vadd.f32 %v12804_v42, %v12983_v27 }
 0x396   : > { %v13037_v12 = vpop.f32.mrb[231].mxu0  ;;  %v10222_v61 = vpop.eup %10221  ;;  %10239 = vrcp.f32 %v6749_v15  ;;  %v6750_v56 = vadd.f32 1.0, %v10220_v2  ;;  %v8505_v36 = vmul.f32 -1.442695, %v5253_v5  ;;  %v5264_v48 = vadd.f32 %v12824_v35, %v12985_v51 }
 0x397   : > { %v13041_v53 = vpop.f32.mrb[86].mxu1  ;;  %v7515_v21 = vmul.f32 %v12898_v25, %v10222_v61  ;;  %10241 = vrcp.f32 %v6747_v26  ;;  %v4385_v45 = vpack.c.bf16 %v4232_v13, %v4231_v59  ;;  %v3837_v63 = vadd.f32 %v12804_v42, %v12991_v55 }
 0x398   : > { %v13044_v31 = vpop.f32.mrb[87].mxu1  ;;  %v10224_v22 = vpop.eup %10223  ;;  %10243 = vrcp.f32 %v6750_v56  ;;  %v4237_v23 = vmax.f32 %v3845_v37, 0.0  ;;  %v8508_v27 = vmul.f32 -1.442695, %v5264_v48  ;;  %v5256_v40 = vadd.f32 %v12824_v35, %v12993_v0 }
 0x399   : > { %v10226_v49 = vpop.eup %10225  ;;  %7772 = vst.msk [vmem:[%s12375_s30 + $0x288] sm:$0xff] %vm7690_vm4, %v7515_v21  ;;  %v7520_v57 = vmul.f32 %v12898_v25, %v10224_v22  ;;  %10245 = vpow2.f32 %v8502_v32  ;;  %v13056_v41 = vpop.f32.mrb[232].mxu0  ;;  %v4235_v16 = vmax.f32 %v3837_v63, 0.0  ;;  %9798 = vmatprep.mubr.msk.bf16.mxu0 %vm2585_vm3, %v4385_v45  ;;  %v3848_v6 = vadd.f32 %v12804_v42, %v12998_v24 }
 0x39a   : > { %v10228_v4 = vpop.eup %10227  ;;  %v7518_v43 = vmul.f32 %v12898_v25, %v10226_v49  ;;  %10247 = vpow2.f32 %v8507_v54  ;;  %v13063_v55 = vpop.f32.mrb[233].mxu0  ;;  %v3840_v18 = vadd.f32 %v12804_v42, %v13000_v29  ;;  %9799 = vmatmul.mubr.msk.bf16.gmra.mrb[76].mxu0 %vm2585_vm3, %v4386_v28  ;;  %v8506_v47 = vmul.f32 -1.442695, %v5256_v40 }
 0x39b   : > { %v10230_v51 = vpop.eup %10229  ;;  %7777 = vst.msk [vmem:[%s12375_s30 + $0x2b0] sm:$0xff] %vm7690_vm4, %v7520_v57  ;;  %v6748_v9 = vadd.f32 1.0, %v10228_v4  ;;  %10249 = vpow2.f32 %v8505_v36  ;;  %v13073_v0 = vpop.f32.mrb[88].mxu1  ;;  %v5277_v50 = vadd.f32 %v12824_v35, %v13017_v34  ;;  %v4238_v19 = vmax.f32 %v3848_v6, 0.0 }
 0x39c   : > { %v10232_v20 = vpop.eup %10231  ;;  %7775 = vst.msk [vmem:[%s12375_s30 + $0x2a0] sm:$0xff] %vm7690_vm4, %v7518_v43  ;;  %v7521_v58 = vmul.f32 %v12898_v25, %v10230_v51  ;;  %10251 = vpow2.f32 %v8508_v27  ;;  %v13075_v3 = vpop.f32.mrb[234].mxu0  ;;  %v4236_v14 = vmax.f32 %v3840_v18, 0.0  ;;  %v5269_v46 = vadd.f32 %v12824_v35, %v13023_v52 }
 0x39d   : > { %v10234_v17 = vpop.eup %10233  ;;  %10253 = vrcp.f32 %v6748_v9  ;;  %v6753_v8 = vadd.f32 1.0, %v10232_v20  ;;  %v13079_v30 = vpop.f32.mrb[89].mxu1  ;;  %v8511_v34 = vmul.f32 -1.442695, %v5277_v50  ;;  %v3861_v62 = vadd.f32 %v12804_v42, %v13025_v1 }
 0x39e   : > { %v13081_v33 = vpop.f32.mrb[235].mxu0  ;;  %v10236_v24 = vpop.eup %10235  ;;  %7778 = vst.msk [vmem:[%s12375_s30 + $0x2b8] sm:$0xff] %vm7690_vm4, %v7521_v58  ;;  %v6751_v29 = vadd.f32 1.0, %v10234_v17  ;;  %v4388_v2 = vpack.c.bf16 %v4238_v19, %v4237_v23  ;;  %v4387_v26 = vpack.c.bf16 %v4236_v14, %v4235_v16  ;;  %v8509_v39 = vmul.f32 -1.442695, %v5269_v46 }
 0x39f   : > { %v13087_v7 = vpop.f32.mrb[90].mxu1  ;;  %v10238_v38 = vpop.eup %10237  ;;  %v7519_v59 = vmul.f32 %v12898_v25, %v10236_v24  ;;  %10255 = vrcp.f32 %v6753_v8  ;;  %v4241_v61 = vmax.f32 %v3861_v62, 0.0  ;;  %v5280_v28 = vadd.f32 %v12824_v35, %v13027_v11 }
 0x3a0   : > { %v13092_v15 = vpop.f32.mrb[91].mxu1  ;;  %v10240_v32 = vpop.eup %10239  ;;  %10257 = vrcp.f32 %v6751_v29  ;;  %v6754_v60 = vadd.f32 1.0, %v10238_v38  ;;  %v3853_v5 = vadd.f32 %v12804_v42, %v13035_v10  ;;  %9802 = vmatprep.mubr.msk.bf16.mxu0 %vm2585_vm3, %v4387_v26  ;;  %v5272_v22 = vadd.f32 %v12824_v35, %v13037_v12 }
 0x3a1   : > { %v10242_v44 = vpop.eup %10241  ;;  %7776 = vst.msk [vmem:[%s12375_s30 + $0x2a8] sm:$0xff] %vm7690_vm4, %v7519_v59  ;;  %v7524_v52 = vmul.f32 %v12898_v25, %v10240_v32  ;;  %10259 = vpow2.f32 %v8506_v47  ;;  %v13103_v21 = vpop.f32.mrb[236].mxu0  ;;  %v3864_v11 = vadd.f32 %v12804_v42, %v13041_v53  ;;  %v8512_v48 = vmul.f32 -1.442695, %v5280_v28 }
 0x3a2   : > { %v10244_v56 = vpop.eup %10243  ;;  %v7522_v1 = vmul.f32 %v12898_v25, %v10242_v44  ;;  %10261 = vrcp.f32 %v6754_v60  ;;  %v13112_v36 = vpop.f32.mrb[237].mxu0  ;;  %v4239_v49 = vmax.f32 %v3853_v5, 0.0  ;;  %9803 = vmatmul.mubr.msk.bf16.gmra.mrb[80].mxu0 %vm2585_vm3, %v4388_v2  ;;  %v8510_v53 = vmul.f32 -1.442695, %v5272_v22 }
 0x3a3   : > { %v10246_v13 = vpop.eup %10245  ;;  %7781 = vst.msk [vmem:[%s12375_s30 + $0x2d0] sm:$0xff] %vm7690_vm4, %v7524_v52  ;;  %v7525_v54 = vmul.f32 %v12898_v25, %v10244_v56  ;;  %10263 = vpow2.f32 %v8511_v34  ;;  %v13117_v57 = vpop.f32.mrb[92].mxu1  ;;  %v4242_v4 = vmax.f32 %v3864_v11, 0.0  ;;  %v3856_v43 = vadd.f32 %v12804_v42, %v13044_v31 }
 0x3a4   : > { %v10248_v10 = vpop.eup %10247  ;;  %7779 = vst.msk [vmem:[%s12375_s30 + $0x2c0] sm:$0xff] %vm7690_vm4, %v7522_v1  ;;  %v6752_v37 = vadd.f32 1.0, %v10246_v13  ;;  %10265 = vpow2.f32 %v8509_v39  ;;  %v13119_v45 = vpop.f32.mrb[238].mxu0  ;;  %v5293_v16 = vadd.f32 %v12824_v35, %v13056_v41  ;;  %v5285_v40 = vadd.f32 %v12824_v35, %v13063_v55 }
 0x3a5   : > { %v10250_v63 = vpop.eup %10249  ;;  %7782 = vst.msk [vmem:[%s12375_s30 + $0x2d8] sm:$0xff] %vm7690_vm4, %v7525_v54  ;;  %v6757_v12 = vadd.f32 1.0, %v10248_v10  ;;  %v13125_v23 = vpop.f32.mrb[93].mxu1  ;;  %v4390_v31 = vpack.c.bf16 %v4242_v4, %v4241_v61  ;;  %v4240_v18 = vmax.f32 %v3856_v43, 0.0  ;;  %v3877_v55 = vadd.f32 %v12804_v42, %v13073_v0 }
 0x3a6   : > { %v13127_v27 = vpop.f32.mrb[239].mxu0  ;;  %v10252_v51 = vpop.eup %10251  ;;  %10267 = vrcp.f32 %v6752_v37  ;;  %v6755_v9 = vadd.f32 1.0, %v10250_v63  ;;  %v8515_v47 = vmul.f32 -1.442695, %v5293_v16  ;;  %v8513_v50 = vmul.f32 -1.442695, %v5285_v40 }
 0x3a7   : > { %v13133_v20 = vpop.f32.mrb[94].mxu1  ;;  %v10254_v58 = vpop.eup %10253  ;;  %10269 = vrcp.f32 %v6757_v12  ;;  %v6758_v6 = vadd.f32 1.0, %v10252_v51  ;;  %v4389_v41 = vpack.c.bf16 %v4240_v18, %v4239_v49  ;;  %v5296_v29 = vadd.f32 %v12824_v35, %v13075_v3 }
 0x3a8   : > { %v13135_v17 = vpop.f32.mrb[95].mxu1  ;;  %v7523_v8 = vmul.f32 %v12898_v25, %v10254_v58  ;;  %10271 = vrcp.f32 %v6755_v9  ;;  %v3869_v46 = vadd.f32 %v12804_v42, %v13079_v30  ;;  %v5288_v38 = vadd.f32 %v12824_v35, %v13081_v33 }
 0x3a9   : > { %v10256_v24 = vpop.eup %10255  ;;  %10273 = vrcp.f32 %v6758_v6  ;;  %v13149_v59 = vpop.f32.mrb[240].mxu0  ;;  %v4245_v3 = vmax.f32 %v3877_v55, 0.0  ;;  %v8516_v62 = vmul.f32 -1.442695, %v5296_v29  ;;  %9806 = vmatprep.mubr.msk.bf16.mxu0 %vm2585_vm3, %v4389_v41  ;;  %v3880_v61 = vadd.f32 %v12804_v42, %v13087_v7 }
 0x3aa   : > { %v10258_v19 = vpop.eup %10257  ;;  %7780 = vst.msk [vmem:[%s12375_s30 + $0x2c8] sm:$0xff] %vm7690_vm4, %v7523_v8  ;;  %v7528_v14 = vmul.f32 %v12898_v25, %v10256_v24  ;;  %10275 = vpow2.f32 %v8512_v48  ;;  %v13153_v32 = vpop.f32.mrb[241].mxu0  ;;  %v4243_v2 = vmax.f32 %v3869_v46, 0.0  ;;  %v8514_v33 = vmul.f32 -1.442695, %v5288_v38  ;;  %9807 = vmatmul.mubr.msk.bf16.gmra.mrb[84].mxu0 %vm2585_vm3, %v4390_v31 }
 0x3ab   : > { %v10260_v34 = vpop.eup %10259  ;;  %v7526_v0 = vmul.f32 %v12898_v25, %v10258_v19  ;;  %10277 = vpow2.f32 %v8510_v53  ;;  %v13158_v26 = vpop.f32.mrb[96].mxu1  ;;  %v3872_v56 = vadd.f32 %v12804_v42, %v13092_v15  ;;  %v5309_v54 = vadd.f32 %v12824_v35, %v13103_v21 }
 0x3ac   : > { %v10262_v60 = vpop.eup %10261  ;;  %7785 = vst.msk [vmem:[%s12375_s30 + $0x2f0] sm:$0xff] %vm7690_vm4, %v7528_v14  ;;  %v6756_v30 = vadd.f32 1.0, %v10260_v34  ;;  %10279 = vpow2.f32 %v8515_v47  ;;  %v13160_v44 = vpop.f32.mrb[242].mxu0  ;;  %v5301_v22 = vadd.f32 %v12824_v35, %v13112_v36  ;;  %v4246_v15 = vmax.f32 %v3880_v61, 0.0 }
 0x3ad   : > { %v10264_v52 = vpop.eup %10263  ;;  %7783 = vst.msk [vmem:[%s12375_s30 + $0x2e0] sm:$0xff] %vm7690_vm4, %v7526_v0  ;;  %v7529_v39 = vmul.f32 %v12898_v25, %v10262_v60  ;;  %10281 = vpow2.f32 %v8513_v50  ;;  %v13169_v1 = vpop.f32.mrb[97].mxu1  ;;  %v4244_v10 = vmax.f32 %v3872_v56, 0.0  ;;  %v8519_v49 = vmul.f32 -1.442695, %v5309_v54 }
 0x3ae   : > { %v13171_v28 = vpop.f32.mrb[243].mxu0  ;;  %v10266_v5 = vpop.eup %10265  ;;  %10283 = vrcp.f32 %v6756_v30  ;;  %v6761_v13 = vadd.f32 1.0, %v10264_v52  ;;  %v8517_v63 = vmul.f32 -1.442695, %v5301_v22  ;;  %v3893_v21 = vadd.f32 %v12804_v42, %v13117_v57 }
 0x3af   : > { %v13177_v11 = vpop.f32.mrb[98].mxu1  ;;  %7786 = vst.msk [vmem:[%s12375_s30 + $0x2f8] sm:$0xff] %vm7690_vm4, %v7529_v39  ;;  %v6759_v7 = vadd.f32 1.0, %v10266_v5  ;;  %10285 = vpow2.f32 %v8516_v62  ;;  %v4392_v53 = vpack.c.bf16 %v4246_v15, %v4245_v3  ;;  %v4391_v4 = vpack.c.bf16 %v4244_v10, %v4243_v2 }
 0x3b0   : > { %v13181_v37 = vpop.f32.mrb[99].mxu1  ;;  %v10268_v48 = vpop.eup %10267  ;;  %10287 = vrcp.f32 %v6761_v13  ;;  %v4249_v9 = vmax.f32 %v3893_v21, 0.0  ;;  %v5312_v16 = vadd.f32 %v12824_v35, %v13119_v45  ;;  %v3885_v6 = vadd.f32 %v12804_v42, %v13125_v23 }
 0x3b1   : > { %v10270_v12 = vpop.eup %10269  ;;  %v7527_v36 = vmul.f32 %v12898_v25, %v10268_v48  ;;  %10289 = vrcp.f32 %v6759_v7  ;;  %v13189_v40 = vpop.f32.mrb[244].mxu0  ;;  %v5304_v31 = vadd.f32 %v12824_v35, %v13127_v27  ;;  %9810 = vmatprep.mubr.msk.bf16.mxu0 %vm2585_vm3, %v4391_v4  ;;  %v3896_v50 = vadd.f32 %v12804_v42, %v13133_v20 }
 0x3b2   : > { %v10272_v43 = vpop.eup %10271  ;;  %v7532_v51 = vmul.f32 %v12898_v25, %v10270_v12  ;;  %10291 = vpow2.f32 %v8514_v33  ;;  %v13199_v18 = vpop.f32.mrb[245].mxu0  ;;  %v8520_v47 = vmul.f32 -1.442695, %v5312_v16  ;;  %9811 = vmatmul.mubr.msk.bf16.gmra.mrb[88].mxu0 %vm2585_vm3, %v4392_v53  ;;  %v4247_v55 = vmax.f32 %v3885_v6, 0.0 }
 0x3b3   : > { %v10274_v58 = vpop.eup %10273  ;;  %7784 = vst.msk [vmem:[%s12375_s30 + $0x2e8] sm:$0xff] %vm7690_vm4, %v7527_v36  ;;  %v7530_v57 = vmul.f32 %v12898_v25, %v10272_v43  ;;  %10293 = vpow2.f32 %v8519_v49  ;;  %v13207_v23 = vpop.f32.mrb[100].mxu1  ;;  %v8518_v29 = vmul.f32 -1.442695, %v5304_v31  ;;  %v3888_v19 = vadd.f32 %v12804_v42, %v13135_v17 }
 0x3b4   : > { %v10276_v45 = vpop.eup %10275  ;;  %7789 = vst.msk [vmem:[%s12375_s30 + $0x310] sm:$0xff] %vm7690_vm4, %v7532_v51  ;;  %v7533_v8 = vmul.f32 %v12898_v25, %v10274_v58  ;;  %10295 = vpow2.f32 %v8517_v63  ;;  %v13209_v27 = vpop.f32.mrb[246].mxu0  ;;  %v4250_v34 = vmax.f32 %v3896_v50, 0.0  ;;  %v5325_v0 = vadd.f32 %v12824_v35, %v13149_v59 }
 0x3b5   : > { %v10278_v24 = vpop.eup %10277  ;;  %7787 = vst.msk [vmem:[%s12375_s30 + $0x300] sm:$0xff] %vm7690_vm4, %v7530_v57  ;;  %v6762_v41 = vadd.f32 1.0, %v10276_v45  ;;  %v13215_v14 = vpop.f32.mrb[101].mxu1  ;;  %10297 = vpow2.f32 %v8520_v47  ;;  %v4248_v30 = vmax.f32 %v3888_v19, 0.0  ;;  %v5317_v42 = vadd.f32 %v12824_v35, %v13153_v32  ;;  %v13233_v32 = vld [vmem:[%s14107_s4] ss:$0 sm:$0xff] }
 0x3b6   : > { %v13217_v46 = vpop.f32.mrb[247].mxu0  ;;  %v10280_v20 = vpop.eup %10279  ;;  %7790 = vst.msk [vmem:[%s12375_s30 + $0x318] sm:$0xff] %vm7690_vm4, %v7533_v8  ;;  %v6760_v38 = vadd.f32 1.0, %v10278_v24  ;;  %v4394_v52 = vpack.c.bf16 %v4250_v34, %v4249_v9  ;;  %v8523_v39 = vmul.f32 -1.442695, %v5325_v0  ;;  %v3909_v22 = vadd.f32 %v13233_v32, %v13158_v26 }
 0x3b7   : > { %v13223_v3 = vpop.f32.mrb[102].mxu1  ;;  %v10282_v62 = vpop.eup %10281  ;;  %10299 = vrcp.f32 %v6762_v41  ;;  %v6765_v60 = vadd.f32 1.0, %v10280_v20  ;;  %v4393_v56 = vpack.c.bf16 %v4248_v30, %v4247_v55  ;;  %v8521_v5 = vmul.f32 -1.442695, %v5317_v42  ;;  %v13274_v8 = vld [vmem:[%s14109_s6] ss:$0 sm:$0xff] }
 0x3b8   : > { %v13227_v17 = vpop.f32.mrb[103].mxu1  ;;  %v10284_v2 = vpop.eup %10283  ;;  %10301 = vrcp.f32 %v6760_v38  ;;  %v6763_v33 = vadd.f32 1.0, %v10282_v62  ;;  %v5328_v7 = vadd.f32 %v12824_v35, %v13160_v44  ;;  %v3901_v49 = vadd.f32 %v13233_v32, %v13169_v1 }
 0x3b9   : > { %v10286_v61 = vpop.eup %10285  ;;  %v7531_v59 = vmul.f32 %v12898_v25, %v10284_v2  ;;  %10303 = vrcp.f32 %v6765_v60  ;;  %v13239_v15 = vpop.f32.mrb[248].mxu0  ;;  %v5320_v63 = vadd.f32 %v12824_v35, %v13171_v28  ;;  %9814 = vmatprep.mubr.msk.bf16.mxu0 %vm2585_vm3, %v4393_v56  ;;  %v4253_v12 = vmax.f32 %v3909_v22, 0.0 }
 0x3ba   : > { %v10288_v13 = vpop.eup %10287  ;;  %10305 = vrcp.f32 %v6763_v33  ;;  %v6766_v54 = vadd.f32 1.0, %v10286_v61  ;;  %v13249_v26 = vpop.f32.mrb[249].mxu0  ;;  %v8524_v36 = vmul.f32 -1.442695, %v5328_v7  ;;  %9815 = vmatmul.mubr.msk.bf16.gmra.mrb[92].mxu0 %vm2585_vm3, %v4394_v52  ;;  %v4251_v28 = vmax.f32 %v3901_v49, 0.0 }
 0x3bb   : > { %v10290_v10 = vpop.eup %10289  ;;  %7788 = vst.msk [vmem:[%s12375_s30 + $0x308] sm:$0xff] %vm7690_vm4, %v7531_v59  ;;  %v7536_v48 = vmul.f32 %v12898_v25, %v10288_v13  ;;  %10307 = vpow2.f32 %v8518_v29  ;;  %v13253_v53 = vpop.f32.mrb[104].mxu1  ;;  %v8522_v43 = vmul.f32 -1.442695, %v5320_v63  ;;  %v3912_v57 = vadd.f32 %v13233_v32, %v13177_v11 }
 0x3bc   : > { %v10292_v44 = vpop.eup %10291  ;;  %v7534_v21 = vmul.f32 %v12898_v25, %v10290_v10  ;;  %10309 = vrcp.f32 %v6766_v54  ;;  %v13255_v4 = vpop.f32.mrb[250].mxu0  ;;  %v3904_v6 = vadd.f32 %v13233_v32, %v13181_v37  ;;  %v5341_v47 = vadd.f32 %v13274_v8, %v13189_v40 }
 0x3bd   : > { %v10294_v1 = vpop.eup %10293  ;;  %7793 = vst.msk [vmem:[%s12375_s30 + $0x330] sm:$0xff] %vm7690_vm4, %v7536_v48  ;;  %v6764_v35 = vadd.f32 1.0, %v10292_v44  ;;  %10311 = vpow2.f32 %v8523_v39  ;;  %v13259_v51 = vpop.f32.mrb[105].mxu1  ;;  %v5333_v50 = vadd.f32 %v13274_v8, %v13199_v18  ;;  %v4254_v37 = vmax.f32 %v3912_v57, 0.0 }
 0x3be   : > { %v13261_v9 = vpop.f32.mrb[251].mxu0  ;;  %v10296_v16 = vpop.eup %10295  ;;  %7791 = vst.msk [vmem:[%s12375_s30 + $0x320] sm:$0xff] %vm7690_vm4, %v7534_v21  ;;  %v6769_v58 = vadd.f32 1.0, %v10294_v1  ;;  %10313 = vpow2.f32 %v8521_v5  ;;  %v4252_v41 = vmax.f32 %v3904_v6, 0.0  ;;  %v3925_v55 = vadd.f32 %v13233_v32, %v13207_v23 }
 0x3bf   : > { %v13269_v31 = vpop.f32.mrb[106].mxu1  ;;  %10315 = vrcp.f32 %v6764_v35  ;;  %v6767_v45 = vadd.f32 1.0, %v10296_v16  ;;  %v10298_v11 = vpop.eup %10297  ;;  %v8527_v20 = vmul.f32 -1.442695, %v5341_v47  ;;  %v8525_v38 = vmul.f32 -1.442695, %v5333_v50 }
 0x3c0   : > { %v13280_v24 = vpop.f32.mrb[107].mxu1  ;;  %10317 = vrcp.f32 %v6769_v58  ;;  %v6770_v19 = vadd.f32 1.0, %v10298_v11  ;;  %v4396_v18 = vpack.c.bf16 %v4254_v37, %v4253_v12  ;;  %v4395_v0 = vpack.c.bf16 %v4252_v41, %v4251_v28 }
 0x3c1   : > { %v10300_v29 = vpop.eup %10299  ;;  %10319 = vrcp.f32 %v6767_v45  ;;  %v4257_v30 = vmax.f32 %v3925_v55, 0.0  ;;  %v5344_v23 = vadd.f32 %v13274_v8, %v13209_v27  ;;  %v3917_v33 = vadd.f32 %v13233_v32, %v13215_v14 }
 0x3c2   : > { %v10302_v34 = vpop.eup %10301  ;;  %v7537_v40 = vmul.f32 %v12898_v25, %v10300_v29  ;;  %10321 = vpow2.f32 %v8524_v36  ;;  %v5336_v52 = vadd.f32 %v13274_v8, %v13217_v46  ;;  %9818 = vmatprep.mubr.msk.bf16.mxu0 %vm2585_vm3, %v4395_v0  ;;  %v13296_v39 = vpop.f32.mrb[252].mxu0  ;;  %v3928_v14 = vadd.f32 %v13233_v32, %v13223_v3 }
 0x3c3   : > { %v10304_v62 = vpop.eup %10303  ;;  %v7535_v60 = vmul.f32 %v12898_v25, %v10302_v34  ;;  %10323 = vrcp.f32 %v6770_v19  ;;  %v13298_v61 = vpop.f32.mrb[108].mxu1  ;;  %v8528_v56 = vmul.f32 -1.442695, %v5344_v23  ;;  %9819 = vmatmul.mubr.msk.bf16.gmra.mrb[96].mxu0 %vm2585_vm3, %v4396_v18  ;;  %v4255_v22 = vmax.f32 %v3917_v33, 0.0 }
 0x3c4   : > { %v10306_v42 = vpop.eup %10305  ;;  %7794 = vst.msk [vmem:[%s12375_s30 + $0x338] sm:$0xff] %vm7690_vm4, %v7537_v40  ;;  %v7540_v2 = vmul.f32 %v12898_v25, %v10304_v62  ;;  %10325 = vpow2.f32 %v8522_v43  ;;  %v13306_v46 = vpop.f32.mrb[253].mxu0  ;;  %v8526_v7 = vmul.f32 -1.442695, %v5336_v52  ;;  %v4258_v63 = vmax.f32 %v3928_v14, 0.0 }
 0x3c5   : > { %v10308_v27 = vpop.eup %10307  ;;  %7792 = vst.msk [vmem:[%s12375_s30 + $0x328] sm:$0xff] %vm7690_vm4, %v7535_v60  ;;  %v7538_v59 = vmul.f32 %v12898_v25, %v10306_v42  ;;  %10327 = vpow2.f32 %v8527_v20  ;;  %v13308_v5 = vpop.f32.mrb[109].mxu1  ;;  %v3920_v44 = vadd.f32 %v13233_v32, %v13227_v17  ;;  %v5357_v35 = vadd.f32 %v13274_v8, %v13239_v15  ;;  %v13335_v15 = vld [vmem:[%s14110_s7] ss:$0 sm:$0xff] }
 0x3c6   : > { %v10310_v13 = vpop.eup %10309  ;;  %7797 = vst.msk [vmem:[%s12375_s30 + $0x350] sm:$0xff] %vm7690_vm4, %v7540_v2  ;;  %v6768_v54 = vadd.f32 1.0, %v10308_v27  ;;  %10329 = vpow2.f32 %v8525_v38  ;;  %v13312_v10 = vpop.f32.mrb[254].mxu0  ;;  %v5349_v28 = vadd.f32 %v13274_v8, %v13249_v26  ;;  %v4398_v17 = vpack.c.bf16 %v4258_v63, %v4257_v30 }
 0x3c7   : > { %v13314_v48 = vpop.f32.mrb[110].mxu1  ;;  %v10312_v49 = vpop.eup %10311  ;;  %7795 = vst.msk [vmem:[%s12375_s30 + $0x340] sm:$0xff] %vm7690_vm4, %v7538_v59  ;;  %v7541_v3 = vmul.f32 %v12898_v25, %v10310_v13  ;;  %10331 = vpow2.f32 %v8528_v56  ;;  %v4256_v58 = vmax.f32 %v3920_v44, 0.0  ;;  %v8531_v45 = vmul.f32 -1.442695, %v5357_v35 }
 0x3c8   : > { %v13321_v21 = vpop.f32.mrb[255].mxu0  ;;  %v13323_v12 = vpop.f32.mrb[111].mxu1  ;;  %10333 = vrcp.f32 %v6768_v54  ;;  %v6773_v1 = vadd.f32 1.0, %v10312_v49  ;;  %v8529_v47 = vmul.f32 -1.442695, %v5349_v28  ;;  %v3941_v37 = vadd.f32 %v13233_v32, %v13253_v53 }
 0x3c9   : > { %v10314_v36 = vpop.eup %10313  ;;  %7798 = vst.msk [vmem:[%s12375_s30 + $0x358] sm:$0xff] %vm7690_vm4, %v7541_v3  ;;  %10335 = vpow2.f32 %v8526_v7  ;;  %v4397_v11 = vpack.c.bf16 %v4256_v58, %v4255_v22  ;;  %v5360_v55 = vadd.f32 %v13274_v8, %v13255_v4  ;;  %v3933_v29 = vadd.f32 %v13233_v32, %v13259_v51 }
 0x3ca   : > { %v10316_v43 = vpop.eup %10315  ;;  %v6771_v16 = vadd.f32 1.0, %v10314_v36  ;;  %10337 = vrcp.f32 %v6773_v1  ;;  %v4261_v53 = vmax.f32 %v3941_v37, 0.0  ;;  %v5352_v34 = vadd.f32 %v13274_v8, %v13261_v9 }
 0x3cb   : > { %v10318_v57 = vpop.eup %10317  ;;  %v7539_v6 = vmul.f32 %v12898_v25, %v10316_v43  ;;  %v13347_v19 = vpop.f32.mrb[112].mxu1  ;;  %9822 = vmatprep.mubr.msk.bf16.mxu0 %vm2585_vm3, %v4397_v11  ;;  %v8532_v0 = vmul.f32 -1.442695, %v5360_v55  ;;  %v4259_v62 = vmax.f32 %v3933_v29, 0.0  ;;  %v3944_v60 = vadd.f32 %v13233_v32, %v13269_v31 }
 0x3cc   : > { %v10320_v50 = vpop.eup %10319  ;;  %v7544_v26 = vmul.f32 %v13335_v15, %v10318_v57  ;;  %10339 = vrcp.f32 %v6771_v16  ;;  %v13354_v40 = vpop.f32.mrb[0].mxu0  ;;  %9823 = vmatmul.mubr.msk.bf16.gmra.mrb[100].mxu0 %vm2585_vm3, %v4398_v17  ;;  %v8530_v2 = vmul.f32 -1.442695, %v5352_v34  ;;  %v3936_v33 = vadd.f32 %v13233_v32, %v13280_v24 }
 0x3cd   : > { %v10322_v41 = vpop.eup %10321  ;;  %7796 = vst.msk [vmem:[%s12375_s30 + $0x348] sm:$0xff] %vm7690_vm4, %v7539_v6  ;;  %v7542_v25 = vmul.f32 %v13335_v15, %v10320_v50  ;;  %10341 = vpow2.f32 %v8531_v45  ;;  %v13356_v18 = vpop.f32.mrb[113].mxu1  ;;  %v4262_v56 = vmax.f32 %v3944_v60, 0.0  ;;  %v5373_v14 = vadd.f32 %v13274_v8, %v13296_v39 }
 0x3ce   : > { %v10324_v20 = vpop.eup %10323  ;;  %7801 = vst.msk [vmem:[%s12375_s30 + $0x370] sm:$0xff] %vm7690_vm4, %v7544_v26  ;;  %v6774_v38 = vadd.f32 1.0, %v10322_v41  ;;  %10343 = vpow2.f32 %v8529_v47  ;;  %v13364_v9 = vpop.f32.mrb[1].mxu0  ;;  %v4260_v7 = vmax.f32 %v3936_v33, 0.0  ;;  %v5365_v24 = vadd.f32 %v13274_v8, %v13306_v46 }
 0x3cf   : > { %v10326_v4 = vpop.eup %10325  ;;  %7799 = vst.msk [vmem:[%s12375_s30 + $0x360] sm:$0xff] %vm7690_vm4, %v7542_v25  ;;  %v7545_v51 = vmul.f32 %v13335_v15, %v10324_v20  ;;  %v13366_v30 = vpop.f32.mrb[114].mxu1  ;;  %v4400_v63 = vpack.c.bf16 %v4262_v56, %v4261_v53  ;;  %v8535_v44 = vmul.f32 -1.442695, %v5373_v14  ;;  %v3957_v16 = vadd.f32 %v13233_v32, %v13298_v61 }
 0x3d0   : > { %v10328_v23 = vpop.eup %10327  ;;  %10345 = vrcp.f32 %v6774_v38  ;;  %v6772_v42 = vadd.f32 1.0, %v10326_v4  ;;  %v13370_v52 = vpop.f32.mrb[2].mxu0  ;;  %v4399_v39 = vpack.c.bf16 %v4260_v7, %v4259_v62  ;;  %v8533_v35 = vmul.f32 -1.442695, %v5365_v24 }
 0x3d1   : > { %v13372_v27 = vpop.f32.mrb[115].mxu1  ;;  %v10330_v59 = vpop.eup %10329  ;;  %7802 = vst.msk [vmem:[%s12375_s30 + $0x378] sm:$0xff] %vm7690_vm4, %v7545_v51  ;;  %v6777_v31 = vadd.f32 1.0, %v10328_v23  ;;  %10347 = vpow2.f32 %v8532_v0  ;;  %v5376_v46 = vadd.f32 %v13274_v8, %v13312_v10  ;;  %v3949_v6 = vadd.f32 %v13233_v32, %v13308_v5 }
 0x3d2   : > { %v13378_v13 = vpop.f32.mrb[3].mxu0  ;;  %v10332_v54 = vpop.eup %10331  ;;  %10349 = vrcp.f32 %v6772_v42  ;;  %v6775_v22 = vadd.f32 1.0, %v10330_v59  ;;  %v5368_v45 = vadd.f32 %v13274_v8, %v13321_v21  ;;  %9826 = vmatprep.mubr.msk.bf16.mxu0 %vm2585_vm3, %v4399_v39  ;;  %v4265_v26 = vmax.f32 %v3957_v16, 0.0 }
 0x3d3   : > { %v10334_v49 = vpop.eup %10333  ;;  %10351 = vrcp.f32 %v6777_v31  ;;  %v6778_v3 = vadd.f32 1.0, %v10332_v54  ;;  %v13387_v17 = vpop.f32.mrb[116].mxu1  ;;  %v8536_v11 = vmul.f32 -1.442695, %v5376_v46  ;;  %v4263_v25 = vmax.f32 %v3949_v6, 0.0 }
 0x3d4   : > { %v10336_v36 = vpop.eup %10335  ;;  %v7543_v1 = vmul.f32 %v13335_v15, %v10334_v49  ;;  %10353 = vrcp.f32 %v6775_v22  ;;  %v13397_v61 = vpop.f32.mrb[4].mxu0  ;;  %9827 = vmatmul.mubr.msk.bf16.gmra.mrb[104].mxu0 %vm2585_vm3, %v4400_v63  ;;  %v8534_v55 = vmul.f32 -1.442695, %v5368_v45  ;;  %v3960_v53 = vadd.f32 %v13233_v32, %v13314_v48 }
 0x3d5   : > { %v10338_v28 = vpop.eup %10337  ;;  %10355 = vrcp.f32 %v6778_v3  ;;  %v6776_v43 = vadd.f32 1.0, %v10336_v36  ;;  %v13399_v10 = vpop.f32.mrb[117].mxu1  ;;  %v3952_v34 = vadd.f32 %v13233_v32, %v13323_v12  ;;  %v5389_v0 = vadd.f32 %v13274_v8, %v13354_v40 }
 0x3d6   : > { %v10340_v58 = vpop.eup %10339  ;;  %7800 = vst.msk [vmem:[%s12375_s30 + $0x368] sm:$0xff] %vm7690_vm4, %v7543_v1  ;;  %v7548_v57 = vmul.f32 %v13335_v15, %v10338_v28  ;;  %10357 = vpow2.f32 %v8530_v2  ;;  %v13403_v37 = vpop.f32.mrb[5].mxu0  ;;  %v5381_v62 = vadd.f32 %v13274_v8, %v13364_v9  ;;  %v13427_v60 = vadd.f32 %v13233_v32, %v13347_v19 }
 0x3d7   : > { %v10342_v47 = vpop.eup %10341  ;;  %v7546_v50 = vmul.f32 %v13335_v15, %v10340_v58  ;;  %10359 = vrcp.f32 %v6776_v43  ;;  %v13405_v5 = vpop.f32.mrb[118].mxu1  ;;  %v4266_v12 = vmax.f32 %v3960_v53, 0.0  ;;  %v4264_v42 = vmax.f32 %v3952_v34, 0.0 }
 0x3d8   : > { %v10344_v21 = vpop.eup %10343  ;;  %7805 = vst.msk [vmem:[%s12375_s30 + $0x390] sm:$0xff] %vm7690_vm4, %v7548_v57  ;;  %v6781_v41 = vadd.f32 1.0, %v10342_v47  ;;  %10361 = vpow2.f32 %v8535_v44  ;;  %v13409_v29 = vpop.f32.mrb[6].mxu0  ;;  %v8539_v59 = vmul.f32 -1.442695, %v5389_v0  ;;  %v4269_v7 = vmax.f32 %v13427_v60, 0.0 }
 0x3d9   : > { %v13411_v20 = vpop.f32.mrb[119].mxu1  ;;  %7803 = vst.msk [vmem:[%s12375_s30 + $0x380] sm:$0xff] %vm7690_vm4, %v7546_v50  ;;  %v6779_v38 = vadd.f32 1.0, %v10344_v21  ;;  %10363 = vpow2.f32 %v8533_v35  ;;  %v13419_v4 = vpop.f32.mrb[7].mxu0  ;;  %v8537_v31 = vmul.f32 -1.442695, %v5381_v62  ;;  %v4402_v19 = vpack.c.bf16 %v4266_v12, %v4265_v26 }
 0x3da   : > { %v10346_v51 = vpop.eup %10345  ;;  %10365 = vrcp.f32 %v6781_v41  ;;  %v4401_v56 = vpack.c.bf16 %v4264_v42, %v4263_v25  ;;  %v5392_v24 = vadd.f32 %v13274_v8, %v13370_v52  ;;  %v3965_v44 = vadd.f32 %v13233_v32, %v13356_v18 }
 0x3db   : > { %v10348_v23 = vpop.eup %10347  ;;  %v7549_v48 = vmul.f32 %v13335_v15, %v10346_v51  ;;  %10367 = vrcp.f32 %v6779_v38  ;;  %v13433_v14 = vpop.f32.mrb[120].mxu1  ;;  %v5384_v36 = vadd.f32 %v13274_v8, %v13378_v13  ;;  %v3976_v18 = vadd.f32 %v13233_v32, %v13366_v30 }
 0x3dc   : > { %v10350_v2 = vpop.eup %10349  ;;  %v6782_v33 = vadd.f32 1.0, %v10348_v23  ;;  %10369 = vpow2.f32 %v8536_v11  ;;  %v13439_v49 = vpop.f32.mrb[121].mxu1  ;;  %9830 = vmatprep.mubr.msk.bf16.mxu0 %vm2585_vm3, %v4401_v56  ;;  %v8540_v28 = vmul.f32 -1.442695, %v5392_v24  ;;  %v4267_v58 = vmax.f32 %v3965_v44, 0.0 }
 0x3dd   : > { %v10352_v40 = vpop.eup %10351  ;;  %7806 = vst.msk [vmem:[%s12375_s30 + $0x398] sm:$0xff] %vm7690_vm4, %v7549_v48  ;;  %v7547_v9 = vmul.f32 %v13335_v15, %v10350_v2  ;;  %10371 = vpow2.f32 %v8534_v55  ;;  %v13449_v1 = vpop.f32.mrb[8].mxu0  ;;  %9831 = vmatmul.mubr.msk.bf16.gmra.mrb[108].mxu0 %vm2585_vm3, %v4402_v19  ;;  %v8538_v57 = vmul.f32 -1.442695, %v5384_v36  ;;  %v3968_v6 = vadd.f32 %v13233_v32, %v13372_v27 }
 0x3de   : > { %v10354_v54 = vpop.eup %10353  ;;  %v7552_v22 = vmul.f32 %v13335_v15, %v10352_v40  ;;  %10373 = vrcp.f32 %v6782_v33  ;;  %v13451_v52 = vpop.f32.mrb[122].mxu1  ;;  %v4270_v50 = vmax.f32 %v3976_v18, 0.0  ;;  %v5405_v26 = vadd.f32 %v13274_v8, %v13397_v61 }
 0x3df   : > { %v10356_v3 = vpop.eup %10355  ;;  %7804 = vst.msk [vmem:[%s12375_s30 + $0x388] sm:$0xff] %vm7690_vm4, %v7547_v9  ;;  %v7550_v63 = vmul.f32 %v13335_v15, %v10354_v54  ;;  %10375 = vpow2.f32 %v8539_v59  ;;  %v13459_v13 = vpop.f32.mrb[9].mxu0  ;;  %v4268_v25 = vmax.f32 %v3968_v6, 0.0  ;;  %v5397_v27 = vadd.f32 %v13274_v8, %v13403_v37 }
 0x3e0   : > { %v10358_v39 = vpop.eup %10357  ;;  %7809 = vst.msk [vmem:[%s12375_s30 + $0x3b0] sm:$0xff] %vm7690_vm4, %v7552_v22  ;;  %v7553_v35 = vmul.f32 %v13335_v15, %v10356_v3  ;;  %10377 = vpow2.f32 %v8537_v31  ;;  %v13461_v43 = vpop.f32.mrb[123].mxu1  ;;  %v4404_v53 = vpack.c.bf16 %v4270_v50, %v4269_v7  ;;  %v8543_v34 = vmul.f32 -1.442695, %v5405_v26 }
 0x3e1   : > { %v10360_v16 = vpop.eup %10359  ;;  %7807 = vst.msk [vmem:[%s12375_s30 + $0x3a0] sm:$0xff] %vm7690_vm4, %v7550_v63  ;;  %v6780_v46 = vadd.f32 1.0, %v10358_v39  ;;  %v13467_v45 = vpop.f32.mrb[10].mxu0  ;;  %10379 = vpow2.f32 %v8540_v28  ;;  %v4403_v0 = vpack.c.bf16 %v4268_v25, %v4267_v58  ;;  %v8541_v62 = vmul.f32 -1.442695, %v5397_v27 }
 0x3e2   : > { %v10362_v47 = vpop.eup %10361  ;;  %7810 = vst.msk [vmem:[%s12375_s30 + $0x3b8] sm:$0xff] %vm7690_vm4, %v7553_v35  ;;  %v7551_v30 = vmul.f32 %v13335_v15, %v10360_v16  ;;  %v13474_v11 = vpop.f32.mrb[11].mxu0  ;;  %v3989_v48 = vadd.f32 %v13233_v32, %v13387_v17  ;;  %v5408_v12 = vadd.f32 %v13274_v8, %v13409_v29  ;;  %v3981_v59 = vadd.f32 %v13233_v32, %v13399_v10 }
 0x3e3   : > { %v10364_v21 = vpop.eup %10363  ;;  %10381 = vrcp.f32 %v6780_v46  ;;  %v6785_v41 = vadd.f32 1.0, %v10362_v47  ;;  %v13481_v60 = vpop.f32.mrb[124].mxu1  ;;  %v5400_v31 = vadd.f32 %v13274_v8, %v13419_v4  ;;  %9834 = vmatprep.mubr.msk.bf16.mxu0 %vm2585_vm3, %v4403_v0  ;;  %v3992_v44 = vadd.f32 %v13233_v32, %v13405_v5 }
 0x3e4   : > { %v10366_v55 = vpop.eup %10365  ;;  %7808 = vst.msk [vmem:[%s12375_s30 + $0x3a8] sm:$0xff] %vm7690_vm4, %v7551_v30  ;;  %v6783_v38 = vadd.f32 1.0, %v10364_v21  ;;  %10383 = vpow2.f32 %v8538_v57  ;;  %v13488_v42 = vpop.f32.mrb[125].mxu1  ;;  %v4273_v9 = vmax.f32 %v3989_v48, 0.0  ;;  %v8544_v19 = vmul.f32 -1.442695, %v5408_v12 }
 0x3e5   : > { %v10368_v51 = vpop.eup %10367  ;;  %v7556_v61 = vmul.f32 %v13335_v15, %v10366_v55  ;;  %10385 = vrcp.f32 %v6785_v41  ;;  %v13497_v40 = vpop.f32.mrb[126].mxu1  ;;  %9835 = vmatmul.mubr.msk.bf16.gmra.mrb[112].mxu0 %vm2585_vm3, %v4404_v53  ;;  %v4271_v22 = vmax.f32 %v3981_v59, 0.0  ;;  %v8542_v7 = vmul.f32 -1.442695, %v5400_v31 }
 0x3e6   : > { %v10370_v23 = vpop.eup %10369  ;;  %v7554_v37 = vmul.f32 %v13335_v15, %v10368_v51  ;;  %10387 = vrcp.f32 %v6783_v38  ;;  %v13502_v56 = vpop.f32.mrb[12].mxu0  ;;  %v3984_v36 = vadd.f32 %v13233_v32, %v13411_v20  ;;  %v5421_v28 = vadd.f32 %v13274_v8, %v13449_v1 }
 0x3e7   : > { %v10372_v2 = vpop.eup %10371  ;;  %7813 = vst.msk [vmem:[%s12375_s30 + $0x3d0] sm:$0xff] %vm7690_vm4, %v7556_v61  ;;  %v6786_v33 = vadd.f32 1.0, %v10370_v23  ;;  %10389 = vpow2.f32 %v8543_v34  ;;  %v13504_v10 = vpop.f32.mrb[127].mxu1  ;;  %v5413_v18 = vadd.f32 %v13274_v8, %v13459_v13  ;;  %v4274_v5 = vmax.f32 %v3992_v44, 0.0 }
 0x3e8   : > { %v10374_v17 = vpop.eup %10373  ;;  %7811 = vst.msk [vmem:[%s12375_s30 + $0x3c0] sm:$0xff] %vm7690_vm4, %v7554_v37  ;;  %v6784_v29 = vadd.f32 1.0, %v10372_v2  ;;  %10391 = vpow2.f32 %v8541_v62  ;;  %v13507_v24 = vpop.f32.mrb[13].mxu0  ;;  %v4272_v58 = vmax.f32 %v3984_v36, 0.0  ;;  %v4005_v20 = vadd.f32 %v13233_v32, %v13433_v14 }
 0x3e9   : > { %v10376_v54 = vpop.eup %10375  ;;  %v7557_v4 = vmul.f32 %v13335_v15, %v10374_v17  ;;  %10393 = vrcp.f32 %v6786_v33  ;;  %v13513_v39 = vpop.f32.mrb[14].mxu0  ;;  %v8547_v47 = vmul.f32 -1.442695, %v5421_v28  ;;  %v8545_v30 = vmul.f32 -1.442695, %v5413_v18 }
 0x3ea   : > { %v10378_v3 = vpop.eup %10377  ;;  %10395 = vrcp.f32 %v6784_v29  ;;  %v6789_v63 = vadd.f32 1.0, %v10376_v54  ;;  %v13521_v16 = vpop.f32.mrb[15].mxu0  ;;  %v4406_v13 = vpack.c.bf16 %v4274_v5, %v4273_v9  ;;  %v4405_v26 = vpack.c.bf16 %v4272_v58, %v4271_v22 }
 0x3eb   : > { %7814 = vst.msk [vmem:[%s12375_s30 + $0x3d8] sm:$0xff] %vm7690_vm4, %v7557_v4  ;;  %v6787_v35 = vadd.f32 1.0, %v10378_v3  ;;  %10397 = vpow2.f32 %v8544_v19  ;;  %v10380_v46 = vpop.eup %10379  ;;  %v4277_v25 = vmax.f32 %v4005_v20, 0.0  ;;  %v5424_v27 = vadd.f32 %v13274_v8, %v13467_v45 }
 0x3ec   : > { %10399 = vrcp.f32 %v6789_v63  ;;  %v6790_v6 = vadd.f32 1.0, %v10380_v46  ;;  %v3997_v38 = vadd.f32 %v13233_v32, %v13439_v49  ;;  %v5416_v53 = vadd.f32 %v13274_v8, %v13474_v11  ;;  %9838 = vmatprep.mubr.msk.bf16.mxu0 %vm2585_vm3, %v4405_v26  ;;  %v13536_v34 = vpop.f32.mrb[16].mxu0 }
 0x3ed   : > { %v10382_v57 = vpop.eup %10381  ;;  %10401 = vrcp.f32 %v6787_v35  ;;  %v8548_v61 = vmul.f32 -1.442695, %v5424_v27  ;;  %v4008_v0 = vadd.f32 %v13233_v32, %v13451_v52  ;;  %9839 = vmatmul.mubr.msk.bf16.gmra.mrb[116].mxu0 %vm2585_vm3, %v4406_v13  ;;  %v13542_v62 = vpop.f32.mrb[17].mxu0  ;;  %v4000_v33 = vadd.f32 %v13233_v32, %v13461_v43 }
 0x3ee   : > { %v10384_v50 = vpop.eup %10383  ;;  %v7555_v1 = vmul.f32 %v13335_v15, %v10382_v57  ;;  %10403 = vpow2.f32 %v8542_v7  ;;  %v4275_v23 = vmax.f32 %v3997_v38, 0.0  ;;  %v8546_v37 = vmul.f32 -1.442695, %v5416_v53  ;;  %v13546_v48 = vpop.f32.mrb[18].mxu0 }
 0x3ef   : > { %v10386_v21 = vpop.eup %10385  ;;  %10405 = vrcp.f32 %v6790_v6  ;;  %v6788_v41 = vadd.f32 1.0, %v10384_v50  ;;  %v4278_v52 = vmax.f32 %v4008_v0, 0.0  ;;  %v13552_v59 = vpop.f32.mrb[19].mxu0  ;;  %v5437_v29 = vadd.f32 %v13274_v8, %v13502_v56 }
 0x3f0   : > { %v10388_v14 = vpop.eup %10387  ;;  %7812 = vst.msk [vmem:[%s12375_s30 + $0x3c8] sm:$0xff] %vm7690_vm4, %v7555_v1  ;;  %v7560_v55 = vmul.f32 %v13335_v15, %v10386_v21  ;;  %10407 = vpow2.f32 %v8547_v47  ;;  %v5429_v9 = vadd.f32 %v13274_v8, %v13507_v24  ;;  %v4276_v22 = vmax.f32 %v4000_v33, 0.0 }
 0x3f1   : > { %v10390_v51 = vpop.eup %10389  ;;  %v7558_v45 = vmul.f32 %v13335_v15, %v10388_v14  ;;  %10409 = vrcp.f32 %v6788_v41  ;;  %v4408_v4 = vpack.c.bf16 %v4278_v52, %v4277_v25  ;;  %v8551_v3 = vmul.f32 -1.442695, %v5437_v29 }
 0x3f2   : > { %v10392_v49 = vpop.eup %10391  ;;  %7817 = vst.msk [vmem:[%s12375_s30 + $0x3f0] sm:$0xff] %vm7690_vm4, %v7560_v55  ;;  %v6793_v11 = vadd.f32 1.0, %v10390_v51  ;;  %10411 = vpow2.f32 %v8545_v30  ;;  %v8549_v63 = vmul.f32 -1.442695, %v5429_v9  ;;  %v4407_v24 = vpack.c.bf16 %v4276_v22, %v4275_v23 }
 0x3f3   : > { %v10394_v12 = vpop.eup %10393  ;;  %7815 = vst.msk [vmem:[%s12375_s30 + $0x3e0] sm:$0xff] %vm7690_vm4, %v7558_v45  ;;  %v6791_v2 = vadd.f32 1.0, %v10392_v49  ;;  %10413 = vpow2.f32 %v8548_v61  ;;  %v4021_v36 = vadd.f32 %v13233_v32, %v13481_v60  ;;  %v5440_v35 = vadd.f32 %v13274_v8, %v13513_v39 }
 0x3f4   : > { %v10396_v31 = vpop.eup %10395  ;;  %v7561_v17 = vmul.f32 %v13335_v15, %v10394_v12  ;;  %10415 = vrcp.f32 %v6793_v11  ;;  %v4013_v46 = vadd.f32 %v13233_v32, %v13488_v42  ;;  %v5432_v5 = vadd.f32 %v13274_v8, %v13521_v16  ;;  %9842 = vmatprep.mubr.msk.bf16.mxu0 %vm2585_vm3, %v4407_v24 }
 0x3f5   : > { %v10398_v19 = vpop.eup %10397  ;;  %v7559_v54 = vmul.f32 %v13335_v15, %v10396_v31  ;;  %10417 = vrcp.f32 %v6791_v2  ;;  %v4281_v60 = vmax.f32 %v4021_v36, 0.0  ;;  %v8552_v57 = vmul.f32 -1.442695, %v5440_v35  ;;  %9843 = vmatmul.mubr.msk.bf16.gmra.mrb[120].mxu0 %vm2585_vm3, %v4408_v4 }
 0x3f6   : > { %v10400_v43 = vpop.eup %10399  ;;  %7818 = vst.msk [vmem:[%s12375_s30 + $0x3f8] sm:$0xff] %vm7690_vm4, %v7561_v17  ;;  %v6794_v7 = vadd.f32 1.0, %v10398_v19  ;;  %10419 = vpow2.f32 %v8546_v37  ;;  %v9744_v39 = vpop.f32.mrb[20].mxu0  ;;  %v4279_v42 = vmax.f32 %v4013_v46, 0.0  ;;  %v8550_v30 = vmul.f32 -1.442695, %v5432_v5 }
 0x3f7   : > { %v10402_v44 = vpop.eup %10401  ;;  %7816 = vst.msk [vmem:[%s12375_s30 + $0x3e8] sm:$0xff] %vm7690_vm4, %v7559_v54  ;;  %v7564_v56 = vmul.f32 %v13335_v15, %v10400_v43  ;;  %v5460_v16 = vpop.f32.mrb[21].mxu0  ;;  %v4024_v13 = vadd.f32 %v13233_v32, %v13497_v40  ;;  %v4016_v26 = vadd.f32 %v13233_v32, %v13504_v10  ;;  %v5453_v27 = vadd.f32 %v13274_v8, %v13536_v34 }
 0x3f8   : > { %v10404_v28 = vpop.eup %10403  ;;  %v7562_v18 = vmul.f32 %v13335_v15, %v10402_v44  ;;  %10421 = vrcp.f32 %v6794_v7  ;;  %v9745_v21 = vpop.f32.mrb[22].mxu0  ;;  %v5445_v14 = vadd.f32 %v13274_v8, %v13542_v62  ;;  %v5456_v37 = vadd.f32 %v13274_v8, %v13546_v48 }
 0x3f9   : > { %v10406_v58 = vpop.eup %10405  ;;  %7821 = vst.msk [vmem:[%s12375_s30 + $0x410] sm:$0xff] %vm7690_vm4, %v7564_v56  ;;  %v6792_v20 = vadd.f32 1.0, %v10404_v28  ;;  %10423 = vpow2.f32 %v8551_v3  ;;  %v5463_v55 = vpop.f32.mrb[23].mxu0  ;;  %v4282_v53 = vmax.f32 %v4024_v13, 0.0  ;;  %v4280_v51 = vmax.f32 %v4016_v26, 0.0 }
 0x3fa   : > { %v10408_v6 = vpop.eup %10407  ;;  %7819 = vst.msk [vmem:[%s12375_s30 + $0x400] sm:$0xff] %vm7690_vm4, %v7562_v18  ;;  %v7565_v47 = vmul.f32 %v13335_v15, %v10406_v58  ;;  %10425 = vpow2.f32 %v8549_v63  ;;  %v8555_v45 = vmul.f32 -1.442695, %v5453_v27  ;;  %v8553_v61 = vmul.f32 -1.442695, %v5445_v14 }
 0x3fb   : > { %v10410_v50 = vpop.eup %10409  ;;  %10427 = vrcp.f32 %v6792_v20  ;;  %v6797_v1 = vadd.f32 1.0, %v10408_v6  ;;  %v4410_v62 = vpack.c.bf16 %v4282_v53, %v4281_v60  ;;  %v4409_v49 = vpack.c.bf16 %v4280_v51, %v4279_v42 }
 0x3fc   : > { %v10412_v41 = vpop.eup %10411  ;;  %7822 = vst.msk [vmem:[%s12375_s30 + $0x418] sm:$0xff] %vm7690_vm4, %v7565_v47  ;;  %v7563_v25 = vmul.f32 %v13335_v15, %v10410_v50  ;;  %10429 = vpow2.f32 %v8552_v57  ;;  %v5448_v12 = vadd.f32 %v13274_v8, %v13552_v59  ;;  %v5469_v52 = vadd.f32 %v13274_v8, %v9744_v39 }
 0x3fd   : > { %v10414_v38 = vpop.eup %10413  ;;  %10431 = vrcp.f32 %v6797_v1  ;;  %v6795_v40 = vadd.f32 1.0, %v10412_v41  ;;  %9846 = vmatprep.mubr.msk.bf16.mxu0 %vm2585_vm3, %v4409_v49  ;;  %v8556_v17 = vmul.f32 -1.442695, %v5456_v37  ;;  %v5461_v48 = vadd.f32 %v13274_v8, %v5460_v16 }
 0x3fe   : > { %v10416_v32 = vpop.eup %10415  ;;  %7820 = vst.msk [vmem:[%s12375_s30 + $0x408] sm:$0xff] %vm7690_vm4, %v7563_v25  ;;  %v6798_v10 = vadd.f32 1.0, %v10414_v38  ;;  %10433 = vpow2.f32 %v8550_v30  ;;  %v9748_v33 = vpop.f32.mrb[24].mxu0  ;;  %v8554_v29 = vmul.f32 -1.442695, %v5448_v12  ;;  %9847 = vmatmul.mubr.msk.bf16.gmra.mrb[124].mxu0 %vm2585_vm3, %v4410_v62  ;;  %v5472_v7 = vadd.f32 %v13274_v8, %v9745_v21 }
 0x3ff   : > { %v10418_v0 = vpop.eup %10417  ;;  %v7568_v34 = vmul.f32 %v13335_v15, %v10416_v32  ;;  %10435 = vrcp.f32 %v6795_v40  ;;  %v5476_v59 = vpop.f32.mrb[25].mxu0  ;;  %v8559_v43 = vmul.f32 -1.442695, %v5469_v52  ;;  %v5464_v56 = vadd.f32 %v13274_v8, %v5463_v55 }
 0x400   : > { %v10420_v11 = vpop.eup %10419  ;;  %v7566_v23 = vmul.f32 %v13335_v15, %v10418_v0  ;;  %10437 = vrcp.f32 %v6798_v10  ;;  %v9749_v54 = vpop.f32.mrb[26].mxu0  ;;  %v8557_v35 = vmul.f32 -1.442695, %v5461_v48  ;;  %v8560_v58 = vmul.f32 -1.442695, %v5472_v7 }
 0x401   : > { %7825 = vst.msk [vmem:[%s12375_s30 + $0x430] sm:$0xff] %vm7690_vm4, %v7568_v34  ;;  %v6796_v2 = vadd.f32 1.0, %v10420_v11  ;;  %10439 = vpow2.f32 %v8555_v45  ;;  %v5479_v3 = vpop.f32.mrb[27].mxu0  ;;  %v5485_v20 = vadd.f32 %v13274_v8, %v9748_v33  ;;  %v8558_v39 = vmul.f32 -1.442695, %v5464_v56 }
 0x402   : > { %v10422_v31 = vpop.eup %10421  ;;  %7823 = vst.msk [vmem:[%s12375_s30 + $0x420] sm:$0xff] %vm7690_vm4, %v7566_v23  ;;  %10441 = vpow2.f32 %v8553_v61  ;;  %v5477_v50 = vadd.f32 %v13274_v8, %v5476_v59  ;;  %v5488_v41 = vadd.f32 %v13274_v8, %v9749_v54  ;;  %v5480_v53 = vadd.f32 %v13274_v8, %v5479_v3  ;;  %v13644_v59 = vld [vmem:[%s14109_s6] ss:$0 sm:$0xff] }
 0x403   : > { %v10424_v9 = vpop.eup %10423  ;;  %v7569_v19 = vmul.f32 %v13335_v15, %v10422_v31  ;;  %10443 = vrcp.f32 %v6796_v2  ;;  %v8563_v21 = vmul.f32 -1.442695, %v5485_v20 }
 0x404   : > { %v10426_v4 = vpop.eup %10425  ;;  %v6801_v22 = vadd.f32 1.0, %v10424_v9  ;;  %10445 = vpow2.f32 %v8556_v17  ;;  %v8561_v10 = vmul.f32 -1.442695, %v5477_v50  ;;  %v8564_v0 = vmul.f32 -1.442695, %v5488_v41 }
 0x405   : > { %v10428_v63 = vpop.eup %10427  ;;  %7826 = vst.msk [vmem:[%s12375_s30 + $0x438] sm:$0xff] %vm7690_vm4, %v7569_v19  ;;  %v6799_v44 = vadd.f32 1.0, %v10426_v4  ;;  %10447 = vpow2.f32 %v8554_v29  ;;  %v8562_v37 = vmul.f32 -1.442695, %v5480_v53 }
 0x406   : > { %v10430_v24 = vpop.eup %10429  ;;  %v7567_v36 = vmul.f32 %v13335_v15, %v10428_v63  ;;  %10449 = vrcp.f32 %v6801_v22 }
 0x407   : > { %v10432_v28 = vpop.eup %10431  ;;  %10451 = vrcp.f32 %v6799_v44  ;;  %v6802_v18 = vadd.f32 1.0, %v10430_v24  ;;  %v9752_v42 = vpop.f32.mrb[28].mxu0 }
 0x408   : > { %v10434_v46 = vpop.eup %10433  ;;  %7824 = vst.msk [vmem:[%s12375_s30 + $0x428] sm:$0xff] %vm7690_vm4, %v7567_v36  ;;  %v7572_v5 = vmul.f32 %v13335_v15, %v10432_v28  ;;  %10453 = vpow2.f32 %v8559_v43  ;;  %v5492_v1 = vpop.f32.mrb[29].mxu0  ;;  %v5501_v34 = vadd.f32 %v13274_v8, %v9752_v42 }
 0x409   : > { %v10436_v60 = vpop.eup %10435  ;;  %10455 = vrcp.f32 %v6802_v18  ;;  %v6800_v57 = vadd.f32 1.0, %v10434_v46  ;;  %v9753_v25 = vpop.f32.mrb[30].mxu0  ;;  %v5493_v33 = vadd.f32 %v13274_v8, %v5492_v1 }
 0x40a   : > { %v10438_v6 = vpop.eup %10437  ;;  %7829 = vst.msk [vmem:[%s12375_s30 + $0x450] sm:$0xff] %vm7690_vm4, %v7572_v5  ;;  %v7570_v47 = vmul.f32 %v13335_v15, %v10436_v60  ;;  %10457 = vpow2.f32 %v8557_v35  ;;  %v5495_v55 = vpop.f32.mrb[31].mxu0  ;;  %v8567_v48 = vmul.f32 -1.442695, %v5501_v34  ;;  %v5504_v9 = vadd.f32 %v13644_v59, %v9753_v25 }
 0x40b   : > { %v10440_v30 = vpop.eup %10439  ;;  %v7573_v16 = vmul.f32 %v13335_v15, %v10438_v6  ;;  %10459 = vrcp.f32 %v6800_v57  ;;  %v5496_v7 = vadd.f32 %v13644_v59, %v5495_v55  ;;  %v8565_v44 = vmul.f32 -1.442695, %v5493_v33 }
 0x40c   : > { %v10442_v13 = vpop.eup %10441  ;;  %7827 = vst.msk [vmem:[%s12375_s30 + $0x440] sm:$0xff] %vm7690_vm4, %v7570_v47  ;;  %v6805_v26 = vadd.f32 1.0, %v10440_v30  ;;  %10461 = vpow2.f32 %v8560_v58  ;;  %v8568_v35 = vmul.f32 -1.442695, %v5504_v9 }
 0x40d   : > { %v10444_v27 = vpop.eup %10443  ;;  %7830 = vst.msk [vmem:[%s12375_s30 + $0x458] sm:$0xff] %vm7690_vm4, %v7573_v16  ;;  %v6803_v14 = vadd.f32 1.0, %v10442_v13  ;;  %10463 = vpow2.f32 %v8558_v39  ;;  %v8566_v58 = vmul.f32 -1.442695, %v5496_v7 }
 0x40e   : > { %v10446_v38 = vpop.eup %10445  ;;  %v7571_v40 = vmul.f32 %v13335_v15, %v10444_v27  ;;  %10465 = vrcp.f32 %v6805_v26 }
 0x40f   : > { %v10448_v51 = vpop.eup %10447  ;;  %10467 = vrcp.f32 %v6803_v14  ;;  %v6806_v32 = vadd.f32 1.0, %v10446_v38  ;;  %v9756_v12 = vpop.f32.mrb[32].mxu0 }
 0x410   : > { %v10450_v45 = vpop.eup %10449  ;;  %7828 = vst.msk [vmem:[%s12375_s30 + $0x448] sm:$0xff] %vm7690_vm4, %v7571_v40  ;;  %v6804_v61 = vadd.f32 1.0, %v10448_v51  ;;  %10469 = vpow2.f32 %v8563_v21  ;;  %v5508_v31 = vpop.f32.mrb[33].mxu0  ;;  %v5517_v56 = vadd.f32 %v13644_v59, %v9756_v12  ;;  %v13680_v12 = vld [vmem:[%s14110_s7] ss:$0 sm:$0xff] }
 0x411   : > { %v10452_v62 = vpop.eup %10451  ;;  %v7576_v49 = vmul.f32 %v13335_v15, %v10450_v45  ;;  %10471 = vrcp.f32 %v6806_v32  ;;  %v9757_v19 = vpop.f32.mrb[34].mxu0  ;;  %v5509_v20 = vadd.f32 %v13644_v59, %v5508_v31 }
 0x412   : > { %v10454_v11 = vpop.eup %10453  ;;  %v7574_v23 = vmul.f32 %v13335_v15, %v10452_v62  ;;  %10473 = vrcp.f32 %v6804_v61  ;;  %v5511_v4 = vpop.f32.mrb[35].mxu0  ;;  %v8571_v39 = vmul.f32 -1.442695, %v5517_v56  ;;  %v5520_v30 = vadd.f32 %v13644_v59, %v9757_v19 }
 0x413   : > { %v10456_v2 = vpop.eup %10455  ;;  %7833 = vst.msk [vmem:[%s12375_s30 + $0x470] sm:$0xff] %vm7690_vm4, %v7576_v49  ;;  %v6809_v52 = vadd.f32 1.0, %v10454_v11  ;;  %10475 = vpow2.f32 %v8561_v10  ;;  %v8569_v41 = vmul.f32 -1.442695, %v5509_v20  ;;  %v5512_v25 = vadd.f32 %v13644_v59, %v5511_v4 }
 0x414   : > { %v10458_v17 = vpop.eup %10457  ;;  %7831 = vst.msk [vmem:[%s12375_s30 + $0x460] sm:$0xff] %vm7690_vm4, %v7574_v23  ;;  %v7577_v29 = vmul.f32 %v13335_v15, %v10456_v2  ;;  %10477 = vpow2.f32 %v8564_v0  ;;  %v8572_v51 = vmul.f32 -1.442695, %v5520_v30 }
 0x415   : > { %v10460_v54 = vpop.eup %10459  ;;  %10479 = vrcp.f32 %v6809_v52  ;;  %v6807_v8 = vadd.f32 1.0, %v10458_v17  ;;  %v8570_v0 = vmul.f32 -1.442695, %v5512_v25 }
 0x416   : > { %v10462_v22 = vpop.eup %10461  ;;  %7834 = vst.msk [vmem:[%s12375_s30 + $0x478] sm:$0xff] %vm7690_vm4, %v7577_v29  ;;  %v7575_v43 = vmul.f32 %v13335_v15, %v10460_v54  ;;  %10481 = vpow2.f32 %v8562_v37 }
 0x417   : > { %v10464_v3 = vpop.eup %10463  ;;  %10483 = vrcp.f32 %v6807_v8  ;;  %v6810_v63 = vadd.f32 1.0, %v10462_v22 }
 0x418   : > { %v10466_v24 = vpop.eup %10465  ;;  %7832 = vst.msk [vmem:[%s12375_s30 + $0x468] sm:$0xff] %vm7690_vm4, %v7575_v43  ;;  %v6808_v36 = vadd.f32 1.0, %v10464_v3  ;;  %10485 = vpow2.f32 %v8567_v48  ;;  %v9760_v6 = vpop.f32.mrb[36].mxu0 }
 0x419   : > { %v10468_v28 = vpop.eup %10467  ;;  %v7580_v18 = vmul.f32 %v13335_v15, %v10466_v24  ;;  %10487 = vrcp.f32 %v6810_v63  ;;  %v5524_v16 = vpop.f32.mrb[37].mxu0  ;;  %v5533_v38 = vadd.f32 %v13644_v59, %v9760_v6 }
 0x41a   : > { %v10470_v46 = vpop.eup %10469  ;;  %v7578_v5 = vmul.f32 %v13335_v15, %v10468_v28  ;;  %10489 = vrcp.f32 %v6808_v36  ;;  %v9761_v13 = vpop.f32.mrb[38].mxu0  ;;  %v5525_v34 = vadd.f32 %v13644_v59, %v5524_v16 }
 0x41b   : > { %v10472_v60 = vpop.eup %10471  ;;  %7837 = vst.msk [vmem:[%s12375_s30 + $0x490] sm:$0xff] %vm7690_vm4, %v7580_v18  ;;  %v6813_v57 = vadd.f32 1.0, %v10470_v46  ;;  %10491 = vpow2.f32 %v8565_v44  ;;  %v5527_v27 = vpop.f32.mrb[39].mxu0  ;;  %v8575_v11 = vmul.f32 -1.442695, %v5533_v38  ;;  %v5536_v31 = vadd.f32 %v13644_v59, %v9761_v13 }
 0x41c   : > { %v10474_v47 = vpop.eup %10473  ;;  %7835 = vst.msk [vmem:[%s12375_s30 + $0x480] sm:$0xff] %vm7690_vm4, %v7578_v5  ;;  %v7581_v42 = vmul.f32 %v13335_v15, %v10472_v60  ;;  %10493 = vpow2.f32 %v8568_v35  ;;  %v8573_v9 = vmul.f32 -1.442695, %v5525_v34  ;;  %v5528_v19 = vadd.f32 %v13644_v59, %v5527_v27 }
 0x41d   : > { %v10476_v50 = vpop.eup %10475  ;;  %v7579_v1 = vmul.f32 %v13335_v15, %v10474_v47  ;;  %10495 = vrcp.f32 %v6813_v57  ;;  %v8576_v44 = vmul.f32 -1.442695, %v5536_v31 }
 0x41e   : > { %v10478_v26 = vpop.eup %10477  ;;  %7838 = vst.msk [vmem:[%s12375_s30 + $0x498] sm:$0xff] %vm7690_vm4, %v7581_v42  ;;  %v6811_v21 = vadd.f32 1.0, %v10476_v50  ;;  %10497 = vpow2.f32 %v8566_v58  ;;  %v8574_v36 = vmul.f32 -1.442695, %v5528_v19 }
 0x41f   : > { %v10480_v14 = vpop.eup %10479  ;;  %7836 = vst.msk [vmem:[%s12375_s30 + $0x488] sm:$0xff] %vm7690_vm4, %v7579_v1  ;;  %v6814_v55 = vadd.f32 1.0, %v10478_v26  ;;  %10499 = vpow2.f32 %v8571_v39 }
 0x420   : > { %v10482_v40 = vpop.eup %10481  ;;  %v7584_v53 = vmul.f32 %v13335_v15, %v10480_v14  ;;  %10501 = vrcp.f32 %v6811_v21  ;;  %v9764_v23 = vpop.f32.mrb[40].mxu0 }
 0x421   : > { %v10484_v32 = vpop.eup %10483  ;;  %10503 = vrcp.f32 %v6814_v55  ;;  %v6812_v10 = vadd.f32 1.0, %v10482_v40  ;;  %v5540_v2 = vpop.f32.mrb[41].mxu0  ;;  %v5549_v7 = vadd.f32 %v13644_v59, %v9764_v23 }
 0x422   : > { %v10486_v45 = vpop.eup %10485  ;;  %7841 = vst.msk [vmem:[%s12375_s30 + $0x4b0] sm:$0xff] %vm7690_vm4, %v7584_v53  ;;  %v7582_v61 = vmul.f32 %v13335_v15, %v10484_v32  ;;  %10505 = vpow2.f32 %v8569_v41  ;;  %v9765_v17 = vpop.f32.mrb[42].mxu0  ;;  %v5541_v35 = vadd.f32 %v13644_v59, %v5540_v2 }
 0x423   : > { %v10488_v62 = vpop.eup %10487  ;;  %10507 = vrcp.f32 %v6812_v10  ;;  %v6817_v49 = vadd.f32 1.0, %v10486_v45  ;;  %v5543_v54 = vpop.f32.mrb[43].mxu0  ;;  %v8579_v58 = vmul.f32 -1.442695, %v5549_v7  ;;  %v5552_v39 = vadd.f32 %v13644_v59, %v9765_v17 }
 0x424   : > { %v10490_v37 = vpop.eup %10489  ;;  %7839 = vst.msk [vmem:[%s12375_s30 + $0x4a0] sm:$0xff] %vm7690_vm4, %v7582_v61  ;;  %v7585_v15 = vmul.f32 %v13680_v12, %v10488_v62  ;;  %10509 = vpow2.f32 %v8572_v51  ;;  %v8577_v30 = vmul.f32 -1.442695, %v5541_v35  ;;  %v5544_v16 = vadd.f32 %v13644_v59, %v5543_v54 }
 0x425   : > { %v10492_v52 = vpop.eup %10491  ;;  %v7583_v33 = vmul.f32 %v13680_v12, %v10490_v37  ;;  %10511 = vrcp.f32 %v6817_v49  ;;  %v8580_v55 = vmul.f32 -1.442695, %v5552_v39 }
 0x426   : > { %v10494_v29 = vpop.eup %10493  ;;  %7842 = vst.msk [vmem:[%s12375_s30 + $0x4b8] sm:$0xff] %vm7690_vm4, %v7585_v15  ;;  %v6815_v48 = vadd.f32 1.0, %v10492_v52  ;;  %10513 = vpow2.f32 %v8570_v0  ;;  %v8578_v51 = vmul.f32 -1.442695, %v5544_v16 }
 0x427   : > { %v10496_v8 = vpop.eup %10495  ;;  %7840 = vst.msk [vmem:[%s12375_s30 + $0x4a8] sm:$0xff] %vm7690_vm4, %v7583_v33  ;;  %v6818_v4 = vadd.f32 1.0, %v10494_v29  ;;  %10515 = vpow2.f32 %v8575_v11 }
 0x428   : > { %v10498_v22 = vpop.eup %10497  ;;  %v7588_v43 = vmul.f32 %v13680_v12, %v10496_v8  ;;  %10517 = vrcp.f32 %v6815_v48 }
 0x429   : > { %v10500_v3 = vpop.eup %10499  ;;  %10519 = vrcp.f32 %v6818_v4  ;;  %v6816_v63 = vadd.f32 1.0, %v10498_v22  ;;  %v9768_v20 = vpop.f32.mrb[44].mxu0 }
 0x42a   : > { %v10502_v56 = vpop.eup %10501  ;;  %7845 = vst.msk [vmem:[%s12375_s30 + $0x4d0] sm:$0xff] %vm7690_vm4, %v7588_v43  ;;  %v6821_v24 = vadd.f32 1.0, %v10500_v3  ;;  %10521 = vpow2.f32 %v8573_v9  ;;  %v5556_v6 = vpop.f32.mrb[45].mxu0  ;;  %v5565_v25 = vadd.f32 %v13644_v59, %v9768_v20 }
 0x42b   : > { %v10504_v28 = vpop.eup %10503  ;;  %v7586_v18 = vmul.f32 %v13680_v12, %v10502_v56  ;;  %10523 = vrcp.f32 %v6816_v63  ;;  %v9769_v50 = vpop.f32.mrb[46].mxu0  ;;  %v5557_v38 = vadd.f32 %v13644_v59, %v5556_v6 }
 0x42c   : > { %v10506_v46 = vpop.eup %10505  ;;  %v7589_v5 = vmul.f32 %v13680_v12, %v10504_v28  ;;  %10525 = vrcp.f32 %v6821_v24  ;;  %v5559_v26 = vpop.f32.mrb[47].mxu0  ;;  %v8583_v0 = vmul.f32 -1.442695, %v5565_v25  ;;  %v5568_v34 = vadd.f32 %v13644_v59, %v9769_v50 }
 0x42d   : > { %v10508_v60 = vpop.eup %10507  ;;  %7843 = vst.msk [vmem:[%s12375_s30 + $0x4c0] sm:$0xff] %vm7690_vm4, %v7586_v18  ;;  %v6819_v57 = vadd.f32 1.0, %v10506_v46  ;;  %10527 = vpow2.f32 %v8576_v44  ;;  %v8581_v23 = vmul.f32 -1.442695, %v5557_v38  ;;  %v5560_v52 = vadd.f32 %v13644_v59, %v5559_v26 }
 0x42e   : > { %v10510_v47 = vpop.eup %10509  ;;  %7846 = vst.msk [vmem:[%s12375_s30 + $0x4d8] sm:$0xff] %vm7690_vm4, %v7589_v5  ;;  %v7587_v42 = vmul.f32 %v13680_v12, %v10508_v60  ;;  %10529 = vpow2.f32 %v8574_v36  ;;  %v8584_v19 = vmul.f32 -1.442695, %v5568_v34 }
 0x42f   : > { %v10512_v1 = vpop.eup %10511  ;;  %10531 = vrcp.f32 %v6819_v57  ;;  %v6822_v13 = vadd.f32 1.0, %v10510_v47  ;;  %v8582_v3 = vmul.f32 -1.442695, %v5560_v52 }
 0x430   : > { %v10514_v21 = vpop.eup %10513  ;;  %7844 = vst.msk [vmem:[%s12375_s30 + $0x4c8] sm:$0xff] %vm7690_vm4, %v7587_v42  ;;  %v7592_v41 = vmul.f32 %v13680_v12, %v10512_v1  ;;  %10533 = vpow2.f32 %v8579_v58 }
 0x431   : > { %v10516_v27 = vpop.eup %10515  ;;  %10535 = vrcp.f32 %v6822_v13  ;;  %v6820_v14 = vadd.f32 1.0, %v10514_v21  ;;  %v9772_v62 = vpop.f32.mrb[48].mxu0 }
 0x432   : > { %v10518_v40 = vpop.eup %10517  ;;  %7849 = vst.msk [vmem:[%s12375_s30 + $0x4f0] sm:$0xff] %vm7690_vm4, %v7592_v41  ;;  %v6825_v53 = vadd.f32 1.0, %v10516_v27  ;;  %10537 = vpow2.f32 %v8577_v30  ;;  %v5572_v37 = vpop.f32.mrb[49].mxu0  ;;  %v5581_v54 = vadd.f32 %v13644_v59, %v9772_v62 }
 0x433   : > { %v10520_v32 = vpop.eup %10519  ;;  %v7590_v10 = vmul.f32 %v13680_v12, %v10518_v40  ;;  %10539 = vrcp.f32 %v6820_v14  ;;  %v9773_v33 = vpop.f32.mrb[50].mxu0  ;;  %v5573_v22 = vadd.f32 %v13644_v59, %v5572_v37 }
 0x434   : > { %v10522_v45 = vpop.eup %10521  ;;  %v7593_v61 = vmul.f32 %v13680_v12, %v10520_v32  ;;  %10541 = vrcp.f32 %v6825_v53  ;;  %v5575_v29 = vpop.f32.mrb[51].mxu0  ;;  %v8587_v36 = vmul.f32 -1.442695, %v5581_v54  ;;  %v5584_v35 = vadd.f32 %v13644_v59, %v9773_v33 }
 0x435   : > { %v10524_v49 = vpop.eup %10523  ;;  %7847 = vst.msk [vmem:[%s12375_s30 + $0x4e0] sm:$0xff] %vm7690_vm4, %v7590_v10  ;;  %v6823_v11 = vadd.f32 1.0, %v10522_v45  ;;  %10543 = vpow2.f32 %v8580_v55  ;;  %v8585_v46 = vmul.f32 -1.442695, %v5573_v22  ;;  %v5576_v6 = vadd.f32 %v13644_v59, %v5575_v29 }
 0x436   : > { %v10526_v15 = vpop.eup %10525  ;;  %7850 = vst.msk [vmem:[%s12375_s30 + $0x4f8] sm:$0xff] %vm7690_vm4, %v7593_v61  ;;  %v7591_v2 = vmul.f32 %v13680_v12, %v10524_v49  ;;  %10545 = vpow2.f32 %v8578_v51  ;;  %v8588_v16 = vmul.f32 -1.442695, %v5584_v35 }
 0x437   : > { %v10528_v31 = vpop.eup %10527  ;;  %v7596_v17 = vmul.f32 %v13680_v12, %v10526_v15  ;;  %10547 = vrcp.f32 %v6823_v11  ;;  %v8586_v55 = vmul.f32 -1.442695, %v5576_v6 }
 0x438   : > { %v10530_v48 = vpop.eup %10529  ;;  %7848 = vst.msk [vmem:[%s12375_s30 + $0x4e8] sm:$0xff] %vm7690_vm4, %v7591_v2  ;;  %v6826_v9 = vadd.f32 1.0, %v10528_v31  ;;  %10549 = vpow2.f32 %v8583_v0 }
 0x439   : > { %v10532_v8 = vpop.eup %10531  ;;  %7853 = vst.msk [vmem:[%s12375_s30 + $0x510] sm:$0xff] %vm7690_vm4, %v7596_v17  ;;  %v6824_v4 = vadd.f32 1.0, %v10530_v48  ;;  %10551 = vpow2.f32 %v8581_v23 }
 0x43a   : > { %v10534_v43 = vpop.eup %10533  ;;  %v7594_v7 = vmul.f32 %v13680_v12, %v10532_v8  ;;  %10553 = vrcp.f32 %v6826_v9  ;;  %v9776_v5 = vpop.f32.mrb[52].mxu0 }
 0x43b   : > { %v10536_v63 = vpop.eup %10535  ;;  %10555 = vrcp.f32 %v6824_v4  ;;  %v6829_v44 = vadd.f32 1.0, %v10534_v43  ;;  %v5588_v60 = vpop.f32.mrb[53].mxu0  ;;  %v5597_v50 = vadd.f32 %v13644_v59, %v9776_v5 }
 0x43c   : > { %v10538_v56 = vpop.eup %10537  ;;  %7851 = vst.msk [vmem:[%s12375_s30 + $0x500] sm:$0xff] %vm7690_vm4, %v7594_v7  ;;  %v7597_v24 = vmul.f32 %v13680_v12, %v10536_v63  ;;  %10557 = vpow2.f32 %v8584_v19  ;;  %v9777_v47 = vpop.f32.mrb[54].mxu0  ;;  %v5589_v25 = vadd.f32 %v13644_v59, %v5588_v60 }
 0x43d   : > { %v10540_v28 = vpop.eup %10539  ;;  %10559 = vrcp.f32 %v6829_v44  ;;  %v6827_v18 = vadd.f32 1.0, %v10538_v56  ;;  %v5591_v1 = vpop.f32.mrb[55].mxu0  ;;  %v8591_v53 = vmul.f32 -1.442695, %v5597_v50  ;;  %v5600_v51 = vadd.f32 %v13644_v59, %v9777_v47 }
 0x43e   : > { %v10542_v58 = vpop.eup %10541  ;;  %7854 = vst.msk [vmem:[%s12375_s30 + $0x518] sm:$0xff] %vm7690_vm4, %v7597_v24  ;;  %v7595_v20 = vmul.f32 %v13680_v12, %v10540_v28  ;;  %10561 = vpow2.f32 %v8582_v3  ;;  %v8589_v34 = vmul.f32 -1.442695, %v5589_v25  ;;  %v5592_v23 = vadd.f32 %v13644_v59, %v5591_v1 }
 0x43f   : > { %v10544_v57 = vpop.eup %10543  ;;  %v7600_v39 = vmul.f32 %v13680_v12, %v10542_v58  ;;  %10563 = vrcp.f32 %v6827_v18  ;;  %v8592_v52 = vmul.f32 -1.442695, %v5600_v51 }
 0x440   : > { %v10546_v42 = vpop.eup %10545  ;;  %7852 = vst.msk [vmem:[%s12375_s30 + $0x508] sm:$0xff] %vm7690_vm4, %v7595_v20  ;;  %v6830_v30 = vadd.f32 1.0, %v10544_v57  ;;  %10565 = vpow2.f32 %v8587_v36  ;;  %v8590_v4 = vmul.f32 -1.442695, %v5592_v23 }
 0x441   : > { %v10548_v13 = vpop.eup %10547  ;;  %7857 = vst.msk [vmem:[%s12375_s30 + $0x530] sm:$0xff] %vm7690_vm4, %v7600_v39  ;;  %v6828_v26 = vadd.f32 1.0, %v10546_v42  ;;  %10567 = vpow2.f32 %v8585_v46 }
 0x442   : > { %v10550_v21 = vpop.eup %10549  ;;  %v7598_v41 = vmul.f32 %v13680_v12, %v10548_v13  ;;  %10569 = vrcp.f32 %v6830_v30  ;;  %v9780_v45 = vpop.f32.mrb[56].mxu0 }
 0x443   : > { %v10552_v27 = vpop.eup %10551  ;;  %10571 = vrcp.f32 %v6828_v26  ;;  %v6833_v14 = vadd.f32 1.0, %v10550_v21  ;;  %v5604_v62 = vpop.f32.mrb[57].mxu0  ;;  %v5613_v33 = vadd.f32 %v13644_v59, %v9780_v45 }
 0x444   : > { %v10554_v38 = vpop.eup %10553  ;;  %7855 = vst.msk [vmem:[%s12375_s30 + $0x520] sm:$0xff] %vm7690_vm4, %v7598_v41  ;;  %v6831_v40 = vadd.f32 1.0, %v10552_v27  ;;  %10573 = vpow2.f32 %v8588_v16  ;;  %v9781_v37 = vpop.f32.mrb[58].mxu0  ;;  %v5605_v19 = vadd.f32 %v13644_v59, %v5604_v62 }
 0x445   : > { %v10556_v32 = vpop.eup %10555  ;;  %v7601_v10 = vmul.f32 %v13680_v12, %v10554_v38  ;;  %10575 = vrcp.f32 %v6833_v14  ;;  %v5607_v31 = vpop.f32.mrb[59].mxu0  ;;  %v5616_v22 = vadd.f32 %v13644_v59, %v9781_v37  ;;  %v8595_v3 = vmul.f32 -1.442695, %v5613_v33 }
 0x446   : > { %v10558_v61 = vpop.eup %10557  ;;  %v7599_v0 = vmul.f32 %v13680_v12, %v10556_v32  ;;  %10577 = vrcp.f32 %v6831_v40  ;;  %v8593_v36 = vmul.f32 -1.442695, %v5605_v19  ;;  %v5608_v35 = vadd.f32 %v13644_v59, %v5607_v31 }
 0x447   : > { %v10560_v49 = vpop.eup %10559  ;;  %7858 = vst.msk [vmem:[%s12375_s30 + $0x538] sm:$0xff] %vm7690_vm4, %v7601_v10  ;;  %v6834_v11 = vadd.f32 1.0, %v10558_v61  ;;  %10579 = vpow2.f32 %v8586_v55  ;;  %v8596_v5 = vmul.f32 -1.442695, %v5616_v22 }
 0x448   : > { %v10562_v15 = vpop.eup %10561  ;;  %7856 = vst.msk [vmem:[%s12375_s30 + $0x528] sm:$0xff] %vm7690_vm4, %v7599_v0  ;;  %v7604_v2 = vmul.f32 %v13680_v12, %v10560_v49  ;;  %10581 = vpow2.f32 %v8591_v53  ;;  %v8594_v50 = vmul.f32 -1.442695, %v5608_v35 }
 0x449   : > { %v10564_v17 = vpop.eup %10563  ;;  %10583 = vrcp.f32 %v6834_v11  ;;  %v6832_v29 = vadd.f32 1.0, %v10562_v15 }
 0x44a   : > { %v10566_v48 = vpop.eup %10565  ;;  %7861 = vst.msk [vmem:[%s12375_s30 + $0x550] sm:$0xff] %vm7690_vm4, %v7604_v2  ;;  %v7602_v9 = vmul.f32 %v13680_v12, %v10564_v17  ;;  %10585 = vpow2.f32 %v8589_v34 }
 0x44b   : > { %v10568_v54 = vpop.eup %10567  ;;  %10587 = vrcp.f32 %v6832_v29  ;;  %v6837_v8 = vadd.f32 1.0, %v10566_v48  ;;  %v9784_v28 = vpop.f32.mrb[60].mxu0 }
 0x44c   : > { %v10570_v43 = vpop.eup %10569  ;;  %7859 = vst.msk [vmem:[%s12375_s30 + $0x540] sm:$0xff] %vm7690_vm4, %v7602_v9  ;;  %v6835_v7 = vadd.f32 1.0, %v10568_v54  ;;  %10589 = vpow2.f32 %v8592_v52  ;;  %v5620_v58 = vpop.f32.mrb[61].mxu0  ;;  %v5629_v57 = vadd.f32 %v13644_v59, %v9784_v28 }
 0x44d   : > { %v10572_v63 = vpop.eup %10571  ;;  %v7605_v44 = vmul.f32 %v13680_v12, %v10570_v43  ;;  %10591 = vrcp.f32 %v6837_v8  ;;  %v9785_v39 = vpop.f32.mrb[62].mxu0  ;;  %v5621_v1 = vadd.f32 %v13644_v59, %v5620_v58 }
 0x44e   : > { %v10574_v56 = vpop.eup %10573  ;;  %v7603_v24 = vmul.f32 %v13680_v12, %v10572_v63  ;;  %10593 = vrcp.f32 %v6835_v7  ;;  %v5623_v42 = vpop.f32.mrb[63].mxu0  ;;  %v5632_v21 = vadd.f32 %v13644_v59, %v9785_v39  ;;  %v8599_v27 = vmul.f32 -1.442695, %v5629_v57 }
 0x44f   : > { %v10576_v18 = vpop.eup %10575  ;;  %7862 = vst.msk [vmem:[%s12375_s30 + $0x558] sm:$0xff] %vm7690_vm4, %v7605_v44  ;;  %v6838_v46 = vadd.f32 1.0, %v10574_v56  ;;  %10595 = vpow2.f32 %v8590_v4  ;;  %v8597_v53 = vmul.f32 -1.442695, %v5621_v1  ;;  %v5624_v51 = vadd.f32 %v13644_v59, %v5623_v42 }
 0x450   : > { %v10578_v20 = vpop.eup %10577  ;;  %7860 = vst.msk [vmem:[%s12375_s30 + $0x548] sm:$0xff] %vm7690_vm4, %v7603_v24  ;;  %v7608_v60 = vmul.f32 %v13680_v12, %v10576_v18  ;;  %10597 = vpow2.f32 %v8595_v3  ;;  %v8600_v61 = vmul.f32 -1.442695, %v5632_v21 }
 0x451   : > { %v10580_v6 = vpop.eup %10579  ;;  %v7606_v47 = vmul.f32 %v13680_v12, %v10578_v20  ;;  %10599 = vrcp.f32 %v6838_v46  ;;  %v8598_v33 = vmul.f32 -1.442695, %v5624_v51 }
 0x452   : > { %v10582_v30 = vpop.eup %10581  ;;  %7865 = vst.msk [vmem:[%s12375_s30 + $0x570] sm:$0xff] %vm7690_vm4, %v7608_v60  ;;  %v6836_v16 = vadd.f32 1.0, %v10580_v6  ;;  %10601 = vpow2.f32 %v8593_v36 }
 0x453   : > { %v10584_v13 = vpop.eup %10583  ;;  %7863 = vst.msk [vmem:[%s12375_s30 + $0x560] sm:$0xff] %vm7690_vm4, %v7606_v47  ;;  %v6841_v26 = vadd.f32 1.0, %v10582_v30  ;;  %10603 = vpow2.f32 %v8596_v5  ;;  %v9788_v32 = vpop.f32.mrb[64].mxu0 }
 0x454   : > { %v10586_v41 = vpop.eup %10585  ;;  %v7609_v25 = vmul.f32 %v13680_v12, %v10584_v13  ;;  %10605 = vrcp.f32 %v6836_v16  ;;  %v5636_v0 = vpop.f32.mrb[65].mxu0  ;;  %v5645_v37 = vadd.f32 %v13644_v59, %v9788_v32 }
 0x455   : > { %v10588_v14 = vpop.eup %10587  ;;  %10607 = vrcp.f32 %v6841_v26  ;;  %v6839_v55 = vadd.f32 1.0, %v10586_v41  ;;  %v9789_v49 = vpop.f32.mrb[66].mxu0  ;;  %v5637_v31 = vadd.f32 %v13644_v59, %v5636_v0 }
 0x456   : > { %v10590_v38 = vpop.eup %10589  ;;  %7866 = vst.msk [vmem:[%s12375_s30 + $0x578] sm:$0xff] %vm7690_vm4, %v7609_v25  ;;  %v7607_v40 = vmul.f32 %v13680_v12, %v10588_v14  ;;  %10609 = vpow2.f32 %v8594_v50  ;;  %v5639_v15 = vpop.f32.mrb[67].mxu0  ;;  %v5648_v19 = vadd.f32 %v13644_v59, %v9789_v49  ;;  %v8603_v4 = vmul.f32 -1.442695, %v5645_v37 }
 0x457   : > { %v10592_v10 = vpop.eup %10591  ;;  %10611 = vrcp.f32 %v6839_v55  ;;  %v6842_v45 = vadd.f32 1.0, %v10590_v38  ;;  %v8601_v7 = vmul.f32 -1.442695, %v5637_v31  ;;  %v5640_v3 = vadd.f32 %v13644_v59, %v5639_v15 }
 0x458   : > { %v10594_v34 = vpop.eup %10593  ;;  %7864 = vst.msk [vmem:[%s12375_s30 + $0x568] sm:$0xff] %vm7690_vm4, %v7607_v40  ;;  %v7612_v62 = vmul.f32 %v13680_v12, %v10592_v10  ;;  %10613 = vpow2.f32 %v8599_v27  ;;  %v8604_v35 = vmul.f32 -1.442695, %v5648_v19 }
 0x459   : > { %v10596_v11 = vpop.eup %10595  ;;  %v7610_v23 = vmul.f32 %v13680_v12, %v10594_v34  ;;  %10615 = vrcp.f32 %v6842_v45  ;;  %v8602_v57 = vmul.f32 -1.442695, %v5640_v3 }
 0x45a   : > { %v10598_v2 = vpop.eup %10597  ;;  %7869 = vst.msk [vmem:[%s12375_s30 + $0x590] sm:$0xff] %vm7690_vm4, %v7612_v62  ;;  %v6840_v52 = vadd.f32 1.0, %v10596_v11  ;;  %10617 = vpow2.f32 %v8597_v53 }
 0x45b   : > { %v10600_v17 = vpop.eup %10599  ;;  %7867 = vst.msk [vmem:[%s12375_s30 + $0x580] sm:$0xff] %vm7690_vm4, %v7610_v23  ;;  %v6845_v29 = vadd.f32 1.0, %v10598_v2  ;;  %10619 = vpow2.f32 %v8600_v61 }
 0x45c   : > { %v10602_v48 = vpop.eup %10601  ;;  %v7613_v9 = vmul.f32 %v13680_v12, %v10600_v17  ;;  %10621 = vrcp.f32 %v6840_v52  ;;  %v9792_v56 = vpop.f32.mrb[68].mxu0 }
 0x45d   : > { %v10604_v54 = vpop.eup %10603  ;;  %10623 = vrcp.f32 %v6845_v29  ;;  %v6843_v8 = vadd.f32 1.0, %v10602_v48  ;;  %v5652_v28 = vpop.f32.mrb[69].mxu0  ;;  %v5661_v5 = vadd.f32 %v13644_v59, %v9792_v56 }
 0x45e   : > { %v10606_v22 = vpop.eup %10605  ;;  %7870 = vst.msk [vmem:[%s12375_s30 + $0x598] sm:$0xff] %vm7690_vm4, %v7613_v9  ;;  %v6846_v43 = vadd.f32 1.0, %v10604_v54  ;;  %10625 = vpow2.f32 %v8598_v33  ;;  %v9793_v58 = vpop.f32.mrb[70].mxu0  ;;  %v5653_v39 = vadd.f32 %v13644_v59, %v5652_v28 }
 0x45f   : > { %v10608_v63 = vpop.eup %10607  ;;  %v7611_v44 = vmul.f32 %v13680_v12, %v10606_v22  ;;  %10627 = vrcp.f32 %v6843_v8  ;;  %v5655_v6 = vpop.f32.mrb[71].mxu0  ;;  %v5664_v50 = vadd.f32 %v13644_v59, %v9793_v58  ;;  %v8607_v26 = vmul.f32 -1.442695, %v5661_v5 }
 0x460   : > { %v10610_v24 = vpop.eup %10609  ;;  %v7616_v36 = vmul.f32 %v13680_v12, %v10608_v63  ;;  %10629 = vrcp.f32 %v6846_v43  ;;  %v5656_v21 = vadd.f32 %v13644_v59, %v5655_v6  ;;  %v8605_v27 = vmul.f32 -1.442695, %v5653_v39 }
 0x461   : > { %v10612_v18 = vpop.eup %10611  ;;  %7868 = vst.msk [vmem:[%s12375_s30 + $0x588] sm:$0xff] %vm7690_vm4, %v7611_v44  ;;  %v6844_v46 = vadd.f32 1.0, %v10610_v24  ;;  %10631 = vpow2.f32 %v8603_v4  ;;  %v8608_v51 = vmul.f32 -1.442695, %v5664_v50 }
 0x462   : > { %v10614_v20 = vpop.eup %10613  ;;  %7873 = vst.msk [vmem:[%s12375_s30 + $0x5b0] sm:$0xff] %vm7690_vm4, %v7616_v36  ;;  %v7614_v60 = vmul.f32 %v13680_v12, %v10612_v18  ;;  %10633 = vpow2.f32 %v8601_v7  ;;  %v8606_v0 = vmul.f32 -1.442695, %v5656_v21 }
 0x463   : > { %v10616_v47 = vpop.eup %10615  ;;  %10635 = vrcp.f32 %v6844_v46  ;;  %v6849_v42 = vadd.f32 1.0, %v10614_v20 }
 0x464   : > { %v10618_v30 = vpop.eup %10617  ;;  %7871 = vst.msk [vmem:[%s12375_s30 + $0x5a0] sm:$0xff] %vm7690_vm4, %v7614_v60  ;;  %v7617_v16 = vmul.f32 %v13680_v12, %v10616_v47  ;;  %10637 = vpow2.f32 %v8604_v35  ;;  %v9796_v38 = vpop.f32.mrb[72].mxu0 }
 0x465   : > { %v10620_v1 = vpop.eup %10619  ;;  %10639 = vrcp.f32 %v6849_v42  ;;  %v6847_v13 = vadd.f32 1.0, %v10618_v30  ;;  %v5677_v32 = vadd.f32 %v13644_v59, %v9796_v38  ;;  %v5668_v10 = vpop.f32.mrb[73].mxu0 }
 0x466   : > { %v10622_v41 = vpop.eup %10621  ;;  %7874 = vst.msk [vmem:[%s12375_s30 + $0x5b8] sm:$0xff] %vm7690_vm4, %v7617_v16  ;;  %v6850_v25 = vadd.f32 1.0, %v10620_v1  ;;  %10641 = vpow2.f32 %v8602_v57  ;;  %v9797_v34 = vpop.f32.mrb[74].mxu0  ;;  %v5669_v11 = vadd.f32 %v13644_v59, %v5668_v10 }
 0x467   : > { %v10624_v14 = vpop.eup %10623  ;;  %v7615_v55 = vmul.f32 %v13680_v12, %v10622_v41  ;;  %10643 = vrcp.f32 %v6847_v13  ;;  %v5671_v23 = vpop.f32.mrb[75].mxu0  ;;  %v8611_v33 = vmul.f32 -1.442695, %v5677_v32  ;;  %v5680_v31 = vadd.f32 %v13644_v59, %v9797_v34 }
 0x468   : > { %v10626_v40 = vpop.eup %10625  ;;  %v7620_v53 = vmul.f32 %v13680_v12, %v10624_v14  ;;  %10645 = vrcp.f32 %v6850_v25  ;;  %v5672_v48 = vadd.f32 %v13644_v59, %v5671_v23  ;;  %v8609_v54 = vmul.f32 -1.442695, %v5669_v11  ;;  %v13862_v23 = vld [vmem:[%s14109_s6] ss:$0 sm:$0xff] }
 0x469   : > { %v10628_v45 = vpop.eup %10627  ;;  %7872 = vst.msk [vmem:[%s12375_s30 + $0x5a8] sm:$0xff] %vm7690_vm4, %v7615_v55  ;;  %v6848_v61 = vadd.f32 1.0, %v10626_v40  ;;  %10647 = vpow2.f32 %v8607_v26  ;;  %v8612_v7 = vmul.f32 -1.442695, %v5680_v31 }
 0x46a   : > { %v10630_v62 = vpop.eup %10629  ;;  %7877 = vst.msk [vmem:[%s12375_s30 + $0x5d0] sm:$0xff] %vm7690_vm4, %v7620_v53  ;;  %v7618_v49 = vmul.f32 %v13680_v12, %v10628_v45  ;;  %10649 = vpow2.f32 %v8605_v27  ;;  %v8610_v56 = vmul.f32 -1.442695, %v5672_v48 }
 0x46b   : > { %v10632_v37 = vpop.eup %10631  ;;  %v7621_v15 = vmul.f32 %v13680_v12, %v10630_v62  ;;  %10651 = vrcp.f32 %v6848_v61 }
 0x46c   : > { %v10634_v2 = vpop.eup %10633  ;;  %7875 = vst.msk [vmem:[%s12375_s30 + $0x5c0] sm:$0xff] %vm7690_vm4, %v7618_v49  ;;  %v6853_v52 = vadd.f32 1.0, %v10632_v37  ;;  %10653 = vpow2.f32 %v8608_v51 }
 0x46d   : > { %v10636_v17 = vpop.eup %10635  ;;  %7878 = vst.msk [vmem:[%s12375_s30 + $0x5d8] sm:$0xff] %vm7690_vm4, %v7621_v15  ;;  %v6851_v29 = vadd.f32 1.0, %v10634_v2  ;;  %10655 = vpow2.f32 %v8606_v0  ;;  %v9800_v3 = vpop.f32.mrb[76].mxu0 }
 0x46e   : > { %v10638_v9 = vpop.eup %10637  ;;  %v7619_v19 = vmul.f32 %v13680_v12, %v10636_v17  ;;  %10657 = vrcp.f32 %v6853_v52  ;;  %v5693_v24 = vadd.f32 %v13644_v59, %v9800_v3  ;;  %v5684_v36 = vpop.f32.mrb[77].mxu0 }
 0x46f   : > { %v10640_v8 = vpop.eup %10639  ;;  %10659 = vrcp.f32 %v6851_v29  ;;  %v6854_v4 = vadd.f32 1.0, %v10638_v9  ;;  %v9801_v18 = vpop.f32.mrb[78].mxu0  ;;  %v5685_v58 = vadd.f32 %v13644_v59, %v5684_v36 }
 0x470   : > { %v10642_v22 = vpop.eup %10641  ;;  %7876 = vst.msk [vmem:[%s12375_s30 + $0x5c8] sm:$0xff] %vm7690_vm4, %v7619_v19  ;;  %v7624_v43 = vmul.f32 %v13680_v12, %v10640_v8  ;;  %10661 = vpow2.f32 %v8611_v33  ;;  %v5687_v20 = vpop.f32.mrb[79].mxu0  ;;  %v8615_v39 = vmul.f32 -1.442695, %v5693_v24  ;;  %v5696_v6 = vadd.f32 %v13644_v59, %v9801_v18 }
 0x471   : > { %v10644_v63 = vpop.eup %10643  ;;  %10663 = vrcp.f32 %v6854_v4  ;;  %v6852_v44 = vadd.f32 1.0, %v10642_v22  ;;  %v5688_v50 = vadd.f32 %v13644_v59, %v5687_v20  ;;  %v8613_v26 = vmul.f32 -1.442695, %v5685_v58 }
 0x472   : > { %v10646_v35 = vpop.eup %10645  ;;  %7881 = vst.msk [vmem:[%s12375_s30 + $0x5f0] sm:$0xff] %vm7690_vm4, %v7624_v43  ;;  %v7622_v28 = vmul.f32 %v13680_v12, %v10644_v63  ;;  %10665 = vpow2.f32 %v8609_v54  ;;  %v8616_v25 = vmul.f32 -1.442695, %v5696_v6 }
 0x473   : > { %v10648_v46 = vpop.eup %10647  ;;  %v7625_v5 = vmul.f32 %v13680_v12, %v10646_v35  ;;  %10667 = vrcp.f32 %v6852_v44  ;;  %v8614_v32 = vmul.f32 -1.442695, %v5688_v50 }
 0x474   : > { %v10650_v60 = vpop.eup %10649  ;;  %7879 = vst.msk [vmem:[%s12375_s30 + $0x5e0] sm:$0xff] %vm7690_vm4, %v7622_v28  ;;  %v6857_v57 = vadd.f32 1.0, %v10648_v46  ;;  %10669 = vpow2.f32 %v8612_v7 }
 0x475   : > { %v10652_v47 = vpop.eup %10651  ;;  %7882 = vst.msk [vmem:[%s12375_s30 + $0x5f8] sm:$0xff] %vm7690_vm4, %v7625_v5  ;;  %v6855_v42 = vadd.f32 1.0, %v10650_v60  ;;  %10671 = vpow2.f32 %v8610_v56  ;;  %v9804_v27 = vpop.f32.mrb[80].mxu0 }
 0x476   : > { %v10654_v30 = vpop.eup %10653  ;;  %v7623_v16 = vmul.f32 %v13680_v12, %v10652_v47  ;;  %10673 = vrcp.f32 %v6857_v57  ;;  %v5709_v38 = vadd.f32 %v13644_v59, %v9804_v27  ;;  %v5700_v40 = vpop.f32.mrb[81].mxu0 }
 0x477   : > { %v10656_v1 = vpop.eup %10655  ;;  %10675 = vrcp.f32 %v6855_v42  ;;  %v6858_v13 = vadd.f32 1.0, %v10654_v30  ;;  %v9805_v10 = vpop.f32.mrb[82].mxu0  ;;  %v5701_v0 = vadd.f32 %v13644_v59, %v5700_v40 }
 0x478   : > { %v10658_v21 = vpop.eup %10657  ;;  %7880 = vst.msk [vmem:[%s12375_s30 + $0x5e8] sm:$0xff] %vm7690_vm4, %v7623_v16  ;;  %v6856_v41 = vadd.f32 1.0, %v10656_v1  ;;  %10677 = vpow2.f32 %v8615_v39  ;;  %v5703_v34 = vpop.f32.mrb[83].mxu0  ;;  %v8619_v11 = vmul.f32 -1.442695, %v5709_v38  ;;  %v5712_v37 = vadd.f32 %v13862_v23, %v9805_v10 }
 0x479   : > { %v10660_v14 = vpop.eup %10659  ;;  %v7628_v55 = vmul.f32 %v13680_v12, %v10658_v21  ;;  %10679 = vrcp.f32 %v6858_v13  ;;  %v5704_v33 = vadd.f32 %v13862_v23, %v5703_v34  ;;  %v8617_v29 = vmul.f32 -1.442695, %v5701_v0 }
 0x47a   : > { %v10662_v53 = vpop.eup %10661  ;;  %v7626_v51 = vmul.f32 %v13680_v12, %v10660_v14  ;;  %10681 = vrcp.f32 %v6856_v41  ;;  %v8620_v19 = vmul.f32 -1.442695, %v5712_v37 }
 0x47b   : > { %v10664_v45 = vpop.eup %10663  ;;  %7885 = vst.msk [vmem:[%s12375_s30 + $0x610] sm:$0xff] %vm7690_vm4, %v7628_v55  ;;  %v6861_v61 = vadd.f32 1.0, %v10662_v53  ;;  %10683 = vpow2.f32 %v8613_v26  ;;  %v8618_v63 = vmul.f32 -1.442695, %v5704_v33 }
 0x47c   : > { %v10666_v62 = vpop.eup %10665  ;;  %7883 = vst.msk [vmem:[%s12375_s30 + $0x600] sm:$0xff] %vm7690_vm4, %v7626_v51  ;;  %v7629_v49 = vmul.f32 %v13680_v12, %v10664_v45  ;;  %10685 = vpow2.f32 %v8616_v25  ;;  %v13898_v45 = vld [vmem:[%s14110_s7] ss:$0 sm:$0xff] }
 0x47d   : > { %v10668_v15 = vpop.eup %10667  ;;  %10687 = vrcp.f32 %v6861_v61  ;;  %v6859_v2 = vadd.f32 1.0, %v10666_v62  ;;  %v9808_v54 = vpop.f32.mrb[84].mxu0 }
 0x47e   : > { %v10670_v59 = vpop.eup %10669  ;;  %7886 = vst.msk [vmem:[%s12375_s30 + $0x618] sm:$0xff] %vm7690_vm4, %v7629_v49  ;;  %v7627_v52 = vmul.f32 %v13680_v12, %v10668_v15  ;;  %10689 = vpow2.f32 %v8614_v32  ;;  %v5725_v22 = vadd.f32 %v13862_v23, %v9808_v54  ;;  %v5716_v43 = vpop.f32.mrb[85].mxu0 }
 0x47f   : > { %v10672_v31 = vpop.eup %10671  ;;  %10691 = vrcp.f32 %v6859_v2  ;;  %v6862_v17 = vadd.f32 1.0, %v10670_v59  ;;  %v5717_v44 = vadd.f32 %v13862_v23, %v5716_v43  ;;  %v9809_v56 = vpop.f32.mrb[86].mxu0 }
 0x480   : > { %v10674_v48 = vpop.eup %10673  ;;  %7884 = vst.msk [vmem:[%s12375_s30 + $0x608] sm:$0xff] %vm7690_vm4, %v7627_v52  ;;  %v6860_v9 = vadd.f32 1.0, %v10672_v31  ;;  %10693 = vpow2.f32 %v8619_v11  ;;  %v8623_v35 = vmul.f32 -1.442695, %v5725_v22  ;;  %v5719_v28 = vpop.f32.mrb[87].mxu0  ;;  %v5728_v5 = vadd.f32 %v13862_v23, %v9809_v56 }
 0x481   : > { %v10676_v8 = vpop.eup %10675  ;;  %v7632_v4 = vmul.f32 %v13680_v12, %v10674_v48  ;;  %10695 = vrcp.f32 %v6862_v17  ;;  %v8621_v39 = vmul.f32 -1.442695, %v5717_v44  ;;  %v5720_v6 = vadd.f32 %v13862_v23, %v5719_v28 }
 0x482   : > { %v10678_v7 = vpop.eup %10677  ;;  %v7630_v3 = vmul.f32 %v13680_v12, %v10676_v8  ;;  %10697 = vrcp.f32 %v6860_v9  ;;  %v8624_v50 = vmul.f32 -1.442695, %v5728_v5 }
 0x483   : > { %v10680_v24 = vpop.eup %10679  ;;  %7889 = vst.msk [vmem:[%s12375_s30 + $0x630] sm:$0xff] %vm7690_vm4, %v7632_v4  ;;  %v6865_v36 = vadd.f32 1.0, %v10678_v7  ;;  %10699 = vpow2.f32 %v8617_v29  ;;  %v8622_v14 = vmul.f32 -1.442695, %v5720_v6 }
 0x484   : > { %v10682_v18 = vpop.eup %10681  ;;  %7887 = vst.msk [vmem:[%s12375_s30 + $0x620] sm:$0xff] %vm7690_vm4, %v7630_v3  ;;  %v7633_v46 = vmul.f32 %v13680_v12, %v10680_v24  ;;  %10701 = vpow2.f32 %v8620_v19 }
 0x485   : > { %v10684_v58 = vpop.eup %10683  ;;  %v7631_v20 = vmul.f32 %v13680_v12, %v10682_v18  ;;  %10703 = vrcp.f32 %v6865_v36  ;;  %v9812_v1 = vpop.f32.mrb[88].mxu0 }
 0x486   : > { %v10686_v60 = vpop.eup %10685  ;;  %7890 = vst.msk [vmem:[%s12375_s30 + $0x638] sm:$0xff] %vm7690_vm4, %v7633_v46  ;;  %v6863_v57 = vadd.f32 1.0, %v10684_v58  ;;  %10705 = vpow2.f32 %v8618_v63  ;;  %v5741_v21 = vadd.f32 %v13862_v23, %v9812_v1  ;;  %v5732_v41 = vpop.f32.mrb[89].mxu0 }
 0x487   : > { %v10688_v47 = vpop.eup %10687  ;;  %7888 = vst.msk [vmem:[%s12375_s30 + $0x628] sm:$0xff] %vm7690_vm4, %v7631_v20  ;;  %v6866_v42 = vadd.f32 1.0, %v10686_v60  ;;  %10707 = vpow2.f32 %v8623_v35  ;;  %v5733_v55 = vadd.f32 %v13862_v23, %v5732_v41  ;;  %v9813_v38 = vpop.f32.mrb[90].mxu0 }
 0x488   : > { %v10690_v30 = vpop.eup %10689  ;;  %v7636_v16 = vmul.f32 %v13680_v12, %v10688_v47  ;;  %10709 = vrcp.f32 %v6863_v57  ;;  %v8627_v51 = vmul.f32 -1.442695, %v5741_v21  ;;  %v5735_v32 = vpop.f32.mrb[91].mxu0  ;;  %v5744_v34 = vadd.f32 %v13862_v23, %v9813_v38 }
 0x489   : > { %v10692_v13 = vpop.eup %10691  ;;  %10711 = vrcp.f32 %v6866_v42  ;;  %v6864_v26 = vadd.f32 1.0, %v10690_v30  ;;  %v8625_v11 = vmul.f32 -1.442695, %v5733_v55  ;;  %v5736_v37 = vadd.f32 %v13862_v23, %v5735_v32 }
 0x48a   : > { %v10694_v25 = vpop.eup %10693  ;;  %7893 = vst.msk [vmem:[%s12375_s30 + $0x650] sm:$0xff] %vm7690_vm4, %v7636_v16  ;;  %v7634_v27 = vmul.f32 %v13680_v12, %v10692_v13  ;;  %10713 = vpow2.f32 %v8621_v39  ;;  %v8628_v29 = vmul.f32 -1.442695, %v5744_v34 }
 0x48b   : > { %v10696_v40 = vpop.eup %10695  ;;  %10715 = vrcp.f32 %v6864_v26  ;;  %v6869_v53 = vadd.f32 1.0, %v10694_v25  ;;  %v8626_v8 = vmul.f32 -1.442695, %v5736_v37 }
 0x48c   : > { %v10698_v10 = vpop.eup %10697  ;;  %7891 = vst.msk [vmem:[%s12375_s30 + $0x640] sm:$0xff] %vm7690_vm4, %v7634_v27  ;;  %v7637_v12 = vmul.f32 %v13898_v45, %v10696_v40  ;;  %10717 = vpow2.f32 %v8624_v50 }
 0x48d   : > { %v10700_v61 = vpop.eup %10699  ;;  %v7635_v0 = vmul.f32 %v13898_v45, %v10698_v10  ;;  %10719 = vrcp.f32 %v6869_v53  ;;  %v9816_v33 = vpop.f32.mrb[92].mxu0 }
 0x48e   : > { %v10702_v62 = vpop.eup %10701  ;;  %7894 = vst.msk [vmem:[%s12375_s30 + $0x658] sm:$0xff] %vm7690_vm4, %v7637_v12  ;;  %v6867_v49 = vadd.f32 1.0, %v10700_v61  ;;  %10721 = vpow2.f32 %v8622_v14  ;;  %v5757_v48 = vadd.f32 %v13862_v23, %v9816_v33  ;;  %v5748_v9 = vpop.f32.mrb[93].mxu0 }
 0x48f   : > { %v10704_v15 = vpop.eup %10703  ;;  %7892 = vst.msk [vmem:[%s12375_s30 + $0x648] sm:$0xff] %vm7690_vm4, %v7635_v0  ;;  %v6870_v2 = vadd.f32 1.0, %v10702_v62  ;;  %10723 = vpow2.f32 %v8627_v51  ;;  %v5749_v4 = vadd.f32 %v13862_v23, %v5748_v9  ;;  %v9817_v22 = vpop.f32.mrb[94].mxu0 }
 0x490   : > { %v10706_v59 = vpop.eup %10705  ;;  %v7640_v52 = vmul.f32 %v13898_v45, %v10704_v15  ;;  %10725 = vrcp.f32 %v6867_v49  ;;  %v5751_v3 = vpop.f32.mrb[95].mxu0  ;;  %v8631_v56 = vmul.f32 -1.442695, %v5757_v48  ;;  %v5760_v35 = vadd.f32 %v13862_v23, %v9817_v22 }
 0x491   : > { %v10708_v31 = vpop.eup %10707  ;;  %10727 = vrcp.f32 %v6870_v2  ;;  %v6868_v17 = vadd.f32 1.0, %v10706_v59  ;;  %v8629_v46 = vmul.f32 -1.442695, %v5749_v4  ;;  %v5752_v5 = vadd.f32 %v13862_v23, %v5751_v3 }
 0x492   : > { %v10710_v19 = vpop.eup %10709  ;;  %7897 = vst.msk [vmem:[%s12375_s30 + $0x670] sm:$0xff] %vm7690_vm4, %v7640_v52  ;;  %v6873_v54 = vadd.f32 1.0, %v10708_v31  ;;  %10729 = vpow2.f32 %v8625_v11  ;;  %v8632_v47 = vmul.f32 -1.442695, %v5760_v35 }
 0x493   : > { %v10712_v43 = vpop.eup %10711  ;;  %v7638_v7 = vmul.f32 %v13898_v45, %v10710_v19  ;;  %10731 = vrcp.f32 %v6868_v17  ;;  %v8630_v50 = vmul.f32 -1.442695, %v5752_v5 }
 0x494   : > { %v10714_v63 = vpop.eup %10713  ;;  %v7641_v44 = vmul.f32 %v13898_v45, %v10712_v43  ;;  %10733 = vrcp.f32 %v6873_v54 }
 0x495   : > { %v10716_v24 = vpop.eup %10715  ;;  %7895 = vst.msk [vmem:[%s12375_s30 + $0x660] sm:$0xff] %vm7690_vm4, %v7638_v7  ;;  %v6871_v36 = vadd.f32 1.0, %v10714_v63  ;;  %10735 = vpow2.f32 %v8628_v29 }
 0x496   : > { %v10718_v28 = vpop.eup %10717  ;;  %7898 = vst.msk [vmem:[%s12375_s30 + $0x678] sm:$0xff] %vm7690_vm4, %v7641_v44  ;;  %v7639_v18 = vmul.f32 %v13898_v45, %v10716_v24  ;;  %10737 = vpow2.f32 %v8626_v8  ;;  %v9820_v42 = vpop.f32.mrb[96].mxu0 }
 0x497   : > { %v10720_v58 = vpop.eup %10719  ;;  %10739 = vrcp.f32 %v6871_v36  ;;  %v6874_v20 = vadd.f32 1.0, %v10718_v28  ;;  %v5773_v1 = vadd.f32 %v13862_v23, %v9820_v42  ;;  %v5764_v13 = vpop.f32.mrb[97].mxu0 }
 0x498   : > { %v10722_v60 = vpop.eup %10721  ;;  %7896 = vst.msk [vmem:[%s12375_s30 + $0x668] sm:$0xff] %vm7690_vm4, %v7639_v18  ;;  %v7644_v57 = vmul.f32 %v13898_v45, %v10720_v58  ;;  %10741 = vpow2.f32 %v8631_v56  ;;  %v5765_v41 = vadd.f32 %v13862_v23, %v5764_v13  ;;  %v9821_v25 = vpop.f32.mrb[98].mxu0 }
 0x499   : > { %v10724_v39 = vpop.eup %10723  ;;  %10743 = vrcp.f32 %v6874_v20  ;;  %v6872_v6 = vadd.f32 1.0, %v10722_v60  ;;  %v8635_v55 = vmul.f32 -1.442695, %v5773_v1  ;;  %v5776_v38 = vadd.f32 %v13862_v23, %v9821_v25  ;;  %v5767_v40 = vpop.f32.mrb[99].mxu0 }
 0x49a   : > { %v10726_v30 = vpop.eup %10725  ;;  %7901 = vst.msk [vmem:[%s12375_s30 + $0x690] sm:$0xff] %vm7690_vm4, %v7644_v57  ;;  %v6877_v16 = vadd.f32 1.0, %v10724_v39  ;;  %10745 = vpow2.f32 %v8629_v46  ;;  %v8633_v32 = vmul.f32 -1.442695, %v5765_v41  ;;  %v5768_v61 = vadd.f32 %v13862_v23, %v5767_v40 }
 0x49b   : > { %v10728_v26 = vpop.eup %10727  ;;  %v7642_v21 = vmul.f32 %v13898_v45, %v10726_v30  ;;  %10747 = vrcp.f32 %v6872_v6  ;;  %v8636_v11 = vmul.f32 -1.442695, %v5776_v38 }
 0x49c   : > { %v10730_v27 = vpop.eup %10729  ;;  %v7645_v14 = vmul.f32 %v13898_v45, %v10728_v26  ;;  %10749 = vrcp.f32 %v6877_v16  ;;  %v8634_v52 = vmul.f32 -1.442695, %v5768_v61 }
 0x49d   : > { %v10732_v53 = vpop.eup %10731  ;;  %7899 = vst.msk [vmem:[%s12375_s30 + $0x680] sm:$0xff] %vm7690_vm4, %v7642_v21  ;;  %v6875_v51 = vadd.f32 1.0, %v10730_v27  ;;  %10751 = vpow2.f32 %v8632_v47 }
 0x49e   : > { %v10734_v10 = vpop.eup %10733  ;;  %7902 = vst.msk [vmem:[%s12375_s30 + $0x698] sm:$0xff] %vm7690_vm4, %v7645_v14  ;;  %v7643_v12 = vmul.f32 %v13898_v45, %v10732_v53  ;;  %10753 = vpow2.f32 %v8630_v50 }
 0x49f   : > { %v10736_v0 = vpop.eup %10735  ;;  %v7648_v34 = vmul.f32 %v13898_v45, %v10734_v10  ;;  %10755 = vrcp.f32 %v6875_v51  ;;  %v9824_v33 = vpop.f32.mrb[100].mxu0 }
 0x4a0   : > { %v10738_v62 = vpop.eup %10737  ;;  %7900 = vst.msk [vmem:[%s12375_s30 + $0x688] sm:$0xff] %vm7690_vm4, %v7643_v12  ;;  %v6878_v49 = vadd.f32 1.0, %v10736_v0  ;;  %10757 = vpow2.f32 %v8635_v55  ;;  %v5789_v29 = vadd.f32 %v13862_v23, %v9824_v33  ;;  %v5780_v48 = vpop.f32.mrb[101].mxu0 }
 0x4a1   : > { %v10740_v37 = vpop.eup %10739  ;;  %7905 = vst.msk [vmem:[%s12375_s30 + $0x6b0] sm:$0xff] %vm7690_vm4, %v7648_v34  ;;  %v6876_v15 = vadd.f32 1.0, %v10738_v62  ;;  %10759 = vpow2.f32 %v8633_v32  ;;  %v5781_v54 = vadd.f32 %v13862_v23, %v5780_v48  ;;  %v9825_v8 = vpop.f32.mrb[102].mxu0 }
 0x4a2   : > { %v10742_v2 = vpop.eup %10741  ;;  %v7646_v59 = vmul.f32 %v13898_v45, %v10740_v37  ;;  %10761 = vrcp.f32 %v6878_v49  ;;  %v8639_v43 = vmul.f32 -1.442695, %v5789_v29  ;;  %v5792_v7 = vadd.f32 %v13862_v23, %v9825_v8  ;;  %v5783_v3 = vpop.f32.mrb[103].mxu0 }
 0x4a3   : > { %v10744_v31 = vpop.eup %10743  ;;  %10763 = vrcp.f32 %v6876_v15  ;;  %v6881_v17 = vadd.f32 1.0, %v10742_v2  ;;  %v8637_v56 = vmul.f32 -1.442695, %v5781_v54  ;;  %v5784_v35 = vadd.f32 %v13862_v23, %v5783_v3 }
 0x4a4   : > { %v10746_v9 = vpop.eup %10745  ;;  %7903 = vst.msk [vmem:[%s12375_s30 + $0x6a0] sm:$0xff] %vm7690_vm4, %v7646_v59  ;;  %v7649_v19 = vmul.f32 %v13898_v45, %v10744_v31  ;;  %10765 = vpow2.f32 %v8636_v11  ;;  %v8640_v46 = vmul.f32 -1.442695, %v5792_v7 }
 0x4a5   : > { %v10748_v4 = vpop.eup %10747  ;;  %10767 = vrcp.f32 %v6881_v17  ;;  %v6879_v22 = vadd.f32 1.0, %v10746_v9  ;;  %v8638_v47 = vmul.f32 -1.442695, %v5784_v35 }
 0x4a6   : > { %v10750_v63 = vpop.eup %10749  ;;  %7906 = vst.msk [vmem:[%s12375_s30 + $0x6b8] sm:$0xff] %vm7690_vm4, %v7649_v19  ;;  %v7647_v44 = vmul.f32 %v13898_v45, %v10748_v4  ;;  %10769 = vpow2.f32 %v8634_v52 }
 0x4a7   : > { %v10752_v24 = vpop.eup %10751  ;;  %v7652_v36 = vmul.f32 %v13898_v45, %v10750_v63  ;;  %10771 = vrcp.f32 %v6879_v22  ;;  %v9828_v57 = vpop.f32.mrb[104].mxu0 }
 0x4a8   : > { %v10754_v28 = vpop.eup %10753  ;;  %7904 = vst.msk [vmem:[%s12375_s30 + $0x6a8] sm:$0xff] %vm7690_vm4, %v7647_v44  ;;  %v6882_v18 = vadd.f32 1.0, %v10752_v24  ;;  %10773 = vpow2.f32 %v8639_v43  ;;  %v5805_v42 = vadd.f32 %v13862_v23, %v9828_v57  ;;  %v5796_v30 = vpop.f32.mrb[105].mxu0 }
 0x4a9   : > { %v10756_v5 = vpop.eup %10755  ;;  %7909 = vst.msk [vmem:[%s12375_s30 + $0x6d0] sm:$0xff] %vm7690_vm4, %v7652_v36  ;;  %v6880_v58 = vadd.f32 1.0, %v10754_v28  ;;  %10775 = vpow2.f32 %v8637_v56  ;;  %v5797_v1 = vadd.f32 %v13862_v23, %v5796_v30  ;;  %v9829_v13 = vpop.f32.mrb[106].mxu0 }
 0x4aa   : > { %v10758_v20 = vpop.eup %10757  ;;  %v7650_v60 = vmul.f32 %v13898_v45, %v10756_v5  ;;  %10777 = vrcp.f32 %v6882_v18  ;;  %v8643_v41 = vmul.f32 -1.442695, %v5805_v42  ;;  %v5808_v25 = vadd.f32 %v13862_v23, %v9829_v13  ;;  %v5799_v27 = vpop.f32.mrb[107].mxu0 }
 0x4ab   : > { %v10760_v39 = vpop.eup %10759  ;;  %10779 = vrcp.f32 %v6880_v58  ;;  %v6885_v6 = vadd.f32 1.0, %v10758_v20  ;;  %v8641_v38 = vmul.f32 -1.442695, %v5797_v1  ;;  %v5800_v51 = vadd.f32 %v13862_v23, %v5799_v27 }
 0x4ac   : > { %v10762_v16 = vpop.eup %10761  ;;  %7907 = vst.msk [vmem:[%s12375_s30 + $0x6c0] sm:$0xff] %vm7690_vm4, %v7650_v60  ;;  %v6883_v50 = vadd.f32 1.0, %v10760_v39  ;;  %10781 = vpow2.f32 %v8640_v46  ;;  %v8644_v12 = vmul.f32 -1.442695, %v5808_v25 }
 0x4ad   : > { %v10764_v26 = vpop.eup %10763  ;;  %v7653_v21 = vmul.f32 %v13898_v45, %v10762_v16  ;;  %10783 = vrcp.f32 %v6885_v6  ;;  %v8642_v37 = vmul.f32 -1.442695, %v5800_v51 }
 0x4ae   : > { %v10766_v14 = vpop.eup %10765  ;;  %v7651_v55 = vmul.f32 %v13898_v45, %v10764_v26  ;;  %10785 = vrcp.f32 %v6883_v50 }
 0x4af   : > { %v10768_v40 = vpop.eup %10767  ;;  %7910 = vst.msk [vmem:[%s12375_s30 + $0x6d8] sm:$0xff] %vm7690_vm4, %v7653_v21  ;;  %v6886_v53 = vadd.f32 1.0, %v10766_v14  ;;  %10787 = vpow2.f32 %v8638_v47 }
 0x4b0   : > { %v10770_v32 = vpop.eup %10769  ;;  %7908 = vst.msk [vmem:[%s12375_s30 + $0x6c8] sm:$0xff] %vm7690_vm4, %v7651_v55  ;;  %v7656_v10 = vmul.f32 %v13898_v45, %v10768_v40  ;;  %10789 = vpow2.f32 %v8643_v41  ;;  %v9832_v15 = vpop.f32.mrb[108].mxu0 }
 0x4b1   : > { %v10772_v61 = vpop.eup %10771  ;;  %10791 = vrcp.f32 %v6886_v53  ;;  %v6884_v0 = vadd.f32 1.0, %v10770_v32  ;;  %v5821_v52 = vadd.f32 %v13862_v23, %v9832_v15  ;;  %v5812_v33 = vpop.f32.mrb[109].mxu0 }
 0x4b2   : > { %v10774_v34 = vpop.eup %10773  ;;  %7913 = vst.msk [vmem:[%s12375_s30 + $0x6f0] sm:$0xff] %vm7690_vm4, %v7656_v10  ;;  %v7654_v62 = vmul.f32 %v13898_v45, %v10772_v61  ;;  %10793 = vpow2.f32 %v8641_v38  ;;  %v5813_v29 = vadd.f32 %v13862_v23, %v5812_v33  ;;  %v9833_v48 = vpop.f32.mrb[110].mxu0 }
 0x4b3   : > { %v10776_v49 = vpop.eup %10775  ;;  %10795 = vrcp.f32 %v6884_v0  ;;  %v6889_v11 = vadd.f32 1.0, %v10774_v34  ;;  %v8647_v54 = vmul.f32 -1.442695, %v5821_v52  ;;  %v5824_v8 = vadd.f32 %v13862_v23, %v9833_v48  ;;  %v5815_v4 = vpop.f32.mrb[111].mxu0 }
 0x4b4   : > { %v10778_v2 = vpop.eup %10777  ;;  %7911 = vst.msk [vmem:[%s12375_s30 + $0x6e0] sm:$0xff] %vm7690_vm4, %v7654_v62  ;;  %v6887_v59 = vadd.f32 1.0, %v10776_v49  ;;  %10797 = vpow2.f32 %v8644_v12  ;;  %v8645_v7 = vmul.f32 -1.442695, %v5813_v29  ;;  %v5816_v3 = vadd.f32 %v13862_v23, %v5815_v4 }
 0x4b5   : > { %v10780_v31 = vpop.eup %10779  ;;  %v7657_v17 = vmul.f32 %v13898_v45, %v10778_v2  ;;  %10799 = vrcp.f32 %v6889_v11  ;;  %v8648_v56 = vmul.f32 -1.442695, %v5824_v8 }
 0x4b6   : > { %v10782_v9 = vpop.eup %10781  ;;  %v7655_v19 = vmul.f32 %v13898_v45, %v10780_v31  ;;  %10801 = vrcp.f32 %v6887_v59  ;;  %v8646_v18 = vmul.f32 -1.442695, %v5816_v3 }
 0x4b7   : > { %v10784_v22 = vpop.eup %10783  ;;  %7914 = vst.msk [vmem:[%s12375_s30 + $0x6f8] sm:$0xff] %vm7690_vm4, %v7657_v17  ;;  %v6890_v43 = vadd.f32 1.0, %v10782_v9  ;;  %10803 = vpow2.f32 %v8642_v37 }
 0x4b8   : > { %v10786_v63 = vpop.eup %10785  ;;  %7912 = vst.msk [vmem:[%s12375_s30 + $0x6e8] sm:$0xff] %vm7690_vm4, %v7655_v19  ;;  %v7660_v44 = vmul.f32 %v13898_v45, %v10784_v22  ;;  %10805 = vpow2.f32 %v8647_v54  ;;  %v9836_v58 = vpop.f32.mrb[112].mxu0 }
 0x4b9   : > { %v10788_v24 = vpop.eup %10787  ;;  %v7658_v36 = vmul.f32 %v13898_v45, %v10786_v63  ;;  %10807 = vrcp.f32 %v6890_v43  ;;  %v5837_v57 = vadd.f32 %v13862_v23, %v9836_v58  ;;  %v5828_v39 = vpop.f32.mrb[113].mxu0 }
 0x4ba   : > { %v10790_v35 = vpop.eup %10789  ;;  %7917 = vst.msk [vmem:[%s12375_s30 + $0x710] sm:$0xff] %vm7690_vm4, %v7660_v44  ;;  %v6888_v28 = vadd.f32 1.0, %v10788_v24  ;;  %10809 = vpow2.f32 %v8645_v7  ;;  %v5829_v42 = vadd.f32 %v13862_v23, %v5828_v39  ;;  %v9837_v30 = vpop.f32.mrb[114].mxu0 }
 0x4bb   : > { %v10792_v46 = vpop.eup %10791  ;;  %7915 = vst.msk [vmem:[%s12375_s30 + $0x700] sm:$0xff] %vm7690_vm4, %v7658_v36  ;;  %v6893_v5 = vadd.f32 1.0, %v10790_v35  ;;  %10811 = vpow2.f32 %v8648_v56  ;;  %v8651_v1 = vmul.f32 -1.442695, %v5837_v57  ;;  %v5840_v13 = vadd.f32 %v13862_v23, %v9837_v30  ;;  %v5831_v26 = vpop.f32.mrb[115].mxu0 }
 0x4bc   : > { %v10794_v20 = vpop.eup %10793  ;;  %v7661_v60 = vmul.f32 %v13898_v45, %v10792_v46  ;;  %10813 = vrcp.f32 %v6888_v28  ;;  %v8649_v25 = vmul.f32 -1.442695, %v5829_v42  ;;  %v5832_v27 = vadd.f32 %v13862_v23, %v5831_v26 }
 0x4bd   : > { %v10796_v6 = vpop.eup %10795  ;;  %10815 = vrcp.f32 %v6893_v5  ;;  %v6891_v47 = vadd.f32 1.0, %v10794_v20  ;;  %v8652_v38 = vmul.f32 -1.442695, %v5840_v13 }
 0x4be   : > { %v10798_v16 = vpop.eup %10797  ;;  %7918 = vst.msk [vmem:[%s12375_s30 + $0x718] sm:$0xff] %vm7690_vm4, %v7661_v60  ;;  %v7659_v50 = vmul.f32 %v13898_v45, %v10796_v6  ;;  %10817 = vpow2.f32 %v8646_v18  ;;  %v8650_v10 = vmul.f32 -1.442695, %v5832_v27 }
 0x4bf   : > { %v10800_v21 = vpop.eup %10799  ;;  %10819 = vrcp.f32 %v6891_v47  ;;  %v6894_v41 = vadd.f32 1.0, %v10798_v16 }
 0x4c0   : > { %v10802_v14 = vpop.eup %10801  ;;  %7916 = vst.msk [vmem:[%s12375_s30 + $0x708] sm:$0xff] %vm7690_vm4, %v7659_v50  ;;  %v7664_v55 = vmul.f32 %v13898_v45, %v10800_v21  ;;  %10821 = vpow2.f32 %v8651_v1  ;;  %v9840_v62 = vpop.f32.mrb[116].mxu0 }
 0x4c1   : > { %v10804_v40 = vpop.eup %10803  ;;  %v7662_v53 = vmul.f32 %v13898_v45, %v10802_v14  ;;  %10823 = vrcp.f32 %v6894_v41  ;;  %v5853_v37 = vadd.f32 %v13862_v23, %v9840_v62  ;;  %v5844_v15 = vpop.f32.mrb[117].mxu0 }
 0x4c2   : > { %v10806_v51 = vpop.eup %10805  ;;  %7921 = vst.msk [vmem:[%s12375_s30 + $0x730] sm:$0xff] %vm7690_vm4, %v7664_v55  ;;  %v6892_v32 = vadd.f32 1.0, %v10804_v40  ;;  %10825 = vpow2.f32 %v8649_v25  ;;  %v5845_v52 = vadd.f32 %v13862_v23, %v5844_v15  ;;  %v9841_v33 = vpop.f32.mrb[118].mxu0 }
 0x4c3   : > { %v10808_v12 = vpop.eup %10807  ;;  %7919 = vst.msk [vmem:[%s12375_s30 + $0x720] sm:$0xff] %vm7690_vm4, %v7662_v53  ;;  %v6897_v61 = vadd.f32 1.0, %v10806_v51  ;;  %10827 = vpow2.f32 %v8652_v38  ;;  %v8655_v29 = vmul.f32 -1.442695, %v5853_v37  ;;  %v5856_v48 = vadd.f32 %v13862_v23, %v9841_v33  ;;  %v5847_v9 = vpop.f32.mrb[119].mxu0 }
 0x4c4   : > { %v10810_v0 = vpop.eup %10809  ;;  %v7665_v34 = vmul.f32 %v13898_v45, %v10808_v12  ;;  %10829 = vrcp.f32 %v6892_v32  ;;  %v8653_v8 = vmul.f32 -1.442695, %v5845_v52  ;;  %v5848_v4 = vadd.f32 %v13862_v23, %v5847_v9 }
 0x4c5   : > { %v10812_v49 = vpop.eup %10811  ;;  %10831 = vrcp.f32 %v6897_v61  ;;  %v6895_v11 = vadd.f32 1.0, %v10810_v0  ;;  %v8656_v7 = vmul.f32 -1.442695, %v5856_v48 }
 0x4c6   : > { %v10814_v2 = vpop.eup %10813  ;;  %7922 = vst.msk [vmem:[%s12375_s30 + $0x738] sm:$0xff] %vm7690_vm4, %v7665_v34  ;;  %v6898_v59 = vadd.f32 1.0, %v10812_v49  ;;  %10833 = vpow2.f32 %v8650_v10  ;;  %v8654_v44 = vmul.f32 -1.442695, %v5848_v4 }
 0x4c7   : > { %v10816_v31 = vpop.eup %10815  ;;  %v7663_v17 = vmul.f32 %v13898_v45, %v10814_v2  ;;  %10835 = vrcp.f32 %v6895_v11 }
 0x4c8   : > { %v10818_v19 = vpop.eup %10817  ;;  %v7668_v54 = vmul.f32 %v13898_v45, %v10816_v31  ;;  %10837 = vrcp.f32 %v6898_v59  ;;  %v9844_v46 = vpop.f32.mrb[120].mxu0 }
 0x4c9   : > { %v10820_v22 = vpop.eup %10819  ;;  %7920 = vst.msk [vmem:[%s12375_s30 + $0x728] sm:$0xff] %vm7690_vm4, %v7663_v17  ;;  %v6896_v43 = vadd.f32 1.0, %v10818_v19  ;;  %10839 = vpow2.f32 %v8655_v29  ;;  %v5869_v20 = vadd.f32 %v13862_v23, %v9844_v46  ;;  %v5860_v60 = vpop.f32.mrb[121].mxu0 }
 0x4ca   : > { %v10822_v3 = vpop.eup %10821  ;;  %7925 = vst.msk [vmem:[%s12375_s30 + $0x750] sm:$0xff] %vm7690_vm4, %v7668_v54  ;;  %v7666_v63 = vmul.f32 %v13898_v45, %v10820_v22  ;;  %10841 = vpow2.f32 %v8653_v8  ;;  %v5861_v6 = vadd.f32 %v13862_v23, %v5860_v60  ;;  %v9845_v47 = vpop.f32.mrb[122].mxu0 }
 0x4cb   : > { %v10824_v56 = vpop.eup %10823  ;;  %10843 = vrcp.f32 %v6896_v43  ;;  %v6901_v24 = vadd.f32 1.0, %v10822_v3  ;;  %v8659_v16 = vmul.f32 -1.442695, %v5869_v20  ;;  %v5872_v50 = vadd.f32 %v13862_v23, %v9845_v47  ;;  %v5863_v1 = vpop.f32.mrb[123].mxu0 }
 0x4cc   : > { %v10826_v36 = vpop.eup %10825  ;;  %7923 = vst.msk [vmem:[%s12375_s30 + $0x740] sm:$0xff] %vm7690_vm4, %v7666_v63  ;;  %v7669_v35 = vmul.f32 %v13898_v45, %v10824_v56  ;;  %10845 = vpow2.f32 %v8656_v7  ;;  %v8657_v21 = vmul.f32 -1.442695, %v5861_v6  ;;  %v5864_v41 = vadd.f32 %v13862_v23, %v5863_v1 }
 0x4cd   : > { %v10828_v28 = vpop.eup %10827  ;;  %10847 = vrcp.f32 %v6901_v24  ;;  %v6899_v18 = vadd.f32 1.0, %v10826_v36  ;;  %v8660_v14 = vmul.f32 -1.442695, %v5872_v50 }
 0x4ce   : > { %v10830_v5 = vpop.eup %10829  ;;  %7926 = vst.msk [vmem:[%s12375_s30 + $0x758] sm:$0xff] %vm7690_vm4, %v7669_v35  ;;  %v6902_v58 = vadd.f32 1.0, %v10828_v28  ;;  %10849 = vpow2.f32 %v8654_v44  ;;  %v8658_v51 = vmul.f32 -1.442695, %v5864_v41 }
 0x4cf   : > { %v10832_v57 = vpop.eup %10831  ;;  %v7667_v39 = vmul.f32 %v13898_v45, %v10830_v5  ;;  %10851 = vrcp.f32 %v6899_v18 }
 0x4d0   : > { %v10834_v42 = vpop.eup %10833  ;;  %v7672_v30 = vmul.f32 %v13898_v45, %v10832_v57  ;;  %10853 = vrcp.f32 %v6902_v58 }
 0x4d1   : > { %v10836_v13 = vpop.eup %10835  ;;  %7924 = vst.msk [vmem:[%s12375_s30 + $0x748] sm:$0xff] %vm7690_vm4, %v7667_v39  ;;  %v6900_v26 = vadd.f32 1.0, %v10834_v42  ;;  %10855 = vpow2.f32 %v8659_v16  ;;  %v9848_v12 = vpop.f32.mrb[124].mxu0 }
 0x4d2   : > { %v10838_v25 = vpop.eup %10837  ;;  %7929 = vst.msk [vmem:[%s12375_s30 + $0x770] sm:$0xff] %vm7690_vm4, %v7672_v30  ;;  %v7670_v27 = vmul.f32 %v13898_v45, %v10836_v13  ;;  %v5885_v34 = vadd.f32 %v13862_v23, %v9848_v12  ;;  %v5876_v62 = vpop.f32.mrb[125].mxu0 }
 0x4d3   : > { %v10840_v55 = vpop.eup %10839  ;;  %v7673_v38 = vmul.f32 %v13898_v45, %v10838_v25  ;;  %10857 = vrcp.f32 %v6900_v26  ;;  %v5877_v37 = vadd.f32 %v13862_v23, %v5876_v62  ;;  %v9849_v15 = vpop.f32.mrb[126].mxu0 }
 0x4d4   : > { %v10842_v40 = vpop.eup %10841  ;;  %7927 = vst.msk [vmem:[%s12375_s30 + $0x760] sm:$0xff] %vm7690_vm4, %v7670_v27  ;;  %v6905_v53 = vadd.f32 1.0, %v10840_v55  ;;  %10859 = vpow2.f32 %v8657_v21  ;;  %v8663_v52 = vmul.f32 -1.442695, %v5885_v34  ;;  %v5888_v33 = vadd.f32 %v13862_v23, %v9849_v15  ;;  %v5879_v31 = vpop.f32.mrb[127].mxu0 }
 0x4d5   : > { %v10844_v32 = vpop.eup %10843  ;;  %7930 = vst.msk [vmem:[%s12375_s30 + $0x778] sm:$0xff] %vm7690_vm4, %v7673_v38  ;;  %v6903_v10 = vadd.f32 1.0, %v10842_v40  ;;  %10861 = vpow2.f32 %v8660_v14  ;;  %v8661_v48 = vmul.f32 -1.442695, %v5877_v37  ;;  %v5880_v9 = vadd.f32 %v13862_v23, %v5879_v31 }
 0x4d6   : > { %v10846_v61 = vpop.eup %10845  ;;  %v7671_v0 = vmul.f32 %v13898_v45, %v10844_v32  ;;  %10863 = vrcp.f32 %v6905_v53  ;;  %v8664_v8 = vmul.f32 -1.442695, %v5888_v33 }
 0x4d7   : > { %v10848_v49 = vpop.eup %10847  ;;  %10865 = vrcp.f32 %v6903_v10  ;;  %v6906_v11 = vadd.f32 1.0, %v10846_v61  ;;  %v8662_v22 = vmul.f32 -1.442695, %v5880_v9 }
 0x4d8   : > { %v10850_v2 = vpop.eup %10849  ;;  %7928 = vst.msk [vmem:[%s12375_s30 + $0x768] sm:$0xff] %vm7690_vm4, %v7671_v0  ;;  %v7676_v59 = vmul.f32 %v13898_v45, %v10848_v49  ;;  %10867 = vpow2.f32 %v8658_v51 }
 0x4d9   : > { %v10852_v17 = vpop.eup %10851  ;;  %10869 = vrcp.f32 %v6906_v11  ;;  %v6904_v29 = vadd.f32 1.0, %v10850_v2 }
 0x4da   : > { %v10854_v19 = vpop.eup %10853  ;;  %7933 = vst.msk [vmem:[%s12375_s30 + $0x790] sm:$0xff] %vm7690_vm4, %v7676_v59  ;;  %v7674_v54 = vmul.f32 %v13898_v45, %v10852_v17  ;;  %10871 = vpow2.f32 %v8663_v52 }
 0x4db   : > { %v7677_v4 = vmul.f32 %v13898_v45, %v10854_v19  ;;  %10873 = vrcp.f32 %v6904_v29  ;;  %v10856_v43 = vpop.eup %10855 }
 0x4dc   : > { %7931 = vst.msk [vmem:[%s12375_s30 + $0x780] sm:$0xff] %vm7690_vm4, %v7674_v54  ;;  %10875 = vpow2.f32 %v8661_v48  ;;  %v6909_v23 = vadd.f32 1.0, %v10856_v43 }
 0x4dd   : > { %v10858_v7 = vpop.eup %10857  ;;  %7934 = vst.msk [vmem:[%s12375_s30 + $0x798] sm:$0xff] %vm7690_vm4, %v7677_v4  ;;  %10877 = vpow2.f32 %v8664_v8 }
 0x4de   : > { %v10860_v3 = vpop.eup %10859  ;;  %v7675_v63 = vmul.f32 %v13898_v45, %v10858_v7  ;;  %10879 = vpow2.f32 %v8662_v22 }
 0x4df   : > { %v10862_v44 = vpop.eup %10861  ;;  %10881 = vrcp.f32 %v6909_v23  ;;  %v6907_v56 = vadd.f32 1.0, %v10860_v3 }
 0x4e0   : > { %v10864_v24 = vpop.eup %10863  ;;  %7932 = vst.msk [vmem:[%s12375_s30 + $0x788] sm:$0xff] %vm7690_vm4, %v7675_v63  ;;  %v6910_v36 = vadd.f32 1.0, %v10862_v44 }
 0x4e1   : > { %v10866_v35 = vpop.eup %10865  ;;  %v7680_v28 = vmul.f32 %v13898_v45, %v10864_v24  ;;  %10883 = vrcp.f32 %v6907_v56 }
 0x4e2   : > { %v10868_v18 = vpop.eup %10867  ;;  %v7678_v46 = vmul.f32 %v13898_v45, %v10866_v35  ;;  %10885 = vrcp.f32 %v6910_v36 }
 0x4e3   : > { %v10870_v5 = vpop.eup %10869  ;;  %7937 = vst.msk [vmem:[%s12375_s30 + $0x7b0] sm:$0xff] %vm7690_vm4, %v7680_v28  ;;  %v6908_v58 = vadd.f32 1.0, %v10868_v18 }
 0x4e4   : > { %v10872_v20 = vpop.eup %10871  ;;  %7935 = vst.msk [vmem:[%s12375_s30 + $0x7a0] sm:$0xff] %vm7690_vm4, %v7678_v46  ;;  %v7681_v60 = vmul.f32 %v13898_v45, %v10870_v5 }
 0x4e5   : > { %v10874_v57 = vpop.eup %10873  ;;  %10887 = vrcp.f32 %v6908_v58  ;;  %v6913_v39 = vadd.f32 1.0, %v10872_v20 }
 0x4e6   : > { %v10876_v6 = vpop.eup %10875  ;;  %7938 = vst.msk [vmem:[%s12375_s30 + $0x7b8] sm:$0xff] %vm7690_vm4, %v7681_v60  ;;  %v7679_v47 = vmul.f32 %v13898_v45, %v10874_v57 }
 0x4e7   : > { %v10878_v42 = vpop.eup %10877  ;;  %10889 = vrcp.f32 %v6913_v39  ;;  %v6911_v30 = vadd.f32 1.0, %v10876_v6 }
 0x4e8   : > { %v10880_v16 = vpop.eup %10879  ;;  %7936 = vst.msk [vmem:[%s12375_s30 + $0x7a8] sm:$0xff] %vm7690_vm4, %v7679_v47  ;;  %v6914_v50 = vadd.f32 1.0, %v10878_v42 }
 0x4e9   : > { %v10882_v1 = vpop.eup %10881  ;;  %10891 = vrcp.f32 %v6911_v30  ;;  %v6912_v13 = vadd.f32 1.0, %v10880_v16 }
 0x4ea   : > { %v7684_v26 = vmul.f32 %v13898_v45, %v10882_v1  ;;  %10893 = vrcp.f32 %v6914_v50 }
 0x4eb   : > { %v10884_v21 = vpop.eup %10883  ;;  %10895 = vrcp.f32 %v6912_v13 }
 0x4ec   : > { %v10886_v41 = vpop.eup %10885  ;;  %7941 = vst.msk [vmem:[%s12375_s30 + $0x7d0] sm:$0xff] %vm7690_vm4, %v7684_v26  ;;  %v7682_v25 = vmul.f32 %v13898_v45, %v10884_v21 }
 0x4ed   : > { %v7685_v27 = vmul.f32 %v13898_v45, %v10886_v41 }
 0x4ee   : > { %7939 = vst.msk [vmem:[%s12375_s30 + $0x7c0] sm:$0xff] %vm7690_vm4, %v7682_v25 }
 0x4ef   : > { %v10888_v14 = vpop.eup %10887  ;;  %7942 = vst.msk [vmem:[%s12375_s30 + $0x7d8] sm:$0xff] %vm7690_vm4, %v7685_v27 }
 0x4f0   : > { %v7683_v55 = vmul.f32 %v13898_v45, %v10888_v14 }
 0x4f1   : > { %v10890_v38 = vpop.eup %10889 }
 0x4f2   : > { %7940 = vst.msk [vmem:[%s12375_s30 + $0x7c8] sm:$0xff] %vm7690_vm4, %v7683_v55  ;;  %v7688_v40 = vmul.f32 %v13898_v45, %v10890_v38 }
 0x4f3   : > { %v10892_v53 = vpop.eup %10891 }
 0x4f4   : > { %v10894_v51 = vpop.eup %10893  ;;  %7945 = vst.msk [vmem:[%s12375_s30 + $0x7f0] sm:$0xff] %vm7690_vm4, %v7688_v40  ;;  %v7686_v32 = vmul.f32 %v13898_v45, %v10892_v53 }
 0x4f5   : > { %v10896_v10 = vpop.eup %10895  ;;  %v7689_v12 = vmul.f32 %v13898_v45, %v10894_v51 }
 0x4f6   : > { %7943 = vst.msk [vmem:[%s12375_s30 + $0x7e0] sm:$0xff] %vm7690_vm4, %v7686_v32  ;;  %v7687_v61 = vmul.f32 %v13898_v45, %v10896_v10 }
 0x4f7   : > { %7946 = vst.msk [vmem:[%s12375_s30 + $0x7f8] sm:$0xff] %vm7690_vm4, %v7689_v12 }
 0x4f8   : > { %7944 = vst.msk [vmem:[%s12375_s30 + $0x7e8] sm:$0xff] %vm7690_vm4, %v7687_v61 }
 0x4f9 PF: > { %s18_s27 = sadd.s32 1, %s10919_s27  }
 0x4fa   : > { %p15_p4 = scmp.ge.s32.totalorder %s18_s27, 4  }
 0x4fc   :  { %17 = sbr.rel (!%p15_p4) target bundleno = 1 (0x1), region = 82 }

</bundles_post_ra>
